<compile_context>
chip_gen: v7x
topology: tpu7x:2x2x1
jax: 0.10.0
libtpu: 0.0.40
codegen_flags: <defaults>
</compile_context>

<pallas_src>
import functools

import jax
import jax.numpy as jnp
from jax.experimental import pallas as pl
from jax.experimental.pallas import tpu as pltpu

EPS_NORM = 1e-8   # eps added to vector norms (IIEU)
EPS_LN = 1e-6     # LayerNorm / SpatialGNorm eps
EPS_BN = 1e-5     # BatchNorm2d default eps

_PAD_L = 8        # sublane-aligned left margin in the depthwise scratch
_PAD_R = 8        # right margin (keeps scratch width 8-aligned when W is)


# ----------------------------------------------------------------------------
# Generation-aware budgets
# ----------------------------------------------------------------------------
@functools.lru_cache(maxsize=None)
def _vmem_capacity_bytes():
    try:
        info = pltpu.get_tpu_info()
        return int(getattr(info, "vmem_capacity_bytes", 64 * 1024 * 1024))
    except Exception:
        return 64 * 1024 * 1024


def _vmem_limit_bytes():
    cap = _vmem_capacity_bytes()
    return int(min(max(cap * 3 // 4, 32 * 1024 * 1024), 100 * 1024 * 1024))


def _row_cap():
    # bigger row blocks on 128-MiB chips (v5e/v6e); conservative on v7x
    return 2048 if _vmem_capacity_bytes() > 64 * 1024 * 1024 else 1024


# ----------------------------------------------------------------------------
# Pallas kernels
# ----------------------------------------------------------------------------
def _fused_kernel(x_ref, w1_ref, s1_ref, b1_ref, ln1w_ref, ln1b_ref, fl1_ref,
                  bd1_ref, w2_ref, s2_ref, b2_ref, ln2w_ref, ln2b_ref, fl2_ref,
                  bd2_ref, w3_ref, s3_ref, b3_ref,
                  y3_ref, sy3_ref, sx_ref, pad_ref, *, H, W):
    """Whole-image (per batch element) fused InvertedResidual main branch:

      1x1 conv + BN1 -> IIEU-B act1 -> depthwise 3x3 + BN2 -> IIEU-B act2
      -> 1x1 conv + BN3

    plus the global average pools (emitted as channel sums) feeding the
    activation shifts (computed in-kernel) and the DynamicScaler (emitted).
    No intermediate (y1/a1/y2/a2) and no 1-lane (xpl) tensor ever hits HBM.
    """
    C = w2_ref.shape[-1]                                  # hidden
    HW = H * W
    inv_hw = 1.0 / float(HW)
    Wp = pad_ref.shape[1]                                 # _PAD_L + W + _PAD_R

    def _ln_sigmoid(v, w, b):
        mu = jnp.mean(v, axis=-1, keepdims=True)
        var = jnp.mean((v - mu) ** 2, axis=-1, keepdims=True)   # biased (torch LN)
        z = (v - mu) / jnp.sqrt(var + EPS_LN) * w + b
        return 1.0 / (1.0 + jnp.exp(-z))

    def _iieu(y, fl, xpl, shift, bound):
        mask = -bound + shift + fl * y * xpl
        return jnp.where(mask < 0.0,
                         bound * y * jnp.exp(jnp.minimum(mask, 0.0)),
                         bound * y + mask * y)

    x = x_ref[0]                                          # (HW, Cin)

    # ---- conv1 (1x1 over channels) + folded BN1 ----------------------------
    y1 = jnp.dot(x, w1_ref[...], preferred_element_type=jnp.float32)
    y1 = y1 * s1_ref[...] + b1_ref[...]                   # (HW, C)

    # shift1 = sigmoid(LayerNorm(global mean of y1)); pool is available
    # in-kernel since the whole image is resident.
    m1 = jnp.sum(y1, axis=0, keepdims=True) * inv_hw      # (1, C)
    shift1 = _ln_sigmoid(m1, ln1w_ref[...], ln1b_ref[...])

    # IIEU-B act1 (x_pre_vec_len recomputed from x; never round-trips HBM)
    xpl1 = 1.0 / (jnp.sqrt(jnp.sum(x * x, axis=-1, keepdims=True)) + EPS_NORM)
    a1 = _iieu(y1, fl1_ref[...], xpl1, shift1, bd1_ref[...])   # (HW, C)

    # ---- depthwise 3x3 (stride 1, pad 1) + folded BN2 -----------------------
    a1_3d = a1.reshape(H, W, C)
    # Zero only the halo strips; the interior is overwritten every grid step.
    zplane = jnp.zeros((1, Wp, C), jnp.float32)
    pad_ref[0:1, :, :] = zplane
    pad_ref[H + 1:H + 2, :, :] = zplane
    pad_ref[1:H + 1, 0:_PAD_L, :] = jnp.zeros((H, _PAD_L, C), jnp.float32)
    pad_ref[1:H + 1, _PAD_L + W:_PAD_L + W + _PAD_R, :] = (
        jnp.zeros((H, _PAD_R, C), jnp.float32))
    pad_ref[1:H + 1, _PAD_L:_PAD_L + W, :] = a1_3d        # sublane-aligned store
    xp = pad_ref[...]                                     # (H+2, Wp, C)

    w2 = w2_ref[...]                                      # (3, 3, C)
    acc = jnp.zeros((H, W, C), jnp.float32)
    for dh in range(3):
        for dw_ in range(3):
            c0 = _PAD_L - 1 + dw_
            acc = acc + xp[dh:dh + H, c0:c0 + W, :] * w2[dh, dw_, :]
    y2 = acc * s2_ref[...] + b2_ref[...]                  # (H, W, C)

    # act2's x_pre_vec_len: (1/3) / (sqrt(avgpool3x3 ||a1||_c^2) + eps),
    # channel sum-of-squares computed once, separable 3+3 box-sum.
    ss = jnp.sum(xp * xp, axis=-1, keepdims=True)         # (H+2, Wp, 1)
    hs = (ss[:, _PAD_L - 1:_PAD_L - 1 + W, :] +
          ss[:, _PAD_L:_PAD_L + W, :] +
          ss[:, _PAD_L + 1:_PAD_L + 1 + W, :])            # (H+2, W, 1)
    box = hs[0:H] + hs[1:H + 1] + hs[2:H + 2]             # (H, W, 1)
    xpl2 = (1.0 / 3.0) / (jnp.sqrt(box * (1.0 / 9.0)) + EPS_NORM)

    # shift2 from the in-kernel global pool of y2
    m2 = jnp.sum(y2, axis=(0, 1), keepdims=True) * inv_hw  # (1, 1, C)
    shift2 = _ln_sigmoid(m2, ln2w_ref[...], ln2b_ref[...])

    a2 = _iieu(y2, fl2_ref[...], xpl2, shift2, bd2_ref[...])   # (H, W, C)

    # ---- conv3 (1x1 over channels) + folded BN3 -----------------------------
    a2f = a2.reshape(HW, C)
    y3 = jnp.dot(a2f, w3_ref[...], preferred_element_type=jnp.float32)
    y3 = y3 * s3_ref[...] + b3_ref[...]                   # (HW, Cout)
    y3_ref[0] = y3.astype(y3_ref.dtype)

    # pooled channel sums for the DynamicScaler (divided by HW on the host)
    sy3_ref[0] = jnp.sum(y3, axis=0, keepdims=True)
    sx_ref[0] = jnp.sum(x, axis=0, keepdims=True)


def _combine_kernel(x_ref, r_ref, a_ref, b_ref, o_ref):
    """DynamicScaler final mix: y3*comb[:,0] + res*comb[:,1] (per-channel)."""
    o_ref[0] = x_ref[0] * a_ref[0] + r_ref[0] * b_ref[0]


# ----------------------------------------------------------------------------
# Pallas wrappers
# ----------------------------------------------------------------------------
def fused_main_branch(x3, p, H, W):
    """x3: (B, H*W, Cin) NHWC-flattened input.  Returns y3 (B, HW, Cout) and
    the per-batch channel sums of y3 and x (for the DynamicScaler)."""
    B, HW, cin = x3.shape
    hidden = p['w1'].shape[1]
    oup = p['w3'].shape[1]

    # IIEU filter-vector-length terms (weight-only; tiny, computed in XLA)
    fl1 = (1.0 / (jnp.sqrt(jnp.sum(p['w1'] ** 2, axis=0)) + EPS_NORM)).reshape(1, hidden)
    fl2 = (1.0 / (jnp.sqrt(jnp.sum(p['w2'] ** 2, axis=(0, 1))) + EPS_NORM)).reshape(1, hidden)

    def rep(shape):                       # replicated (grid-invariant) operand
        zeros = (0,) * len(shape)
        return pl.BlockSpec(shape, lambda b, _z=zeros: _z)

    kern = functools.partial(_fused_kernel, H=H, W=W)
    return pl.pallas_call(
        kern,
        out_shape=(jax.ShapeDtypeStruct((B, HW, oup), jnp.float32),
                   jax.ShapeDtypeStruct((B, 1, oup), jnp.float32),
                   jax.ShapeDtypeStruct((B, 1, cin), jnp.float32)),
        grid=(B,),
        in_specs=[
            pl.BlockSpec((1, HW, cin), lambda b: (b, 0, 0)),   # x
            rep((cin, hidden)),                                # w1
            rep((1, hidden)), rep((1, hidden)),                # bn1 scale/bias
            rep((1, hidden)), rep((1, hidden)),                # ln1 w/b
            rep((1, hidden)),                                  # fl1
            rep((1, hidden)),                                  # bound1
            rep((3, 3, hidden)),                               # w2 (depthwise)
            rep((1, hidden)), rep((1, hidden)),                # bn2 scale/bias
            rep((1, hidden)), rep((1, hidden)),                # ln2 w/b
            rep((1, hidden)),                                  # fl2
            rep((1, hidden)),                                  # bound2
            rep((hidden, oup)),                                # w3
            rep((1, oup)), rep((1, oup)),                      # bn3 scale/bias
        ],
        out_specs=(pl.BlockSpec((1, HW, oup), lambda b: (b, 0, 0)),
                   pl.BlockSpec((1, 1, oup), lambda b: (b, 0, 0)),
                   pl.BlockSpec((1, 1, cin), lambda b: (b, 0, 0))),
        scratch_shapes=[pltpu.VMEM((H + 2, _PAD_L + W + _PAD_R, hidden),
                                   jnp.float32)],
        compiler_params=pltpu.CompilerParams(
            dimension_semantics=("parallel",),
            vmem_limit_bytes=_vmem_limit_bytes()),
    )(x3,
      p['w1'], p['bn1_scale'].reshape(1, hidden), p['bn1_bias'].reshape(1, hidden),
      p['ln1_w'].reshape(1, hidden), p['ln1_b'].reshape(1, hidden),
      fl1, p['bound1'].reshape(1, hidden),
      p['w2'], p['bn2_scale'].reshape(1, hidden), p['bn2_bias'].reshape(1, hidden),
      p['ln2_w'].reshape(1, hidden), p['ln2_b'].reshape(1, hidden),
      fl2, p['bound2'].reshape(1, hidden),
      p['w3'], p['bn3_scale'].reshape(1, oup), p['bn3_bias'].reshape(1, oup))


def combine(y3, x3, a, b):
    """out = y3*a + x3*b, output aliased onto y3 (no extra HBM allocation)."""
    B, HW, C = y3.shape
    cap = _row_cap()
    tm = HW if HW <= cap else cap
    nr = pl.cdiv(HW, tm)
    return pl.pallas_call(
        _combine_kernel,
        out_shape=jax.ShapeDtypeStruct((B, HW, C), jnp.float32),
        grid=(B, nr),
        in_specs=[pl.BlockSpec((1, tm, C), lambda i, r: (i, r, 0)),
                  pl.BlockSpec((1, tm, C), lambda i, r: (i, r, 0)),
                  pl.BlockSpec((1, 1, C), lambda i, r: (i, 0, 0)),
                  pl.BlockSpec((1, 1, C), lambda i, r: (i, 0, 0))],
        out_specs=pl.BlockSpec((1, tm, C), lambda i, r: (i, r, 0)),
        input_output_aliases={0: 0},
        compiler_params=pltpu.CompilerParams(
            dimension_semantics=("parallel", "parallel"),
            vmem_limit_bytes=_vmem_limit_bytes()),
    )(y3, x3, a, b)


# ----------------------------------------------------------------------------
# Small-tensor glue (plain JAX): DynamicScaler / SpatialGNorm math on (B, C)
# ----------------------------------------------------------------------------
def _layernorm(x, w, b, eps=EPS_LN):
    mu = jnp.mean(x, axis=-1, keepdims=True)
    var = jnp.mean((x - mu) ** 2, axis=-1, keepdims=True)  # biased (torch LN)
    return (x - mu) / jnp.sqrt(var + eps) * w + b


def _iieub_shift(y_nhwc, ln_w, ln_b):
    s = jnp.mean(y_nhwc, axis=(1, 2))
    return jax.nn.sigmoid(_layernorm(s, ln_w, ln_b))[:, None, None, :]


def _iieu_formula(x, fl, xpl, shift, bound):
    mask = -bound + shift + fl * x * xpl
    return jnp.where(mask < 0,
                     bound * x * jnp.exp(jnp.minimum(mask, 0.0)),
                     bound * x + mask * x)


def _scaler_coeffs(avg_x, avg_r, p):
    """DynamicScaler softmax weights from pooled (B, C) features (tiny tensors).
    Includes SpatialGNorm (AxTrans=True: normalize over last dim, unbiased std)."""
    B, C = avg_x.shape
    c4 = p['g1'].shape[0]
    cat = jnp.concatenate([avg_x, avg_r], axis=-1)            # (B, 2C)
    avg = _layernorm(cat, p['lnc_w'], p['lnc_b']).reshape(B, 2, C)
    comb = jnp.einsum('btc,kc->btk', avg, p['g1'])             # gen1
    # IIEU-B DC with SpatialGNorm-based shift
    xpl = 1.0 / (jnp.sqrt(jnp.sum(avg ** 2, axis=-1, keepdims=True)) + EPS_NORM)
    fl = (1.0 / (jnp.sqrt(jnp.sum(p['g1'] ** 2, axis=1)) + EPS_NORM)).reshape(1, 1, c4)
    m = jnp.mean(comb, axis=-1, keepdims=True)
    sd = jnp.sqrt(jnp.sum((comb - m) ** 2, axis=-1, keepdims=True) / (c4 - 1))
    shift = jax.nn.sigmoid(p['sg_gamma'] * (comb - m) / (sd + EPS_LN) + p['sg_beta'])
    comb = _iieu_formula(comb, fl, xpl, shift, p['bound_dc'].reshape(1, 1, c4))
    comb = jnp.einsum('btk,ck->btc', comb, p['g2'])            # gen2
    comb = _layernorm(comb.reshape(B, 2 * C), p['lns_w'], p['lns_b']).reshape(B, 2, C)
    comb = jax.nn.softmax(comb, axis=1)
    return comb[:, 0, :], comb[:, 1, :]


# ----------------------------------------------------------------------------
# Full InvertedResidual forward (fused main-branch kernel + combine kernel)
# ----------------------------------------------------------------------------
def inverted_residual(x_nchw, p):
    B, cin, H, W = x_nchw.shape
    oup = p['w3'].shape[1]
    HW = H * W
    inv_hw = 1.0 / HW

    x3 = jnp.transpose(x_nchw, (0, 2, 3, 1)).reshape(B, HW, cin)   # NCHW -> NHWC

    y3, sum_y3, sum_x = fused_main_branch(x3, p, H, W)

    # identity branch: DynamicScaler (tiny per-batch math incl. SpatialGNorm)
    a, b = _scaler_coeffs(sum_y3[:, 0, :] * inv_hw, sum_x[:, 0, :] * inv_hw, p)
    out3 = combine(y3, x3, a.reshape(B, 1, oup), b.reshape(B, 1, oup))
    out = out3.reshape(B, H, W, oup)
    return jnp.transpose(out, (0, 3, 1, 2))                        # back to NCHW


# ----------------------------------------------------------------------------
# Pure-JAX reference (no Pallas) for validation
# ----------------------------------------------------------------------------
def reference_forward(x_nchw, p):
    hp = jax.lax.Precision.HIGHEST
    x = jnp.transpose(x_nchw, (0, 2, 3, 1))
    res = x
    hidden = p['w1'].shape[1]

    y1 = jnp.einsum('bhwc,ck->bhwk', x, p['w1'], precision=hp) * p['bn1_scale'] + p['bn1_bias']
    xpl1 = 1.0 / (jnp.linalg.norm(res, axis=-1, keepdims=True) + EPS_NORM)
    fl1 = (1.0 / (jnp.sqrt(jnp.sum(p['w1'] ** 2, axis=0)) + EPS_NORM)).reshape(1, 1, 1, hidden)
    shift1 = _iieub_shift(y1, p['ln1_w'], p['ln1_b'])
    a1 = _iieu_formula(y1, fl1, xpl1, shift1, p['bound1'].reshape(1, 1, 1, hidden))

    y2 = jax.lax.conv_general_dilated(
        a1, p['w2'].reshape(3, 3, 1, hidden), window_strides=(1, 1),
        padding=((1, 1), (1, 1)), dimension_numbers=('NHWC', 'HWIO', 'NHWC'),
        feature_group_count=hidden, precision=hp) * p['bn2_scale'] + p['bn2_bias']
    sq = jnp.sum(a1 ** 2, axis=-1, keepdims=True)
    avg = jax.lax.reduce_window(sq, jnp.array(0.0, sq.dtype), jax.lax.add,
                                (1, 3, 3, 1), (1, 1, 1, 1),
                                ((0, 0), (1, 1), (1, 1), (0, 0))) / 9.0
    xpl2 = (1.0 / 3.0) / (jnp.sqrt(avg) + EPS_NORM)
    fl2 = (1.0 / (jnp.sqrt(jnp.sum(p['w2'] ** 2, axis=(0, 1))) + EPS_NORM)).reshape(1, 1, 1, hidden)
    shift2 = _iieub_shift(y2, p['ln2_w'], p['ln2_b'])
    a2 = _iieu_formula(y2, fl2, xpl2, shift2, p['bound2'].reshape(1, 1, 1, hidden))

    y3 = jnp.einsum('bhwc,ck->bhwk', a2, p['w3'], precision=hp) * p['bn3_scale'] + p['bn3_bias']
    a, b = _scaler_coeffs(jnp.mean(y3, axis=(1, 2)), jnp.mean(res, axis=(1, 2)), p)
    out = y3 * a[:, None, None, :] + res * b[:, None, None, :]
    return jnp.transpose(out, (0, 3, 1, 2))


# ----------------------------------------------------------------------------
# Deterministic parameter initialization (shapes per the module's __init__)
# ----------------------------------------------------------------------------
def init_params(key, inp, oup, expand_ratio):
    hidden = round(inp * expand_ratio)
    ks = jax.random.split(key, 12)

    def nrm(k, shape, s=0.3):
        return s * jax.random.normal(k, shape, jnp.float32)

    def bn_fold(k, c):
        k1, k2, k3, k4 = jax.random.split(k, 4)
        gamma = 1.0 + 0.1 * jax.random.normal(k1, (c,), jnp.float32)
        beta = 0.1 * jax.random.normal(k2, (c,), jnp.float32)
        mean = 0.1 * jax.random.normal(k3, (c,), jnp.float32)
        var = 0.5 + jax.random.uniform(k4, (c,), jnp.float32)
        scale = gamma / jnp.sqrt(var + EPS_BN)
        return scale, beta - mean * scale

    p = {}
    p['w1'] = nrm(ks[0], (inp, hidden))          # Conv2d(inp, hidden, 1) (Cin,Cout)
    p['w2'] = nrm(ks[1], (3, 3, hidden))         # depthwise Conv2d(hidden, hidden, 3)
    p['w3'] = nrm(ks[2], (hidden, oup))          # Conv2d(hidden, oup, 1)
    p['bn1_scale'], p['bn1_bias'] = bn_fold(ks[3], hidden)
    p['bn2_scale'], p['bn2_bias'] = bn_fold(ks[4], hidden)
    p['bn3_scale'], p['bn3_bias'] = bn_fold(ks[5], oup)
    p['ln1_w'] = 0.01 * jnp.ones((hidden,), jnp.float32)
    p['ln1_b'] = jnp.zeros((hidden,), jnp.float32)
    p['ln2_w'] = 0.01 * jnp.ones((hidden,), jnp.float32)
    p['ln2_b'] = jnp.zeros((hidden,), jnp.float32)
    p['bound1'] = 0.05 * jnp.ones((hidden,), jnp.float32)
    p['bound2'] = 0.05 * jnp.ones((hidden,), jnp.float32)
    c4 = oup // 4
    p['g1'] = nrm(ks[6], (c4, oup))              # gen1: Linear(oup, oup//4, bias=False)
    p['g2'] = nrm(ks[7], (oup, c4))              # gen2: Linear(oup//4, oup, bias=False)
    p['lnc_w'] = jnp.ones((2 * oup,), jnp.float32)
    p['lnc_b'] = jnp.zeros((2 * oup,), jnp.float32)
    p['lns_w'] = 0.01 * jnp.ones((2 * oup,), jnp.float32)
    p['lns_b'] = jnp.zeros((2 * oup,), jnp.float32)
    p['sg_gamma'] = 0.01 * jnp.ones((1, 2, c4), jnp.float32)  # SpatialGNorm gamma/beta
    p['sg_beta'] = jnp.zeros((1, 2, c4), jnp.float32)
    p['bound_dc'] = 0.05 * jnp.ones((c4,), jnp.float32)
    return p


if __name__ == "__main__":
    B, inp, oup, H, W = 2, 8, 8, 16, 16
    expand_ratio, stride = 2, 1          # identity = (stride==1 and inp==oup) -> True

    key = jax.random.PRNGKey(0)
    kx, kp = jax.random.split(key)
    x = jax.random.normal(kx, (B, inp, H, W), jnp.float32)   # NCHW like PyTorch
    params = init_params(kp, inp, oup, expand_ratio)

    fwd = jax.jit(inverted_residual)
    out = jax.block_until_ready(fwd(x, params))
    assert out.shape == (B, oup, H, W)

    ref = jax.block_until_ready(reference_forward(x, params))
    err = float(jnp.max(jnp.abs(out - ref)))
    if not jnp.allclose(out, ref, atol=5e-3, rtol=5e-2):
        raise AssertionError(f"mismatch vs reference: max abs err {err}")

    print("KERNEL_OK")
</pallas_src>

<mosaic_0001>
module attributes {stable_mosaic.version = 11 : i64} {
  func.func @_fused_kernel(%arg0: i32, %arg1: memref<1x256x8xf32, #tpu.memory_space<vmem>>, %arg2: memref<8x16xf32, #tpu.memory_space<vmem>>, %arg3: memref<1x16xf32, #tpu.memory_space<vmem>>, %arg4: memref<1x16xf32, #tpu.memory_space<vmem>>, %arg5: memref<1x16xf32, #tpu.memory_space<vmem>>, %arg6: memref<1x16xf32, #tpu.memory_space<vmem>>, %arg7: memref<1x16xf32, #tpu.memory_space<vmem>>, %arg8: memref<1x16xf32, #tpu.memory_space<vmem>>, %arg9: memref<3x3x16xf32, #tpu.memory_space<vmem>>, %arg10: memref<1x16xf32, #tpu.memory_space<vmem>>, %arg11: memref<1x16xf32, #tpu.memory_space<vmem>>, %arg12: memref<1x16xf32, #tpu.memory_space<vmem>>, %arg13: memref<1x16xf32, #tpu.memory_space<vmem>>, %arg14: memref<1x16xf32, #tpu.memory_space<vmem>>, %arg15: memref<1x16xf32, #tpu.memory_space<vmem>>, %arg16: memref<16x8xf32, #tpu.memory_space<vmem>>, %arg17: memref<1x8xf32, #tpu.memory_space<vmem>>, %arg18: memref<1x8xf32, #tpu.memory_space<vmem>>, %arg19: memref<1x256x8xf32, #tpu.memory_space<vmem>>, %arg20: memref<1x1x8xf32, #tpu.memory_space<vmem>>, %arg21: memref<1x1x8xf32, #tpu.memory_space<vmem>>, %arg22: memref<18x32x16xf32, #tpu.memory_space<vmem>>) attributes {dimension_semantics = [#tpu.dimension_semantics<parallel>], iteration_bounds = array<i64: 2>, scalar_prefetch = 0 : i64, scratch_operands = 1 : i64, tpu.core_type = #tpu.core_type<tc>, window_params = [{transform_indices = @transform_0, window_bounds = array<i64: 1, 256, 8>}, {pipeline_mode = #tpu.pipeline_mode<synchronous>, transform_indices = @transform_1, window_bounds = array<i64: 8, 16>}, {pipeline_mode = #tpu.pipeline_mode<synchronous>, transform_indices = @transform_2, window_bounds = array<i64: 1, 16>}, {pipeline_mode = #tpu.pipeline_mode<synchronous>, transform_indices = @transform_3, window_bounds = array<i64: 1, 16>}, {pipeline_mode = #tpu.pipeline_mode<synchronous>, transform_indices = @transform_4, window_bounds = array<i64: 1, 16>}, {pipeline_mode = #tpu.pipeline_mode<synchronous>, transform_indices = @transform_5, window_bounds = array<i64: 1, 16>}, {pipeline_mode = #tpu.pipeline_mode<synchronous>, transform_indices = @transform_6, window_bounds = array<i64: 1, 16>}, {pipeline_mode = #tpu.pipeline_mode<synchronous>, transform_indices = @transform_7, window_bounds = array<i64: 1, 16>}, {pipeline_mode = #tpu.pipeline_mode<synchronous>, transform_indices = @transform_8, window_bounds = array<i64: 3, 3, 16>}, {pipeline_mode = #tpu.pipeline_mode<synchronous>, transform_indices = @transform_9, window_bounds = array<i64: 1, 16>}, {pipeline_mode = #tpu.pipeline_mode<synchronous>, transform_indices = @transform_10, window_bounds = array<i64: 1, 16>}, {pipeline_mode = #tpu.pipeline_mode<synchronous>, transform_indices = @transform_11, window_bounds = array<i64: 1, 16>}, {pipeline_mode = #tpu.pipeline_mode<synchronous>, transform_indices = @transform_12, window_bounds = array<i64: 1, 16>}, {pipeline_mode = #tpu.pipeline_mode<synchronous>, transform_indices = @transform_13, window_bounds = array<i64: 1, 16>}, {pipeline_mode = #tpu.pipeline_mode<synchronous>, transform_indices = @transform_14, window_bounds = array<i64: 1, 16>}, {pipeline_mode = #tpu.pipeline_mode<synchronous>, transform_indices = @transform_15, window_bounds = array<i64: 16, 8>}, {pipeline_mode = #tpu.pipeline_mode<synchronous>, transform_indices = @transform_16, window_bounds = array<i64: 1, 8>}, {pipeline_mode = #tpu.pipeline_mode<synchronous>, transform_indices = @transform_17, window_bounds = array<i64: 1, 8>}, {transform_indices = @transform_18, window_bounds = array<i64: 1, 256, 8>}, {transform_indices = @transform_19, window_bounds = array<i64: 1, 1, 8>}, {transform_indices = @transform_20, window_bounds = array<i64: 1, 1, 8>}]} {
    %c0 = arith.constant 0 : index
    %c0_0 = arith.constant 0 : index
    %c0_1 = arith.constant 0 : index
    %0 = vector.load %arg1[%c0, %c0_0, %c0_1] : memref<1x256x8xf32, #tpu.memory_space<vmem>>, vector<1x256x8xf32>
    %1 = vector.shape_cast %0 : vector<1x256x8xf32> to vector<256x8xf32>
    %c0_2 = arith.constant 0 : index
    %c0_3 = arith.constant 0 : index
    %2 = vector.load %arg2[%c0_2, %c0_3] : memref<8x16xf32, #tpu.memory_space<vmem>>, vector<8x16xf32>
    %cst = arith.constant dense<0.000000e+00> : vector<256x16xf32>
    %3 = tpu.matmul %1, %2, %cst {dimension_numbers = #tpu.dot_dimension_numbers<[1], [0], [0], [1], [0, 0, 1, 1], [], []>} : vector<256x8xf32>, vector<8x16xf32>, vector<256x16xf32> -> vector<256x16xf32>
    %c0_4 = arith.constant 0 : index
    %c0_5 = arith.constant 0 : index
    %4 = vector.load %arg3[%c0_4, %c0_5] : memref<1x16xf32, #tpu.memory_space<vmem>>, vector<1x16xf32>
    %5 = vector.broadcast %4 : vector<1x16xf32> to vector<256x16xf32>
    %6 = arith.mulf %3, %5 : vector<256x16xf32>
    %c0_6 = arith.constant 0 : index
    %c0_7 = arith.constant 0 : index
    %7 = vector.load %arg4[%c0_6, %c0_7] : memref<1x16xf32, #tpu.memory_space<vmem>>, vector<1x16xf32>
    %8 = vector.broadcast %7 : vector<1x16xf32> to vector<256x16xf32>
    %9 = arith.addf %6, %8 : vector<256x16xf32>
    %cst_8 = arith.constant dense<0.000000e+00> : vector<16xf32>
    %10 = vector.multi_reduction <add>, %9, %cst_8 [0] : vector<256x16xf32> to vector<16xf32>
    %11 = vector.shape_cast %10 : vector<16xf32> to vector<1x16xf32>
    %cst_9 = arith.constant 3.906250e-03 : f32
    %12 = vector.broadcast %cst_9 : f32 to vector<1x16xf32>
    %13 = arith.mulf %11, %12 : vector<1x16xf32>
    %c0_10 = arith.constant 0 : index
    %c0_11 = arith.constant 0 : index
    %14 = vector.load %arg5[%c0_10, %c0_11] : memref<1x16xf32, #tpu.memory_space<vmem>>, vector<1x16xf32>
    %c0_12 = arith.constant 0 : index
    %c0_13 = arith.constant 0 : index
    %15 = vector.load %arg6[%c0_12, %c0_13] : memref<1x16xf32, #tpu.memory_space<vmem>>, vector<1x16xf32>
    %cst_14 = arith.constant dense<0.000000e+00> : vector<1xf32>
    %16 = vector.multi_reduction <add>, %13, %cst_14 [1] : vector<1x16xf32> to vector<1xf32>
    %17 = vector.shape_cast %16 : vector<1xf32> to vector<1x1xf32>
    %cst_15 = arith.constant 1.600000e+01 : f32
    %18 = vector.broadcast %cst_15 : f32 to vector<1x1xf32>
    %19 = arith.divf %17, %18 : vector<1x1xf32>
    %20 = vector.broadcast %19 : vector<1x1xf32> to vector<1x16xf32>
    %21 = arith.subf %13, %20 : vector<1x16xf32>
    %22 = arith.mulf %21, %21 : vector<1x16xf32>
    %cst_16 = arith.constant dense<0.000000e+00> : vector<1xf32>
    %23 = vector.multi_reduction <add>, %22, %cst_16 [1] : vector<1x16xf32> to vector<1xf32>
    %24 = vector.shape_cast %23 : vector<1xf32> to vector<1x1xf32>
    %cst_17 = arith.constant 1.600000e+01 : f32
    %25 = vector.broadcast %cst_17 : f32 to vector<1x1xf32>
    %26 = arith.divf %24, %25 : vector<1x1xf32>
    %27 = vector.broadcast %19 : vector<1x1xf32> to vector<1x16xf32>
    %28 = arith.subf %13, %27 : vector<1x16xf32>
    %cst_18 = arith.constant 9.99999997E-7 : f32
    %29 = vector.broadcast %cst_18 : f32 to vector<1x1xf32>
    %30 = arith.addf %26, %29 : vector<1x1xf32>
    %31 = math.sqrt %30 : vector<1x1xf32>
    %32 = vector.broadcast %31 : vector<1x1xf32> to vector<1x16xf32>
    %33 = arith.divf %28, %32 : vector<1x16xf32>
    %34 = arith.mulf %33, %14 : vector<1x16xf32>
    %35 = arith.addf %34, %15 : vector<1x16xf32>
    %cst_19 = arith.constant 0.000000e+00 : f32
    %36 = vector.broadcast %cst_19 : f32 to vector<1x16xf32>
    %37 = arith.subf %36, %35 : vector<1x16xf32>
    %38 = math.exp %37 : vector<1x16xf32>
    %cst_20 = arith.constant 1.000000e+00 : f32
    %39 = vector.broadcast %cst_20 : f32 to vector<1x16xf32>
    %40 = arith.addf %39, %38 : vector<1x16xf32>
    %cst_21 = arith.constant 1.000000e+00 : f32
    %41 = vector.broadcast %cst_21 : f32 to vector<1x16xf32>
    %42 = arith.divf %41, %40 : vector<1x16xf32>
    %43 = arith.mulf %1, %1 : vector<256x8xf32>
    %cst_22 = arith.constant dense<0.000000e+00> : vector<256xf32>
    %44 = vector.multi_reduction <add>, %43, %cst_22 [1] : vector<256x8xf32> to vector<256xf32>
    %45 = vector.shape_cast %44 : vector<256xf32> to vector<256x1xf32>
    %46 = math.sqrt %45 : vector<256x1xf32>
    %cst_23 = arith.constant 9.99999993E-9 : f32
    %47 = vector.broadcast %cst_23 : f32 to vector<256x1xf32>
    %48 = arith.addf %46, %47 : vector<256x1xf32>
    %cst_24 = arith.constant 1.000000e+00 : f32
    %49 = vector.broadcast %cst_24 : f32 to vector<256x1xf32>
    %50 = arith.divf %49, %48 : vector<256x1xf32>
    %c0_25 = arith.constant 0 : index
    %c0_26 = arith.constant 0 : index
    %51 = vector.load %arg7[%c0_25, %c0_26] : memref<1x16xf32, #tpu.memory_space<vmem>>, vector<1x16xf32>
    %c0_27 = arith.constant 0 : index
    %c0_28 = arith.constant 0 : index
    %52 = vector.load %arg8[%c0_27, %c0_28] : memref<1x16xf32, #tpu.memory_space<vmem>>, vector<1x16xf32>
    %cst_29 = arith.constant 0.000000e+00 : f32
    %53 = vector.broadcast %cst_29 : f32 to vector<1x16xf32>
    %54 = arith.subf %53, %52 : vector<1x16xf32>
    %55 = arith.addf %54, %42 : vector<1x16xf32>
    %56 = vector.broadcast %51 : vector<1x16xf32> to vector<256x16xf32>
    %57 = arith.mulf %56, %9 : vector<256x16xf32>
    %58 = vector.broadcast %50 : vector<256x1xf32> to vector<256x16xf32>
    %59 = arith.mulf %57, %58 : vector<256x16xf32>
    %60 = vector.broadcast %55 : vector<1x16xf32> to vector<256x16xf32>
    %61 = arith.addf %60, %59 : vector<256x16xf32>
    %cst_30 = arith.constant 0.000000e+00 : f32
    %62 = vector.broadcast %cst_30 : f32 to vector<256x16xf32>
    %63 = arith.cmpf olt, %61, %62 : vector<256x16xf32>
    %64 = vector.broadcast %52 : vector<1x16xf32> to vector<256x16xf32>
    %65 = arith.mulf %64, %9 : vector<256x16xf32>
    %cst_31 = arith.constant 0.000000e+00 : f32
    %66 = vector.broadcast %cst_31 : f32 to vector<256x16xf32>
    %67 = arith.minimumf %61, %66 : vector<256x16xf32>
    %68 = math.exp %67 : vector<256x16xf32>
    %69 = arith.mulf %65, %68 : vector<256x16xf32>
    %70 = vector.broadcast %52 : vector<1x16xf32> to vector<256x16xf32>
    %71 = arith.mulf %70, %9 : vector<256x16xf32>
    %72 = arith.mulf %61, %9 : vector<256x16xf32>
    %73 = arith.addf %71, %72 : vector<256x16xf32>
    %74 = arith.select %63, %69, %73 : vector<256x16xi1>, vector<256x16xf32>
    %75 = vector.shape_cast %74 : vector<256x16xf32> to vector<16x16x16xf32>
    %cst_32 = arith.constant 0.000000e+00 : f32
    %76 = vector.broadcast %cst_32 : f32 to vector<1x32x16xf32>
    %c0_33 = arith.constant 0 : index
    %c0_34 = arith.constant 0 : index
    %c0_35 = arith.constant 0 : index
    %77 = vector.load %arg22[%c0_33, %c0_34, %c0_35] : memref<18x32x16xf32, #tpu.memory_space<vmem>>, vector<1x32x16xf32>
    tpu.vector_store %arg22[%c0_33, %c0_34, %c0_35], %76 {strides = array<i32>} : memref<18x32x16xf32, #tpu.memory_space<vmem>>, vector<1x32x16xf32>,
    %c17 = arith.constant 17 : index
    %c0_36 = arith.constant 0 : index
    %c0_37 = arith.constant 0 : index
    %78 = vector.load %arg22[%c17, %c0_36, %c0_37] : memref<18x32x16xf32, #tpu.memory_space<vmem>>, vector<1x32x16xf32>
    tpu.vector_store %arg22[%c17, %c0_36, %c0_37], %76 {strides = array<i32>} : memref<18x32x16xf32, #tpu.memory_space<vmem>>, vector<1x32x16xf32>,
    %cst_38 = arith.constant 0.000000e+00 : f32
    %79 = vector.broadcast %cst_38 : f32 to vector<16x8x16xf32>
    %c1 = arith.constant 1 : index
    %c0_39 = arith.constant 0 : index
    %c0_40 = arith.constant 0 : index
    %80 = vector.load %arg22[%c1, %c0_39, %c0_40] : memref<18x32x16xf32, #tpu.memory_space<vmem>>, vector<16x8x16xf32>
    tpu.vector_store %arg22[%c1, %c0_39, %c0_40], %79 {strides = array<i32>} : memref<18x32x16xf32, #tpu.memory_space<vmem>>, vector<16x8x16xf32>,
    %cst_41 = arith.constant 0.000000e+00 : f32
    %81 = vector.broadcast %cst_41 : f32 to vector<16x8x16xf32>
    %c1_42 = arith.constant 1 : index
    %c24 = arith.constant 24 : index
    %c0_43 = arith.constant 0 : index
    %82 = vector.load %arg22[%c1_42, %c24, %c0_43] : memref<18x32x16xf32, #tpu.memory_space<vmem>>, vector<16x8x16xf32>
    tpu.vector_store %arg22[%c1_42, %c24, %c0_43], %81 {strides = array<i32>} : memref<18x32x16xf32, #tpu.memory_space<vmem>>, vector<16x8x16xf32>,
    %c1_44 = arith.constant 1 : index
    %c8 = arith.constant 8 : index
    %c0_45 = arith.constant 0 : index
    %83 = vector.load %arg22[%c1_44, %c8, %c0_45] : memref<18x32x16xf32, #tpu.memory_space<vmem>>, vector<16x16x16xf32>
    tpu.vector_store %arg22[%c1_44, %c8, %c0_45], %75 {strides = array<i32>} : memref<18x32x16xf32, #tpu.memory_space<vmem>>, vector<16x16x16xf32>,
    %c0_46 = arith.constant 0 : index
    %c0_47 = arith.constant 0 : index
    %c0_48 = arith.constant 0 : index
    %84 = vector.load %arg22[%c0_46, %c0_47, %c0_48] : memref<18x32x16xf32, #tpu.memory_space<vmem>>, vector<18x32x16xf32>
    %c0_49 = arith.constant 0 : index
    %c0_50 = arith.constant 0 : index
    %c0_51 = arith.constant 0 : index
    %85 = vector.load %arg9[%c0_49, %c0_50, %c0_51] : memref<3x3x16xf32, #tpu.memory_space<vmem>>, vector<3x3x16xf32>
    %cst_52 = arith.constant 0.000000e+00 : f32
    %86 = vector.broadcast %cst_52 : f32 to vector<16x16x16xf32>
    %87 = vector.extract_strided_slice %84 {offsets = [0, 7, 0], sizes = [16, 16, 16], strides = [1, 1, 1]} : vector<18x32x16xf32> to vector<16x16x16xf32>
    %88 = vector.extract_strided_slice %85 {offsets = [0, 0, 0], sizes = [1, 1, 16], strides = [1, 1, 1]} : vector<3x3x16xf32> to vector<1x1x16xf32>
    %89 = vector.shape_cast %88 : vector<1x1x16xf32> to vector<16xf32>
    %90 = vector.shape_cast %89 : vector<16xf32> to vector<1x1x16xf32>
    %91 = vector.broadcast %90 : vector<1x1x16xf32> to vector<16x16x16xf32>
    %92 = arith.mulf %87, %91 : vector<16x16x16xf32>
    %93 = arith.addf %86, %92 : vector<16x16x16xf32>
    %94 = vector.extract_strided_slice %84 {offsets = [0, 8, 0], sizes = [16, 16, 16], strides = [1, 1, 1]} : vector<18x32x16xf32> to vector<16x16x16xf32>
    %95 = vector.extract_strided_slice %85 {offsets = [0, 1, 0], sizes = [1, 1, 16], strides = [1, 1, 1]} : vector<3x3x16xf32> to vector<1x1x16xf32>
    %96 = vector.shape_cast %95 : vector<1x1x16xf32> to vector<16xf32>
    %97 = vector.shape_cast %96 : vector<16xf32> to vector<1x1x16xf32>
    %98 = vector.broadcast %97 : vector<1x1x16xf32> to vector<16x16x16xf32>
    %99 = arith.mulf %94, %98 : vector<16x16x16xf32>
    %100 = arith.addf %93, %99 : vector<16x16x16xf32>
    %101 = vector.extract_strided_slice %84 {offsets = [0, 9, 0], sizes = [16, 16, 16], strides = [1, 1, 1]} : vector<18x32x16xf32> to vector<16x16x16xf32>
    %102 = vector.extract_strided_slice %85 {offsets = [0, 2, 0], sizes = [1, 1, 16], strides = [1, 1, 1]} : vector<3x3x16xf32> to vector<1x1x16xf32>
    %103 = vector.shape_cast %102 : vector<1x1x16xf32> to vector<16xf32>
    %104 = vector.shape_cast %103 : vector<16xf32> to vector<1x1x16xf32>
    %105 = vector.broadcast %104 : vector<1x1x16xf32> to vector<16x16x16xf32>
    %106 = arith.mulf %101, %105 : vector<16x16x16xf32>
    %107 = arith.addf %100, %106 : vector<16x16x16xf32>
    %108 = vector.extract_strided_slice %84 {offsets = [1, 7, 0], sizes = [16, 16, 16], strides = [1, 1, 1]} : vector<18x32x16xf32> to vector<16x16x16xf32>
    %109 = vector.extract_strided_slice %85 {offsets = [1, 0, 0], sizes = [1, 1, 16], strides = [1, 1, 1]} : vector<3x3x16xf32> to vector<1x1x16xf32>
    %110 = vector.shape_cast %109 : vector<1x1x16xf32> to vector<16xf32>
    %111 = vector.shape_cast %110 : vector<16xf32> to vector<1x1x16xf32>
    %112 = vector.broadcast %111 : vector<1x1x16xf32> to vector<16x16x16xf32>
    %113 = arith.mulf %108, %112 : vector<16x16x16xf32>
    %114 = arith.addf %107, %113 : vector<16x16x16xf32>
    %115 = vector.extract_strided_slice %84 {offsets = [1, 8, 0], sizes = [16, 16, 16], strides = [1, 1, 1]} : vector<18x32x16xf32> to vector<16x16x16xf32>
    %116 = vector.extract_strided_slice %85 {offsets = [1, 1, 0], sizes = [1, 1, 16], strides = [1, 1, 1]} : vector<3x3x16xf32> to vector<1x1x16xf32>
    %117 = vector.shape_cast %116 : vector<1x1x16xf32> to vector<16xf32>
    %118 = vector.shape_cast %117 : vector<16xf32> to vector<1x1x16xf32>
    %119 = vector.broadcast %118 : vector<1x1x16xf32> to vector<16x16x16xf32>
    %120 = arith.mulf %115, %119 : vector<16x16x16xf32>
    %121 = arith.addf %114, %120 : vector<16x16x16xf32>
    %122 = vector.extract_strided_slice %84 {offsets = [1, 9, 0], sizes = [16, 16, 16], strides = [1, 1, 1]} : vector<18x32x16xf32> to vector<16x16x16xf32>
    %123 = vector.extract_strided_slice %85 {offsets = [1, 2, 0], sizes = [1, 1, 16], strides = [1, 1, 1]} : vector<3x3x16xf32> to vector<1x1x16xf32>
    %124 = vector.shape_cast %123 : vector<1x1x16xf32> to vector<16xf32>
    %125 = vector.shape_cast %124 : vector<16xf32> to vector<1x1x16xf32>
    %126 = vector.broadcast %125 : vector<1x1x16xf32> to vector<16x16x16xf32>
    %127 = arith.mulf %122, %126 : vector<16x16x16xf32>
    %128 = arith.addf %121, %127 : vector<16x16x16xf32>
    %129 = vector.extract_strided_slice %84 {offsets = [2, 7, 0], sizes = [16, 16, 16], strides = [1, 1, 1]} : vector<18x32x16xf32> to vector<16x16x16xf32>
    %130 = vector.extract_strided_slice %85 {offsets = [2, 0, 0], sizes = [1, 1, 16], strides = [1, 1, 1]} : vector<3x3x16xf32> to vector<1x1x16xf32>
    %131 = vector.shape_cast %130 : vector<1x1x16xf32> to vector<16xf32>
    %132 = vector.shape_cast %131 : vector<16xf32> to vector<1x1x16xf32>
    %133 = vector.broadcast %132 : vector<1x1x16xf32> to vector<16x16x16xf32>
    %134 = arith.mulf %129, %133 : vector<16x16x16xf32>
    %135 = arith.addf %128, %134 : vector<16x16x16xf32>
    %136 = vector.extract_strided_slice %84 {offsets = [2, 8, 0], sizes = [16, 16, 16], strides = [1, 1, 1]} : vector<18x32x16xf32> to vector<16x16x16xf32>
    %137 = vector.extract_strided_slice %85 {offsets = [2, 1, 0], sizes = [1, 1, 16], strides = [1, 1, 1]} : vector<3x3x16xf32> to vector<1x1x16xf32>
    %138 = vector.shape_cast %137 : vector<1x1x16xf32> to vector<16xf32>
    %139 = vector.shape_cast %138 : vector<16xf32> to vector<1x1x16xf32>
    %140 = vector.broadcast %139 : vector<1x1x16xf32> to vector<16x16x16xf32>
    %141 = arith.mulf %136, %140 : vector<16x16x16xf32>
    %142 = arith.addf %135, %141 : vector<16x16x16xf32>
    %143 = vector.extract_strided_slice %84 {offsets = [2, 9, 0], sizes = [16, 16, 16], strides = [1, 1, 1]} : vector<18x32x16xf32> to vector<16x16x16xf32>
    %144 = vector.extract_strided_slice %85 {offsets = [2, 2, 0], sizes = [1, 1, 16], strides = [1, 1, 1]} : vector<3x3x16xf32> to vector<1x1x16xf32>
    %145 = vector.shape_cast %144 : vector<1x1x16xf32> to vector<16xf32>
    %146 = vector.shape_cast %145 : vector<16xf32> to vector<1x1x16xf32>
    %147 = vector.broadcast %146 : vector<1x1x16xf32> to vector<16x16x16xf32>
    %148 = arith.mulf %143, %147 : vector<16x16x16xf32>
    %149 = arith.addf %142, %148 : vector<16x16x16xf32>
    %c0_53 = arith.constant 0 : index
    %c0_54 = arith.constant 0 : index
    %150 = vector.load %arg10[%c0_53, %c0_54] : memref<1x16xf32, #tpu.memory_space<vmem>>, vector<1x16xf32>
    %151 = vector.shape_cast %150 : vector<1x16xf32> to vector<1x1x16xf32>
    %152 = vector.broadcast %151 : vector<1x1x16xf32> to vector<16x16x16xf32>
    %153 = arith.mulf %149, %152 : vector<16x16x16xf32>
    %c0_55 = arith.constant 0 : index
    %c0_56 = arith.constant 0 : index
    %154 = vector.load %arg11[%c0_55, %c0_56] : memref<1x16xf32, #tpu.memory_space<vmem>>, vector<1x16xf32>
    %155 = vector.shape_cast %154 : vector<1x16xf32> to vector<1x1x16xf32>
    %156 = vector.broadcast %155 : vector<1x1x16xf32> to vector<16x16x16xf32>
    %157 = arith.addf %153, %156 : vector<16x16x16xf32>
    %158 = arith.mulf %84, %84 : vector<18x32x16xf32>
    %cst_57 = arith.constant dense<0.000000e+00> : vector<18x32xf32>
    %159 = vector.multi_reduction <add>, %158, %cst_57 [2] : vector<18x32x16xf32> to vector<18x32xf32>
    %160 = vector.shape_cast %159 : vector<18x32xf32> to vector<18x32x1xf32>
    %161 = vector.extract_strided_slice %160 {offsets = [0, 7, 0], sizes = [18, 16, 1], strides = [1, 1, 1]} : vector<18x32x1xf32> to vector<18x16x1xf32>
    %162 = vector.extract_strided_slice %160 {offsets = [0, 8, 0], sizes = [18, 16, 1], strides = [1, 1, 1]} : vector<18x32x1xf32> to vector<18x16x1xf32>
    %163 = arith.addf %161, %162 : vector<18x16x1xf32>
    %164 = vector.extract_strided_slice %160 {offsets = [0, 9, 0], sizes = [18, 16, 1], strides = [1, 1, 1]} : vector<18x32x1xf32> to vector<18x16x1xf32>
    %165 = arith.addf %163, %164 : vector<18x16x1xf32>
    %166 = vector.extract_strided_slice %165 {offsets = [0, 0, 0], sizes = [16, 16, 1], strides = [1, 1, 1]} : vector<18x16x1xf32> to vector<16x16x1xf32>
    %167 = vector.extract_strided_slice %165 {offsets = [1, 0, 0], sizes = [16, 16, 1], strides = [1, 1, 1]} : vector<18x16x1xf32> to vector<16x16x1xf32>
    %168 = arith.addf %166, %167 : vector<16x16x1xf32>
    %169 = vector.extract_strided_slice %165 {offsets = [2, 0, 0], sizes = [16, 16, 1], strides = [1, 1, 1]} : vector<18x16x1xf32> to vector<16x16x1xf32>
    %170 = arith.addf %168, %169 : vector<16x16x1xf32>
    %cst_58 = arith.constant 0.111111112 : f32
    %171 = vector.broadcast %cst_58 : f32 to vector<16x16x1xf32>
    %172 = arith.mulf %170, %171 : vector<16x16x1xf32>
    %173 = math.sqrt %172 : vector<16x16x1xf32>
    %cst_59 = arith.constant 9.99999993E-9 : f32
    %174 = vector.broadcast %cst_59 : f32 to vector<16x16x1xf32>
    %175 = arith.addf %173, %174 : vector<16x16x1xf32>
    %cst_60 = arith.constant 0.333333343 : f32
    %176 = vector.broadcast %cst_60 : f32 to vector<16x16x1xf32>
    %177 = arith.divf %176, %175 : vector<16x16x1xf32>
    %cst_61 = arith.constant dense<0.000000e+00> : vector<16xf32>
    %178 = vector.multi_reduction <add>, %157, %cst_61 [0, 1] : vector<16x16x16xf32> to vector<16xf32>
    %179 = vector.shape_cast %178 : vector<16xf32> to vector<1x1x16xf32>
    %cst_62 = arith.constant 3.906250e-03 : f32
    %180 = vector.broadcast %cst_62 : f32 to vector<1x1x16xf32>
    %181 = arith.mulf %179, %180 : vector<1x1x16xf32>
    %c0_63 = arith.constant 0 : index
    %c0_64 = arith.constant 0 : index
    %182 = vector.load %arg12[%c0_63, %c0_64] : memref<1x16xf32, #tpu.memory_space<vmem>>, vector<1x16xf32>
    %c0_65 = arith.constant 0 : index
    %c0_66 = arith.constant 0 : index
    %183 = vector.load %arg13[%c0_65, %c0_66] : memref<1x16xf32, #tpu.memory_space<vmem>>, vector<1x16xf32>
    %cst_67 = arith.constant dense<0.000000e+00> : vector<1x1xf32>
    %184 = vector.multi_reduction <add>, %181, %cst_67 [2] : vector<1x1x16xf32> to vector<1x1xf32>
    %185 = vector.shape_cast %184 : vector<1x1xf32> to vector<1x1x1xf32>
    %cst_68 = arith.constant 1.600000e+01 : f32
    %186 = vector.broadcast %cst_68 : f32 to vector<1x1x1xf32>
    %187 = arith.divf %185, %186 : vector<1x1x1xf32>
    %188 = vector.broadcast %187 : vector<1x1x1xf32> to vector<1x1x16xf32>
    %189 = arith.subf %181, %188 : vector<1x1x16xf32>
    %190 = arith.mulf %189, %189 : vector<1x1x16xf32>
    %cst_69 = arith.constant dense<0.000000e+00> : vector<1x1xf32>
    %191 = vector.multi_reduction <add>, %190, %cst_69 [2] : vector<1x1x16xf32> to vector<1x1xf32>
    %192 = vector.shape_cast %191 : vector<1x1xf32> to vector<1x1x1xf32>
    %cst_70 = arith.constant 1.600000e+01 : f32
    %193 = vector.broadcast %cst_70 : f32 to vector<1x1x1xf32>
    %194 = arith.divf %192, %193 : vector<1x1x1xf32>
    %195 = vector.broadcast %187 : vector<1x1x1xf32> to vector<1x1x16xf32>
    %196 = arith.subf %181, %195 : vector<1x1x16xf32>
    %cst_71 = arith.constant 9.99999997E-7 : f32
    %197 = vector.broadcast %cst_71 : f32 to vector<1x1x1xf32>
    %198 = arith.addf %194, %197 : vector<1x1x1xf32>
    %199 = math.sqrt %198 : vector<1x1x1xf32>
    %200 = vector.broadcast %199 : vector<1x1x1xf32> to vector<1x1x16xf32>
    %201 = arith.divf %196, %200 : vector<1x1x16xf32>
    %202 = vector.shape_cast %182 : vector<1x16xf32> to vector<1x1x16xf32>
    %203 = arith.mulf %201, %202 : vector<1x1x16xf32>
    %204 = vector.shape_cast %183 : vector<1x16xf32> to vector<1x1x16xf32>
    %205 = arith.addf %203, %204 : vector<1x1x16xf32>
    %cst_72 = arith.constant 0.000000e+00 : f32
    %206 = vector.broadcast %cst_72 : f32 to vector<1x1x16xf32>
    %207 = arith.subf %206, %205 : vector<1x1x16xf32>
    %208 = math.exp %207 : vector<1x1x16xf32>
    %cst_73 = arith.constant 1.000000e+00 : f32
    %209 = vector.broadcast %cst_73 : f32 to vector<1x1x16xf32>
    %210 = arith.addf %209, %208 : vector<1x1x16xf32>
    %cst_74 = arith.constant 1.000000e+00 : f32
    %211 = vector.broadcast %cst_74 : f32 to vector<1x1x16xf32>
    %212 = arith.divf %211, %210 : vector<1x1x16xf32>
    %c0_75 = arith.constant 0 : index
    %c0_76 = arith.constant 0 : index
    %213 = vector.load %arg14[%c0_75, %c0_76] : memref<1x16xf32, #tpu.memory_space<vmem>>, vector<1x16xf32>
    %c0_77 = arith.constant 0 : index
    %c0_78 = arith.constant 0 : index
    %214 = vector.load %arg15[%c0_77, %c0_78] : memref<1x16xf32, #tpu.memory_space<vmem>>, vector<1x16xf32>
    %cst_79 = arith.constant 0.000000e+00 : f32
    %215 = vector.broadcast %cst_79 : f32 to vector<1x16xf32>
    %216 = arith.subf %215, %214 : vector<1x16xf32>
    %217 = vector.shape_cast %216 : vector<1x16xf32> to vector<1x1x16xf32>
    %218 = arith.addf %217, %212 : vector<1x1x16xf32>
    %219 = vector.shape_cast %213 : vector<1x16xf32> to vector<1x1x16xf32>
    %220 = vector.broadcast %219 : vector<1x1x16xf32> to vector<16x16x16xf32>
    %221 = arith.mulf %220, %157 : vector<16x16x16xf32>
    %222 = vector.broadcast %177 : vector<16x16x1xf32> to vector<16x16x16xf32>
    %223 = arith.mulf %221, %222 : vector<16x16x16xf32>
    %224 = vector.broadcast %218 : vector<1x1x16xf32> to vector<16x16x16xf32>
    %225 = arith.addf %224, %223 : vector<16x16x16xf32>
    %cst_80 = arith.constant 0.000000e+00 : f32
    %226 = vector.broadcast %cst_80 : f32 to vector<16x16x16xf32>
    %227 = arith.cmpf olt, %225, %226 : vector<16x16x16xf32>
    %228 = vector.shape_cast %214 : vector<1x16xf32> to vector<1x1x16xf32>
    %229 = vector.broadcast %228 : vector<1x1x16xf32> to vector<16x16x16xf32>
    %230 = arith.mulf %229, %157 : vector<16x16x16xf32>
    %cst_81 = arith.constant 0.000000e+00 : f32
    %231 = vector.broadcast %cst_81 : f32 to vector<16x16x16xf32>
    %232 = arith.minimumf %225, %231 : vector<16x16x16xf32>
    %233 = math.exp %232 : vector<16x16x16xf32>
    %234 = arith.mulf %230, %233 : vector<16x16x16xf32>
    %235 = vector.shape_cast %214 : vector<1x16xf32> to vector<1x1x16xf32>
    %236 = vector.broadcast %235 : vector<1x1x16xf32> to vector<16x16x16xf32>
    %237 = arith.mulf %236, %157 : vector<16x16x16xf32>
    %238 = arith.mulf %225, %157 : vector<16x16x16xf32>
    %239 = arith.addf %237, %238 : vector<16x16x16xf32>
    %240 = arith.select %227, %234, %239 : vector<16x16x16xi1>, vector<16x16x16xf32>
    %241 = vector.shape_cast %240 : vector<16x16x16xf32> to vector<256x16xf32>
    %c0_82 = arith.constant 0 : index
    %c0_83 = arith.constant 0 : index
    %242 = vector.load %arg16[%c0_82, %c0_83] : memref<16x8xf32, #tpu.memory_space<vmem>>, vector<16x8xf32>
    %cst_84 = arith.constant dense<0.000000e+00> : vector<256x8xf32>
    %243 = tpu.matmul %241, %242, %cst_84 {dimension_numbers = #tpu.dot_dimension_numbers<[1], [0], [0], [1], [0, 0, 1, 1], [], []>} : vector<256x16xf32>, vector<16x8xf32>, vector<256x8xf32> -> vector<256x8xf32>
    %c0_85 = arith.constant 0 : index
    %c0_86 = arith.constant 0 : index
    %244 = vector.load %arg17[%c0_85, %c0_86] : memref<1x8xf32, #tpu.memory_space<vmem>>, vector<1x8xf32>
    %245 = vector.broadcast %244 : vector<1x8xf32> to vector<256x8xf32>
    %246 = arith.mulf %243, %245 : vector<256x8xf32>
    %c0_87 = arith.constant 0 : index
    %c0_88 = arith.constant 0 : index
    %247 = vector.load %arg18[%c0_87, %c0_88] : memref<1x8xf32, #tpu.memory_space<vmem>>, vector<1x8xf32>
    %248 = vector.broadcast %247 : vector<1x8xf32> to vector<256x8xf32>
    %249 = arith.addf %246, %248 : vector<256x8xf32>
    %c0_89 = arith.constant 0 : index
    %c0_90 = arith.constant 0 : index
    %c0_91 = arith.constant 0 : index
    %250 = vector.load %arg19[%c0_89, %c0_90, %c0_91] : memref<1x256x8xf32, #tpu.memory_space<vmem>>, vector<1x256x8xf32>
    %251 = vector.shape_cast %250 : vector<1x256x8xf32> to vector<256x8xf32>
    %252 = vector.shape_cast %249 : vector<256x8xf32> to vector<1x256x8xf32>
    tpu.vector_store %arg19[%c0_89, %c0_90, %c0_91], %252 {strides = array<i32>} : memref<1x256x8xf32, #tpu.memory_space<vmem>>, vector<1x256x8xf32>,
    %cst_92 = arith.constant dense<0.000000e+00> : vector<8xf32>
    %253 = vector.multi_reduction <add>, %249, %cst_92 [0] : vector<256x8xf32> to vector<8xf32>
    %254 = vector.shape_cast %253 : vector<8xf32> to vector<1x8xf32>
    %c0_93 = arith.constant 0 : index
    %c0_94 = arith.constant 0 : index
    %c0_95 = arith.constant 0 : index
    %255 = vector.load %arg20[%c0_93, %c0_94, %c0_95] : memref<1x1x8xf32, #tpu.memory_space<vmem>>, vector<1x1x8xf32>
    %256 = vector.shape_cast %255 : vector<1x1x8xf32> to vector<1x8xf32>
    %257 = vector.shape_cast %254 : vector<1x8xf32> to vector<1x1x8xf32>
    tpu.vector_store %arg20[%c0_93, %c0_94, %c0_95], %257 {strides = array<i32>} : memref<1x1x8xf32, #tpu.memory_space<vmem>>, vector<1x1x8xf32>,
    %cst_96 = arith.constant dense<0.000000e+00> : vector<8xf32>
    %258 = vector.multi_reduction <add>, %1, %cst_96 [0] : vector<256x8xf32> to vector<8xf32>
    %259 = vector.shape_cast %258 : vector<8xf32> to vector<1x8xf32>
    %c0_97 = arith.constant 0 : index
    %c0_98 = arith.constant 0 : index
    %c0_99 = arith.constant 0 : index
    %260 = vector.load %arg21[%c0_97, %c0_98, %c0_99] : memref<1x1x8xf32, #tpu.memory_space<vmem>>, vector<1x1x8xf32>
    %261 = vector.shape_cast %260 : vector<1x1x8xf32> to vector<1x8xf32>
    %262 = vector.shape_cast %259 : vector<1x8xf32> to vector<1x1x8xf32>
    tpu.vector_store %arg21[%c0_97, %c0_98, %c0_99], %262 {strides = array<i32>} : memref<1x1x8xf32, #tpu.memory_space<vmem>>, vector<1x1x8xf32>,
    return
  }
  func.func @transform_0(%arg0: i32) -> (i32, i32, i32) {
    %c0_i32 = arith.constant 0 : i32
    %c0_i32_0 = arith.constant 0 : i32
    %c0_i32_1 = arith.constant 0 : i32
    return %arg0, %c0_i32, %c0_i32_0 : i32, i32, i32
  }
  func.func @transform_1(%arg0: i32) -> (i32, i32) {
    %c0_i32 = arith.constant 0 : i32
    %c0_i32_0 = arith.constant 0 : i32
    %c0_i32_1 = arith.constant 0 : i32
    return %c0_i32, %c0_i32_0 : i32, i32
  }
  func.func @transform_2(%arg0: i32) -> (i32, i32) {
    %c0_i32 = arith.constant 0 : i32
    %c0_i32_0 = arith.constant 0 : i32
    %c0_i32_1 = arith.constant 0 : i32
    return %c0_i32, %c0_i32_0 : i32, i32
  }
  func.func @transform_3(%arg0: i32) -> (i32, i32) {
    %c0_i32 = arith.constant 0 : i32
    %c0_i32_0 = arith.constant 0 : i32
    %c0_i32_1 = arith.constant 0 : i32
    return %c0_i32, %c0_i32_0 : i32, i32
  }
  func.func @transform_4(%arg0: i32) -> (i32, i32) {
    %c0_i32 = arith.constant 0 : i32
    %c0_i32_0 = arith.constant 0 : i32
    %c0_i32_1 = arith.constant 0 : i32
    return %c0_i32, %c0_i32_0 : i32, i32
  }
  func.func @transform_5(%arg0: i32) -> (i32, i32) {
    %c0_i32 = arith.constant 0 : i32
    %c0_i32_0 = arith.constant 0 : i32
    %c0_i32_1 = arith.constant 0 : i32
    return %c0_i32, %c0_i32_0 : i32, i32
  }
  func.func @transform_6(%arg0: i32) -> (i32, i32) {
    %c0_i32 = arith.constant 0 : i32
    %c0_i32_0 = arith.constant 0 : i32
    %c0_i32_1 = arith.constant 0 : i32
    return %c0_i32, %c0_i32_0 : i32, i32
  }
  func.func @transform_7(%arg0: i32) -> (i32, i32) {
    %c0_i32 = arith.constant 0 : i32
    %c0_i32_0 = arith.constant 0 : i32
    %c0_i32_1 = arith.constant 0 : i32
    return %c0_i32, %c0_i32_0 : i32, i32
  }
  func.func @transform_8(%arg0: i32) -> (i32, i32, i32) {
    %c0_i32 = arith.constant 0 : i32
    %c0_i32_0 = arith.constant 0 : i32
    %c0_i32_1 = arith.constant 0 : i32
    %c0_i32_2 = arith.constant 0 : i32
    return %c0_i32, %c0_i32_0, %c0_i32_1 : i32, i32, i32
  }
  func.func @transform_9(%arg0: i32) -> (i32, i32) {
    %c0_i32 = arith.constant 0 : i32
    %c0_i32_0 = arith.constant 0 : i32
    %c0_i32_1 = arith.constant 0 : i32
    return %c0_i32, %c0_i32_0 : i32, i32
  }
  func.func @transform_10(%arg0: i32) -> (i32, i32) {
    %c0_i32 = arith.constant 0 : i32
    %c0_i32_0 = arith.constant 0 : i32
    %c0_i32_1 = arith.constant 0 : i32
    return %c0_i32, %c0_i32_0 : i32, i32
  }
  func.func @transform_11(%arg0: i32) -> (i32, i32) {
    %c0_i32 = arith.constant 0 : i32
    %c0_i32_0 = arith.constant 0 : i32
    %c0_i32_1 = arith.constant 0 : i32
    return %c0_i32, %c0_i32_0 : i32, i32
  }
  func.func @transform_12(%arg0: i32) -> (i32, i32) {
    %c0_i32 = arith.constant 0 : i32
    %c0_i32_0 = arith.constant 0 : i32
    %c0_i32_1 = arith.constant 0 : i32
    return %c0_i32, %c0_i32_0 : i32, i32
  }
  func.func @transform_13(%arg0: i32) -> (i32, i32) {
    %c0_i32 = arith.constant 0 : i32
    %c0_i32_0 = arith.constant 0 : i32
    %c0_i32_1 = arith.constant 0 : i32
    return %c0_i32, %c0_i32_0 : i32, i32
  }
  func.func @transform_14(%arg0: i32) -> (i32, i32) {
    %c0_i32 = arith.constant 0 : i32
    %c0_i32_0 = arith.constant 0 : i32
    %c0_i32_1 = arith.constant 0 : i32
    return %c0_i32, %c0_i32_0 : i32, i32
  }
  func.func @transform_15(%arg0: i32) -> (i32, i32) {
    %c0_i32 = arith.constant 0 : i32
    %c0_i32_0 = arith.constant 0 : i32
    %c0_i32_1 = arith.constant 0 : i32
    return %c0_i32, %c0_i32_0 : i32, i32
  }
  func.func @transform_16(%arg0: i32) -> (i32, i32) {
    %c0_i32 = arith.constant 0 : i32
    %c0_i32_0 = arith.constant 0 : i32
    %c0_i32_1 = arith.constant 0 : i32
    return %c0_i32, %c0_i32_0 : i32, i32
  }
  func.func @transform_17(%arg0: i32) -> (i32, i32) {
    %c0_i32 = arith.constant 0 : i32
    %c0_i32_0 = arith.constant 0 : i32
    %c0_i32_1 = arith.constant 0 : i32
    return %c0_i32, %c0_i32_0 : i32, i32
  }
  func.func @transform_18(%arg0: i32) -> (i32, i32, i32) {
    %c0_i32 = arith.constant 0 : i32
    %c0_i32_0 = arith.constant 0 : i32
    %c0_i32_1 = arith.constant 0 : i32
    return %arg0, %c0_i32, %c0_i32_0 : i32, i32, i32
  }
  func.func @transform_19(%arg0: i32) -> (i32, i32, i32) {
    %c0_i32 = arith.constant 0 : i32
    %c0_i32_0 = arith.constant 0 : i32
    %c0_i32_1 = arith.constant 0 : i32
    return %arg0, %c0_i32, %c0_i32_0 : i32, i32, i32
  }
  func.func @transform_20(%arg0: i32) -> (i32, i32, i32) {
    %c0_i32 = arith.constant 0 : i32
    %c0_i32_0 = arith.constant 0 : i32
    %c0_i32_1 = arith.constant 0 : i32
    return %arg0, %c0_i32, %c0_i32_0 : i32, i32, i32
  }
}

module attributes {stable_mosaic.version = 11 : i64} {
  func.func @_combine_kernel(%arg0: i32, %arg1: i32, %arg2: memref<1x256x8xf32, #tpu.memory_space<vmem>>, %arg3: memref<1x256x8xf32, #tpu.memory_space<vmem>>, %arg4: memref<1x1x8xf32, #tpu.memory_space<vmem>>, %arg5: memref<1x1x8xf32, #tpu.memory_space<vmem>>, %arg6: memref<1x256x8xf32, #tpu.memory_space<vmem>>) attributes {dimension_semantics = [#tpu.dimension_semantics<parallel>, #tpu.dimension_semantics<parallel>], iteration_bounds = array<i64: 2, 1>, scalar_prefetch = 0 : i64, scratch_operands = 0 : i64, tpu.core_type = #tpu.core_type<tc>, window_params = [{transform_indices = @transform_0, window_bounds = array<i64: 1, 256, 8>}, {transform_indices = @transform_1, window_bounds = array<i64: 1, 256, 8>}, {transform_indices = @transform_2, window_bounds = array<i64: 1, 1, 8>}, {transform_indices = @transform_3, window_bounds = array<i64: 1, 1, 8>}, {transform_indices = @transform_4, window_bounds = array<i64: 1, 256, 8>}]} {
    %c0 = arith.constant 0 : index
    %c0_0 = arith.constant 0 : index
    %c0_1 = arith.constant 0 : index
    %0 = vector.load %arg2[%c0, %c0_0, %c0_1] : memref<1x256x8xf32, #tpu.memory_space<vmem>>, vector<1x256x8xf32>
    %1 = vector.shape_cast %0 : vector<1x256x8xf32> to vector<256x8xf32>
    %c0_2 = arith.constant 0 : index
    %c0_3 = arith.constant 0 : index
    %c0_4 = arith.constant 0 : index
    %2 = vector.load %arg4[%c0_2, %c0_3, %c0_4] : memref<1x1x8xf32, #tpu.memory_space<vmem>>, vector<1x1x8xf32>
    %3 = vector.shape_cast %2 : vector<1x1x8xf32> to vector<1x8xf32>
    %4 = vector.broadcast %3 : vector<1x8xf32> to vector<256x8xf32>
    %5 = arith.mulf %1, %4 : vector<256x8xf32>
    %c0_5 = arith.constant 0 : index
    %c0_6 = arith.constant 0 : index
    %c0_7 = arith.constant 0 : index
    %6 = vector.load %arg3[%c0_5, %c0_6, %c0_7] : memref<1x256x8xf32, #tpu.memory_space<vmem>>, vector<1x256x8xf32>
    %7 = vector.shape_cast %6 : vector<1x256x8xf32> to vector<256x8xf32>
    %c0_8 = arith.constant 0 : index
    %c0_9 = arith.constant 0 : index
    %c0_10 = arith.constant 0 : index
    %8 = vector.load %arg5[%c0_8, %c0_9, %c0_10] : memref<1x1x8xf32, #tpu.memory_space<vmem>>, vector<1x1x8xf32>
    %9 = vector.shape_cast %8 : vector<1x1x8xf32> to vector<1x8xf32>
    %10 = vector.broadcast %9 : vector<1x8xf32> to vector<256x8xf32>
    %11 = arith.mulf %7, %10 : vector<256x8xf32>
    %12 = arith.addf %5, %11 : vector<256x8xf32>
    %c0_11 = arith.constant 0 : index
    %c0_12 = arith.constant 0 : index
    %c0_13 = arith.constant 0 : index
    %13 = vector.load %arg6[%c0_11, %c0_12, %c0_13] : memref<1x256x8xf32, #tpu.memory_space<vmem>>, vector<1x256x8xf32>
    %14 = vector.shape_cast %13 : vector<1x256x8xf32> to vector<256x8xf32>
    %15 = vector.shape_cast %12 : vector<256x8xf32> to vector<1x256x8xf32>
    tpu.vector_store %arg6[%c0_11, %c0_12, %c0_13], %15 {strides = array<i32>} : memref<1x256x8xf32, #tpu.memory_space<vmem>>, vector<1x256x8xf32>,
    return
  }
  func.func @transform_0(%arg0: i32, %arg1: i32) -> (i32, i32, i32) {
    %c0_i32 = arith.constant 0 : i32
    %c0_i32_0 = arith.constant 0 : i32
    return %arg0, %arg1, %c0_i32 : i32, i32, i32
  }
  func.func @transform_1(%arg0: i32, %arg1: i32) -> (i32, i32, i32) {
    %c0_i32 = arith.constant 0 : i32
    %c0_i32_0 = arith.constant 0 : i32
    return %arg0, %arg1, %c0_i32 : i32, i32, i32
  }
  func.func @transform_2(%arg0: i32, %arg1: i32) -> (i32, i32, i32) {
    %c0_i32 = arith.constant 0 : i32
    %c0_i32_0 = arith.constant 0 : i32
    %c0_i32_1 = arith.constant 0 : i32
    return %arg0, %c0_i32, %c0_i32_0 : i32, i32, i32
  }
  func.func @transform_3(%arg0: i32, %arg1: i32) -> (i32, i32, i32) {
    %c0_i32 = arith.constant 0 : i32
    %c0_i32_0 = arith.constant 0 : i32
    %c0_i32_1 = arith.constant 0 : i32
    return %arg0, %c0_i32, %c0_i32_0 : i32, i32, i32
  }
  func.func @transform_4(%arg0: i32, %arg1: i32) -> (i32, i32, i32) {
    %c0_i32 = arith.constant 0 : i32
    %c0_i32_0 = arith.constant 0 : i32
    return %arg0, %arg1, %c0_i32 : i32, i32, i32
  }
}

</mosaic_0001>

<bundles_post_ra>
// kernel: neg.0
= control target key start
LH: loop header
LB: loop body
LE: loop exit
PB: predicated region body
PF: predicated region fallthrough
CT: control target
= control target key end

     0   :  { %s24_s0 = inlined_call_operand.vmem [shape: f32[2], index: 0, kind: input, shape index: {}]   ;;  %s25_s1 = inlined_call_operand.vmem [shape: f32[2], index: 1, kind: output, shape index: {}]  }
   0x1   :  { %v2_v0 = vld [vmem:[%s24_s0] sm:$0x1] }
   0x2   :  { %v5_v1 = vxor.u32 2147483648, %v2_v0 }
   0x4   :  { %7 = vst [vmem:[%s25_s1] sm:$0x1] %v5_v1 }

// kernel: inverted_residual.3
= control target key start
LH: loop header
LB: loop body
LE: loop exit
PB: predicated region body
PF: predicated region fallthrough
CT: control target
= control target key end

     0   :  { %s722_s15 = smov 0   ;;  %s724_s16 = smov 0   ;;  %s1072_s0 = inlined_call_operand.vmem [shape: f32[2,256,8], index: 0, kind: input, shape index: {}, may-alias: {0,4}]   ;;  %s1073_s1 = inlined_call_operand.vmem [shape: f32[2,256,8], index: 1, kind: input, shape index: {}]   ;;  %s1074_s2 = inlined_call_operand.vmem [shape: f32[2,1,8], index: 2, kind: input, shape index: {}]   ;;  %s1075_s3 = inlined_call_operand.vmem [shape: f32[2,1,8], index: 3, kind: input, shape index: {}]   ;;  %s1076_s4 = inlined_call_operand.vmem [shape: f32[2,256,8], index: 4, kind: output, shape index: {}, may-alias: {0,4}]  }
   0x1   :  { %s726_s17 = smov 0  }
   0x2 LB: > { %s26_s18 = sadd.s32 1, %s691_s16  ;;  %p635_p0 = scmp.ge.s32.totalorder %s695_s17, 1  ;;  %s695_s17 = sphi %s726_s17, %s14_s17   ;;  %s691_s16 = sphi %s724_s16, %s1078_s16   ;;  %s687_s15 = sphi %s722_s15, %s1077_s15  }
   0x3   : > { %p28_p1 = scmp.ge.s32.totalorder %s26_s18, 2  ;;  %p216_p2 = scmp.lt.s32.totalorder %s695_s17, 3 }
   0x5   : > { %s1080_s18 = smov (%p28_p1, %s26_s18), 0  ;;  %p217_p3 = pnand %p635_p0, %p216_p2 }
   0x6   : > { %p266_p4 = scmp.lt.s32.totalorder (!%p217_p3), %s687_s15, 1  ;;  %vm475_vm0 = vcmask (!%p217_p3), 64512  }
   0x7   : > { %220 = sbr.rel (%p217_p3) target bundleno = 52 (0x34), region = 36 }
   0xe   : > { %s1082_s15 = smov (!%p266_p4, %s687_s15), 1 }
   0xf   : > { %s743_s19 = sshll.u32 %s1082_s15, 8  ;;  %s287_s22 = scalar_lea.vmem %s1074_s2, %s1082_s15 }
  0x10   : > { %s753_s25 = scalar_lea.vmem %s1072_s0, %s743_s19  ;;  %v755_v0 = vld [vmem:[%s287_s22] ss:$0 sm:$0xff]  ;;  %s812_s28 = scalar_lea.vmem %s1073_s1, %s743_s19 }
  0x11   : > { %v301_v1 = vld [vmem:[%s753_s25] sm:$0xff]  ;;  %v302_v2 = vld [vmem:[%s753_s25 + $0x8] sm:$0xff]  ;;  %v303_v3 = vld [vmem:[%s753_s25 + $0x10] sm:$0xff]  ;;  %s290_s5 = scalar_lea.vmem %s1075_s3, %s1082_s15  ;;  %s907_s8 = scalar_lea.vmem %s1076_s4, %s743_s19 }
  0x12   : > { %v304_v4 = vld [vmem:[%s753_s25 + $0x18] sm:$0xff]  ;;  %v305_v5 = vld [vmem:[%s753_s25 + $0x20] sm:$0xff]  ;;  %v306_v6 = vld [vmem:[%s753_s25 + $0x28] sm:$0xff]  ;;  %v773_v16 = vmul.f32 %v755_v0, %v301_v1  ;;  %v776_v17 = vmul.f32 %v755_v0, %v302_v2  ;;  %v782_v21 = vmul.f32 %v755_v0, %v303_v3 }
  0x13   : > { %v307_v7 = vld [vmem:[%s753_s25 + $0x30] sm:$0xff]  ;;  %v308_v8 = vld [vmem:[%s753_s25 + $0x38] sm:$0xff]  ;;  %v309_v9 = vld [vmem:[%s753_s25 + $0x40] sm:$0xff]  ;;  %v785_v22 = vmul.f32 %v755_v0, %v304_v4  ;;  %v788_v23 = vmul.f32 %v755_v0, %v305_v5  ;;  %v791_v24 = vmul.f32 %v755_v0, %v306_v6 }
  0x14   : > { %v310_v10 = vld [vmem:[%s753_s25 + $0x48] sm:$0xff]  ;;  %v311_v11 = vld [vmem:[%s753_s25 + $0x50] sm:$0xff]  ;;  %v312_v12 = vld [vmem:[%s753_s25 + $0x58] sm:$0xff]  ;;  %v797_v28 = vmul.f32 %v755_v0, %v307_v7  ;;  %v800_v29 = vmul.f32 %v755_v0, %v308_v8  ;;  %v803_v30 = vmul.f32 %v755_v0, %v309_v9 }
  0x15   : > { %v313_v13 = vld [vmem:[%s753_s25 + $0x60] sm:$0xff]  ;;  %v314_v14 = vld [vmem:[%s753_s25 + $0x68] sm:$0xff]  ;;  %v315_v15 = vld [vmem:[%s753_s25 + $0x70] sm:$0xff]  ;;  %v806_v31 = vmul.f32 %v755_v0, %v310_v10  ;;  %v818_v35 = vmul.f32 %v755_v0, %v311_v11  ;;  %v821_v36 = vmul.f32 %v755_v0, %v312_v12 }
  0x16   : > { %v316_v18 = vld [vmem:[%s753_s25 + $0x78] sm:$0xff]  ;;  %v317_v19 = vld [vmem:[%s753_s25 + $0x80] sm:$0xff]  ;;  %v318_v20 = vld [vmem:[%s753_s25 + $0x88] sm:$0xff]  ;;  %v824_v37 = vmul.f32 %v755_v0, %v313_v13  ;;  %v827_v38 = vmul.f32 %v755_v0, %v314_v14  ;;  %v837_v42 = vmul.f32 %v755_v0, %v315_v15 }
  0x17   : > { %v319_v25 = vld [vmem:[%s753_s25 + $0x90] sm:$0xff]  ;;  %v320_v26 = vld [vmem:[%s753_s25 + $0x98] sm:$0xff]  ;;  %v321_v27 = vld [vmem:[%s753_s25 + $0xa0] sm:$0xff]  ;;  %v840_v43 = vmul.f32 %v755_v0, %v316_v18  ;;  %v843_v44 = vmul.f32 %v755_v0, %v317_v19  ;;  %v846_v45 = vmul.f32 %v755_v0, %v318_v20 }
  0x18   : > { %v322_v32 = vld [vmem:[%s753_s25 + $0xa8] sm:$0xff]  ;;  %v323_v33 = vld [vmem:[%s753_s25 + $0xb0] sm:$0xff]  ;;  %v324_v34 = vld [vmem:[%s753_s25 + $0xb8] sm:$0xff]  ;;  %v852_v49 = vmul.f32 %v755_v0, %v319_v25  ;;  %v855_v50 = vmul.f32 %v755_v0, %v320_v26  ;;  %v858_v51 = vmul.f32 %v755_v0, %v321_v27 }
  0x19   : > { %v325_v39 = vld [vmem:[%s753_s25 + $0xc0] sm:$0xff]  ;;  %v326_v40 = vld [vmem:[%s753_s25 + $0xc8] sm:$0xff]  ;;  %v327_v41 = vld [vmem:[%s753_s25 + $0xd0] sm:$0xff]  ;;  %v861_v52 = vmul.f32 %v755_v0, %v322_v32  ;;  %v867_v56 = vmul.f32 %v755_v0, %v323_v33  ;;  %v870_v57 = vmul.f32 %v755_v0, %v324_v34 }
  0x1a   : > { %v328_v46 = vld [vmem:[%s753_s25 + $0xd8] sm:$0xff]  ;;  %v329_v47 = vld [vmem:[%s753_s25 + $0xe0] sm:$0xff]  ;;  %v330_v48 = vld [vmem:[%s753_s25 + $0xe8] sm:$0xff]  ;;  %v873_v58 = vmul.f32 %v755_v0, %v325_v39  ;;  %v876_v59 = vmul.f32 %v755_v0, %v326_v40  ;;  %v883_v63 = vmul.f32 %v755_v0, %v327_v41 }
  0x1b   : > { %v331_v53 = vld [vmem:[%s753_s25 + $0xf0] sm:$0xff]  ;;  %v332_v54 = vld [vmem:[%s753_s25 + $0xf8] sm:$0xff]  ;;  %v372_v55 = vld [vmem:[%s812_s28] sm:$0xff]  ;;  %v886_v1 = vmul.f32 %v755_v0, %v328_v46  ;;  %v889_v2 = vmul.f32 %v755_v0, %v329_v47  ;;  %v892_v3 = vmul.f32 %v755_v0, %v330_v48 }
  0x1c   : > { %v878_v60 = vld [vmem:[%s290_s5] ss:$0 sm:$0xff]  ;;  %v373_v61 = vld [vmem:[%s812_s28 + $0x8] sm:$0xff]  ;;  %v374_v62 = vld [vmem:[%s812_s28 + $0x10] sm:$0xff]  ;;  %v901_v10 = vmul.f32 %v755_v0, %v331_v53  ;;  %v916_v19 = vmul.f32 %v755_v0, %v332_v54 }
  0x1d   : > { %v411_v4 = vmul.f32 %v878_v60, %v372_v55  ;;  %v412_v5 = vmul.f32 %v878_v60, %v373_v61  ;;  %v413_v6 = vmul.f32 %v878_v60, %v374_v62  ;;  %v375_v7 = vld [vmem:[%s812_s28 + $0x18] sm:$0xff]  ;;  %v376_v8 = vld [vmem:[%s812_s28 + $0x20] sm:$0xff]  ;;  %v377_v9 = vld [vmem:[%s812_s28 + $0x28] sm:$0xff] }
  0x1e   : > { %v414_v11 = vmul.f32 %v878_v60, %v375_v7  ;;  %v415_v12 = vmul.f32 %v878_v60, %v376_v8  ;;  %v416_v13 = vmul.f32 %v878_v60, %v377_v9  ;;  %v378_v14 = vld [vmem:[%s812_s28 + $0x30] sm:$0xff]  ;;  %v379_v15 = vld [vmem:[%s812_s28 + $0x38] sm:$0xff]  ;;  %v380_v18 = vld [vmem:[%s812_s28 + $0x40] sm:$0xff] }
  0x1f   : > { %v443_v20 = vadd.f32 %v411_v4, %v773_v16  ;;  %v444_v25 = vadd.f32 %v412_v5, %v776_v17  ;;  %v445_v26 = vadd.f32 %v413_v6, %v782_v21  ;;  %v417_v27 = vmul.f32 %v878_v60, %v378_v14  ;;  %v381_v32 = vld [vmem:[%s812_s28 + $0x48] sm:$0xff]  ;;  %v382_v33 = vld [vmem:[%s812_s28 + $0x50] sm:$0xff]  ;;  %v383_v34 = vld [vmem:[%s812_s28 + $0x58] sm:$0xff] }
  0x20   : > { %v446_v39 = vadd.f32 %v414_v11, %v785_v22  ;;  %v447_v0 = vadd.f32 %v415_v12, %v788_v23  ;;  %v448_v16 = vadd.f32 %v416_v13, %v791_v24  ;;  %v418_v40 = vmul.f32 %v878_v60, %v379_v15  ;;  %v384_v17 = vld [vmem:[%s812_s28 + $0x60] sm:$0xff]  ;;  %v385_v41 = vld [vmem:[%s812_s28 + $0x68] sm:$0xff]  ;;  %v386_v21 = vld [vmem:[%s812_s28 + $0x70] sm:$0xff] }
  0x21   : > { %476 = vst.msk [vmem:[%s907_s8] sm:$0xff] %vm475_vm0, %v443_v20  ;;  %477 = vst.msk [vmem:[%s907_s8 + $0x8] sm:$0xff] %vm475_vm0, %v444_v25  ;;  %v449_v22 = vadd.f32 %v417_v27, %v797_v28  ;;  %v419_v23 = vmul.f32 %v878_v60, %v380_v18  ;;  %v420_v24 = vmul.f32 %v878_v60, %v381_v32  ;;  %v387_v47 = vld [vmem:[%s812_s28 + $0x78] sm:$0xff]  ;;  %v388_v55 = vld [vmem:[%s812_s28 + $0x80] sm:$0xff] }
  0x22   : > { %478 = vst.msk [vmem:[%s907_s8 + $0x10] sm:$0xff] %vm475_vm0, %v445_v26  ;;  %v421_v46 = vmul.f32 %v878_v60, %v382_v33  ;;  %479 = vst.msk [vmem:[%s907_s8 + $0x18] sm:$0xff] %vm475_vm0, %v446_v39  ;;  %v450_v48 = vadd.f32 %v418_v40, %v800_v29  ;;  %v422_v28 = vmul.f32 %v878_v60, %v383_v34  ;;  %v389_v61 = vld [vmem:[%s812_s28 + $0x88] sm:$0xff]  ;;  %v390_v62 = vld [vmem:[%s812_s28 + $0x90] sm:$0xff] }
  0x23   : > { %480 = vst.msk [vmem:[%s907_s8 + $0x20] sm:$0xff] %vm475_vm0, %v447_v0  ;;  %481 = vst.msk [vmem:[%s907_s8 + $0x28] sm:$0xff] %vm475_vm0, %v448_v16  ;;  %v423_v53 = vmul.f32 %v878_v60, %v384_v17  ;;  %v424_v54 = vmul.f32 %v878_v60, %v385_v41  ;;  %v451_v4 = vadd.f32 %v419_v23, %v803_v30  ;;  %v391_v7 = vld [vmem:[%s812_s28 + $0x98] sm:$0xff]  ;;  %v392_v8 = vld [vmem:[%s812_s28 + $0xa0] sm:$0xff] }
  0x24   : > { %482 = vst.msk [vmem:[%s907_s8 + $0x30] sm:$0xff] %vm475_vm0, %v449_v22  ;;  %v452_v5 = vadd.f32 %v420_v24, %v806_v31  ;;  %v453_v29 = vadd.f32 %v421_v46, %v818_v35  ;;  %v425_v6 = vmul.f32 %v878_v60, %v386_v21  ;;  %v393_v9 = vld [vmem:[%s812_s28 + $0xa8] sm:$0xff]  ;;  %483 = vst.msk [vmem:[%s907_s8 + $0x38] sm:$0xff] %vm475_vm0, %v450_v48  ;;  %v394_v35 = vld [vmem:[%s812_s28 + $0xb0] sm:$0xff] }
  0x25   : > { %v454_v11 = vadd.f32 %v422_v28, %v821_v36  ;;  %v455_v12 = vadd.f32 %v423_v53, %v824_v37  ;;  %v456_v30 = vadd.f32 %v424_v54, %v827_v38  ;;  %v426_v31 = vmul.f32 %v878_v60, %v387_v47  ;;  %484 = vst.msk [vmem:[%s907_s8 + $0x40] sm:$0xff] %vm475_vm0, %v451_v4  ;;  %v395_v14 = vld [vmem:[%s812_s28 + $0xb8] sm:$0xff]  ;;  %v396_v25 = vld [vmem:[%s812_s28 + $0xc0] sm:$0xff]  ;;  %v397_v26 = vld [vmem:[%s812_s28 + $0xc8] sm:$0xff] }
  0x26   : > { %485 = vst.msk [vmem:[%s907_s8 + $0x48] sm:$0xff] %vm475_vm0, %v452_v5  ;;  %486 = vst.msk [vmem:[%s907_s8 + $0x50] sm:$0xff] %vm475_vm0, %v453_v29  ;;  %v457_v13 = vadd.f32 %v425_v6, %v837_v42  ;;  %v427_v36 = vmul.f32 %v878_v60, %v388_v55  ;;  %v428_v37 = vmul.f32 %v878_v60, %v389_v61  ;;  %v398_v27 = vld [vmem:[%s812_s28 + $0xd0] sm:$0xff]  ;;  %v399_v39 = vld [vmem:[%s812_s28 + $0xd8] sm:$0xff] }
  0x27   : > { %v429_v38 = vmul.f32 %v878_v60, %v390_v62  ;;  %487 = vst.msk [vmem:[%s907_s8 + $0x58] sm:$0xff] %vm475_vm0, %v454_v11  ;;  %488 = vst.msk [vmem:[%s907_s8 + $0x60] sm:$0xff] %vm475_vm0, %v455_v12  ;;  %v458_v15 = vadd.f32 %v426_v31, %v840_v43  ;;  %v430_v42 = vmul.f32 %v878_v60, %v391_v7  ;;  %v400_v0 = vld [vmem:[%s812_s28 + $0xe0] sm:$0xff]  ;;  %v401_v16 = vld [vmem:[%s812_s28 + $0xe8] sm:$0xff] }
  0x28   : > { %489 = vst.msk [vmem:[%s907_s8 + $0x68] sm:$0xff] %vm475_vm0, %v456_v30  ;;  %v431_v18 = vmul.f32 %v878_v60, %v392_v8  ;;  %v432_v20 = vmul.f32 %v878_v60, %v393_v9  ;;  %490 = vst.msk [vmem:[%s907_s8 + $0x70] sm:$0xff] %vm475_vm0, %v457_v13  ;;  %v459_v32 = vadd.f32 %v427_v36, %v843_v44 }
  0x29   : > { %v460_v33 = vadd.f32 %v428_v37, %v846_v45  ;;  %v461_v43 = vadd.f32 %v429_v38, %v852_v49  ;;  %v433_v34 = vmul.f32 %v878_v60, %v394_v35  ;;  %491 = vst.msk [vmem:[%s907_s8 + $0x78] sm:$0xff] %vm475_vm0, %v458_v15  ;;  %v462_v40 = vadd.f32 %v430_v42, %v855_v50  ;;  %v402_v49 = vld [vmem:[%s812_s28 + $0xf0] sm:$0xff] }
  0x2a   : > { %v463_v17 = vadd.f32 %v431_v18, %v858_v51  ;;  %v464_v44 = vadd.f32 %v432_v20, %v861_v52  ;;  %v434_v45 = vmul.f32 %v878_v60, %v395_v14  ;;  %492 = vst.msk [vmem:[%s907_s8 + $0x80] sm:$0xff] %vm475_vm0, %v459_v32  ;;  %v435_v21 = vmul.f32 %v878_v60, %v396_v25  ;;  %v403_v52 = vld [vmem:[%s812_s28 + $0xf8] sm:$0xff] }
  0x2b   : > { %493 = vst.msk [vmem:[%s907_s8 + $0x88] sm:$0xff] %vm475_vm0, %v460_v33  ;;  %494 = vst.msk [vmem:[%s907_s8 + $0x90] sm:$0xff] %vm475_vm0, %v461_v43  ;;  %v465_v41 = vadd.f32 %v433_v34, %v867_v56  ;;  %v436_v50 = vmul.f32 %v878_v60, %v397_v26  ;;  %v437_v51 = vmul.f32 %v878_v60, %v398_v27 }
  0x2c   : > { %495 = vst.msk [vmem:[%s907_s8 + $0x98] sm:$0xff] %vm475_vm0, %v462_v40  ;;  %496 = vst.msk [vmem:[%s907_s8 + $0xa0] sm:$0xff] %vm475_vm0, %v463_v17  ;;  %v466_v22 = vadd.f32 %v434_v45, %v870_v57  ;;  %v438_v56 = vmul.f32 %v878_v60, %v399_v39  ;;  %v439_v23 = vmul.f32 %v878_v60, %v400_v0 }
  0x2d   : > { %497 = vst.msk [vmem:[%s907_s8 + $0xa8] sm:$0xff] %vm475_vm0, %v464_v44  ;;  %v440_v24 = vmul.f32 %v878_v60, %v401_v16  ;;  %498 = vst.msk [vmem:[%s907_s8 + $0xb0] sm:$0xff] %vm475_vm0, %v465_v41  ;;  %v467_v46 = vadd.f32 %v435_v21, %v873_v58  ;;  %v468_v47 = vadd.f32 %v436_v50, %v876_v59 }
  0x2e   : > { %v469_v48 = vadd.f32 %v437_v51, %v883_v63  ;;  %v441_v57 = vmul.f32 %v878_v60, %v402_v49  ;;  %499 = vst.msk [vmem:[%s907_s8 + $0xb8] sm:$0xff] %vm475_vm0, %v466_v22  ;;  %v470_v28 = vadd.f32 %v438_v56, %v886_v1  ;;  %v471_v53 = vadd.f32 %v439_v23, %v889_v2 }
  0x2f   : > { %v472_v54 = vadd.f32 %v440_v24, %v892_v3  ;;  %v442_v55 = vmul.f32 %v878_v60, %v403_v52  ;;  %500 = vst.msk [vmem:[%s907_s8 + $0xc0] sm:$0xff] %vm475_vm0, %v467_v46  ;;  %501 = vst.msk [vmem:[%s907_s8 + $0xc8] sm:$0xff] %vm475_vm0, %v468_v47 }
  0x30   : > { %502 = vst.msk [vmem:[%s907_s8 + $0xd0] sm:$0xff] %vm475_vm0, %v469_v48  ;;  %v473_v58 = vadd.f32 %v441_v57, %v901_v10  ;;  %503 = vst.msk [vmem:[%s907_s8 + $0xd8] sm:$0xff] %vm475_vm0, %v470_v28 }
  0x31   : > { %504 = vst.msk [vmem:[%s907_s8 + $0xe0] sm:$0xff] %vm475_vm0, %v471_v53  ;;  %505 = vst.msk [vmem:[%s907_s8 + $0xe8] sm:$0xff] %vm475_vm0, %v472_v54  ;;  %v474_v59 = vadd.f32 %v442_v55, %v916_v19 }
  0x32   : > { %506 = vst.msk [vmem:[%s907_s8 + $0xf0] sm:$0xff] %vm475_vm0, %v473_v58 }
  0x33   : > { %507 = vst.msk [vmem:[%s907_s8 + $0xf8] sm:$0xff] %vm475_vm0, %v474_v59 }
  0x34 PF: > { %s14_s17 = sadd.s32 1, %s695_s17   ;;  %s1077_s15 = smov %s691_s16 }
  0x35   : > { %p11_p5 = scmp.ge.s32.totalorder %s14_s17, 4   ;;  %s1078_s16 = smov %s1080_s18 }
  0x37   :  { %13 = sbr.rel (!%p11_p5) target bundleno = 2 (0x2), region = 75 }

// kernel: inverted_residual.2
= control target key start
LH: loop header
LB: loop body
LE: loop exit
PB: predicated region body
PF: predicated region fallthrough
CT: control target
= control target key end

     0   :  { %s14797_s0 = inlined_call_operand.vmem [shape: f32[2,256,8], index: 0, kind: input, shape index: {}]   ;;  %s14798_s1 = inlined_call_operand.vmem [shape: f32[8,16], index: 1, kind: input, shape index: {}]   ;;  %s14799_s2 = inlined_call_operand.vmem [shape: f32[1,16], index: 2, kind: input, shape index: {}]   ;;  %s14800_s3 = inlined_call_operand.vmem [shape: f32[1,16], index: 3, kind: input, shape index: {}]   ;;  %s14801_s4 = inlined_call_operand.vmem [shape: f32[1,16], index: 4, kind: input, shape index: {}]   ;;  %s14802_s5 = inlined_call_operand.vmem [shape: f32[1,16], index: 5, kind: input, shape index: {}]   ;;  %s14803_s6 = inlined_call_operand.vmem [shape: f32[1,16], index: 6, kind: input, shape index: {}]   ;;  %s14804_s7 = inlined_call_operand.vmem [shape: f32[1,16], index: 7, kind: input, shape index: {}]   ;;  %s14805_s8 = inlined_call_operand.vmem [shape: f32[3,3,16], index: 8, kind: input, shape index: {}]   ;;  %s14806_s9 = inlined_call_operand.vmem [shape: f32[1,16], index: 9, kind: input, shape index: {}]   ;;  %s14807_s10 = inlined_call_operand.vmem [shape: f32[1,16], index: 10, kind: input, shape index: {}]   ;;  %s14808_s11 = inlined_call_operand.vmem [shape: f32[1,16], index: 11, kind: input, shape index: {}]   ;;  %s14809_s12 = inlined_call_operand.vmem [shape: f32[1,16], index: 12, kind: input, shape index: {}]   ;;  %s14810_s13 = inlined_call_operand.vmem [shape: f32[1,16], index: 13, kind: input, shape index: {}]   ;;  %s14811_s14 = inlined_call_operand.vmem [shape: f32[1,16], index: 14, kind: input, shape index: {}]   ;;  %s14812_s15 = inlined_call_operand.vmem [shape: f32[16,8], index: 15, kind: input, shape index: {}]   ;;  %s14813_s16 = inlined_call_operand.vmem [shape: f32[1,8], index: 16, kind: input, shape index: {}]   ;;  %s14814_s17 = inlined_call_operand.vmem [shape: f32[1,8], index: 17, kind: input, shape index: {}]   ;;  %s14815_s18 = inlined_call_operand.vmem [shape: f32[2,256,8], index: 18, kind: output, shape index: {0}]   ;;  %s14816_s19 = inlined_call_operand.vmem [shape: f32[2,1,8], index: 19, kind: output, shape index: {1}]   ;;  %s14817_s20 = inlined_call_operand.vmem [shape: f32[2,1,8], index: 20, kind: output, shape index: {2}]  }
   0x1   :  { %15222 = sst [smem:[#allocation127_spill]] %s14797_s0 }
   0x2   :  { %15223 = sst [smem:[#allocation128_spill]] %s14798_s1  ;;  %s8166_s1 = smov 0  }
   0x3   :  { %15224 = sst [smem:[#allocation129_spill]] %s14799_s2 }
   0x4   :  { %15225 = sst [smem:[#allocation130_spill]] %s14800_s3 }
   0x5   :  { %15226 = sst [smem:[#allocation131_spill]] %s14801_s4 }
   0x6 LB: > { %s7261_s22 = sadd.s32 4294967295, %s8057_s1   ;;  %p7265_p0 = scmp.ge.s32.totalorder %s8057_s1, 1  ;;  %s8057_s1 = sphi %s8166_s1, %s31_s1  }
   0x7   : > { %p567_p1 = scmp.lt.s32.totalorder %s8057_s1, 3 }
   0x9   : > { %p568_p2 = pnand %p7265_p0, %p567_p1 }
   0xb   : > { %571 = sbr.rel (%p568_p2) target bundleno = 1915 (0x77b), region = 92 }
  0x12   : > { %s15227_s2 = sld [smem:[#allocation128_spill]]  ;;  %p631_p3 = scmp.lt.s32.totalorder %s7261_s22, 1  ;;  %vm14938_vm0 = vcmask 64512   ;;  %vm14937_vm1 = vcmask 57344   ;;  %vm1080_vm2 = vcmask 130048  }
  0x13   : > { %s15228_s27 = sld [smem:[#allocation127_spill]]  ;;  %s15229_s23 = sld [smem:[#allocation129_spill]] }
  0x14   : > { %s16140_s22 = smov (!%p631_p3, %s7261_s22), 1  ;;  %s15230_s3 = sld [smem:[#allocation130_spill]] }
  0x15   : > { %s7344_s25 = sshll.u32 %s16140_s22, 8  ;;  %s646_s30 = scalar_lea.vmem %s14817_s20, %s16140_s22 }
  0x16   : > { %s14628_s24 = scalar_lea.vmem %s14815_s18, %s7344_s25 }
  0x18   : > { %v679_v0 = vld [vmem:[%s15227_s2] sm:$0xff] }
  0x19   : > { %7413 = vmatprep.subr.mxu0 %v679_v0  ;;  %s8185_s28 = scalar_lea.vmem %s15228_s27, %s7344_s25 }
  0x1a   : > { %7414 = vmatpush3.msra.mxu0 %v679_v0  ;;  %v647_v1 = vld [vmem:[%s8185_s28] sm:$0xff]  ;;  %v648_v2 = vld [vmem:[%s8185_s28 + $0x8] sm:$0xff]  ;;  %v8190_v3 = vld [vmem:[%s8185_s28 + $0x10] sm:$0xff] }
  0x1b   : > { %7415 = vmatprep.mubr.msk.f32.mxu0 %vm14938_vm0, %v647_v1  ;;  %v7086_v4 = vsel %vm14938_vm0, %v647_v1, 0.0  ;;  %v7087_v5 = vsel %vm14938_vm0, %v648_v2, 0.0  ;;  %v7089_v6 = vsel %vm14938_vm0, %v8190_v3, 0.0  ;;  %v650_v8 = vld [vmem:[%s8185_s28 + $0x18] sm:$0xff]  ;;  %v1182_v10 = vmul.f32 %v647_v1, %v647_v1  ;;  %v8203_v12 = vld [vmem:[%s8185_s28 + $0x20] sm:$0xff]  ;;  %v652_v16 = vld [vmem:[%s8185_s28 + $0x28] sm:$0xff] }
  0x1c   : > { %7416 = vmatmul.mubr.msk.f32.vlgmr.msra.gmra.mrb[0].mxu0 %vm14938_vm0, %v648_v2  ;;  %v7088_v7 = vadd.f32 %v7087_v5, %v7086_v4  ;;  %v7091_v9 = vsel %vm14938_vm0, %v650_v8, 0.0  ;;  %v7093_v13 = vsel %vm14938_vm0, %v8203_v12, 0.0  ;;  %v1183_v14 = vmul.f32 %v648_v2, %v648_v2  ;;  %v8214_v20 = vld [vmem:[%s8185_s28 + $0x30] sm:$0xff]  ;;  %v654_v25 = vld [vmem:[%s8185_s28 + $0x38] sm:$0xff]  ;;  %v8225_v28 = vld [vmem:[%s8185_s28 + $0x40] sm:$0xff] }
  0x1d   : > { %7418 = vmatprep.mubr.msk.f32.mxu0 %vm14938_vm0, %v8190_v3  ;;  %v7095_v17 = vsel %vm14938_vm0, %v652_v16, 0.0  ;;  %v1214_v18 = vsel %vm14938_vm0, %v1182_v10, 0.0  ;;  %v7097_v21 = vsel %vm14938_vm0, %v8214_v20, 0.0  ;;  %v1185_v23 = vmul.f32 %v650_v8, %v650_v8  ;;  %v656_v33 = vld [vmem:[%s8185_s28 + $0x48] sm:$0xff]  ;;  %v8236_v36 = vld [vmem:[%s8185_s28 + $0x50] sm:$0xff]  ;;  %v658_v41 = vld [vmem:[%s8185_s28 + $0x58] sm:$0xff] }
  0x1e   : > { %v7090_v11 = vadd.f32 %v7089_v6, %v7088_v7  ;;  %1215 = vadd.xlane.f32.xlu1 %v1214_v18  ;;  %v1217_v22 = vsel %vm14938_vm0, %v1183_v14, 0.0  ;;  %v7099_v26 = vsel %vm14938_vm0, %v654_v25, 0.0  ;;  %v7101_v29 = vsel %vm14938_vm0, %v8225_v28, 0.0  ;;  %v8247_v44 = vld [vmem:[%s8185_s28 + $0x60] sm:$0xff]  ;;  %v660_v49 = vld [vmem:[%s8185_s28 + $0x68] sm:$0xff]  ;;  %v8258_v52 = vld [vmem:[%s8185_s28 + $0x70] sm:$0xff] }
  0x1f   : > { %v1223_v30 = vsel %vm14938_vm0, %v1185_v23, 0.0  ;;  %v1187_v31 = vmul.f32 %v652_v16, %v652_v16  ;;  %v7103_v34 = vsel %vm14938_vm0, %v656_v33, 0.0  ;;  %v7105_v37 = vsel %vm14938_vm0, %v8236_v36, 0.0  ;;  %v662_v57 = vld [vmem:[%s8185_s28 + $0x78] sm:$0xff]  ;;  %v8269_v60 = vld [vmem:[%s8185_s28 + $0x80] sm:$0xff]  ;;  %v664_v1 = vld [vmem:[%s8185_s28 + $0x88] sm:$0xff] }
  0x20   : > { %7419 = vmatmul.mubr.msk.f32.gmra.mrb[2].mxu0 %vm14938_vm0, %v650_v8  ;;  %v7092_v15 = vadd.f32 %v7091_v9, %v7090_v11  ;;  %v1189_v39 = vmul.f32 %v654_v25, %v654_v25  ;;  %v7107_v42 = vsel %vm14938_vm0, %v658_v41, 0.0  ;;  %v7109_v45 = vsel %vm14938_vm0, %v8247_v44, 0.0  ;;  %v8280_v5 = vld [vmem:[%s8185_s28 + $0x90] sm:$0xff]  ;;  %v666_v10 = vld [vmem:[%s8185_s28 + $0x98] sm:$0xff]  ;;  %v8291_v14 = vld [vmem:[%s8185_s28 + $0xa0] sm:$0xff] }
  0x21   : > { %7421 = vmatprep.mubr.msk.f32.mxu0 %vm14938_vm0, %v8203_v12  ;;  %v1229_v38 = vsel %vm14938_vm0, %v1187_v31, 0.0  ;;  %v1191_v47 = vmul.f32 %v656_v33, %v656_v33  ;;  %v7111_v50 = vsel %vm14938_vm0, %v660_v49, 0.0  ;;  %v7113_v53 = vsel %vm14938_vm0, %v8258_v52, 0.0  ;;  %v8302_v23 = vld [vmem:[%s8185_s28 + $0xb0] sm:$0xff] }
  0x22   : > { %v7094_v19 = vadd.f32 %v7093_v13, %v7092_v15  ;;  %1218 = vadd.xlane.f32.xlu1 %v1217_v22  ;;  %v1235_v46 = vsel %vm14938_vm0, %v1189_v39, 0.0  ;;  %v1193_v55 = vmul.f32 %v658_v41, %v658_v41  ;;  %v7115_v58 = vsel %vm14938_vm0, %v662_v57, 0.0 }
  0x23   : > { %v1241_v54 = vsel %vm14938_vm0, %v1191_v47, 0.0  ;;  %v7117_v61 = vsel %vm14938_vm0, %v8269_v60, 0.0  ;;  %v1195_v63 = vmul.f32 %v660_v49, %v660_v49  ;;  %v7119_v2 = vsel %vm14938_vm0, %v664_v1, 0.0  ;;  %v674_v47 = vld [vmem:[%s8185_s28 + $0xd8] sm:$0xff] }
  0x24   : > { %7422 = vmatmul.mubr.msk.f32.gmra.mrb[4].mxu0 %vm14938_vm0, %v652_v16  ;;  %v7096_v24 = vadd.f32 %v7095_v17, %v7094_v19  ;;  %v1247_v62 = vsel %vm14938_vm0, %v1193_v55, 0.0  ;;  %v7121_v6 = vsel %vm14938_vm0, %v8280_v5, 0.0  ;;  %v1197_v8 = vmul.f32 %v662_v57, %v662_v57  ;;  %v668_v19 = vld [vmem:[%s8185_s28 + $0xa8] sm:$0xff] }
  0x25   : > { %7424 = vmatprep.mubr.msk.f32.mxu0 %vm14938_vm0, %v8214_v20  ;;  %v1253_v7 = vsel %vm14938_vm0, %v1195_v63, 0.0  ;;  %v7123_v11 = vsel %vm14938_vm0, %v666_v10, 0.0  ;;  %v7125_v15 = vsel %vm14938_vm0, %v8291_v14, 0.0  ;;  %v1199_v17 = vmul.f32 %v664_v1, %v664_v1 }
  0x26   : > { %v7098_v27 = vadd.f32 %v7097_v21, %v7096_v24  ;;  %1224 = vadd.xlane.f32.xlu1 %v1223_v30  ;;  %v1259_v16 = vsel %vm14938_vm0, %v1197_v8, 0.0  ;;  %v7127_v21 = vsel %vm14938_vm0, %v668_v19, 0.0  ;;  %v7129_v24 = vsel %vm14938_vm0, %v8302_v23, 0.0 }
  0x27   : > { %v1209_v63 = vmul.f32 %v674_v47, %v674_v47 }
  0x28   : > { %7425 = vmatmul.mubr.msk.f32.gmra.mrb[6].mxu0 %vm14938_vm0, %v654_v25  ;;  %v7100_v32 = vadd.f32 %v7099_v26, %v7098_v27  ;;  %v1265_v25 = vsel %vm14938_vm0, %v1199_v17, 0.0  ;;  %v1201_v26 = vmul.f32 %v666_v10, %v666_v10 }
  0x29   : > { %7427 = vmatprep.mubr.msk.f32.mxu0 %vm14938_vm0, %v8225_v28 }
  0x2a   : > { %v7102_v35 = vadd.f32 %v7101_v29, %v7100_v32  ;;  %1230 = vadd.xlane.f32.xlu1 %v1229_v38  ;;  %v670_v29 = vld [vmem:[%s8185_s28 + $0xb8] sm:$0xff]  ;;  %v8313_v32 = vld [vmem:[%s8185_s28 + $0xc0] sm:$0xff]  ;;  %v672_v38 = vld [vmem:[%s8185_s28 + $0xc8] sm:$0xff] }
  0x2b   : > { %v7131_v30 = vsel %vm14938_vm0, %v670_v29, 0.0  ;;  %v7135_v39 = vsel %vm14938_vm0, %v672_v38, 0.0 }
  0x2c   : > { %7428 = vmatmul.mubr.msk.f32.gmra.mrb[8].mxu0 %vm14938_vm0, %v656_v33  ;;  %v7104_v40 = vadd.f32 %v7103_v34, %v7102_v35  ;;  %v7133_v33 = vsel %vm14938_vm0, %v8313_v32, 0.0  ;;  %v1271_v34 = vsel %vm14938_vm0, %v1201_v26, 0.0  ;;  %v1203_v35 = vmul.f32 %v668_v19, %v668_v19 }
  0x2d   : > { %7430 = vmatprep.mubr.msk.f32.mxu0 %vm14938_vm0, %v8236_v36 }
  0x2e   : > { %v7106_v43 = vadd.f32 %v7105_v37, %v7104_v40  ;;  %1236 = vadd.xlane.f32.xlu1 %v1235_v46 }
  0x30   : > { %7431 = vmatmul.mubr.msk.f32.gmra.mrb[10].mxu0 %vm14938_vm0, %v658_v41  ;;  %v7108_v48 = vadd.f32 %v7107_v42, %v7106_v43  ;;  %v8324_v41 = vld [vmem:[%s8185_s28 + $0xd0] sm:$0xff]  ;;  %v1277_v43 = vsel %vm14938_vm0, %v1203_v35, 0.0 }
  0x31   : > { %7433 = vmatprep.mubr.msk.f32.mxu0 %vm14938_vm0, %v8247_v44  ;;  %v7137_v42 = vsel %vm14938_vm0, %v8324_v41, 0.0 }
  0x32   : > { %v7110_v51 = vadd.f32 %v7109_v45, %v7108_v48  ;;  %1242 = vadd.xlane.f32.xlu1 %v1241_v54  ;;  %v1205_v45 = vmul.f32 %v670_v29, %v670_v29  ;;  %v7139_v48 = vsel %vm14938_vm0, %v674_v47, 0.0  ;;  %v1207_v54 = vmul.f32 %v672_v38, %v672_v38 }
  0x34   : > { %7434 = vmatmul.mubr.msk.f32.gmra.mrb[12].mxu0 %vm14938_vm0, %v660_v49  ;;  %v7112_v56 = vadd.f32 %v7111_v50, %v7110_v51  ;;  %v8335_v50 = vld [vmem:[%s8185_s28 + $0xe0] sm:$0xff] }
  0x35   : > { %7436 = vmatprep.mubr.msk.f32.mxu0 %vm14938_vm0, %v8258_v52  ;;  %v7141_v51 = vsel %vm14938_vm0, %v8335_v50, 0.0 }
  0x36   : > { %v7114_v59 = vadd.f32 %v7113_v53, %v7112_v56  ;;  %1248 = vadd.xlane.f32.xlu1 %v1247_v62  ;;  %v1283_v53 = vsel %vm14938_vm0, %v1205_v45, 0.0  ;;  %v676_v56 = vld [vmem:[%s8185_s28 + $0xe8] sm:$0xff]  ;;  %v1289_v62 = vsel %vm14938_vm0, %v1207_v54, 0.0 }
  0x38   : > { %7437 = vmatmul.mubr.msk.f32.gmra.mrb[14].mxu0 %vm14938_vm0, %v662_v57  ;;  %v7116_v0 = vadd.f32 %v7115_v58, %v7114_v59  ;;  %v7143_v57 = vsel %vm14938_vm0, %v676_v56, 0.0  ;;  %v8346_v59 = vld [vmem:[%s8185_s28 + $0xf0] sm:$0xff] }
  0x39   : > { %7439 = vmatprep.mubr.msk.f32.mxu0 %vm14938_vm0, %v8269_v60 }
  0x3a   : > { %v7118_v4 = vadd.f32 %v7117_v61, %v7116_v0  ;;  %1254 = vadd.xlane.f32.xlu1 %v1253_v7  ;;  %v7145_v61 = vsel %vm14938_vm0, %v8346_v59, 0.0  ;;  %v1211_v7 = vmul.f32 %v676_v56, %v676_v56 }
  0x3c   : > { %7440 = vmatmul.mubr.msk.f32.gmra.mrb[16].mxu0 %vm14938_vm0, %v664_v1  ;;  %v7120_v9 = vadd.f32 %v7119_v2, %v7118_v4  ;;  %v678_v1 = vld [vmem:[%s8185_s28 + $0xf8] sm:$0xff] }
  0x3d   : > { %7442 = vmatprep.mubr.msk.f32.mxu0 %vm14938_vm0, %v8280_v5  ;;  %v7147_v2 = vsel %vm14938_vm0, %v678_v1, 0.0 }
  0x3e   : > { %v7122_v13 = vadd.f32 %v7121_v6, %v7120_v9  ;;  %1260 = vadd.xlane.f32.xlu1 %v1259_v16  ;;  %v1295_v6 = vsel %vm14938_vm0, %v1209_v63, 0.0 }
  0x40   : > { %7443 = vmatmul.mubr.msk.f32.gmra.mrb[18].mxu0 %vm14938_vm0, %v666_v10  ;;  %v7124_v18 = vadd.f32 %v7123_v11, %v7122_v13  ;;  %v1301_v10 = vsel %vm14938_vm0, %v1211_v7, 0.0  ;;  %v1213_v11 = vmul.f32 %v678_v1, %v678_v1 }
  0x41   : > { %7445 = vmatprep.mubr.msk.f32.mxu0 %vm14938_vm0, %v8291_v14 }
  0x42   : > { %v7126_v22 = vadd.f32 %v7125_v15, %v7124_v18  ;;  %1266 = vadd.xlane.f32.xlu1 %v1265_v25  ;;  %v1307_v16 = vsel %vm14938_vm0, %v1213_v11, 0.0 }
  0x44   : > { %7446 = vmatmul.mubr.msk.f32.gmra.mrb[20].mxu0 %vm14938_vm0, %v668_v19  ;;  %v7128_v27 = vadd.f32 %v7127_v21, %v7126_v22  ;;  %v8368_v21 = vld [vmem:[%s15229_s23] ss:$0 sm:$0xff]  ;;  %s15309_s23 = sld [smem:[#allocation131_spill]] }
  0x45   : > { %7448 = vmatprep.mubr.msk.f32.mxu0 %vm14938_vm0, %v8302_v23 }
  0x46   : > { %v7130_v31 = vadd.f32 %v7129_v24, %v7128_v27  ;;  %1272 = vadd.xlane.f32.xlu1 %v1271_v34  ;;  %v8373_v24 = vld [vmem:[%s15230_s3] ss:$0 sm:$0xff]  ;;  %s643_s3 = scalar_lea.vmem %s14816_s19, %s16140_s22 }
  0x48   : > { %7449 = vmatmul.mubr.msk.f32.gmra.mrb[22].mxu0 %vm14938_vm0, %v670_v29  ;;  %v7132_v37 = vadd.f32 %v7131_v30, %v7130_v31 }
  0x49   : > { %7451 = vmatprep.mubr.msk.f32.mxu0 %vm14938_vm0, %v8313_v32 }
  0x4a   : > { %v7134_v40 = vadd.f32 %v7133_v33, %v7132_v37  ;;  %1278 = vadd.xlane.f32.xlu1 %v1277_v43 }
  0x4c   : > { %7452 = vmatmul.mubr.msk.f32.gmra.mrb[24].mxu0 %vm14938_vm0, %v672_v38  ;;  %v7136_v46 = vadd.f32 %v7135_v39, %v7134_v40 }
  0x4d   : > { %7454 = vmatprep.mubr.msk.f32.mxu0 %vm14938_vm0, %v8324_v41 }
  0x4e   : > { %v7138_v49 = vadd.f32 %v7137_v42, %v7136_v46  ;;  %1284 = vadd.xlane.f32.xlu1 %v1283_v53 }
  0x50   : > { %7455 = vmatmul.mubr.msk.f32.gmra.mrb[26].mxu0 %vm14938_vm0, %v674_v47  ;;  %v7140_v55 = vadd.f32 %v7139_v48, %v7138_v49 }
  0x51   : > { %7457 = vmatprep.mubr.msk.f32.mxu0 %vm14938_vm0, %v8335_v50 }
  0x52   : > { %v7142_v58 = vadd.f32 %v7141_v51, %v7140_v55  ;;  %1290 = vadd.xlane.f32.xlu1 %v1289_v62 }
  0x54   : > { %7458 = vmatmul.mubr.msk.f32.gmra.mrb[28].mxu0 %vm14938_vm0, %v676_v56  ;;  %v7144_v0 = vadd.f32 %v7143_v57, %v7142_v58 }
  0x55   : > { %7460 = vmatprep.mubr.msk.f32.mxu0 %vm14938_vm0, %v8346_v59 }
  0x56   : > { %v7146_v4 = vadd.f32 %v7145_v61, %v7144_v0  ;;  %1296 = vadd.xlane.f32.xlu1 %v1295_v6 }
  0x58   : > { %7461 = vmatmul.mubr.msk.f32.gmra.mrb[30].mxu0 %vm14938_vm0, %v678_v1  ;;  %v7148_v8 = vadd.f32 %v7147_v2, %v7146_v4 }
  0x5a   : > { %v7149_v9 = vrot.slane %v7148_v8, 4  ;;  %1302 = vadd.xlane.f32.xlu1 %v1301_v10 }
  0x5c   : > { %v7150_v13 = vadd.f32 %v7149_v9, %v7148_v8 }
  0x5e   : > { %v7151_v15 = vrot.slane %v7150_v13, 2  ;;  %1308 = vadd.xlane.f32.xlu1 %v1307_v16 }
  0x60   : > { %v7152_v17 = vadd.f32 %v7151_v15, %v7150_v13 }
  0x62   : > { %v7153_v18 = vrot.slane %v7152_v17, 1 }
  0x64   : > { %v7154_v19 = vadd.f32 %v7153_v18, %v7152_v17 }
  0x66   : > { %7155 = vst.msk [vmem:[%s646_s30] sm:$0x1] %vm14937_vm1, %v7154_v19 }
  0xef   : > { %v7417_v22 = vpop.f32.mrb[0].mxu0 }
  0xf0   : > { %v1010_v25 = vmul.f32 %v7417_v22, %v8368_v21  ;;  %v843_v26 = vpop.f32.mrb[1].mxu0 }
  0xf1   : > { %v1009_v27 = vmul.f32 %v8368_v21, %v843_v26 }
  0xf2   : > { %v8378_v29 = vadd.f32 %v8373_v24, %v1010_v25 }
  0xf3   : > { %v8381_v30 = vadd.f32 %v8373_v24, %v1009_v27  ;;  %v7420_v31 = vpop.f32.mrb[2].mxu0 }
  0xf4   : > { %15231 = vst [vmem:[#allocation3_spill] sm:$0xff] %v8378_v29  ;;  %v1012_v33 = vmul.f32 %v7420_v31, %v8368_v21  ;;  %v853_v34 = vpop.f32.mrb[3].mxu0  ;;  %v1082_v35 = vsel %vm1080_vm2, %v8378_v29, 0.0 }
  0xf5   : > { %15232 = vst [vmem:[#allocation4_spill] sm:$0xff] %v8381_v30  ;;  %v1081_v37 = vsel %vm1080_vm2, %v8381_v30, 0.0  ;;  %v1011_v38 = vmul.f32 %v8368_v21, %v853_v34 }
  0xf6   : > { %v8390_v39 = vadd.f32 %v8373_v24, %v1012_v33  ;;  %v1083_v43 = vadd.f32 %v1082_v35, %v1081_v37 }
  0xf7   : > { %v8393_v40 = vadd.f32 %v8373_v24, %v1011_v38  ;;  %v7423_v42 = vpop.f32.mrb[4].mxu0 }
  0xf8   : > { %15233 = vst [vmem:[#allocation5_spill] sm:$0xff] %v8390_v39  ;;  %v1014_v45 = vmul.f32 %v7423_v42, %v8368_v21  ;;  %v863_v46 = vpop.f32.mrb[5].mxu0  ;;  %v1086_v51 = vsel %vm1080_vm2, %v8390_v39, 0.0 }
  0xf9   : > { %15234 = vst [vmem:[#allocation6_spill] sm:$0xff] %v8393_v40  ;;  %v1084_v47 = vsel %vm1080_vm2, %v8393_v40, 0.0  ;;  %v1013_v48 = vmul.f32 %v8368_v21, %v863_v46 }
  0xfa   : > { %v1085_v49 = vadd.f32 %v1084_v47, %v1083_v43  ;;  %v8402_v53 = vadd.f32 %v8373_v24, %v1014_v45 }
  0xfb   : > { %v8405_v54 = vadd.f32 %v8373_v24, %v1013_v48  ;;  %v7426_v55 = vpop.f32.mrb[6].mxu0 }
  0xfc   : > { %15235 = vst [vmem:[#allocation7_spill] sm:$0xff] %v8402_v53  ;;  %v1087_v56 = vadd.f32 %v1086_v51, %v1085_v49  ;;  %v873_v57 = vpop.f32.mrb[7].mxu0  ;;  %v1016_v61 = vmul.f32 %v7426_v55, %v8368_v21  ;;  %v1090_v0 = vsel %vm1080_vm2, %v8402_v53, 0.0 }
  0xfd   : > { %15236 = vst [vmem:[#allocation8_spill] sm:$0xff] %v8405_v54  ;;  %v1088_v58 = vsel %vm1080_vm2, %v8405_v54, 0.0  ;;  %v1015_v63 = vmul.f32 %v8368_v21, %v873_v57 }
  0xfe   : > { %v1089_v62 = vadd.f32 %v1088_v58, %v1087_v56  ;;  %v8414_v2 = vadd.f32 %v8373_v24, %v1016_v61 }
  0xff   : > { %v7429_v1 = vpop.f32.mrb[8].mxu0  ;;  %v8417_v4 = vadd.f32 %v8373_v24, %v1015_v63 }
 0x100   : > { %15237 = vst [vmem:[#allocation9_spill] sm:$0xff] %v8414_v2  ;;  %v1091_v6 = vadd.f32 %v1090_v0, %v1089_v62  ;;  %v1018_v7 = vmul.f32 %v7429_v1, %v8368_v21  ;;  %v883_v8 = vpop.f32.mrb[9].mxu0  ;;  %v1094_v16 = vsel %vm1080_vm2, %v8414_v2, 0.0 }
 0x101   : > { %15238 = vst [vmem:[#allocation10_spill] sm:$0xff] %v8417_v4  ;;  %v1017_v9 = vmul.f32 %v8368_v21, %v883_v8  ;;  %v1092_v10 = vsel %vm1080_vm2, %v8417_v4, 0.0 }
 0x102   : > { %v1093_v11 = vadd.f32 %v1092_v10, %v1091_v6  ;;  %v8429_v17 = vadd.f32 %v8373_v24, %v1018_v7 }
 0x103   : > { %v8424_v13 = vadd.f32 %v8373_v24, %v1017_v9  ;;  %v7432_v15 = vpop.f32.mrb[10].mxu0 }
 0x104   : > { %15240 = vst [vmem:[#allocation12_spill] sm:$0xff] %v8429_v17  ;;  %v1020_v18 = vmul.f32 %v7432_v15, %v8368_v21  ;;  %v893_v19 = vpop.f32.mrb[11].mxu0  ;;  %v1095_v22 = vadd.f32 %v1094_v16, %v1093_v11  ;;  %v1098_v33 = vsel %vm1080_vm2, %v8429_v17, 0.0 }
 0x105   : > { %15239 = vst [vmem:[#allocation11_spill] sm:$0xff] %v8424_v13  ;;  %v1096_v25 = vsel %vm1080_vm2, %v8424_v13, 0.0  ;;  %v1019_v26 = vmul.f32 %v8368_v21, %v893_v19 }
 0x106   : > { %v1097_v27 = vadd.f32 %v1096_v25, %v1095_v22  ;;  %v8438_v34 = vadd.f32 %v8373_v24, %v1020_v18 }
 0x107   : > { %v7435_v31 = vpop.f32.mrb[12].mxu0  ;;  %v8441_v35 = vadd.f32 %v8373_v24, %v1019_v26 }
 0x108   : > { %15241 = vst [vmem:[#allocation13_spill] sm:$0xff] %v8438_v34  ;;  %v903_v37 = vpop.f32.mrb[13].mxu0  ;;  %v1099_v38 = vadd.f32 %v1098_v33, %v1097_v27  ;;  %v1022_v42 = vmul.f32 %v7435_v31, %v8368_v21  ;;  %v1102_v49 = vsel %vm1080_vm2, %v8438_v34, 0.0 }
 0x109   : > { %15242 = vst [vmem:[#allocation14_spill] sm:$0xff] %v8441_v35  ;;  %v1021_v43 = vmul.f32 %v8368_v21, %v903_v37  ;;  %v1100_v45 = vsel %vm1080_vm2, %v8441_v35, 0.0 }
 0x10a   : > { %v1101_v46 = vadd.f32 %v1100_v45, %v1099_v38  ;;  %v8453_v51 = vadd.f32 %v8373_v24, %v1022_v42 }
 0x10b   : > { %v8448_v47 = vadd.f32 %v8373_v24, %v1021_v43  ;;  %v7438_v48 = vpop.f32.mrb[14].mxu0 }
 0x10c   : > { %15244 = vst [vmem:[#allocation16_spill] sm:$0xff] %v8453_v51  ;;  %v1024_v55 = vmul.f32 %v7438_v48, %v8368_v21  ;;  %v913_v56 = vpop.f32.mrb[15].mxu0  ;;  %v1103_v57 = vadd.f32 %v1102_v49, %v1101_v46  ;;  %v1106_v0 = vsel %vm1080_vm2, %v8453_v51, 0.0 }
 0x10d   : > { %15243 = vst [vmem:[#allocation15_spill] sm:$0xff] %v8448_v47  ;;  %v1104_v58 = vsel %vm1080_vm2, %v8448_v47, 0.0  ;;  %v1023_v62 = vmul.f32 %v8368_v21, %v913_v56 }
 0x10e   : > { %v1105_v61 = vadd.f32 %v1104_v58, %v1103_v57  ;;  %v8462_v1 = vadd.f32 %v8373_v24, %v1024_v55 }
 0x10f   : > { %v7441_v63 = vpop.f32.mrb[16].mxu0  ;;  %v8465_v7 = vadd.f32 %v8373_v24, %v1023_v62 }
 0x110   : > { %15245 = vst [vmem:[#allocation17_spill] sm:$0xff] %v8462_v1  ;;  %v923_v6 = vpop.f32.mrb[17].mxu0  ;;  %v1107_v8 = vadd.f32 %v1106_v0, %v1105_v61  ;;  %v1026_v9 = vmul.f32 %v7441_v63, %v8368_v21  ;;  %v1110_v22 = vsel %vm1080_vm2, %v8462_v1, 0.0 }
 0x111   : > { %15246 = vst [vmem:[#allocation18_spill] sm:$0xff] %v8465_v7  ;;  %v1025_v10 = vmul.f32 %v8368_v21, %v923_v6  ;;  %v1108_v11 = vsel %vm1080_vm2, %v8465_v7, 0.0 }
 0x112   : > { %v1109_v18 = vadd.f32 %v1108_v11, %v1107_v8  ;;  %v8477_v25 = vadd.f32 %v8373_v24, %v1026_v9 }
 0x113   : > { %v8472_v15 = vadd.f32 %v8373_v24, %v1025_v10  ;;  %v7444_v16 = vpop.f32.mrb[18].mxu0 }
 0x114   : > { %v933_v19 = vpop.f32.mrb[19].mxu0  ;;  %15248 = vst [vmem:[#allocation20_spill] sm:$0xff] %v8477_v25  ;;  %v1028_v27 = vmul.f32 %v7444_v16, %v8368_v21  ;;  %v1111_v31 = vadd.f32 %v1110_v22, %v1109_v18  ;;  %v1114_v46 = vsel %vm1080_vm2, %v8477_v25, 0.0 }
 0x115   : > { %15247 = vst [vmem:[#allocation19_spill] sm:$0xff] %v8472_v15  ;;  %v1112_v26 = vsel %vm1080_vm2, %v8472_v15, 0.0  ;;  %v1027_v33 = vmul.f32 %v8368_v21, %v933_v19 }
 0x116   : > { %v1113_v38 = vadd.f32 %v1112_v26, %v1111_v31  ;;  %v8490_v48 = vadd.f32 %v8373_v24, %v1028_v27 }
 0x117   : > { %v7447_v37 = vpop.f32.mrb[20].mxu0  ;;  %v8484_v42 = vadd.f32 %v8373_v24, %v1027_v33 }
 0x118   : > { %v1030_v43 = vmul.f32 %v7447_v37, %v8368_v21  ;;  %v943_v45 = vpop.f32.mrb[21].mxu0  ;;  %15250 = vst [vmem:[#allocation22_spill] sm:$0xff] %v8490_v48  ;;  %v1115_v55 = vadd.f32 %v1114_v46, %v1113_v38  ;;  %v1118_v0 = vsel %vm1080_vm2, %v8490_v48, 0.0 }
 0x119   : > { %15249 = vst [vmem:[#allocation21_spill] sm:$0xff] %v8484_v42  ;;  %v1029_v49 = vmul.f32 %v8368_v21, %v943_v45  ;;  %v1116_v56 = vsel %vm1080_vm2, %v8484_v42, 0.0 }
 0x11a   : > { %v1117_v61 = vadd.f32 %v1116_v56, %v1115_v55  ;;  %v8499_v62 = vadd.f32 %v8373_v24, %v1030_v43 }
 0x11b   : > { %v8496_v57 = vadd.f32 %v8373_v24, %v1029_v49  ;;  %v7450_v58 = vpop.f32.mrb[22].mxu0 }
 0x11c   : > { %15252 = vst [vmem:[#allocation24_spill] sm:$0xff] %v8499_v62  ;;  %v953_v63 = vpop.f32.mrb[23].mxu0  ;;  %v1032_v8 = vmul.f32 %v7450_v58, %v8368_v21  ;;  %v1119_v9 = vadd.f32 %v1118_v0, %v1117_v61  ;;  %v1122_v16 = vsel %vm1080_vm2, %v8499_v62, 0.0 }
 0x11d   : > { %15251 = vst [vmem:[#allocation23_spill] sm:$0xff] %v8496_v57  ;;  %v1120_v6 = vsel %vm1080_vm2, %v8496_v57, 0.0  ;;  %v1031_v10 = vmul.f32 %v8368_v21, %v953_v63 }
 0x11e   : > { %v1121_v18 = vadd.f32 %v1120_v6, %v1119_v9  ;;  %v8510_v22 = vadd.f32 %v8373_v24, %v1032_v8 }
 0x11f   : > { %v7453_v11 = vpop.f32.mrb[24].mxu0  ;;  %v8513_v26 = vadd.f32 %v8373_v24, %v1031_v10 }
 0x120   : > { %v963_v19 = vpop.f32.mrb[25].mxu0  ;;  %15253 = vst [vmem:[#allocation25_spill] sm:$0xff] %v8510_v22  ;;  %v1034_v27 = vmul.f32 %v7453_v11, %v8368_v21  ;;  %v1123_v33 = vadd.f32 %v1122_v16, %v1121_v18  ;;  %v1126_v55 = vsel %vm1080_vm2, %v8510_v22, 0.0 }
 0x121   : > { %15254 = vst [vmem:[#allocation26_spill] sm:$0xff] %v8513_v26  ;;  %v1033_v31 = vmul.f32 %v8368_v21, %v963_v19  ;;  %v1124_v37 = vsel %vm1080_vm2, %v8513_v26, 0.0 }
 0x122   : > { %v1125_v43 = vadd.f32 %v1124_v37, %v1123_v33  ;;  %v8526_v56 = vadd.f32 %v8373_v24, %v1034_v27 }
 0x123   : > { %v7456_v38 = vpop.f32.mrb[26].mxu0  ;;  %v8520_v45 = vadd.f32 %v8373_v24, %v1033_v31 }
 0x124   : > { %v1036_v46 = vmul.f32 %v7456_v38, %v8368_v21  ;;  %v973_v49 = vpop.f32.mrb[27].mxu0  ;;  %15256 = vst [vmem:[#allocation28_spill] sm:$0xff] %v8526_v56  ;;  %v1127_v61 = vadd.f32 %v1126_v55, %v1125_v43  ;;  %v1130_v11 = vsel %vm1080_vm2, %v8526_v56, 0.0 }
 0x125   : > { %15255 = vst [vmem:[#allocation27_spill] sm:$0xff] %v8520_v45  ;;  %v1035_v58 = vmul.f32 %v8368_v21, %v973_v49  ;;  %v1128_v63 = vsel %vm1080_vm2, %v8520_v45, 0.0 }
 0x126   : > { %v1129_v8 = vadd.f32 %v1128_v63, %v1127_v61  ;;  %v8535_v9 = vadd.f32 %v8373_v24, %v1036_v46 }
 0x127   : > { %v8532_v0 = vadd.f32 %v8373_v24, %v1035_v58  ;;  %v7459_v6 = vpop.f32.mrb[28].mxu0 }
 0x128   : > { %v983_v10 = vpop.f32.mrb[29].mxu0  ;;  %v1038_v18 = vmul.f32 %v7459_v6, %v8368_v21  ;;  %v1131_v19 = vadd.f32 %v1130_v11, %v1129_v8  ;;  %v1134_v33 = vsel %vm1080_vm2, %v8535_v9, 0.0 }
 0x129   : > { %15257 = vst [vmem:[#allocation29_spill] sm:$0xff] %v8532_v0  ;;  %v1132_v16 = vsel %vm1080_vm2, %v8532_v0, 0.0  ;;  %v1037_v27 = vmul.f32 %v8368_v21, %v983_v10 }
 0x12a   : > { %v1133_v37 = vadd.f32 %v1132_v16, %v1131_v19  ;;  %v8546_v43 = vadd.f32 %v8373_v24, %v1038_v18 }
 0x12b   : > { %v7462_v31 = vpop.f32.mrb[30].mxu0  ;;  %v8549_v46 = vadd.f32 %v8373_v24, %v1037_v27 }
 0x12c   : > { %v993_v38 = vpop.f32.mrb[31].mxu0  ;;  %15258 = vst [vmem:[#allocation30_spill] sm:$0xff] %v8546_v43  ;;  %v1040_v49 = vmul.f32 %v7462_v31, %v8368_v21  ;;  %v1135_v58 = vadd.f32 %v1134_v33, %v1133_v37  ;;  %v1138_v8 = vsel %vm1080_vm2, %v8546_v43, 0.0 }
 0x12d   : > { %15259 = vst [vmem:[#allocation31_spill] sm:$0xff] %v8549_v46  ;;  %v1039_v55 = vmul.f32 %v8368_v21, %v993_v38  ;;  %v1136_v61 = vsel %vm1080_vm2, %v8549_v46, 0.0 }
 0x12e   : > { %v1137_v63 = vadd.f32 %v1136_v61, %v1135_v58  ;;  %v8561_v10 = vadd.f32 %v8373_v24, %v1040_v49 }
 0x12f   : > { %v8556_v6 = vadd.f32 %v8373_v24, %v1039_v55 }
 0x130   : > { %15261 = vst [vmem:[#allocation33_spill] sm:$0xff] %v8561_v10  ;;  %v1139_v16 = vadd.f32 %v1138_v8, %v1137_v63  ;;  %v1142_v21 = vsel %vm1080_vm2, %v8561_v10, 0.0  ;;  %v1184_v8 = vmul.f32 %v8190_v3, %v8190_v3  ;;  %v1190_v3 = vmul.f32 %v8225_v28, %v8225_v28 }
 0x131   : > { %15260 = vst [vmem:[#allocation32_spill] sm:$0xff] %v8556_v6  ;;  %v1140_v11 = vsel %vm1080_vm2, %v8556_v6, 0.0 }
 0x132   : > { %v1141_v18 = vadd.f32 %v1140_v11, %v1139_v16  ;;  %v1220_v16 = vsel %vm14938_vm0, %v1184_v8, 0.0 }
 0x134   : > { %v1143_v19 = vadd.f32 %v1142_v21, %v1141_v18  ;;  %v1186_v18 = vmul.f32 %v8203_v12, %v8203_v12 }
 0x136   : > { %v1144_v27 = vrot.slane %v1143_v19, 4  ;;  %v1226_v21 = vsel %vm14938_vm0, %v1186_v18, 0.0 }
 0x138   : > { %v1145_v31 = vadd.f32 %v1144_v27, %v1143_v19  ;;  %v1188_v19 = vmul.f32 %v8214_v20, %v8214_v20 }
 0x13a   : > { %v1146_v33 = vrot.slane %v1145_v31, 2  ;;  %v1232_v27 = vsel %vm14938_vm0, %v1188_v19, 0.0 }
 0x13c   : > { %v1147_v37 = vadd.f32 %v1146_v33, %v1145_v31  ;;  %v1238_v31 = vsel %vm14938_vm0, %v1190_v3, 0.0  ;;  %v1192_v33 = vmul.f32 %v8236_v36, %v8236_v36 }
 0x13e   : > { %v1148_v38 = vrot.slane %v1147_v37, 1  ;;  %v1244_v12 = vsel %vm14938_vm0, %v1192_v33, 0.0 }
 0x140   : > { %v1149_v55 = vadd.f32 %v1148_v38, %v1147_v37  ;;  %v1194_v37 = vmul.f32 %v8247_v44, %v8247_v44  ;;  %v1196_v38 = vmul.f32 %v8258_v52, %v8258_v52  ;;  %v1200_v44 = vmul.f32 %v8280_v5, %v8280_v5 }
 0x141   : > { %v1202_v52 = vmul.f32 %v8291_v14, %v8291_v14  ;;  %v1206_v5 = vmul.f32 %v8313_v32, %v8313_v32  ;;  %v1208_v14 = vmul.f32 %v8324_v41, %v8324_v41  ;;  %v1212_v32 = vmul.f32 %v8346_v59, %v8346_v59 }
 0x142   : > { %v1150_v58 = vmul.f32 0.00390625, %v1149_v55  ;;  %v1250_v20 = vsel %vm14938_vm0, %v1194_v37, 0.0  ;;  %v1256_v28 = vsel %vm14938_vm0, %v1196_v38, 0.0  ;;  %v1198_v55 = vmul.f32 %v8269_v60, %v8269_v60 }
 0x143   : > { %v1204_v60 = vmul.f32 %v8302_v23, %v8302_v23  ;;  %v1292_v18 = vsel %vm14938_vm0, %v1208_v14, 0.0  ;;  %v1210_v23 = vmul.f32 %v8335_v50, %v8335_v50  ;;  %v1304_v3 = vsel %vm14938_vm0, %v1212_v32, 0.0 }
 0x144   : > { %v1153_v61 = vsel %vm1080_vm2, %v1150_v58, 0.0  ;;  %v1262_v36 = vsel %vm14938_vm0, %v1198_v55, 0.0  ;;  %v1705_v14 = vlaneseq }
 0x145   : > { %1154 = vadd.xlane.f32.xlu0 %v1153_v61  ;;  %v1280_v8 = vsel %vm14938_vm0, %v1204_v60, 0.0  ;;  %v1298_v19 = vsel %vm14938_vm0, %v1210_v23, 0.0 }
 0x1d2   : > { %v1155_v24 = vpop.xlane.xlu0 %1154 }
 0x1d3   : > { %v1157_v49 = vmul.f32 0.0625, %v1155_v24  ;;  %v1268_v24 = vsel %vm14938_vm0, %v1200_v44, 0.0 }
 0x1d5   : > { %v8568_v46 = vsub.f32 %v1150_v58, %v1157_v49  ;;  %v8596_v58 = vpop.xlane.xlu1 %1215  ;;  %v1274_v49 = vsel %vm14938_vm0, %v1202_v52, 0.0 }
 0x1d6   : > { %7531 = vrsqrt.f32 %v8596_v58  ;;  %vm1312_vm3 = vcmp.eq.f32.partialorder %v8596_v58, inf  ;;  %vm1314_vm5 = vcmp.eq.f32.partialorder %v8596_v58, 0.0 }
 0x1d7   : > { %v1159_v63 = vmul.f32 %v8568_v46, %v8568_v46 }
 0x1d9   : > { %v1160_v11 = vsel %vm1080_vm2, %v1159_v63, 0.0  ;;  %v8601_v61 = vpop.xlane.xlu1 %1218 }
 0x1da   : > { %1161 = vadd.xlane.f32.xlu0 %v1160_v11  ;;  %7533 = vrsqrt.f32 %v8601_v61  ;;  %vm1319_vm4 = vcmp.eq.f32.partialorder %v8601_v61, inf  ;;  %v1322_v60 = vand.u32 2147483648, %v8601_v61  ;;  %vm1321_vm7 = vcmp.eq.f32.partialorder %v8601_v61, 0.0 }
 0x1dd   : > { %v8609_v63 = vpop.xlane.xlu1 %1224 }
 0x1de   : > { %1221 = vadd.xlane.f32.xlu0 %v1220_v16  ;;  %v1286_v16 = vsel %vm14938_vm0, %v1206_v5, 0.0  ;;  %7535 = vrsqrt.f32 %v8609_v63  ;;  %vm1333_vm6 = vcmp.eq.f32.partialorder %v8609_v63, inf  ;;  %vm1335_vm9 = vcmp.eq.f32.partialorder %v8609_v63, 0.0 }
 0x1e0   : > { %v7532_v37 = vpop.eup %7531 }
 0x1e1   : > { %v8614_v11 = vpop.xlane.xlu1 %1230  ;;  %v1311_v38 = vmul.f32 %v7532_v37, %v8596_v58 }
 0x1e2   : > { %1227 = vadd.xlane.f32.xlu0 %v1226_v21  ;;  %7537 = vrsqrt.f32 %v8614_v11  ;;  %vm1347_vm8 = vcmp.eq.f32.partialorder %v8614_v11, inf  ;;  %vm1349_vm10 = vcmp.eq.f32.partialorder %v8614_v11, 0.0  ;;  %v1350_v32 = vand.u32 2147483648, %v8614_v11 }
 0x1e3   : > { %v1313_v52 = vsel %vm1312_vm3, %v8596_v58, %v1311_v38 }
 0x1e5   : > { %v8622_v21 = vpop.xlane.xlu1 %1236 }
 0x1e6   : > { %1233 = vadd.xlane.f32.xlu0 %v1232_v27  ;;  %7539 = vrsqrt.f32 %v8622_v21  ;;  %vm1361_vm11 = vcmp.eq.f32.partialorder %v8622_v21, inf  ;;  %vm1363_vm12 = vcmp.eq.f32.partialorder %v8622_v21, 0.0 }
 0x1e9   : > { %v8627_v27 = vpop.xlane.xlu1 %1242 }
 0x1ea   : > { %1239 = vadd.xlane.f32.xlu0 %v1238_v31  ;;  %7541 = vrsqrt.f32 %v8627_v27  ;;  %vm1375_vm13 = vcmp.eq.f32.partialorder %v8627_v27, inf  ;;  %vm1377_vm15 = vcmp.eq.f32.partialorder %v8627_v27, 0.0 }
 0x1ed   : > { %v8630_v41 = vpop.xlane.xlu1 %1248 }
 0x1ee   : > { %1245 = vadd.xlane.f32.xlu0 %v1244_v12  ;;  %7543 = vrsqrt.f32 %v8630_v41  ;;  %vm1389_vm14 = vcmp.eq.f32.partialorder %v8630_v41, inf  ;;  %vm1391_vm3 = vcmp.eq.f32.partialorder %v8630_v41, 0.0 }
 0x1f1   : > { %v8632_v31 = vpop.xlane.xlu1 %1254 }
 0x1f2   : > { %1251 = vadd.xlane.f32.xlu0 %v1250_v20  ;;  %v7534_v20 = vpop.eup %7533  ;;  %7545 = vrsqrt.f32 %v8632_v31 }
 0x1f3   : > { %v7536_v55 = vpop.eup %7535 }
 0x1f4   : > { %v7538_v44 = vpop.eup %7537 }
 0x1f5   : > { %v8634_v33 = vpop.xlane.xlu1 %1260 }
 0x1f6   : > { %1257 = vadd.xlane.f32.xlu0 %v1256_v28  ;;  %7547 = vrsqrt.f32 %v8634_v33 }
 0x1f9   : > { %v8636_v50 = vpop.xlane.xlu1 %1266 }
 0x1fa   : > { %1263 = vadd.xlane.f32.xlu0 %v1262_v36  ;;  %v1318_v36 = vmul.f32 %v7534_v20, %v8601_v61  ;;  %7549 = vrsqrt.f32 %v8636_v50 }
 0x1fc   : > { %v1320_v5 = vsel %vm1319_vm4, %v8601_v61, %v1318_v36  ;;  %vm1403_vm4 = vcmp.eq.f32.partialorder %v8632_v31, inf }
 0x1fd   : > { %v8639_v12 = vpop.xlane.xlu1 %1272  ;;  %v1323_v61 = vsel %vm1321_vm7, %v1322_v60, %v1320_v5  ;;  %v8690_v5 = vshrl.u32 %v1705_v14, 7  ;;  %v1392_v14 = vand.u32 2147483648, %v8630_v41  ;;  %vm1419_vm7 = vcmp.eq.f32.partialorder %v8634_v33, 0.0 }
 0x1fe   : > { %1269 = vadd.xlane.f32.xlu0 %v1268_v24  ;;  %v1315_v24 = vand.u32 2147483648, %v8596_v58  ;;  %7551 = vrsqrt.f32 %v8639_v12  ;;  %v1535_v36 = vadd.f32 1e-08, %v1323_v61 }
 0x200   : > { %v1316_v23 = vsel %vm1314_vm5, %v1315_v24, %v1313_v52  ;;  %vm1405_vm5 = vcmp.eq.f32.partialorder %v8632_v31, 0.0 }
 0x201   : > { %v8644_v59 = vpop.xlane.xlu1 %1278  ;;  %v1534_v20 = vadd.f32 1e-08, %v1316_v23 }
 0x202   : > { %1275 = vadd.xlane.f32.xlu0 %v1274_v49  ;;  %v1332_v49 = vmul.f32 %v7536_v55, %v8609_v63  ;;  %7553 = vrsqrt.f32 %v8644_v59 }
 0x204   : > { %v1334_v58 = vsel %vm1333_vm6, %v8609_v63, %v1332_v49  ;;  %vm1417_vm6 = vcmp.eq.f32.partialorder %v8634_v33, inf }
 0x205   : > { %v8649_v28 = vpop.xlane.xlu1 %1284 }
 0x206   : > { %1281 = vadd.xlane.f32.xlu0 %v1280_v8  ;;  %v7540_v8 = vpop.eup %7539  ;;  %7555 = vrsqrt.f32 %v8649_v28 }
 0x207   : > { %v7542_v37 = vpop.eup %7541  ;;  %7557 = vrcp.f32 %v1534_v20 }
 0x208   : > { %v7544_v55 = vpop.eup %7543  ;;  %v1374_v60 = vmul.f32 %v7542_v37, %v8627_v27 }
 0x20a   : > { %1287 = vadd.xlane.f32.xlu0 %v1286_v16  ;;  %v1346_v16 = vmul.f32 %v7538_v44, %v8614_v11  ;;  %v1364_v44 = vand.u32 2147483648, %v8622_v21 }
 0x20c   : > { %v1348_v38 = vsel %vm1347_vm8, %v8614_v11, %v1346_v16  ;;  %v1388_v16 = vmul.f32 %v7544_v55, %v8630_v41  ;;  %v1378_v11 = vand.u32 2147483648, %v8627_v27  ;;  %vm1431_vm8 = vcmp.eq.f32.partialorder %v8636_v50, inf }
 0x20d   : > { %v1351_v52 = vsel %vm1349_vm10, %v1350_v32, %v1348_v38  ;;  %v8701_v32 = vsub.s32 0, %v8690_v5  ;;  %vm1445_vm10 = vcmp.eq.f32.partialorder %v8639_v12, inf }
 0x20e   : > { %1293 = vadd.xlane.f32.xlu0 %v1292_v18  ;;  %v8664_v18 = vpop.xlane.xlu1 %1290  ;;  %v1539_v23 = vadd.f32 1e-08, %v1351_v52  ;;  %v1390_v38 = vsel %vm1389_vm14, %v8630_v41, %v1388_v16  ;;  %vm1461_vm14 = vcmp.eq.f32.partialorder %v8644_v59, 0.0 }
 0x20f   : > { %7559 = vrsqrt.f32 %v8664_v18  ;;  %15262 = vst [vmem:[#allocation34_spill] sm:$0xff] %v8701_v32 }
 0x210   : > { %7561 = vrcp.f32 %v1535_v36 }
 0x212   : > { %1299 = vadd.xlane.f32.xlu0 %v1298_v19  ;;  %v1336_v19 = vand.u32 2147483648, %v8609_v63  ;;  %v8682_v24 = vpop.xlane.xlu1 %1296 }
 0x214   : > { %v1337_v63 = vsel %vm1335_vm9, %v1336_v19, %v1334_v58  ;;  %v1376_v58 = vsel %vm1375_vm13, %v8627_v27, %v1374_v60  ;;  %v1420_v60 = vand.u32 2147483648, %v8634_v33  ;;  %vm1433_vm9 = vcmp.eq.f32.partialorder %v8636_v50, 0.0 }
 0x215   : > { %vm1473_vm13 = vcmp.eq.f32.partialorder %v8649_v28, inf }
 0x216   : > { %1305 = vadd.xlane.f32.xlu0 %v1304_v3  ;;  %v1360_v3 = vmul.f32 %v7540_v8, %v8622_v21  ;;  %v1537_v8 = vadd.f32 1e-08, %v1337_v63  ;;  %v1379_v63 = vsel %vm1377_vm15, %v1378_v11, %v1376_v58  ;;  %vm1487_vm15 = vcmp.eq.f32.partialorder %v8664_v18, inf }
 0x218   : > { %v1362_v49 = vsel %vm1361_vm11, %v8622_v21, %v1360_v3  ;;  %v7546_v21 = vpop.eup %7545  ;;  %7563 = vrcp.f32 %v1537_v8  ;;  %v8703_v3 = vpop.xlane.xlu1 %1302  ;;  %vm1459_vm11 = vcmp.eq.f32.partialorder %v8644_v59, inf }
 0x219   : > { %v1365_v19 = vsel %vm1363_vm12, %v1364_v44, %v1362_v49  ;;  %v7548_v61 = vpop.eup %7547  ;;  %7565 = vrsqrt.f32 %v8682_v24  ;;  %v1402_v55 = vmul.f32 %v7546_v21, %v8632_v31  ;;  %v1406_v44 = vand.u32 2147483648, %v8632_v31 }
 0x21a   : > { %v7550_v37 = vpop.eup %7549  ;;  %v1541_v20 = vadd.f32 1e-08, %v1365_v19  ;;  %7567 = vrcp.f32 %v1539_v23  ;;  %v1416_v52 = vmul.f32 %v7548_v61, %v8634_v33  ;;  %v1393_v49 = vsel %vm1391_vm3, %v1392_v14, %v1390_v38 }
 0x21b   : > { %v7552_v27 = vpop.eup %7551  ;;  %7569 = vrsqrt.f32 %v8703_v3  ;;  %v1430_v8 = vmul.f32 %v7550_v37, %v8636_v50  ;;  %v1543_v23 = vadd.f32 1e-08, %v1379_v63  ;;  %v1404_v41 = vsel %vm1403_vm4, %v8632_v31, %v1402_v55 }
 0x21c   : > { %v7554_v36 = vpop.eup %7553  ;;  %7571 = vrcp.f32 %v1541_v20  ;;  %v1444_v19 = vmul.f32 %v7552_v27, %v8639_v12  ;;  %v1545_v61 = vadd.f32 1e-08, %v1393_v49  ;;  %v1418_v14 = vsel %vm1417_vm6, %v8634_v33, %v1416_v52  ;;  %v8738_v63 = vpop.xlane.xlu1 %1308 }
 0x21d   : > { %v7556_v16 = vpop.eup %7555  ;;  %v1458_v21 = vmul.f32 %v7554_v36, %v8644_v59  ;;  %v1434_v37 = vand.u32 2147483648, %v8636_v50  ;;  %v1432_v20 = vsel %vm1431_vm8, %v8636_v50, %v1430_v8  ;;  %vm1447_vm12 = vcmp.eq.f32.partialorder %v8639_v12, 0.0 }
 0x21e   : > { %v8721_v11 = vpop.eup %7557  ;;  %v1448_v38 = vand.u32 2147483648, %v8639_v12  ;;  %v1472_v27 = vmul.f32 %v7556_v16, %v8649_v28  ;;  %v1407_v36 = vsel %vm1405_vm5, %v1406_v44, %v1404_v41  ;;  %v1446_v52 = vsel %vm1445_vm10, %v8639_v12, %v1444_v19 }
 0x21f   : > { %v7560_v58 = vpop.eup %7559  ;;  %v1462_v49 = vand.u32 2147483648, %v8644_v59  ;;  %v1421_v6 = vsel %vm1419_vm7, %v1420_v60, %v1418_v14  ;;  %v1460_v16 = vsel %vm1459_vm11, %v8644_v59, %v1458_v21  ;;  %v1435_v31 = vsel %vm1433_vm9, %v1434_v37, %v1432_v20 }
 0x220   : > { %v8740_v55 = vpop.eup %7561  ;;  %v1486_v10 = vmul.f32 %v7560_v58, %v8664_v18  ;;  %v1476_v44 = vand.u32 2147483648, %v8649_v28  ;;  %7573 = vrsqrt.f32 %v8738_v63  ;;  %v1547_v33 = vadd.f32 1e-08, %v1407_v36 }
 0x221   : > { %v1449_v60 = vsel %vm1447_vm12, %v1448_v38, %v1446_v52  ;;  %v1474_v59 = vsel %vm1473_vm13, %v8649_v28, %v1472_v27  ;;  %vm1475_vm3 = vcmp.eq.f32.partialorder %v8649_v28, 0.0  ;;  %7575 = vrcp.f32 %v1543_v23 }
 0x222   : > { %v8747_v8 = vpop.eup %7563  ;;  %v1549_v50 = vadd.f32 1e-08, %v1421_v6  ;;  %v1463_v21 = vsel %vm1461_vm14, %v1462_v49, %v1460_v16  ;;  %v1490_v58 = vand.u32 2147483648, %v8664_v18  ;;  %v1551_v14 = vadd.f32 1e-08, %v1435_v31 }
 0x223   : > { %v7566_v43 = vpop.eup %7565  ;;  %v1488_v37 = vsel %vm1487_vm15, %v8664_v18, %v1486_v10  ;;  %vm1489_vm4 = vcmp.eq.f32.partialorder %v8664_v18, 0.0  ;;  %7577 = vrcp.f32 %v1545_v61  ;;  %v1553_v12 = vadd.f32 1e-08, %v1449_v60  ;;  %v8775_v6 = vld [vmem:[%s14803_s6] ss:$0 sm:$0xff] }
 0x224   : > { %v8759_v19 = vpop.eup %7567  ;;  %v1500_v20 = vmul.f32 %v7566_v43, %v8682_v24  ;;  %v1477_v38 = vsel %vm1475_vm3, %v1476_v44, %v1474_v59  ;;  %vm1501_vm5 = vcmp.eq.f32.partialorder %v8682_v24, inf  ;;  %v8780_v10 = vld [vmem:[%s14804_s7] sm:$0x1]  ;;  %7579 = vrcp.f32 %v1547_v33 }
 0x225   : > { %v7570_v41 = vpop.eup %7569  ;;  %v1555_v28 = vadd.f32 1e-08, %v1463_v21  ;;  %7581 = vrcp.f32 %v1549_v50  ;;  %v1491_v18 = vsel %vm1489_vm4, %v1490_v58, %v1488_v37  ;;  %v1504_v23 = vand.u32 2147483648, %v8682_v24 }
 0x226   : > { %v8769_v36 = vpop.eup %7571  ;;  %v1514_v43 = vmul.f32 %v7570_v41, %v8703_v3  ;;  %vm1515_vm6 = vcmp.eq.f32.partialorder %v8703_v3, inf  ;;  %7583 = vrcp.f32 %v1551_v14  ;;  %v1557_v61 = vadd.f32 1e-08, %v1477_v38 }
 0x227   : > { %v1502_v27 = vsel %vm1501_vm5, %v8682_v24, %v1500_v20  ;;  %vm1503_vm7 = vcmp.eq.f32.partialorder %v8682_v24, 0.0  ;;  %v1641_v52 = vmul.f32 %v8775_v6, %v8378_v29  ;;  %v8791_v49 = vrot.slane %v8780_v10, %v8701_v32 }
 0x228   : > { %7585 = vrcp.f32 %v1553_v12  ;;  %v1518_v16 = vand.u32 2147483648, %v8703_v3  ;;  %v1559_v31 = vadd.f32 1e-08, %v1491_v18  ;;  %v1516_v44 = vsel %vm1515_vm6, %v8703_v3, %v1514_v43 }
 0x229   : > { %7587 = vrcp.f32 %v1555_v28  ;;  %vm1517_vm8 = vcmp.eq.f32.partialorder %v8703_v3, 0.0  ;;  %v1640_v24 = vmul.f32 %v8775_v6, %v8381_v30  ;;  %v1505_v60 = vsel %vm1503_vm7, %v1504_v23, %v1502_v27 }
 0x22a   : > { %v7574_v33 = vpop.eup %7573  ;;  %vm1529_vm9 = vcmp.eq.f32.partialorder %v8738_v63, inf  ;;  %vm1531_vm10 = vcmp.eq.f32.partialorder %v8738_v63, 0.0  ;;  %v1643_v59 = vmul.f32 %v8775_v6, %v8390_v39  ;;  %7589 = vrcp.f32 %v1557_v61 }
 0x22b   : > { %v8803_v50 = vpop.eup %7575  ;;  %v8806_v21 = vmul.f32 %v8740_v55, %v1641_v52  ;;  %v8810_v3 = vmul.f32 %v8791_v49, %v8378_v29  ;;  %v8814_v58 = vmul.f32 %v8791_v49, %v8381_v30  ;;  %v1519_v14 = vsel %vm1517_vm8, %v1518_v16, %v1516_v44 }
 0x22c   : > { %v8059_v37 = vmov 0.0   ;;  %v1645_v55 = vmul.f32 %v8775_v6, %v8402_v53  ;;  %7591 = vrcp.f32 %v1559_v31  ;;  %v1561_v20 = vadd.f32 1e-08, %v1505_v60 }
 0x22d   : > { %15263 = vst [vmem:[#allocation35_spill] sm:$0xff] %v8806_v21  ;;  %15264 = vst [vmem:[#allocation36_spill] sm:$0xff] %v8810_v3  ;;  %v1528_v12 = vmul.f32 %v7574_v33, %v8738_v63  ;;  %v7578_v28 = vpop.eup %7577  ;;  %v8860_v43 = vmul.f32 %v8721_v11, %v1640_v24  ;;  %v8864_v18 = vmul.f32 %v8791_v49, %v8390_v39  ;;  %v1563_v31 = vadd.f32 1e-08, %v1519_v14 }
 0x22e   : > { %15265 = vst [vmem:[#allocation37_spill] sm:$0xff] %v8814_v58  ;;  %2037 = vst.msk [vmem:[#allocation2 + $0x8] sm:$0xff] %vm1080_vm2, %v8059_v37  ;;  %v8868_v23 = vmul.f32 %v8775_v6, %v8393_v40  ;;  %v7580_v27 = vpop.eup %7579  ;;  %v8871_v52 = vmul.f32 %v8747_v8, %v1643_v59  ;;  %v8875_v16 = vmul.f32 %v8791_v49, %v8393_v40  ;;  %7593 = vrcp.f32 %v1561_v20 }
 0x22f   : > { %2036 = vst.msk [vmem:[#allocation2] sm:$0xff] %vm1080_vm2, %v8059_v37  ;;  %2038 = vst.msk [vmem:[#allocation2 + $0x10] sm:$0xff] %vm1080_vm2, %v8059_v37  ;;  %v1647_v11 = vmul.f32 %v8775_v6, %v8414_v2  ;;  %v7582_v44 = vpop.eup %7581  ;;  %v8881_v33 = vmul.f32 %v8791_v49, %v8402_v53  ;;  %v8885_v24 = vmul.f32 %v8775_v6, %v8405_v54  ;;  %vm2353_vm6 = vcmask 1046528  }
 0x230   : > { %2039 = vst.msk [vmem:[#allocation2 + $0x18] sm:$0xff] %vm1080_vm2, %v8059_v37  ;;  %2041 = vst.msk [vmem:[#allocation2 + $0x220] sm:$0xff] %vm1080_vm2, %v8059_v37  ;;  %v8889_v8 = vmul.f32 %v8791_v49, %v8405_v54  ;;  %v8893_v59 = vpop.eup %7583  ;;  %v1649_v14 = vmul.f32 %v8775_v6, %v8429_v17  ;;  %v8937_v58 = vmul.f32 %v8775_v6, %v8424_v13  ;;  %vm2598_vm7 = vcmask 1045504  }
 0x231   : > { %2042 = vst.msk [vmem:[#allocation2 + $0x228] sm:$0xff] %vm1080_vm2, %v8059_v37  ;;  %2043 = vst.msk [vmem:[#allocation2 + $0x230] sm:$0xff] %vm1080_vm2, %v8059_v37  ;;  %v1653_v54 = vmul.f32 %v8775_v6, %v8453_v51  ;;  %v1657_v39 = vmul.f32 %v8775_v6, %v8477_v25  ;;  %v1659_v29 = vmul.f32 %v8775_v6, %v8490_v48 }
 0x232   : > { %2044 = vst.msk [vmem:[#allocation2 + $0x238] sm:$0xff] %vm1080_vm2, %v8059_v37  ;;  %2046 = vst.msk [vmem:[#allocation2 + $0x20] sm:$0xff] %vm1080_vm2, %v8059_v37 }
 0x233   : > { %2047 = vst.msk [vmem:[#allocation2 + $0x40] sm:$0xff] %vm1080_vm2, %v8059_v37  ;;  %2048 = vst.msk [vmem:[#allocation2 + $0x60] sm:$0xff] %vm1080_vm2, %v8059_v37 }
 0x234   : > { %2049 = vst.msk [vmem:[#allocation2 + $0x80] sm:$0xff] %vm1080_vm2, %v8059_v37  ;;  %2050 = vst.msk [vmem:[#allocation2 + $0xa0] sm:$0xff] %vm1080_vm2, %v8059_v37 }
 0x235   : > { %2051 = vst.msk [vmem:[#allocation2 + $0xc0] sm:$0xff] %vm1080_vm2, %v8059_v37  ;;  %2052 = vst.msk [vmem:[#allocation2 + $0xe0] sm:$0xff] %vm1080_vm2, %v8059_v37  ;;  %v8931_v3 = vld [vmem:[#allocation2 + $0x8] sm:$0xff] }
 0x236   : > { %2053 = vst.msk [vmem:[#allocation2 + $0x100] sm:$0xff] %vm1080_vm2, %v8059_v37  ;;  %2054 = vst.msk [vmem:[#allocation2 + $0x120] sm:$0xff] %vm1080_vm2, %v8059_v37 }
 0x237   : > { %2055 = vst.msk [vmem:[#allocation2 + $0x140] sm:$0xff] %vm1080_vm2, %v8059_v37  ;;  %2056 = vst.msk [vmem:[#allocation2 + $0x160] sm:$0xff] %vm1080_vm2, %v8059_v37 }
 0x238   : > { %2057 = vst.msk [vmem:[#allocation2 + $0x180] sm:$0xff] %vm1080_vm2, %v8059_v37  ;;  %2058 = vst.msk [vmem:[#allocation2 + $0x1a0] sm:$0xff] %vm1080_vm2, %v8059_v37 }
 0x239   : > { %2059 = vst.msk [vmem:[#allocation2 + $0x1c0] sm:$0xff] %vm1080_vm2, %v8059_v37  ;;  %2060 = vst.msk [vmem:[#allocation2 + $0x1e0] sm:$0xff] %vm1080_vm2, %v8059_v37 }
 0x23a   : > { %2061 = vst.msk [vmem:[#allocation2 + $0x200] sm:$0xff] %vm1080_vm2, %v8059_v37  ;;  %2062 = vst.msk [vmem:[#allocation2 + $0x38] sm:$0xff] %vm1080_vm2, %v8059_v37 }
 0x23b   : > { %2063 = vst.msk [vmem:[#allocation2 + $0x58] sm:$0xff] %vm1080_vm2, %v8059_v37  ;;  %2064 = vst.msk [vmem:[#allocation2 + $0x78] sm:$0xff] %vm1080_vm2, %v8059_v37 }
 0x23c   : > { %2065 = vst.msk [vmem:[#allocation2 + $0x98] sm:$0xff] %vm1080_vm2, %v8059_v37  ;;  %2066 = vst.msk [vmem:[#allocation2 + $0xb8] sm:$0xff] %vm1080_vm2, %v8059_v37 }
 0x23d   : > { %2067 = vst.msk [vmem:[#allocation2 + $0xd8] sm:$0xff] %vm1080_vm2, %v8059_v37  ;;  %2068 = vst.msk [vmem:[#allocation2 + $0xf8] sm:$0xff] %vm1080_vm2, %v8059_v37 }
 0x23e   : > { %2069 = vst.msk [vmem:[#allocation2 + $0x118] sm:$0xff] %vm1080_vm2, %v8059_v37  ;;  %2070 = vst.msk [vmem:[#allocation2 + $0x138] sm:$0xff] %vm1080_vm2, %v8059_v37 }
 0x23f   : > { %2071 = vst.msk [vmem:[#allocation2 + $0x158] sm:$0xff] %vm1080_vm2, %v8059_v37  ;;  %2072 = vst.msk [vmem:[#allocation2 + $0x178] sm:$0xff] %vm1080_vm2, %v8059_v37 }
 0x240   : > { %2073 = vst.msk [vmem:[#allocation2 + $0x198] sm:$0xff] %vm1080_vm2, %v8059_v37  ;;  %2074 = vst.msk [vmem:[#allocation2 + $0x1b8] sm:$0xff] %vm1080_vm2, %v8059_v37 }
 0x241   : > { %2075 = vst.msk [vmem:[#allocation2 + $0x1d8] sm:$0xff] %vm1080_vm2, %v8059_v37  ;;  %2076 = vst.msk [vmem:[#allocation2 + $0x1f8] sm:$0xff] %vm1080_vm2, %v8059_v37 }
 0x242   : > { %2077 = vst.msk [vmem:[#allocation2 + $0x218] sm:$0xff] %vm1080_vm2, %v8059_v37  ;;  %15266 = vst [vmem:[#allocation38_spill] sm:$0xff] %v8864_v18  ;;  %v8896_v37 = vmul.f32 %v8759_v19, %v1645_v55  ;;  %v8913_v19 = vmul.f32 %v8775_v6, %v8417_v4  ;;  %v1651_v55 = vmul.f32 %v8775_v6, %v8438_v34 }
 0x243   : > { %15267 = vst [vmem:[#allocation39_spill] sm:$0xff] %v8871_v52  ;;  %15268 = vst [vmem:[#allocation40_spill] sm:$0xff] %v8875_v16  ;;  %v8925_v18 = vmul.f32 %v8791_v49, %v8417_v4 }
 0x244   : > { %15269 = vst [vmem:[#allocation41_spill] sm:$0xff] %v8881_v33  ;;  %15270 = vst [vmem:[#allocation42_spill] sm:$0xff] %v8889_v8  ;;  %v8905_v33 = vpop.eup %7585  ;;  %v8933_v8 = vld [vmem:[#allocation2 + $0x10] sm:$0xff] }
 0x245   : > { %15271 = vst [vmem:[#allocation43_spill] sm:$0xff] %v8896_v37  ;;  %v8918_v20 = vpop.eup %7587  ;;  %15274 = vst [vmem:[#allocation46_spill] sm:$0xff] %v8925_v18  ;;  %v4063_v18 = vmul.f32 %v8933_v8, %v8933_v8 }
 0x246   : > { %v8947_v4 = vpop.eup %7589 }
 0x267   : > { %v1162_v38 = vpop.xlane.xlu0 %1161 }
 0x268   : > { %v1163_v61 = vmul.f32 0.0625, %v1162_v38  ;;  %v1530_v38 = vsel %vm1529_vm9, %v8738_v63, %v1528_v12  ;;  %v8921_v12 = vmul.f32 %v8769_v36, %v1647_v11  ;;  %v8941_v36 = vmul.f32 %v8791_v49, %v8424_v13 }
 0x269   : > { %v4062_v11 = vmul.f32 %v8931_v3, %v8931_v3 }
 0x26a   : > { %v8891_v60 = vadd.f32 1e-06, %v1163_v61  ;;  %v8909_v61 = vmul.f32 %v8791_v49, %v8414_v2  ;;  %15273 = vst [vmem:[#allocation45_spill] sm:$0xff] %v8921_v12  ;;  %15276 = vst [vmem:[#allocation48_spill] sm:$0xff] %v8941_v36  ;;  %v15279_v36 = vand.u32 2147483648, %v8738_v63  ;;  %v8964_v2 = vmul.f32 %v7578_v28, %v1651_v55 }
 0x26b   : > { %v8903_v41 = vpop.xlane.xlu0 %1221  ;;  %v8980_v63 = vmul.f32 %v8791_v49, %v8453_v51  ;;  %v8984_v28 = vmul.f32 %v8775_v6, %v8448_v47  ;;  %v4139_v55 = vsel %vm1080_vm2, %v4063_v18, 0.0  ;;  %v9004_v18 = vmul.f32 %v8791_v49, %v8462_v1 }
 0x26c   : > { %15272 = vst [vmem:[#allocation44_spill] sm:$0xff] %v8909_v61  ;;  %7595 = vrsqrt.f32 %v8891_v60  ;;  %v8929_v61 = vmul.f32 %v8791_v49, %v8429_v17  ;;  %v1533_v13 = vsel %vm1531_vm10, %v15279_v36, %v1530_v38  ;;  %15280 = vst [vmem:[#allocation51_spill] sm:$0xff] %v8964_v2  ;;  %v4136_v38 = vsel %vm1080_vm2, %v4062_v11, 0.0  ;;  %v8988_v36 = vld [vmem:[#allocation2] sm:$0xff]  ;;  %4140 = vadd.xlane.f32.xlu0 %v4139_v55 }
 0x26d   : > { %7597 = vrcp.f32 %v1563_v31  ;;  %v8950_v31 = vmul.f32 %v8803_v50, %v1649_v14  ;;  %v8968_v50 = vmul.f32 %v8775_v6, %v8441_v35  ;;  %v8972_v14 = vmul.f32 %v8791_v49, %v8441_v35  ;;  %15282 = vst [vmem:[#allocation53_spill] sm:$0xff] %v8980_v63  ;;  %4137 = vadd.xlane.f32.xlu1 %v4136_v38 }
 0x26e   : > { %15275 = vst [vmem:[#allocation47_spill] sm:$0xff] %v8929_v61  ;;  %v8954_v61 = vmul.f32 %v8791_v49, %v8438_v34  ;;  %v8976_v34 = vpop.eup %7591  ;;  %v8994_v35 = vmul.f32 %v8791_v49, %v8448_v47  ;;  %v1565_v53 = vadd.f32 1e-08, %v1533_v13  ;;  %v4061_v63 = vmul.f32 %v8988_v36, %v8988_v36  ;;  %15285 = vst [vmem:[#allocation56_spill] sm:$0xff] %v9004_v18  ;;  %v9034_v18 = vld [vmem:[#allocation2 + $0x20] sm:$0xff] }
 0x26f   : > { %15277 = vst [vmem:[#allocation49_spill] sm:$0xff] %v8950_v31  ;;  %v8962_v17 = vpop.xlane.xlu0 %1227  ;;  %15281 = vst [vmem:[#allocation52_spill] sm:$0xff] %v8972_v14  ;;  %v8990_v14 = vld [vmem:[#allocation2 + $0x18] sm:$0xff]  ;;  %v9000_v11 = vmul.f32 %v7580_v27, %v1653_v54  ;;  %7599 = vrsqrt.f32 %v8903_v41  ;;  %v9015_v55 = vmul.f32 %v8775_v6, %v8465_v7  ;;  %v9019_v54 = vmul.f32 %v8791_v49, %v8465_v7  ;;  %v9022_v27 = vpop.eup %7593 }
 0x270   : > { %15278 = vst [vmem:[#allocation50_spill] sm:$0xff] %v8954_v61  ;;  %v1655_v61 = vmul.f32 %v8775_v6, %v8462_v1  ;;  %15283 = vst [vmem:[#allocation54_spill] sm:$0xff] %v8994_v35  ;;  %v4064_v51 = vmul.f32 %v8990_v14, %v8990_v14  ;;  %7601 = vrsqrt.f32 %v8962_v17  ;;  %v9026_v35 = vmul.f32 %v8791_v49, %v8477_v25  ;;  %v9036_v7 = vld [vmem:[#allocation2 + $0x38] sm:$0xff] }
 0x271   : > { %15284 = vst [vmem:[#allocation55_spill] sm:$0xff] %v9000_v11  ;;  %15287 = vst [vmem:[#allocation58_spill] sm:$0xff] %v9019_v54  ;;  %v9040_v1 = vmul.f32 %v8791_v49, %v8472_v15  ;;  %7603 = vrcp.f32 %v1565_v53  ;;  %vm1167_vm11 = vcmp.eq.f32.partialorder %v8891_v60, inf  ;;  %vm1169_vm12 = vcmp.eq.f32.partialorder %v8891_v60, 0.0 }
 0x272   : > { %v9011_v38 = vmul.f32 %v7582_v44, %v1655_v61  ;;  %15288 = vst [vmem:[#allocation59_spill] sm:$0xff] %v9026_v35  ;;  %v9030_v44 = vmul.f32 %v8775_v6, %v8472_v15  ;;  %v4133_v61 = vsel %vm1080_vm2, %v4061_v63, 0.0  ;;  %v4142_v47 = vsel %vm1080_vm2, %v4064_v51, 0.0 }
 0x273   : > { %v9009_v13 = vpop.xlane.xlu0 %1233  ;;  %15289 = vst [vmem:[#allocation60_spill] sm:$0xff] %v9040_v1  ;;  %4134 = vadd.xlane.f32.xlu1 %v4133_v61  ;;  %4143 = vadd.xlane.f32.xlu0 %v4142_v47  ;;  %v4065_v35 = vmul.f32 %v9034_v18, %v9034_v18  ;;  %v4068_v63 = vmul.f32 %v9036_v7, %v9036_v7  ;;  %v1170_v15 = vand.u32 2147483648, %v8891_v60  ;;  %vm1326_vm13 = vcmp.eq.f32.partialorder %v8903_v41, inf }
 0x274   : > { %15286 = vst [vmem:[#allocation57_spill] sm:$0xff] %v9011_v38  ;;  %v9049_v51 = vmul.f32 %v8893_v59, %v1657_v39  ;;  %v9055_v1 = vmul.f32 %v8791_v49, %v8490_v48  ;;  %v1661_v61 = vmul.f32 %v8775_v6, %v8499_v62  ;;  %7605 = vrsqrt.f32 %v9009_v13 }
 0x275   : > { %v4145_v59 = vsel %vm1080_vm2, %v4065_v35, 0.0  ;;  %v1663_v48 = vmul.f32 %v8775_v6, %v8510_v22  ;;  %v9082_v35 = vmul.f32 %v8791_v49, %v8484_v42  ;;  %vm1328_vm14 = vcmp.eq.f32.partialorder %v8903_v41, 0.0 }
 0x276   : > { %v7596_v54 = vpop.eup %7595  ;;  %15290 = vst [vmem:[#allocation61_spill] sm:$0xff] %v9049_v51  ;;  %15291 = vst [vmem:[#allocation62_spill] sm:$0xff] %v9055_v1  ;;  %v4154_v1 = vsel %vm1080_vm2, %v4068_v63, 0.0  ;;  %vm1340_vm15 = vcmp.eq.f32.partialorder %v8962_v17, inf  ;;  %vm1342_vm3 = vcmp.eq.f32.partialorder %v8962_v17, 0.0  ;;  %vm1354_vm4 = vcmp.eq.f32.partialorder %v9009_v13, inf }
 0x277   : > { %v9046_v25 = vpop.eup %7597  ;;  %v1166_v53 = vmul.f32 %v7596_v54, %v8891_v60  ;;  %v9058_v47 = vpop.xlane.xlu0 %1239  ;;  %v9069_v54 = vld [vmem:[#allocation2 + $0x40] sm:$0xff]  ;;  %4146 = vadd.xlane.f32.xlu1 %v4145_v59  ;;  %4155 = vadd.xlane.f32.xlu0 %v4154_v1  ;;  %15292 = vst [vmem:[#allocation63_spill] sm:$0xff] %v9082_v35  ;;  %v9094_v1 = vmul.f32 %v8791_v49, %v8499_v62  ;;  %vm1356_vm5 = vcmp.eq.f32.partialorder %v9009_v13, 0.0 }
 0x278   : > { %7607 = vrsqrt.f32 %v9058_v47  ;;  %v4069_v16 = vmul.f32 %v9069_v54, %v9069_v54  ;;  %v1665_v59 = vmul.f32 %v8775_v6, %v8526_v56  ;;  %v9120_v62 = vmul.f32 %v8947_v4, %v1663_v48 }
 0x279   : > { %v1168_v39 = vsel %vm1167_vm11, %v8891_v60, %v1166_v53  ;;  %v9078_v60 = vmul.f32 %v8775_v6, %v8484_v42  ;;  %v9090_v53 = vmul.f32 %v8905_v33, %v1659_v29  ;;  %15294 = vst [vmem:[#allocation65_spill] sm:$0xff] %v9094_v1  ;;  %v7600_v35 = vpop.eup %7599  ;;  %v9106_v42 = vmul.f32 %v8918_v20, %v1661_v61 }
 0x27a   : > { %v1171_v30 = vsel %vm1169_vm12, %v1170_v15, %v1168_v39  ;;  %v9087_v15 = vsub.s32 1, %v8690_v5  ;;  %v9098_v39 = vmul.f32 %v8775_v6, %v8496_v57  ;;  %v9110_v29 = vmul.f32 %v8791_v49, %v8496_v57  ;;  %v7602_v1 = vpop.eup %7601  ;;  %15299 = vst [vmem:[#allocation70_spill] sm:$0xff] %v9120_v62 }
 0x27b   : > { %7609 = vrcp.f32 %v1171_v30  ;;  %v9084_v63 = vpop.xlane.xlu0 %1245  ;;  %15293 = vst [vmem:[#allocation64_spill] sm:$0xff] %v9090_v53  ;;  %v2182_v30 = vld [vmem:[%s14805_s8] sm:$0x7]  ;;  %15296 = vst [vmem:[#allocation67_spill] sm:$0xff] %v9106_v42  ;;  %v9114_v33 = vmul.f32 %v8791_v49, %v8510_v22  ;;  %v9124_v53 = vmul.f32 %v8775_v6, %v8513_v26  ;;  %v4157_v61 = vsel %vm1080_vm2, %v4069_v16, 0.0  ;;  %v9144_v57 = vpop.eup %7603 }
 0x27c   : > { %15295 = vst [vmem:[#allocation66_spill] sm:$0xff] %v9098_v39  ;;  %15297 = vst [vmem:[#allocation68_spill] sm:$0xff] %v9110_v29  ;;  %v9117_v39 = vsub.s32 2, %v8690_v5  ;;  %v9127_v20 = vrot.slane %v2182_v30, %v9087_v15  ;;  %v9132_v29 = vmul.f32 %v8791_v49, %v8513_v26  ;;  %v9136_v5 = vmul.f32 %v8791_v49, %v8526_v56 }
 0x27d   : > { %15298 = vst [vmem:[#allocation69_spill] sm:$0xff] %v9114_v33  ;;  %15300 = vst [vmem:[#allocation71_spill] sm:$0xff] %v9124_v53  ;;  %7611 = vrsqrt.f32 %v9084_v63  ;;  %4158 = vadd.xlane.f32.xlu1 %v4157_v61  ;;  %v9147_v16 = vmul.f32 %v8976_v34, %v1665_v59  ;;  %v9155_v26 = vmul.f32 %v8791_v49, %v8520_v45  ;;  %v1343_v56 = vand.u32 2147483648, %v8962_v17 }
 0x27e   : > { %15301 = vst [vmem:[#allocation72_spill] sm:$0xff] %v9127_v20  ;;  %15302 = vst [vmem:[#allocation73_spill] sm:$0xff] %v9132_v29  ;;  %v9142_v48 = vrot.slane %v2182_v30, %v9117_v39  ;;  %v9151_v29 = vmul.f32 %v8775_v6, %v8520_v45  ;;  %v9159_v53 = vmul.f32 %v8775_v6, %v8535_v9  ;;  %v7606_v59 = vpop.eup %7605  ;;  %vm1368_vm8 = vcmp.eq.f32.partialorder %v9058_v47, inf }
 0x27f   : > { %15303 = vst [vmem:[#allocation74_spill] sm:$0xff] %v9136_v5  ;;  %v9139_v4 = vpop.xlane.xlu0 %1251  ;;  %15305 = vst [vmem:[#allocation76_spill] sm:$0xff] %v9147_v16  ;;  %v1325_v5 = vmul.f32 %v7600_v35, %v8903_v41  ;;  %v1339_v34 = vmul.f32 %v7602_v1, %v8962_v17  ;;  %v9167_v61 = vrot.slane %v2182_v30, %v8701_v32  ;;  %v1329_v35 = vand.u32 2147483648, %v8903_v41  ;;  %v1151_v16 = vld [vmem:[%s15309_s23] sm:$0x1] }
 0x280   : > { %15304 = vst [vmem:[#allocation75_spill] sm:$0xff] %v9142_v48  ;;  %15306 = vst [vmem:[#allocation77_spill] sm:$0xff] %v9151_v29  ;;  %v2289_v45 = vmul.f32 %v9127_v20, %v8931_v3  ;;  %v2502_v1 = vmul.f32 %v9142_v48, %v8931_v3  ;;  %v9183_v30 = vmul.f32 %v9142_v48, %v8933_v8  ;;  %7613 = vrsqrt.f32 %v9139_v4 }
 0x281   : > { %15307 = vst [vmem:[#allocation78_spill] sm:$0xff] %v9155_v26  ;;  %15308 = vst [vmem:[#allocation79_spill] sm:$0xff] %v9167_v61  ;;  %v9171_v26 = vmul.f32 %v9127_v20, %v8933_v8  ;;  %v1357_v20 = vand.u32 2147483648, %v9009_v13  ;;  %v1327_v62 = vsel %vm1326_vm13, %v8903_v41, %v1325_v5  ;;  %v1341_v42 = vsel %vm1340_vm15, %v8962_v17, %v1339_v34  ;;  %v1152_v5 = vld [vmem:[%s14802_s5] sm:$0x1] }
 0x282   : > { %v7608_v33 = vpop.eup %7607  ;;  %v1353_v51 = vmul.f32 %v7606_v59, %v9009_v13  ;;  %v2189_v2 = vmul.f32 %v9167_v61, %v8988_v36  ;;  %v2354_v31 = vrot.slane %v2289_v45, 1  ;;  %v2190_v34 = vmul.f32 %v9167_v61, %v8931_v3 }
 0x283   : > { %v9177_v29 = vpop.xlane.xlu0 %1257  ;;  %v2355_v11 = vrot.slane %v9171_v26, 1  ;;  %v2600_v59 = vrot.slane %v9183_v30, 2  ;;  %v2599_v40 = vrot.slane %v2502_v1, 2  ;;  %v1367_v26 = vmul.f32 %v7608_v33, %v9058_v47 }
 0x284   : > { %7615 = vrsqrt.f32 %v9177_v29  ;;  %vm1370_vm9 = vcmp.eq.f32.partialorder %v9058_v47, 0.0  ;;  %v1371_v3 = vand.u32 2147483648, %v9058_v47  ;;  %v2450_v33 = vadd.f32 %v2354_v31, %v2189_v2 }
 0x285   : > { %v7610_v22 = vpop.eup %7609  ;;  %v1344_v1 = vsel %vm1342_vm3, %v1343_v56, %v1341_v42  ;;  %v2601_v37 = vsel %vm2598_vm7, %v2599_v40, %v2600_v59  ;;  %v1369_v21 = vsel %vm1368_vm8, %v9058_v47, %v1367_v26  ;;  %v9234_v2 = vmul.f32 %v8791_v49, %v8535_v9 }
 0x286   : > { %v1173_v38 = vmul.f32 %v7610_v22, %v8568_v46  ;;  %v1355_v46 = vsel %vm1354_vm4, %v9009_v13, %v1353_v51  ;;  %vm1382_vm10 = vcmp.eq.f32.partialorder %v9084_v63, inf  ;;  %v2191_v42 = vmul.f32 %v9167_v61, %v8933_v8  ;;  %v9251_v13 = vld [vmem:[%s14805_s8 + $0x4] sm:$0x7] }
 0x287   : > { %v9207_v12 = vpop.xlane.xlu0 %1263  ;;  %v7612_v45 = vpop.eup %7611  ;;  %15310 = vst [vmem:[#allocation80_spill] sm:$0xff] %v9234_v2  ;;  %v1358_v17 = vsel %vm1356_vm5, %v1357_v20, %v1355_v46  ;;  %v2727_v41 = vadd.f32 %v2599_v40, %v2450_v33  ;;  %v1385_v26 = vand.u32 2147483648, %v9084_v63  ;;  %vm1384_vm11 = vcmp.eq.f32.partialorder %v9084_v63, 0.0 }
 0x288   : > { %v1174_v22 = vmul.f32 %v1173_v38, %v1151_v16  ;;  %7617 = vrsqrt.f32 %v9207_v12  ;;  %v2356_v38 = vsel %vm2353_vm6, %v2354_v31, %v2355_v11  ;;  %v1330_v16 = vsel %vm1328_vm14, %v1329_v35, %v1327_v62 }
 0x289   : > { %v2451_v51 = vadd.f32 %v2356_v38, %v2190_v34  ;;  %v1536_v56 = vadd.f32 1e-08, %v1330_v16  ;;  %v1538_v34 = vadd.f32 1e-08, %v1344_v1  ;;  %v1540_v40 = vadd.f32 1e-08, %v1358_v17 }
 0x28a   : > { %v1175_v36 = vadd.f32 %v1174_v22, %v1152_v5  ;;  %v1381_v5 = vmul.f32 %v7612_v45, %v9084_v63  ;;  %v7614_v35 = vpop.eup %7613  ;;  %v1372_v22 = vsel %vm1370_vm9, %v1371_v3, %v1369_v21  ;;  %v9259_v21 = vmul.f32 %v8775_v6, %v8532_v0 }
 0x28b   : > { %v9226_v30 = vpop.xlane.xlu0 %1269  ;;  %v9241_v31 = vadd.f32 %v2601_v37, %v2451_v51  ;;  %v9263_v37 = vmul.f32 %v8791_v49, %v8532_v0  ;;  %v2452_v47 = vadd.f32 %v2355_v11, %v2191_v42  ;;  %v1542_v3 = vadd.f32 1e-08, %v1372_v22  ;;  %v15316_v51 = vld [vmem:[#allocation33_spill] sm:$0xff] }
 0x28c   : > { %v1176_v52 = vsub.f32 0.0, %v1175_v36  ;;  %7619 = vrsqrt.f32 %v9226_v30  ;;  %v1383_v8 = vsel %vm1382_vm10, %v9084_v63, %v1381_v5  ;;  %15312 = vst [vmem:[#allocation82_spill] sm:$0xff] %v9259_v21  ;;  %v9271_v63 = vrot.slane %v9251_v13, %v8701_v32  ;;  %v15315_v36 = vld [vmem:[#allocation30_spill] sm:$0xff] }
 0x28d   : > { %15311 = vst [vmem:[#allocation81_spill] sm:$0xff] %v9241_v31  ;;  %15313 = vst [vmem:[#allocation83_spill] sm:$0xff] %v9263_v37  ;;  %v1669_v38 = vmul.f32 %v8775_v6, %v15315_v36  ;;  %v1386_v33 = vsel %vm1384_vm11, %v1385_v26, %v1383_v8  ;;  %vm1396_vm12 = vcmp.eq.f32.partialorder %v9139_v4, inf  ;;  %vm1398_vm13 = vcmp.eq.f32.partialorder %v9139_v4, 0.0  ;;  %v9296_v26 = vld [vmem:[#allocation2 + $0x58] sm:$0xff] }
 0x28e   : > { %v1177_v62 = vmul.f32 1.442695, %v1176_v52  ;;  %v2504_v52 = vmul.f32 %v9142_v48, %v8990_v14  ;;  %v7616_v46 = vpop.eup %7615  ;;  %v9267_v14 = vmul.f32 %v9022_v27, %v9159_v53  ;;  %15314 = vst [vmem:[#allocation84_spill] sm:$0xff] %v9271_v63  ;;  %v1671_v27 = vmul.f32 %v8775_v6, %v15316_v51 }
 0x28f   : > { %v9246_v45 = vpop.xlane.xlu0 %1275  ;;  %v1395_v53 = vmul.f32 %v7614_v35, %v9139_v4  ;;  %v1409_v5 = vmul.f32 %v7616_v46, %v9177_v29  ;;  %vm1410_vm14 = vcmp.eq.f32.partialorder %v9177_v29, inf  ;;  %v1413_v35 = vand.u32 2147483648, %v9177_v29 }
 0x290   : > { %7621 = vpow2.f32 %v1177_v62  ;;  %v2602_v20 = vrot.slane %v2504_v52, 2  ;;  %v2779_v62 = vmul.f32 %v9271_v63, %v9034_v18  ;;  %vm1424_vm15 = vcmp.eq.f32.partialorder %v9207_v12, inf }
 0x291   : > { %7623 = vrcp.f32 %v1536_v56  ;;  %v1399_v56 = vand.u32 2147483648, %v9139_v4  ;;  %v1397_v52 = vsel %vm1396_vm12, %v9139_v4, %v1395_v53  ;;  %v1411_v8 = vsel %vm1410_vm14, %v9177_v29, %v1409_v5 }
 0x292   : > { %7625 = vrcp.f32 %v1538_v34  ;;  %v2603_v11 = vsel %vm2598_vm7, %v2600_v59, %v2602_v20  ;;  %v7618_v1 = vpop.eup %7617  ;;  %v1544_v59 = vadd.f32 1e-08, %v1386_v33  ;;  %vm1412_vm3 = vcmp.eq.f32.partialorder %v9177_v29, 0.0 }
 0x293   : > { %v9275_v16 = vpop.xlane.xlu0 %1281  ;;  %7627 = vrcp.f32 %v1540_v40  ;;  %v9285_v17 = vadd.f32 %v2603_v11, %v2452_v47  ;;  %v1423_v34 = vmul.f32 %v7618_v1, %v9207_v12  ;;  %vm1438_vm4 = vcmp.eq.f32.partialorder %v9226_v30, inf }
 0x294   : > { %7629 = vrsqrt.f32 %v9246_v45  ;;  %v9307_v47 = vadd.f32 %v2779_v62, %v2727_v41  ;;  %vm1426_vm5 = vcmp.eq.f32.partialorder %v9207_v12, 0.0  ;;  %v1427_v46 = vand.u32 2147483648, %v9207_v12 }
 0x295   : > { %15317 = vst [vmem:[#allocation30_spill] sm:$0xff] %v9285_v17  ;;  %7631 = vrcp.f32 %v1542_v3  ;;  %v4072_v3 = vmul.f32 %v9296_v26, %v9296_v26  ;;  %v1400_v11 = vsel %vm1398_vm13, %v1399_v56, %v1397_v52  ;;  %v1425_v1 = vsel %vm1424_vm15, %v9207_v12, %v1423_v34  ;;  %v15320_v56 = vld [vmem:[#allocation31_spill] sm:$0xff] }
 0x296   : > { %v7620_v42 = vpop.eup %7619  ;;  %7633 = vrsqrt.f32 %v9275_v16  ;;  %15318 = vst [vmem:[#allocation33_spill] sm:$0xff] %v9307_v47  ;;  %v1441_v29 = vand.u32 2147483648, %v9226_v30  ;;  %v1414_v5 = vsel %vm1412_vm3, %v1413_v35, %v1411_v8  ;;  %vm1440_vm8 = vcmp.eq.f32.partialorder %v9226_v30, 0.0  ;;  %v15324_v8 = vld [vmem:[#allocation32_spill] sm:$0xff] }
 0x297   : > { %v9294_v22 = vpop.xlane.xlu0 %1287  ;;  %v1437_v40 = vmul.f32 %v7620_v42, %v9226_v30  ;;  %v9323_v62 = vmul.f32 %v9046_v25, %v1669_v38  ;;  %v9327_v4 = vmul.f32 %v8791_v49, %v15315_v36  ;;  %v9331_v34 = vmul.f32 %v8775_v6, %v15320_v56 }
 0x298   : > { %7635 = vrsqrt.f32 %v9294_v22  ;;  %v9335_v52 = vmul.f32 %v8791_v49, %v15320_v56  ;;  %v1546_v25 = vadd.f32 1e-08, %v1400_v11  ;;  %v1428_v38 = vsel %vm1426_vm5, %v1427_v46, %v1425_v1 }
 0x299   : > { %7637 = vrcp.f32 %v1544_v59  ;;  %v1439_v42 = vsel %vm1438_vm4, %v9226_v30, %v1437_v40  ;;  %15319 = vst [vmem:[#allocation85_spill] sm:$0xff] %v9327_v4  ;;  %15321 = vst [vmem:[#allocation86_spill] sm:$0xff] %v9331_v34  ;;  %v9339_v30 = vmul.f32 %v8791_v49, %v15316_v51  ;;  %v1548_v47 = vadd.f32 1e-08, %v1414_v5  ;;  %v2184_v5 = vld [vmem:[%s14805_s8 + $0x8] sm:$0x7] }
 0x29a   : > { %v7622_v20 = vpop.eup %7621  ;;  %15322 = vst [vmem:[#allocation87_spill] sm:$0xff] %v9335_v52  ;;  %v4166_v31 = vsel %vm1080_vm2, %v4072_v3, 0.0  ;;  %v9349_v52 = vmul.f32 %v9144_v57, %v1671_v27  ;;  %v9353_v56 = vmul.f32 %v8791_v49, %v15324_v8  ;;  %v1632_v12 = vsub.f32 0.0, %v8780_v10  ;;  %v15389_v4 = vld [vmem:[#allocation20_spill] sm:$0xff] }
 0x29b   : > { %v1179_v33 = vadd.f32 1.0, %v7622_v20  ;;  %v9317_v53 = vpop.xlane.xlu0 %1293  ;;  %v7624_v41 = vpop.eup %7623  ;;  %15323 = vst [vmem:[#allocation88_spill] sm:$0xff] %v9339_v30  ;;  %v9345_v20 = vmul.f32 %v8775_v6, %v15324_v8  ;;  %4167 = vadd.xlane.f32.xlu0 %v4166_v31  ;;  %v1550_v1 = vadd.f32 1e-08, %v1428_v38  ;;  %vm1452_vm9 = vcmp.eq.f32.partialorder %v9246_v45, inf  ;;  %v15387_v30 = vld [vmem:[#allocation16_spill] sm:$0xff] }
 0x29c   : > { %7639 = vrsqrt.f32 %v9317_v53  ;;  %v7626_v59 = vpop.eup %7625  ;;  %15326 = vst [vmem:[#allocation90_spill] sm:$0xff] %v9353_v56  ;;  %v9357_v46 = vmul.f32 %v7624_v41, %v8868_v23  ;;  %vm1454_vm10 = vcmp.eq.f32.partialorder %v9246_v45, 0.0  ;;  %v1455_v10 = vand.u32 2147483648, %v9246_v45 }
 0x29d   : > { %7641 = vrcp.f32 %v1179_v33  ;;  %v7628_v35 = vpop.eup %7627  ;;  %15325 = vst [vmem:[#allocation89_spill] sm:$0xff] %v9345_v20  ;;  %v1442_v33 = vsel %vm1440_vm8, %v1441_v29, %v1439_v42  ;;  %v9360_v11 = vmul.f32 %v7626_v59, %v8885_v24  ;;  %v9371_v23 = vrot.slane %v9251_v13, %v9087_v15  ;;  %v9399_v59 = vld [vmem:[#allocation2 + $0x78] sm:$0xff] }
 0x29e   : > { %v7630_v40 = vpop.eup %7629  ;;  %v9363_v3 = vmul.f32 %v7628_v35, %v8913_v19  ;;  %7643 = vrcp.f32 %v1546_v25  ;;  %v1552_v49 = vadd.f32 1e-08, %v1442_v33  ;;  %v9375_v24 = vmul.f32 %v9167_v61, %v9034_v18  ;;  %v9377_v19 = vld [vmem:[#allocation2 + $0x60] sm:$0xff]  ;;  %15333 = vst [vmem:[#allocation97_spill] sm:$0xff] %v9399_v59 }
 0x29f   : > { %v7632_v34 = vpop.eup %7631  ;;  %v1451_v27 = vmul.f32 %v7630_v40, %v9246_v45  ;;  %7645 = vrcp.f32 %v1548_v47  ;;  %15327 = vst [vmem:[#allocation91_spill] sm:$0xff] %v9371_v23  ;;  %15329 = vst [vmem:[#allocation93_spill] sm:$0xff] %v9377_v19  ;;  %vm1466_vm11 = vcmp.eq.f32.partialorder %v9275_v16, inf  ;;  %vm1468_vm12 = vcmp.eq.f32.partialorder %v9275_v16, 0.0  ;;  %v9385_v47 = vpop.xlane.xlu0 %1299 }
 0x2a0   : > { %v7634_v6 = vpop.eup %7633  ;;  %15328 = vst [vmem:[#allocation92_spill] sm:$0xff] %v9375_v24  ;;  %v9380_v29 = vmul.f32 %v7632_v34, %v8937_v58  ;;  %15330 = vst [vmem:[#allocation94_spill] sm:$0xff] %v9385_v47  ;;  %7647 = vrcp.f32 %v1550_v1  ;;  %v9393_v42 = vrot.slane %v9251_v13, %v9117_v39  ;;  %v9397_v58 = vmul.f32 %v9142_v48, %v9036_v7 }
 0x2a1   : > { %v1465_v41 = vmul.f32 %v7634_v6, %v9275_v16  ;;  %7649 = vrcp.f32 %v1552_v49  ;;  %v1453_v35 = vsel %vm1452_vm9, %v9246_v45, %v1451_v27  ;;  %vm1480_vm13 = vcmp.eq.f32.partialorder %v9294_v22, inf }
 0x2a2   : > { %v7636_v57 = vpop.eup %7635  ;;  %15331 = vst [vmem:[#allocation95_spill] sm:$0xff] %v9393_v42  ;;  %15332 = vst [vmem:[#allocation96_spill] sm:$0xff] %v9397_v58  ;;  %v4073_v25 = vmul.f32 %v9377_v19, %v9377_v19  ;;  %v1469_v13 = vand.u32 2147483648, %v9275_v16  ;;  %v1483_v40 = vand.u32 2147483648, %v9294_v22  ;;  %7651 = vrsqrt.f32 %v9385_v47 }
 0x2a3   : > { %v7638_v31 = vpop.eup %7637  ;;  %v1479_v18 = vmul.f32 %v7636_v57, %v9294_v22  ;;  %v9411_v33 = vrot.slane %v2184_v5, %v8701_v32  ;;  %v1467_v1 = vsel %vm1466_vm11, %v9275_v16, %v1465_v41  ;;  %v4076_v49 = vmul.f32 %v9399_v59, %v9399_v59  ;;  %v15380_v59 = vld [vmem:[#allocation4_spill] sm:$0xff] }
 0x2a4   : > { %v4169_v57 = vsel %vm1080_vm2, %v4073_v25, 0.0  ;;  %v1456_v27 = vsel %vm1454_vm10, %v1455_v10, %v1453_v35  ;;  %vm1482_vm14 = vcmp.eq.f32.partialorder %v9294_v22, 0.0  ;;  %v9424_v8 = vrot.slane %v2184_v5, %v9087_v15 }
 0x2a5   : > { %15334 = vst [vmem:[#allocation98_spill] sm:$0xff] %v9411_v33  ;;  %v1481_v56 = vsel %vm1480_vm13, %v9294_v22, %v1479_v18  ;;  %4170 = vadd.xlane.f32.xlu1 %v4169_v57  ;;  %v1470_v45 = vsel %vm1468_vm12, %v1469_v13, %v1467_v1  ;;  %vm1494_vm15 = vcmp.eq.f32.partialorder %v9317_v53, inf  ;;  %v9439_v15 = vrot.slane %v2184_v5, %v9117_v39 }
 0x2a6   : > { %v7640_v34 = vpop.eup %7639  ;;  %15335 = vst [vmem:[#allocation99_spill] sm:$0xff] %v9424_v8  ;;  %v4178_v22 = vsel %vm1080_vm2, %v4076_v49, 0.0  ;;  %v1484_v18 = vsel %vm1482_vm14, %v1483_v40, %v1481_v56  ;;  %v9452_v39 = vmul.f32 %v9271_v63, %v9069_v54  ;;  %v9456_v5 = vmul.f32 %v9142_v48, %v9296_v26  ;;  %v9464_v40 = vpop.xlane.xlu0 %1305 }
 0x2a7   : > { %v7642_v38 = vpop.eup %7641  ;;  %v1493_v41 = vmul.f32 %v7640_v34, %v9317_v53  ;;  %15337 = vst [vmem:[#allocation101_spill] sm:$0xff] %v9439_v15  ;;  %4179 = vadd.xlane.f32.xlu0 %v4178_v22  ;;  %v1497_v34 = vand.u32 2147483648, %v9317_v53  ;;  %v9460_v35 = vmul.f32 %v9393_v42, %v9296_v26  ;;  %v1556_v56 = vadd.f32 1e-08, %v1470_v45  ;;  %15342 = vst [vmem:[#allocation106_spill] sm:$0xff] %v9464_v40 }
 0x2a8   : > { %v1633_v6 = vadd.f32 %v7642_v38, %v1632_v12  ;;  %v9427_v12 = vmul.f32 %v7638_v31, %v8968_v50  ;;  %v9433_v38 = vmul.f32 %v9393_v42, %v9036_v7  ;;  %v7644_v50 = vpop.eup %7643  ;;  %v1554_v31 = vadd.f32 1e-08, %v1456_v27  ;;  %15339 = vst [vmem:[#allocation103_spill] sm:$0xff] %v9452_v39  ;;  %15340 = vst [vmem:[#allocation104_spill] sm:$0xff] %v9456_v5  ;;  %v15371_v5 = vld [vmem:[#allocation76_spill] sm:$0xff] }
 0x2a9   : > { %v9447_v7 = vmul.f32 %v9167_v61, %v9069_v54  ;;  %v7646_v16 = vpop.eup %7645  ;;  %15341 = vst [vmem:[#allocation105_spill] sm:$0xff] %v9460_v35  ;;  %v1495_v13 = vsel %vm1494_vm15, %v9317_v53, %v1493_v41  ;;  %vm1496_vm3 = vcmp.eq.f32.partialorder %v9317_v53, 0.0  ;;  %v9471_v57 = vmul.f32 %v7644_v50, %v8984_v28  ;;  %v15367_v35 = vld [vmem:[#allocation67_spill] sm:$0xff] }
 0x2aa   : > { %15336 = vst [vmem:[#allocation100_spill] sm:$0xff] %v9433_v38  ;;  %v9443_v10 = vrot.slane %v1633_v6, %v8701_v32  ;;  %v9468_v6 = vmul.f32 %v9411_v33, %v9069_v54  ;;  %v7648_v1 = vpop.eup %7647  ;;  %v1558_v49 = vadd.f32 1e-08, %v1484_v18  ;;  %v9476_v45 = vmul.f32 %v9439_v15, %v9296_v26  ;;  %v15364_v32 = vld [vmem:[#allocation57_spill] sm:$0xff] }
 0x2ab   : > { %15338 = vst [vmem:[#allocation102_spill] sm:$0xff] %v9447_v7  ;;  %v7650_v41 = vpop.eup %7649  ;;  %v9483_v22 = vmul.f32 %v7646_v16, %v9015_v55  ;;  %7653 = vrcp.f32 %v1554_v31  ;;  %v1498_v50 = vsel %vm1496_vm3, %v1497_v34, %v1495_v13  ;;  %v9491_v25 = vmul.f32 %v7648_v1, %v9030_v44  ;;  %v15351_v1 = vld [vmem:[#allocation35_spill] sm:$0xff]  ;;  %v15375_v7 = vld [vmem:[#allocation40_spill] sm:$0xff] }
 0x2ac   : > { %15343 = vst [vmem:[#allocation107_spill] sm:$0xff] %v9468_v6  ;;  %15344 = vst [vmem:[#allocation108_spill] sm:$0xff] %v9476_v45  ;;  %v9480_v53 = vadd.f32 %v9443_v10, %v9357_v46  ;;  %v7652_v28 = vpop.eup %7651  ;;  %7655 = vrsqrt.f32 %v9464_v40  ;;  %v9495_v55 = vmul.f32 %v9167_v61, %v9377_v19  ;;  %v9498_v46 = vmul.f32 %v7650_v41, %v9078_v60  ;;  %v15352_v60 = vld [vmem:[#allocation39_spill] sm:$0xff]  ;;  %v15366_v45 = vld [vmem:[#allocation64_spill] sm:$0xff] }
 0x2ad   : > { %15345 = vst [vmem:[#allocation109_spill] sm:$0xff] %v9483_v22  ;;  %15346 = vst [vmem:[#allocation110_spill] sm:$0xff] %v9491_v25  ;;  %7657 = vrcp.f32 %v1556_v56  ;;  %v9504_v34 = vadd.f32 %v9443_v10, %v8860_v43  ;;  %v9506_v44 = vadd.f32 1e-08, %v1498_v50  ;;  %v9509_v56 = vmul.f32 %v7652_v28, %v9385_v47  ;;  %v15353_v41 = vld [vmem:[#allocation43_spill] sm:$0xff]  ;;  %v15355_v43 = vld [vmem:[#allocation6_spill] sm:$0xff] }
 0x2ae   : > { %v1814_v27 = vmin.f32 %v9480_v53, 0.0  ;;  %15347 = vst [vmem:[#allocation111_spill] sm:$0xff] %v9495_v55  ;;  %15348 = vst [vmem:[#allocation112_spill] sm:$0xff] %v9498_v46  ;;  %7659 = vrcp.f32 %v1558_v49  ;;  %v9513_v26 = vadd.f32 %v9443_v10, %v15351_v1  ;;  %v9517_v49 = vadd.f32 %v9443_v10, %v15352_v60  ;;  %v15356_v50 = vld [vmem:[#allocation45_spill] sm:$0xff]  ;;  %v15360_v1 = vld [vmem:[#allocation51_spill] sm:$0xff] }
 0x2af   : > { %15349 = vst [vmem:[#allocation113_spill] sm:$0xff] %v9506_v44  ;;  %15350 = vst [vmem:[#allocation114_spill] sm:$0xff] %v9509_v56  ;;  %v9521_v16 = vadd.f32 %v9443_v10, %v15353_v41  ;;  %v9527_v18 = vadd.f32 %v9443_v10, %v15356_v50  ;;  %v15358_v28 = vld [vmem:[#allocation49_spill] sm:$0xff]  ;;  %v9535_v54 = vadd.f32 %v9443_v10, %v15360_v1  ;;  %v15362_v60 = vld [vmem:[#allocation55_spill] sm:$0xff]  ;;  %vm1744_vm4 = vcmp.lt.f32.partialorder %v9480_v53, 0.0 }
 0x2b0   : > { %v1848_v13 = vmul.f32 1.442695, %v1814_v27  ;;  %v1942_v27 = vmul.f32 %v9480_v53, %v15355_v43  ;;  %v9531_v31 = vadd.f32 %v9443_v10, %v15358_v28  ;;  %v9539_v41 = vadd.f32 %v9443_v10, %v15362_v60  ;;  %v15365_v55 = vld [vmem:[#allocation61_spill] sm:$0xff]  ;;  %v15381_v19 = vld [vmem:[#allocation3_spill] sm:$0xff]  ;;  %v15385_v47 = vld [vmem:[#allocation12_spill] sm:$0xff] }
 0x2b1   : > { %15354 = vst [vmem:[#allocation35_spill] sm:$0xff] %v9521_v16  ;;  %15357 = vst [vmem:[#allocation39_spill] sm:$0xff] %v9527_v18  ;;  %v9543_v43 = vadd.f32 %v9443_v10, %v15364_v32  ;;  %v9547_v50 = vadd.f32 %v9443_v10, %v15365_v55  ;;  %v9551_v28 = vadd.f32 %v9443_v10, %v15366_v45  ;;  %v1817_v8 = vmin.f32 %v9521_v16, 0.0  ;;  %v15383_v40 = vld [vmem:[#allocation7_spill] sm:$0xff]  ;;  %v15388_v22 = vld [vmem:[#allocation17_spill] sm:$0xff] }
 0x2b2   : > { %15359 = vst [vmem:[#allocation43_spill] sm:$0xff] %v9531_v31  ;;  %15361 = vst [vmem:[#allocation6_spill] sm:$0xff] %v9535_v54  ;;  %7661 = vpow2.f32 %v1848_v13  ;;  %v9555_v1 = vadd.f32 %v9443_v10, %v15367_v35  ;;  %v15369_v13 = vld [vmem:[#allocation70_spill] sm:$0xff]  ;;  %v9563_v32 = vadd.f32 %v9443_v10, %v15371_v5  ;;  %v9567_v55 = vadd.f32 %v9443_v10, %v9267_v14 }
 0x2b3   : > { %15363 = vst [vmem:[#allocation45_spill] sm:$0xff] %v9539_v41  ;;  %v9559_v60 = vadd.f32 %v9443_v10, %v15369_v13  ;;  %v9571_v45 = vadd.f32 %v9443_v10, %v9323_v62  ;;  %v9575_v35 = vadd.f32 %v9443_v10, %v9349_v52  ;;  %v1974_v6 = vadd.f32 %v1942_v27, %v15375_v7 }
 0x2b4   : > { %15368 = vst [vmem:[#allocation49_spill] sm:$0xff] %v9555_v1  ;;  %15372 = vst [vmem:[#allocation55_spill] sm:$0xff] %v9563_v32  ;;  %v1812_v13 = vmin.f32 %v9504_v34, 0.0  ;;  %v1813_v5 = vmin.f32 %v9513_v26, 0.0  ;;  %v1815_v14 = vmin.f32 %v9517_v49, 0.0  ;;  %v1819_v62 = vmin.f32 %v9527_v18, 0.0 }
 0x2b5   : > { %15370 = vst [vmem:[#allocation51_spill] sm:$0xff] %v9559_v60  ;;  %15373 = vst [vmem:[#allocation57_spill] sm:$0xff] %v9567_v55  ;;  %v9579_v39 = vpop.eup %7653  ;;  %v1821_v52 = vmin.f32 %v9531_v31, 0.0  ;;  %v1823_v27 = vmin.f32 %v9535_v54, 0.0  ;;  %v1825_v38 = vmin.f32 %v9539_v41, 0.0  ;;  %v1827_v58 = vmin.f32 %v9543_v43, 0.0 }
 0x2b6   : > { %15374 = vst [vmem:[#allocation61_spill] sm:$0xff] %v9571_v45  ;;  %15376 = vst [vmem:[#allocation64_spill] sm:$0xff] %v9579_v39  ;;  %v9586_v33 = vpop.eup %7655  ;;  %v1829_v37 = vmin.f32 %v9547_v50, 0.0  ;;  %v1831_v24 = vmin.f32 %v9551_v28, 0.0  ;;  %v1833_v61 = vmin.f32 %v9555_v1, 0.0  ;;  %v1835_v0 = vmin.f32 %v9559_v60, 0.0 }
 0x2b7   : > { %15377 = vst [vmem:[#allocation67_spill] sm:$0xff] %v9586_v33  ;;  %v9592_v20 = vpop.eup %7657  ;;  %v1837_v15 = vmin.f32 %v9563_v32, 0.0  ;;  %v1839_v23 = vmin.f32 %v9567_v55, 0.0  ;;  %v1841_v42 = vmin.f32 %v9571_v45, 0.0  ;;  %v1843_v48 = vmin.f32 %v9575_v35, 0.0  ;;  %v15382_v33 = vld [vmem:[#allocation5_spill] sm:$0xff] }
 0x2b8   : > { %15378 = vst [vmem:[#allocation70_spill] sm:$0xff] %v9592_v20  ;;  %v9598_v17 = vpop.eup %7659  ;;  %v1940_v63 = vmul.f32 %v9504_v34, %v15380_v59  ;;  %v1941_v21 = vmul.f32 %v9513_v26, %v15381_v19  ;;  %v1943_v56 = vmul.f32 %v9517_v49, %v15382_v33  ;;  %v1945_v44 = vmul.f32 %v9521_v16, %v15383_v40  ;;  %v15384_v20 = vld [vmem:[#allocation9_spill] sm:$0xff] }
 0x2b9   : > { %15379 = vst [vmem:[#allocation76_spill] sm:$0xff] %v9598_v17  ;;  %v9612_v17 = vadd.f32 %v9443_v10, %v9360_v11  ;;  %v1947_v39 = vmul.f32 %v9527_v18, %v15384_v20  ;;  %v1949_v46 = vmul.f32 %v9531_v31, %v15385_v47  ;;  %v15386_v59 = vld [vmem:[#allocation13_spill] sm:$0xff]  ;;  %v1953_v33 = vmul.f32 %v9539_v41, %v15387_v30  ;;  %v15390_v18 = vld [vmem:[#allocation22_spill] sm:$0xff]  ;;  %v15391_v31 = vld [vmem:[#allocation24_spill] sm:$0xff] }
 0x2ba   : > { %v1951_v25 = vmul.f32 %v9535_v54, %v15386_v59  ;;  %v1955_v11 = vmul.f32 %v9543_v43, %v15388_v22  ;;  %v1957_v2 = vmul.f32 %v9547_v50, %v15389_v4  ;;  %v1959_v47 = vmul.f32 %v9551_v28, %v15390_v18  ;;  %v15392_v54 = vld [vmem:[#allocation25_spill] sm:$0xff]  ;;  %v15393_v30 = vld [vmem:[#allocation28_spill] sm:$0xff] }
 0x2bb   : > { %v1816_v40 = vmin.f32 %v9612_v17, 0.0  ;;  %v1961_v59 = vmul.f32 %v9555_v1, %v15391_v31  ;;  %v1963_v16 = vmul.f32 %v9559_v60, %v15392_v54  ;;  %v9638_v41 = vmul.f32 %v9563_v32, %v15393_v30  ;;  %v15394_v31 = vld [vmem:[#allocation8_spill] sm:$0xff] }
 0x2bc   : > { %v7662_v19 = vpop.eup %7661  ;;  %v9642_v4 = vmul.f32 %v9567_v55, %v8535_v9  ;;  %v1844_v54 = vmul.f32 1.442695, %v1812_v13  ;;  %v1846_v60 = vmul.f32 1.442695, %v1813_v5  ;;  %v1850_v30 = vmul.f32 1.442695, %v1815_v14 }
 0x2bd   : > { %v1910_v20 = vmul.f32 %v7662_v19, %v15375_v7  ;;  %v9646_v7 = vmul.f32 %v9571_v45, %v15315_v36  ;;  %v1852_v22 = vmul.f32 1.442695, %v1816_v40  ;;  %v1944_v19 = vmul.f32 %v9612_v17, %v15394_v31  ;;  %v15396_v13 = vld [vmem:[#allocation42_spill] sm:$0xff] }
 0x2be   : > { %v1854_v32 = vmul.f32 1.442695, %v1817_v8  ;;  %v1858_v9 = vmul.f32 1.442695, %v1819_v62  ;;  %v1971_v55 = vmul.f32 %v9575_v35, %v15316_v51  ;;  %v1862_v36 = vmul.f32 1.442695, %v1821_v52 }
 0x2bf   : > { %v2006_v18 = vsel %vm1744_vm4, %v1910_v20, %v1974_v6  ;;  %7663 = vpow2.f32 %v1852_v22  ;;  %v1866_v45 = vmul.f32 1.442695, %v1823_v27  ;;  %v1870_v40 = vmul.f32 1.442695, %v1825_v38  ;;  %v15395_v20 = vld [vmem:[#allocation37_spill] sm:$0xff]  ;;  %v15402_v27 = vld [vmem:[#allocation50_spill] sm:$0xff] }
 0x2c0   : > { %2080 = vst.msk [vmem:[#allocation2 + $0x48] sm:$0xff] %vm1080_vm2, %v2006_v18  ;;  %v1874_v1 = vmul.f32 1.442695, %v1827_v58  ;;  %v1878_v53 = vmul.f32 1.442695, %v1829_v37  ;;  %v9658_v31 = vadd.f32 %v1940_v63, %v15395_v20  ;;  %v1976_v5 = vadd.f32 %v1944_v19, %v15396_v13  ;;  %v15398_v63 = vld [vmem:[#allocation38_spill] sm:$0xff] }
 0x2c1   : > { %v9655_v6 = vmul.f32 1.442695, %v1831_v24  ;;  %v9661_v18 = vmul.f32 1.442695, %v1833_v61  ;;  %v9663_v14 = vmul.f32 1.442695, %v1835_v0  ;;  %v9678_v62 = vadd.f32 %v1943_v56, %v15398_v63 }
 0x2c2   : > { %v9665_v8 = vmul.f32 1.442695, %v1837_v15  ;;  %vm1746_vm5 = vcmp.lt.f32.partialorder %v9612_v17, 0.0  ;;  %v9668_v51 = vmul.f32 1.442695, %v1839_v23  ;;  %v15397_v24 = vld [vmem:[#allocation36_spill] sm:$0xff]  ;;  %v9685_v0 = vadd.f32 %v9443_v10, %v9363_v3 }
 0x2c3   : > { %v9670_v38 = vmul.f32 1.442695, %v1841_v42  ;;  %v9672_v37 = vmul.f32 1.442695, %v1843_v48  ;;  %v9675_v58 = vadd.f32 %v1941_v21, %v15397_v24  ;;  %v15399_v61 = vld [vmem:[#allocation41_spill] sm:$0xff]  ;;  %7665 = vpow2.f32 %v1844_v54  ;;  %v15400_v23 = vld [vmem:[#allocation44_spill] sm:$0xff] }
 0x2c4   : > { %v9681_v52 = vadd.f32 %v1945_v44, %v15399_v61  ;;  %v9688_v15 = vadd.f32 %v1947_v39, %v15400_v23  ;;  %v15401_v42 = vld [vmem:[#allocation47_spill] sm:$0xff]  ;;  %v9694_v21 = vadd.f32 %v1951_v25, %v15402_v27  ;;  %7667 = vpow2.f32 %v1846_v60  ;;  %v15403_v56 = vld [vmem:[#allocation53_spill] sm:$0xff]  ;;  %v15405_v19 = vld [vmem:[#allocation56_spill] sm:$0xff] }
 0x2c5   : > { %v9691_v48 = vadd.f32 %v1949_v46, %v15401_v42  ;;  %v9697_v22 = vadd.f32 %v1953_v33, %v15403_v56  ;;  %v1818_v44 = vmin.f32 %v9685_v0, 0.0  ;;  %7669 = vpow2.f32 %v1850_v30  ;;  %v15407_v54 = vld [vmem:[#allocation59_spill] sm:$0xff]  ;;  %v15409_v60 = vld [vmem:[#allocation62_spill] sm:$0xff]  ;;  %v15411_v30 = vld [vmem:[#allocation65_spill] sm:$0xff] }
 0x2c6   : > { %v9702_v3 = vadd.f32 %v9443_v10, %v9380_v29  ;;  %v9705_v39 = vadd.f32 %v1955_v11, %v15405_v19  ;;  %v9708_v46 = vadd.f32 %v1957_v2, %v15407_v54  ;;  %7671 = vpow2.f32 %v1854_v32  ;;  %v15413_v2 = vld [vmem:[#allocation69_spill] sm:$0xff]  ;;  %v15415_v32 = vld [vmem:[#allocation10_spill] sm:$0xff] }
 0x2c7   : > { %15404 = vst [vmem:[#allocation40_spill] sm:$0xff] %v9697_v22  ;;  %v9712_v25 = vadd.f32 %v9443_v10, %v9427_v12  ;;  %vm1742_vm8 = vcmp.lt.f32.partialorder %v9504_v34, 0.0  ;;  %v9716_v33 = vadd.f32 %v1959_v47, %v15409_v60  ;;  %v9719_v22 = vadd.f32 %v1961_v59, %v15411_v30  ;;  %v15430_v17 = vld [vmem:[#allocation110_spill] sm:$0xff] }
 0x2c8   : > { %15406 = vst [vmem:[#allocation4_spill] sm:$0xff] %v9705_v39  ;;  %15408 = vst [vmem:[#allocation3_spill] sm:$0xff] %v9708_v46  ;;  %v1856_v29 = vmul.f32 1.442695, %v1818_v44  ;;  %7673 = vpow2.f32 %v1858_v9  ;;  %vm1743_vm9 = vcmp.lt.f32.partialorder %v9513_v26, 0.0  ;;  %v9723_v46 = vadd.f32 %v1963_v16, %v15413_v2  ;;  %v15416_v9 = vld [vmem:[#allocation11_spill] sm:$0xff] }
 0x2c9   : > { %15410 = vst [vmem:[#allocation5_spill] sm:$0xff] %v9716_v33  ;;  %15412 = vst [vmem:[#allocation7_spill] sm:$0xff] %v9719_v22  ;;  %v7664_v11 = vpop.eup %7663  ;;  %v1946_v12 = vmul.f32 %v9685_v0, %v15415_v32  ;;  %7675 = vpow2.f32 %v1862_v36  ;;  %v9729_v39 = vadd.f32 %v9443_v10, %v9471_v57  ;;  %vm1745_vm10 = vcmp.lt.f32.partialorder %v9517_v49, 0.0  ;;  %v15417_v16 = vld [vmem:[#allocation35_spill] sm:$0xff]  ;;  %v15420_v36 = vld [vmem:[#allocation80_spill] sm:$0xff] }
 0x2ca   : > { %15414 = vst [vmem:[#allocation9_spill] sm:$0xff] %v9723_v46  ;;  %v1912_v47 = vmul.f32 %v7664_v11, %v15396_v13  ;;  %7677 = vpow2.f32 %v1856_v29  ;;  %v1820_v59 = vmin.f32 %v9702_v3, 0.0  ;;  %v1948_v44 = vmul.f32 %v9702_v3, %v15416_v9  ;;  %v15418_v46 = vld [vmem:[#allocation74_spill] sm:$0xff]  ;;  %v15422_v13 = vld [vmem:[#allocation39_spill] sm:$0xff]  ;;  %v15423_v11 = vld [vmem:[#allocation85_spill] sm:$0xff] }
 0x2cb   : > { %vm1747_vm11 = vcmp.lt.f32.partialorder %v15417_v16, 0.0  ;;  %v9739_v32 = vadd.f32 %v9638_v41, %v15418_v46  ;;  %v9743_v57 = vadd.f32 %v9642_v4, %v15420_v36  ;;  %7679 = vpow2.f32 %v1866_v45  ;;  %v15425_v33 = vld [vmem:[#allocation109_spill] sm:$0xff]  ;;  %v15427_v45 = vld [vmem:[#allocation88_spill] sm:$0xff]  ;;  %v15440_v16 = vld [vmem:[#allocation55_spill] sm:$0xff] }
 0x2cc   : > { %v1822_v22 = vmin.f32 %v9712_v25, 0.0  ;;  %vm1749_vm12 = vcmp.lt.f32.partialorder %v15422_v13, 0.0  ;;  %v2008_v29 = vsel %vm1746_vm5, %v1912_v47, %v1976_v5  ;;  %v9751_v9 = vadd.f32 %v9646_v7, %v15423_v11  ;;  %v15435_v11 = vld [vmem:[#allocation45_spill] sm:$0xff] }
 0x2cd   : > { %15419 = vst [vmem:[#allocation12_spill] sm:$0xff] %v9739_v32  ;;  %15421 = vst [vmem:[#allocation13_spill] sm:$0xff] %v9743_v57  ;;  %7681 = vpow2.f32 %v1870_v40  ;;  %v9755_v41 = vadd.f32 %v9443_v10, %v15425_v33  ;;  %v15426_v32 = vld [vmem:[#allocation43_spill] sm:$0xff]  ;;  %v9760_v4 = vadd.f32 %v1971_v55, %v15427_v45  ;;  %v15429_v57 = vld [vmem:[#allocation46_spill] sm:$0xff]  ;;  %v9767_v7 = vadd.f32 %v9443_v10, %v15430_v17  ;;  %v7666_v40 = vpop.eup %7665 }
 0x2ce   : > { %15424 = vst [vmem:[#allocation16_spill] sm:$0xff] %v9751_v9  ;;  %vm1751_vm13 = vcmp.lt.f32.partialorder %v15426_v32, 0.0  ;;  %2082 = vst.msk [vmem:[#allocation2 + $0x68] sm:$0xff] %vm1080_vm2, %v2008_v29  ;;  %v9763_v36 = vadd.f32 %v1946_v12, %v15429_v57  ;;  %7683 = vpow2.f32 %v1874_v1  ;;  %vm1748_vm14 = vcmp.lt.f32.partialorder %v9685_v0, 0.0  ;;  %v15431_v33 = vld [vmem:[#allocation48_spill] sm:$0xff]  ;;  %v7668_v55 = vpop.eup %7667  ;;  %v15434_v17 = vld [vmem:[#allocation14_spill] sm:$0xff] }
 0x2cf   : > { %15428 = vst [vmem:[#allocation17_spill] sm:$0xff] %v9760_v4  ;;  %7685 = vpow2.f32 %v1878_v53  ;;  %v1860_v5 = vmul.f32 1.442695, %v1820_v59  ;;  %v9771_v47 = vadd.f32 %v1948_v44, %v15431_v33  ;;  %v1824_v29 = vmin.f32 %v9729_v39, 0.0  ;;  %v15433_v4 = vld [vmem:[#allocation6_spill] sm:$0xff]  ;;  %v7670_v45 = vpop.eup %7669  ;;  %v15436_v59 = vld [vmem:[#allocation15_spill] sm:$0xff] }
 0x2d0   : > { %vm1753_vm15 = vcmp.lt.f32.partialorder %v15433_v4, 0.0  ;;  %7687 = vpow2.f32 %v9655_v6  ;;  %v1908_v1 = vmul.f32 %v7666_v40, %v15395_v20  ;;  %v1864_v12 = vmul.f32 1.442695, %v1822_v22  ;;  %v7672_v33 = vpop.eup %7671  ;;  %v15441_v13 = vld [vmem:[#allocation57_spill] sm:$0xff] }
 0x2d1   : > { %15432 = vst [vmem:[#allocation20_spill] sm:$0xff] %v9771_v47  ;;  %v1950_v9 = vmul.f32 %v9712_v25, %v15434_v17  ;;  %vm1755_vm3 = vcmp.lt.f32.partialorder %v15435_v11, 0.0  ;;  %7689 = vpow2.f32 %v9661_v18  ;;  %v1909_v53 = vmul.f32 %v7668_v55, %v15397_v24  ;;  %v15443_v32 = vld [vmem:[#allocation61_spill] sm:$0xff]  ;;  %v15448_v11 = vld [vmem:[#allocation66_spill] sm:$0xff] }
 0x2d2   : > { %v1952_v44 = vmul.f32 %v9729_v39, %v15436_v59  ;;  %v1826_v47 = vmin.f32 %v9755_v41, 0.0  ;;  %vm1757_vm4 = vcmp.lt.f32.partialorder %v9543_v43, 0.0  ;;  %7691 = vpow2.f32 %v9663_v14  ;;  %v7674_v22 = vpop.eup %7673  ;;  %v15451_v43 = vld [vmem:[#allocation71_spill] sm:$0xff] }
 0x2d3   : > { %v1911_v6 = vmul.f32 %v7670_v45, %v15398_v63  ;;  %v2004_v20 = vsel %vm1742_vm8, %v1908_v1, %v9658_v31  ;;  %v1828_v18 = vmin.f32 %v9767_v7, 0.0  ;;  %vm1759_vm5 = vcmp.lt.f32.partialorder %v9547_v50, 0.0  ;;  %v7676_v63 = vpop.eup %7675  ;;  %v15454_v50 = vld [vmem:[#allocation18_spill] sm:$0xff] }
 0x2d4   : > { %7693 = vpow2.f32 %v9665_v8  ;;  %v1913_v24 = vmul.f32 %v7672_v33, %v15399_v61  ;;  %v2005_v40 = vsel %vm1743_vm9, %v1909_v53, %v9675_v58  ;;  %v1868_v14 = vmul.f32 1.442695, %v1824_v29  ;;  %2078 = vst.msk [vmem:[#allocation2 + $0x28] sm:$0xff] %vm1080_vm2, %v2004_v20  ;;  %v15437_v8 = vld [vmem:[#allocation112_spill] sm:$0xff]  ;;  %v7678_v58 = vpop.eup %7677  ;;  %v15438_v61 = vld [vmem:[#allocation49_spill] sm:$0xff]  ;;  %v15445_v53 = vld [vmem:[#allocation54_spill] sm:$0xff] }
 0x2d5   : > { %vm1761_vm1 = vcmp.lt.f32.partialorder %v9551_v28, 0.0  ;;  %7695 = vpow2.f32 %v9668_v51  ;;  %v1915_v34 = vmul.f32 %v7674_v22, %v15400_v23  ;;  %v2007_v31 = vsel %vm1745_vm10, %v1911_v6, %v9678_v62  ;;  %2079 = vst.msk [vmem:[#allocation2 + $0x30] sm:$0xff] %vm1080_vm2, %v2005_v40  ;;  %v7680_v62 = vpop.eup %7679  ;;  %v15439_v23 = vld [vmem:[#allocation51_spill] sm:$0xff]  ;;  %v15447_v6 = vld [vmem:[#allocation4_spill] sm:$0xff] }
 0x2d6   : > { %v9808_v26 = vadd.f32 %v9443_v10, %v15437_v8  ;;  %vm1763_vm8 = vcmp.lt.f32.partialorder %v15438_v61, 0.0  ;;  %7697 = vpow2.f32 %v9670_v38  ;;  %v1917_v45 = vmul.f32 %v7676_v63, %v15401_v42  ;;  %2081 = vst.msk [vmem:[#allocation2 + $0x50] sm:$0xff] %vm1080_vm2, %v2007_v31  ;;  %v15453_v31 = vld [vmem:[#allocation5_spill] sm:$0xff] }
 0x2d7   : > { %v2009_v51 = vsel %vm1747_vm11, %v1913_v24, %v9681_v52  ;;  %v1872_v49 = vmul.f32 1.442695, %v1826_v47  ;;  %vm1765_vm9 = vcmp.lt.f32.partialorder %v15439_v23, 0.0  ;;  %v1914_v33 = vmul.f32 %v7678_v58, %v15429_v57  ;;  %v7682_v29 = vpop.eup %7681  ;;  %v15450_v24 = vld [vmem:[#allocation3_spill] sm:$0xff] }
 0x2d8   : > { %7699 = vpow2.f32 %v9672_v37  ;;  %v2011_v38 = vsel %vm1749_vm12, %v1915_v34, %v9688_v15  ;;  %2083 = vst.msk [vmem:[#allocation2 + $0x70] sm:$0xff] %vm1080_vm2, %v2009_v51  ;;  %v1876_v42 = vmul.f32 1.442695, %v1828_v18  ;;  %vm1767_vm10 = vcmp.lt.f32.partialorder %v15440_v16, 0.0  ;;  %v7684_v57 = vpop.eup %7683 }
 0x2d9   : > { %7701 = vpow2.f32 %v1860_v5  ;;  %v1919_v52 = vmul.f32 %v7680_v62, %v15402_v27  ;;  %v2013_v47 = vsel %vm1751_vm13, %v1917_v45, %v9691_v48  ;;  %2085 = vst.msk [vmem:[#allocation2 + $0x90] sm:$0xff] %vm1080_vm2, %v2011_v38  ;;  %v1830_v37 = vmin.f32 %v9808_v26, 0.0  ;;  %v15442_v5 = vld [vmem:[#allocation52_spill] sm:$0xff]  ;;  %v7686_v48 = vpop.eup %7685  ;;  %v15456_v62 = vld [vmem:[#allocation113_spill] sm:$0xff] }
 0x2da   : > { %vm1769_vm11 = vcmp.lt.f32.partialorder %v15441_v13, 0.0  ;;  %v2010_v15 = vsel %vm1748_vm14, %v1914_v33, %v9763_v36  ;;  %v1921_v55 = vmul.f32 %v7682_v29, %v15403_v56  ;;  %7703 = vpow2.f32 %v1864_v12  ;;  %2087 = vst.msk [vmem:[#allocation2 + $0xb0] sm:$0xff] %vm1080_vm2, %v2013_v47  ;;  %v7688_v56 = vpop.eup %7687  ;;  %v15444_v12 = vld [vmem:[#allocation40_spill] sm:$0xff]  ;;  %v15458_v29 = vld [vmem:[#allocation9_spill] sm:$0xff] }
 0x2db   : > { %v9837_v27 = vadd.f32 %v1950_v9, %v15442_v5  ;;  %vm1771_vm12 = vcmp.lt.f32.partialorder %v15443_v32, 0.0  ;;  %2084 = vst.msk [vmem:[#allocation2 + $0x88] sm:$0xff] %vm1080_vm2, %v2010_v15  ;;  %v1923_v1 = vmul.f32 %v7684_v57, %v15405_v19  ;;  %v2015_v0 = vsel %vm1753_vm15, %v1919_v52, %v9694_v21  ;;  %v15446_v19 = vld [vmem:[#allocation94_spill] sm:$0xff]  ;;  %v7690_v21 = vpop.eup %7689  ;;  %v15457_v38 = vld [vmem:[#allocation80_spill] sm:$0xff] }
 0x2dc   : > { %7705 = vpow2.f32 %v1868_v14  ;;  %v1880_v36 = vmul.f32 1.442695, %v1830_v37  ;;  %vm1773_vm13 = vcmp.lt.f32.partialorder %v9575_v35, 0.0  ;;  %v1925_v9 = vmul.f32 %v7686_v48, %v15407_v54  ;;  %2089 = vst.msk [vmem:[#allocation2 + $0xd0] sm:$0xff] %vm1080_vm2, %v2015_v0  ;;  %v7692_v18 = vpop.eup %7691  ;;  %v15459_v52 = vld [vmem:[#allocation106_spill] sm:$0xff]  ;;  %v15460_v37 = vld [vmem:[#allocation85_spill] sm:$0xff] }
 0x2dd   : > { %v2017_v17 = vsel %vm1755_vm3, %v1921_v55, %v15444_v12  ;;  %v9852_v59 = vadd.f32 %v1952_v44, %v15445_v53  ;;  %7707 = vpow2.f32 %v1872_v49  ;;  %vm1508_vm14 = vcmp.eq.f32.partialorder %v15446_v19, inf  ;;  %v15449_v44 = vld [vmem:[#allocation64_spill] sm:$0xff]  ;;  %v15455_v49 = vld [vmem:[#allocation7_spill] sm:$0xff] }
 0x2de   : > { %vm1750_vm15 = vcmp.lt.f32.partialorder %v9702_v3, 0.0  ;;  %v1927_v4 = vmul.f32 %v7688_v56, %v15409_v60  ;;  %v2019_v54 = vsel %vm1757_vm4, %v1923_v1, %v15447_v6  ;;  %2091 = vst.msk [vmem:[#allocation2 + $0xf0] sm:$0xff] %vm1080_vm2, %v2017_v17  ;;  %7709 = vpow2.f32 %v1876_v42  ;;  %v15452_v60 = vld [vmem:[#allocation70_spill] sm:$0xff]  ;;  %v7694_v63 = vpop.eup %7693  ;;  %v15461_v15 = vld [vmem:[#allocation12_spill] sm:$0xff]  ;;  %v15462_v48 = vld [vmem:[#allocation19_spill] sm:$0xff] }
 0x2df   : > { %v1692_v20 = vmul.f32 %v15449_v44, %v15448_v11  ;;  %v1929_v22 = vmul.f32 %v7690_v21, %v15411_v30  ;;  %vm1752_vm3 = vcmp.lt.f32.partialorder %v9712_v25, 0.0  ;;  %v2021_v40 = vsel %vm1759_vm5, %v1925_v9, %v15450_v24  ;;  %2093 = vst.msk [vmem:[#allocation2 + $0x110] sm:$0xff] %vm1080_vm2, %v2019_v54  ;;  %v7696_v45 = vpop.eup %7695  ;;  %v15463_v1 = vld [vmem:[#allocation77_spill] sm:$0xff]  ;;  %v15464_v0 = vld [vmem:[#allocation76_spill] sm:$0xff]  ;;  %v15474_v3 = vld [vmem:[#allocation114_spill] sm:$0xff] }
 0x2e0   : > { %7711 = vpow2.f32 %v1880_v36  ;;  %v1694_v14 = vmul.f32 %v15452_v60, %v15451_v43  ;;  %vm1510_vm4 = vcmp.eq.f32.partialorder %v15446_v19, 0.0  ;;  %v1931_v34 = vmul.f32 %v7692_v18, %v15413_v2  ;;  %2095 = vst.msk [vmem:[#allocation2 + $0x130] sm:$0xff] %vm1080_vm2, %v2021_v40  ;;  %v7698_v33 = vpop.eup %7697  ;;  %v15465_v9 = vld [vmem:[#allocation88_spill] sm:$0xff]  ;;  %v15466_v17 = vld [vmem:[#allocation13_spill] sm:$0xff]  ;;  %v15469_v18 = vld [vmem:[#allocation58_spill] sm:$0xff] }
 0x2e1   : > { %v2023_v30 = vsel %vm1761_vm1, %v1927_v4, %v15453_v31  ;;  %vm1754_vm0 = vcmp.lt.f32.partialorder %v9729_v39, 0.0  ;;  %v1954_v8 = vmul.f32 %v9755_v41, %v15454_v50  ;;  %v9882_v58 = vadd.f32 %v9443_v10, %v1692_v20  ;;  %v15467_v54 = vld [vmem:[#allocation48_spill] sm:$0xff]  ;;  %v15470_v24 = vld [vmem:[#allocation21_spill] sm:$0xff] }
 0x2e2   : > { %v1933_v51 = vmul.f32 %v7694_v63, %v15418_v46  ;;  %v2025_v2 = vsel %vm1763_vm8, %v1929_v22, %v15455_v49  ;;  %2097 = vst.msk [vmem:[#allocation2 + $0x150] sm:$0xff] %vm1080_vm2, %v2023_v30  ;;  %vm1756_vm1 = vcmp.lt.f32.partialorder %v9755_v41, 0.0  ;;  %v9891_v28 = vadd.f32 %v9443_v10, %v1694_v14  ;;  %v7700_v47 = vpop.eup %7699  ;;  %v15468_v44 = vld [vmem:[#allocation16_spill] sm:$0xff]  ;;  %v15471_v60 = vld [vmem:[#allocation17_spill] sm:$0xff]  ;;  %v15477_v41 = vld [vmem:[#allocation67_spill] sm:$0xff] }
 0x2e3   : > { %7713 = vrcp.f32 %v15456_v62  ;;  %v1935_v42 = vmul.f32 %v7696_v45, %v15457_v38  ;;  %v2027_v46 = vsel %vm1765_vm9, %v1931_v34, %v15458_v29  ;;  %2099 = vst.msk [vmem:[#allocation2 + $0x170] sm:$0xff] %vm1080_vm2, %v2025_v2  ;;  %vm1758_vm5 = vcmp.lt.f32.partialorder %v9767_v7, 0.0  ;;  %v7702_v56 = vpop.eup %7701  ;;  %v15472_v34 = vld [vmem:[#allocation20_spill] sm:$0xff] }
 0x2e4   : > { %v1832_v61 = vmin.f32 %v9882_v58, 0.0  ;;  %vm1522_vm8 = vcmp.eq.f32.partialorder %v15459_v52, inf  ;;  %v1937_v57 = vmul.f32 %v7698_v33, %v15460_v37  ;;  %v2029_v55 = vsel %vm1767_vm10, %v1933_v51, %v15461_v15  ;;  %2101 = vst.msk [vmem:[#allocation2 + $0x190] sm:$0xff] %vm1080_vm2, %v2027_v46  ;;  %v7704_v6 = vpop.eup %7703  ;;  %v15473_v50 = vld [vmem:[#allocation60_spill] sm:$0xff]  ;;  %v15475_v33 = vld [vmem:[#allocation63_spill] sm:$0xff] }
 0x2e5   : > { %v1956_v23 = vmul.f32 %v9767_v7, %v15462_v48  ;;  %v1696_v36 = vmul.f32 %v15464_v0, %v15463_v1  ;;  %vm1524_vm9 = vcmp.eq.f32.partialorder %v15459_v52, 0.0  ;;  %v1939_v12 = vmul.f32 %v7700_v47, %v15465_v9  ;;  %2103 = vst.msk [vmem:[#allocation2 + $0x1b0] sm:$0xff] %vm1080_vm2, %v2029_v55  ;;  %v9972_v55 = vld [vmem:[#allocation2 + $0x30] sm:$0xff]  ;;  %v15482_v0 = vld [vmem:[#allocation75_spill] sm:$0xff] }
 0x2e6   : > { %v2031_v21 = vsel %vm1769_vm11, %v1935_v42, %v15466_v17  ;;  %v1884_v16 = vmul.f32 1.442695, %v1832_v61  ;;  %v1834_v4 = vmin.f32 %v9891_v28, 0.0  ;;  %v1916_v11 = vmul.f32 %v7702_v56, %v15467_v54  ;;  %v7706_v40 = vpop.eup %7705  ;;  %v15479_v48 = vld [vmem:[#allocation93_spill] sm:$0xff]  ;;  %v15483_v56 = vld [vmem:[#allocation23_spill] sm:$0xff] }
 0x2e7   : > { %v2033_v20 = vsel %vm1771_vm12, %v1937_v57, %v15468_v44  ;;  %2105 = vst.msk [vmem:[#allocation2 + $0x1d0] sm:$0xff] %vm1080_vm2, %v2031_v21  ;;  %v1986_v22 = vadd.f32 %v1954_v8, %v15469_v18  ;;  %v1958_v13 = vmul.f32 %v9808_v26, %v15470_v24  ;;  %v1918_v43 = vmul.f32 %v7704_v6, %v15442_v5  ;;  %v7708_v32 = vpop.eup %7707  ;;  %v15478_v57 = vld [vmem:[#allocation82_spill] sm:$0xff]  ;;  %v15481_v7 = vld [vmem:[#allocation97_spill] sm:$0xff]  ;;  %v15484_v17 = vld [vmem:[#allocation95_spill] sm:$0xff] }
 0x2e8   : > { %v2035_v14 = vsel %vm1773_vm13, %v1939_v12, %v15471_v60  ;;  %2107 = vst.msk [vmem:[#allocation2 + $0x1f0] sm:$0xff] %vm1080_vm2, %v2033_v20  ;;  %7715 = vpow2.f32 %v1884_v16  ;;  %v1888_v63 = vmul.f32 1.442695, %v1834_v4  ;;  %v2012_v31 = vsel %vm1750_vm15, %v1916_v11, %v15472_v34  ;;  %v7710_v35 = vpop.eup %7709  ;;  %v15485_v16 = vld [vmem:[#allocation26_spill] sm:$0xff] }
 0x2e9   : > { %v1920_v30 = vmul.f32 %v7706_v40, %v15445_v53  ;;  %2109 = vst.msk [vmem:[#allocation2 + $0x210] sm:$0xff] %vm1080_vm2, %v2035_v14  ;;  %v1988_v8 = vadd.f32 %v1956_v23, %v15473_v50  ;;  %v9938_v5 = vadd.f32 %v9443_v10, %v1696_v36  ;;  %2086 = vst.msk [vmem:[#allocation2 + $0xa8] sm:$0xff] %vm1080_vm2, %v2012_v31  ;;  %vm1760_vm10 = vcmp.lt.f32.partialorder %v9808_v26, 0.0  ;;  %v15480_v23 = vld [vmem:[#allocation84_spill] sm:$0xff]  ;;  %v15491_v31 = vld [vmem:[#allocation27_spill] sm:$0xff] }
 0x2ea   : > { %v2014_v45 = vsel %vm1752_vm3, %v1918_v43, %v9837_v27  ;;  %v1922_v51 = vmul.f32 %v7708_v32, %v15469_v18  ;;  %7717 = vpow2.f32 %v1888_v63  ;;  %v1509_v53 = vsel %vm1508_vm14, %v15446_v19, %v15474_v3  ;;  %v7712_v49 = vpop.eup %7711  ;;  %v15487_v18 = vld [vmem:[#allocation72_spill] sm:$0xff]  ;;  %v15488_v43 = vld [vmem:[#allocation91_spill] sm:$0xff] }
 0x2eb   : > { %2088 = vst.msk [vmem:[#allocation2 + $0xc8] sm:$0xff] %vm1080_vm2, %v2014_v45  ;;  %v2016_v2 = vsel %vm1754_vm0, %v1920_v30, %v9852_v59  ;;  %v1924_v62 = vmul.f32 %v7710_v35, %v15473_v50  ;;  %v1836_v25 = vmin.f32 %v9938_v5, 0.0  ;;  %v1926_v38 = vmul.f32 %v7712_v49, %v15475_v33  ;;  %v15490_v63 = vld [vmem:[#allocation68_spill] sm:$0xff]  ;;  %v15493_v49 = vld [vmem:[#allocation30_spill] sm:$0xff] }
 0x2ec   : > { %2090 = vst.msk [vmem:[#allocation2 + $0xe8] sm:$0xff] %vm1080_vm2, %v2016_v2  ;;  %v2018_v27 = vsel %vm1756_vm1, %v1922_v51, %v1986_v22  ;;  %v1990_v42 = vadd.f32 %v1958_v13, %v15475_v33  ;;  %v15476_v29 = vand.u32 2147483648, %v15446_v19  ;;  %v1521_v47 = vmul.f32 %v15477_v41, %v15459_v52  ;;  %v9974_v19 = vld [vmem:[#allocation2 + $0x28] sm:$0xff]  ;;  %v15492_v51 = vld [vmem:[#allocation73_spill] sm:$0xff] }
 0x2ed   : > { %v7714_v59 = vpop.eup %7713  ;;  %2092 = vst.msk [vmem:[#allocation2 + $0x108] sm:$0xff] %vm1080_vm2, %v2018_v27  ;;  %v2020_v26 = vsel %vm1758_vm5, %v1924_v62, %v1988_v8  ;;  %v1892_v46 = vmul.f32 1.442695, %v1836_v25  ;;  %v9978_v1 = vmul.f32 %v15480_v23, %v15479_v48  ;;  %v9982_v36 = vmul.f32 %v15482_v0, %v15481_v7  ;;  %v15494_v62 = vld [vmem:[#allocation29_spill] sm:$0xff] }
 0x2ee   : > { %v1512_v39 = vsel %vm1510_vm4, %v15476_v29, %v1509_v53  ;;  %2094 = vst.msk [vmem:[#allocation2 + $0x128] sm:$0xff] %vm1080_vm2, %v2020_v26  ;;  %v2022_v37 = vsel %vm1760_vm10, %v1926_v38, %v1990_v42  ;;  %v1698_v15 = vmul.f32 %v7714_v59, %v15478_v57  ;;  %v1960_v9 = vmul.f32 %v9882_v58, %v15483_v56  ;;  %v15495_v38 = vld [vmem:[#allocation78_spill] sm:$0xff] }
 0x2ef   : > { %v1562_v61 = vadd.f32 1e-08, %v1512_v39  ;;  %2096 = vst.msk [vmem:[#allocation2 + $0x148] sm:$0xff] %vm1080_vm2, %v2022_v37  ;;  %7719 = vpow2.f32 %v1892_v46  ;;  %v1523_v12 = vsel %vm1522_vm8, %v15459_v52, %v1521_v47  ;;  %v9992_v21 = vmul.f32 %v15484_v17, %v15481_v7  ;;  %v15496_v39 = vld [vmem:[#allocation79_spill] sm:$0xff]  ;;  %v15497_v47 = vld [vmem:[#allocation92_spill] sm:$0xff] }
 0x2f0   : > { %v1962_v4 = vmul.f32 %v9891_v28, %v15485_v16  ;;  %v9997_v6 = vadd.f32 %v9443_v10, %v1698_v15  ;;  %v15486_v54 = vand.u32 2147483648, %v15459_v52  ;;  %v2781_v20 = vmul.f32 %v15480_v23, %v9972_v55  ;;  %v15489_v52 = vld [vmem:[#allocation101_spill] sm:$0xff] }
 0x2f1   : > { %7721 = vrcp.f32 %v1562_v61  ;;  %v2291_v22 = vmul.f32 %v15487_v18, %v9974_v19  ;;  %v2292_v24 = vmul.f32 %v15487_v18, %v9972_v55  ;;  %vm1762_vm0 = vcmp.lt.f32.partialorder %v9882_v58, 0.0 }
 0x2f2   : > { %v1526_v11 = vsel %vm1524_vm9, %v15486_v54, %v1523_v12  ;;  %v7716_v13 = vpop.eup %7715  ;;  %v1838_v40 = vmin.f32 %v9997_v6, 0.0  ;;  %v2880_v60 = vmul.f32 %v15488_v43, %v9972_v55  ;;  %v10015_v14 = vmul.f32 %v15489_v52, %v15481_v7 }
 0x2f3   : > { %v1564_v44 = vadd.f32 1e-08, %v1526_v11  ;;  %v1928_v32 = vmul.f32 %v7716_v13, %v15490_v63  ;;  %v1992_v34 = vadd.f32 %v1960_v9, %v15490_v63  ;;  %v1964_v30 = vmul.f32 %v9938_v5, %v15491_v31  ;;  %v15498_v9 = vld [vmem:[#allocation83_spill] sm:$0xff]  ;;  %v15500_v13 = vld [vmem:[#allocation81_spill] sm:$0xff] }
 0x2f4   : > { %v7718_v50 = vpop.eup %7717  ;;  %vm1764_vm11 = vcmp.lt.f32.partialorder %v9891_v28, 0.0  ;;  %v1896_v58 = vmul.f32 1.442695, %v1838_v40  ;;  %v2357_v8 = vrot.slane %v2291_v22, 1  ;;  %v2358_v35 = vrot.slane %v2292_v24, 1 }
 0x2f5   : > { %7723 = vrcp.f32 %v1564_v44  ;;  %v2024_v45 = vsel %vm1762_vm0, %v1928_v32, %v1992_v34  ;;  %v1930_v3 = vmul.f32 %v7718_v50, %v15492_v51  ;;  %v1994_v53 = vadd.f32 %v1962_v4, %v15492_v51  ;;  %v15499_v4 = vld [vmem:[#allocation86_spill] sm:$0xff] }
 0x2f6   : > { %v2829_v2 = vadd.f32 %v2781_v20, %v15493_v49  ;;  %2098 = vst.msk [vmem:[#allocation2 + $0x168] sm:$0xff] %vm1080_vm2, %v2024_v45  ;;  %7725 = vpow2.f32 %v1896_v58  ;;  %v1966_v25 = vmul.f32 %v9997_v6, %v15494_v62  ;;  %v2944_v27 = vrot.slane %v2880_v60, 1  ;;  %v10051_v20 = vld [vmem:[#allocation2 + $0x50] sm:$0xff]  ;;  %v10063_v58 = vld [vmem:[#allocation2 + $0x48] sm:$0xff] }
 0x2f7   : > { %v2879_v28 = vmul.f32 %v15488_v43, %v9974_v19  ;;  %v2026_v33 = vsel %vm1764_vm11, %v1930_v3, %v1994_v53  ;;  %vm1766_vm12 = vcmp.lt.f32.partialorder %v9938_v5, 0.0  ;;  %v1996_v42 = vadd.f32 %v1964_v30, %v15495_v38  ;;  %v15501_v5 = vld [vmem:[#allocation89_spill] sm:$0xff] }
 0x2f8   : > { %v2505_v29 = vmul.f32 %v15482_v0, %v9974_v19  ;;  %2100 = vst.msk [vmem:[#allocation2 + $0x188] sm:$0xff] %vm1080_vm2, %v2026_v33  ;;  %v2193_v59 = vmul.f32 %v15496_v39, %v9974_v19  ;;  %v2359_v26 = vsel %vm2353_vm6, %v2357_v8, %v2358_v35  ;;  %v2780_v46 = vmul.f32 %v15480_v23, %v9974_v19  ;;  %v15502_v45 = vld [vmem:[#allocation33_spill] sm:$0xff]  ;;  %v15506_v33 = vld [vmem:[#allocation100_spill] sm:$0xff] }
 0x2f9   : > { %v2506_v61 = vmul.f32 %v15482_v0, %v9972_v55  ;;  %v7720_v41 = vpop.eup %7719  ;;  %v2453_v37 = vadd.f32 %v2357_v8, %v15497_v47  ;;  %v2943_v57 = vrot.slane %v2879_v28, 1  ;;  %v3091_v15 = vmul.f32 %v15484_v17, %v9974_v19  ;;  %v15508_v47 = vld [vmem:[#allocation87_spill] sm:$0xff] }
 0x2fa   : > { %v3092_v48 = vmul.f32 %v15484_v17, %v9972_v55  ;;  %v1932_v56 = vmul.f32 %v7720_v41, %v15495_v38  ;;  %vm1768_vm13 = vcmp.lt.f32.partialorder %v9997_v6, 0.0  ;;  %v1998_v12 = vadd.f32 %v1966_v25, %v15498_v9  ;;  %v15504_v25 = vld [vmem:[#allocation96_spill] sm:$0xff] }
 0x2fb   : > { %v7722_v7 = vpop.eup %7721  ;;  %v3041_v16 = vadd.f32 %v2944_v27, %v2829_v2  ;;  %v2454_v11 = vadd.f32 %v2359_v26, %v2193_v59  ;;  %v2604_v44 = vrot.slane %v2505_v29, 2  ;;  %v2605_v22 = vrot.slane %v2506_v61, 2  ;;  %v15503_v2 = vld [vmem:[#allocation31_spill] sm:$0xff] }
 0x2fc   : > { %v1700_v54 = vmul.f32 %v7722_v7, %v15499_v4  ;;  %v2028_v24 = vsel %vm1766_vm12, %v1932_v56, %v1996_v42  ;;  %v2828_v40 = vadd.f32 %v2780_v46, %v15500_v13  ;;  %v2194_v60 = vmul.f32 %v15496_v39, %v9972_v55 }
 0x2fd   : > { %v3188_v63 = vrot.slane %v3092_v48, 2  ;;  %2102 = vst.msk [vmem:[#allocation2 + $0x1a8] sm:$0xff] %vm1080_vm2, %v2028_v24  ;;  %v2730_v31 = vadd.f32 %v2604_v44, %v2453_v37  ;;  %v2945_v30 = vsel %vm2353_vm6, %v2943_v57, %v2944_v27  ;;  %v3187_v50 = vrot.slane %v3091_v15, 2  ;;  %v15509_v48 = vld [vmem:[#allocation32_spill] sm:$0xff] }
 0x2fe   : > { %v10060_v34 = vadd.f32 %v9443_v10, %v1700_v54  ;;  %v3039_v51 = vadd.f32 %v2943_v57, %v15502_v45  ;;  %v2455_v3 = vadd.f32 %v2358_v35, %v2194_v60  ;;  %v10069_v53 = vmul.f32 %v15488_v43, %v10051_v20 }
 0x2ff   : > { %v7724_v32 = vpop.eup %7723  ;;  %v15505_v28 = vrot.slane %v15504_v25, 2  ;;  %v15507_v38 = vrot.slane %v15506_v33, 2  ;;  %v3040_v59 = vadd.f32 %v2945_v30, %v2828_v40  ;;  %v2783_v26 = vmul.f32 %v15480_v23, %v10063_v58 }
 0x300   : > { %v1702_v8 = vmul.f32 %v7724_v32, %v15501_v5  ;;  %v1840_v49 = vmin.f32 %v10060_v34, 0.0  ;;  %v1968_v62 = vmul.f32 %v10060_v34, %v15503_v2  ;;  %v7726_v29 = vpop.eup %7725  ;;  %v2784_v46 = vmul.f32 %v15480_v23, %v10051_v20 }
 0x301   : > { %v2608_v27 = vsel %vm2598_vm7, %v2605_v22, %v15505_v28  ;;  %v3191_v42 = vsel %vm2598_vm7, %v3188_v63, %v15507_v38  ;;  %v1934_v61 = vmul.f32 %v7726_v29, %v15498_v9  ;;  %v3315_v7 = vadd.f32 %v3187_v50, %v3039_v51  ;;  %v15510_v9 = vld [vmem:[#allocation98_spill] sm:$0xff]  ;;  %v10141_v29 = vld [vmem:[#allocation2 + $0x70] sm:$0xff] }
 0x302   : > { %v10081_v35 = vadd.f32 %v9443_v10, %v1702_v8  ;;  %v1900_v41 = vmul.f32 1.442695, %v1840_v49  ;;  %v10089_v37 = vadd.f32 %v1968_v62, %v15508_v47  ;;  %v3317_v57 = vadd.f32 %v3191_v42, %v3041_v16  ;;  %v15511_v16 = vld [vmem:[#allocation90_spill] sm:$0xff]  ;;  %v15513_v8 = vld [vmem:[#allocation103_spill] sm:$0xff] }
 0x303   : > { %v2732_v56 = vadd.f32 %v2608_v27, %v2455_v3  ;;  %v2030_v4 = vsel %vm1768_vm13, %v1934_v61, %v1998_v12  ;;  %v2947_v54 = vrot.slane %v10069_v53, 1  ;;  %v3369_v24 = vmul.f32 %v15510_v9, %v10051_v20  ;;  %v15512_v12 = vld [vmem:[#allocation99_spill] sm:$0xff] }
 0x304   : > { %v1842_v15 = vmin.f32 %v10081_v35, 0.0  ;;  %v1970_v10 = vmul.f32 %v10081_v35, %v15509_v48  ;;  %7727 = vpow2.f32 %v1900_v41  ;;  %2104 = vst.msk [vmem:[#allocation2 + $0x1c8] sm:$0xff] %vm1080_vm2, %v2030_v4  ;;  %v2606_v60 = vsel %vm2598_vm7, %v2604_v44, %v2605_v22  ;;  %v15514_v44 = vld [vmem:[#allocation107_spill] sm:$0xff] }
 0x305   : > { %v10106_v32 = vmul.f32 %v15487_v18, %v10063_v58  ;;  %v2731_v6 = vadd.f32 %v2606_v60, %v2454_v11  ;;  %v3468_v30 = vmul.f32 %v15512_v12, %v10051_v20  ;;  %v10112_v5 = vmul.f32 %v15487_v18, %v10051_v20 }
 0x306   : > { %v1904_v13 = vmul.f32 1.442695, %v1842_v15  ;;  %v10101_v40 = vadd.f32 %v1970_v10, %v15511_v16  ;;  %v10115_v45 = vadd.f32 %v15513_v8, %v2730_v31  ;;  %v2832_v51 = vadd.f32 %v2784_v46, %v2732_v56  ;;  %v10143_v46 = vld [vmem:[#allocation2 + $0x68] sm:$0xff]  ;;  %v15515_v15 = vld [vmem:[#allocation102_spill] sm:$0xff] }
 0x307   : > { %v3189_v3 = vsel %vm2598_vm7, %v3187_v50, %v3188_v63  ;;  %v3415_v22 = vadd.f32 %v15514_v44, %v3315_v7  ;;  %v3417_v49 = vadd.f32 %v3369_v24, %v3317_v57  ;;  %v2361_v2 = vrot.slane %v10112_v5, 1 }
 0x308   : > { %7729 = vpow2.f32 %v1904_v13  ;;  %v10122_v11 = vmul.f32 %v15488_v43, %v10063_v58  ;;  %v3467_v62 = vmul.f32 %v15512_v12, %v10063_v58  ;;  %v3316_v25 = vadd.f32 %v3189_v3, %v3040_v59  ;;  %v15516_v13 = vld [vmem:[#allocation104_spill] sm:$0xff] }
 0x309   : > { %v2360_v31 = vrot.slane %v10106_v32, 1  ;;  %v2197_v28 = vmul.f32 %v15496_v39, %v10051_v20  ;;  %v10131_v63 = vmul.f32 %v15482_v0, %v10051_v20  ;;  %vm1770_vm14 = vcmp.lt.f32.partialorder %v10060_v34, 0.0 }
 0x30a   : > { %v2831_v50 = vadd.f32 %v2783_v26, %v2731_v6  ;;  %v3532_v27 = vrot.slane %v3468_v30, 1  ;;  %v3679_v33 = vmul.f32 %v15489_v52, %v10063_v58  ;;  %vm1772_vm15 = vcmp.lt.f32.partialorder %v10081_v35, 0.0 }
 0x30b   : > { %v3044_v38 = vadd.f32 %v2947_v54, %v2832_v51  ;;  %v3368_v42 = vmul.f32 %v15510_v9, %v10063_v58  ;;  %v2458_v59 = vadd.f32 %v2361_v2, %v2197_v28  ;;  %v2946_v26 = vrot.slane %v10122_v11, 1 }
 0x30c   : > { %v3629_v61 = vadd.f32 %v3532_v27, %v3417_v49  ;;  %v3531_v41 = vrot.slane %v3467_v62, 1  ;;  %v2610_v57 = vrot.slane %v10131_v63, 2  ;;  %v2456_v48 = vadd.f32 %v2360_v31, %v15515_v15 }
 0x30d   : > { %v3416_v10 = vadd.f32 %v3368_v42, %v3316_v25  ;;  %v10150_v7 = vmul.f32 %v15484_v17, %v10051_v20  ;;  %v3680_v56 = vmul.f32 %v15489_v52, %v10051_v20  ;;  %v3775_v24 = vrot.slane %v3679_v33, 2  ;;  %v15518_v42 = vld [vmem:[#allocation105_spill] sm:$0xff] }
 0x30e   : > { %v7728_v4 = vpop.eup %7727  ;;  %v15517_v60 = vrot.slane %v15516_v13, 2  ;;  %v2787_v6 = vmul.f32 %v15480_v23, %v10141_v29  ;;  %v2295_v30 = vmul.f32 %v15487_v18, %v10143_v46  ;;  %v3533_v44 = vsel %vm2353_vm6, %v3531_v41, %v3532_v27 }
 0x30f   : > { %v1936_v5 = vmul.f32 %v7728_v4, %v15508_v47  ;;  %v3193_v51 = vrot.slane %v10150_v7, 2  ;;  %v3776_v3 = vrot.slane %v3680_v56, 2  ;;  %v10168_v49 = vmul.f32 %v15487_v18, %v10141_v29  ;;  %v15520_v4 = vld [vmem:[#allocation108_spill] sm:$0xff] }
 0x310   : > { %v2613_v32 = vsel %vm2598_vm7, %v2610_v57, %v15517_v60  ;;  %v2363_v11 = vrot.slane %v2295_v30, 1  ;;  %v2508_v62 = vmul.f32 %v15482_v0, %v10063_v58  ;;  %v3627_v47 = vadd.f32 %v3531_v41, %v3415_v22  ;;  %v15522_v60 = vld [vmem:[#allocation111_spill] sm:$0xff] }
 0x311   : > { %v2735_v8 = vadd.f32 %v2613_v32, %v2458_v59  ;;  %v2032_v28 = vsel %vm1770_vm14, %v1936_v5, %v10089_v37  ;;  %v15519_v59 = vrot.slane %v15518_v42, 2  ;;  %v3372_v56 = vmul.f32 %v15510_v9, %v10141_v29 }
 0x312   : > { %v7730_v25 = vpop.eup %7729  ;;  %2106 = vst.msk [vmem:[#allocation2 + $0x1e8] sm:$0xff] %vm1080_vm2, %v2032_v28  ;;  %v15521_v13 = vrot.slane %v15520_v4, 2  ;;  %v3628_v37 = vadd.f32 %v3533_v44, %v3416_v10  ;;  %v2364_v41 = vrot.slane %v10168_v49, 1  ;;  %v10191_v32 = vadd.f32 %v2363_v11, %v15522_v60 }
 0x313   : > { %v10175_v33 = vadd.f32 %v2787_v6, %v2735_v8  ;;  %v3196_v27 = vsel %vm2598_vm7, %v3193_v51, %v15519_v59  ;;  %v1938_v15 = vmul.f32 %v7730_v25, %v15511_v16  ;;  %v2199_v6 = vmul.f32 %v15496_v39, %v10143_v46 }
 0x314   : > { %v3320_v7 = vadd.f32 %v3196_v27, %v3044_v38  ;;  %v3779_v34 = vsel %vm2598_vm7, %v3776_v3, %v15521_v13  ;;  %v2609_v30 = vrot.slane %v2508_v62, 2  ;;  %v2362_v10 = vsel %vm2353_vm6, %v2360_v31, %v2361_v2  ;;  %v10213_v62 = vld [vmem:[%s14806_s9] ss:$0 sm:$0xff] }
 0x315   : > { %v10187_v22 = vadd.f32 %v3779_v34, %v3629_v61  ;;  %v2034_v16 = vsel %vm1772_vm15, %v1938_v15, %v10101_v40  ;;  %v2196_v61 = vmul.f32 %v15496_v39, %v10063_v58  ;;  %v3903_v5 = vadd.f32 %v3775_v24, %v3627_v47 }
 0x316   : > { %v10196_v38 = vadd.f32 %v3372_v56, %v3320_v7  ;;  %2108 = vst.msk [vmem:[#allocation2 + $0x208] sm:$0xff] %vm1080_vm2, %v2034_v16  ;;  %v2365_v8 = vsel %vm2353_vm6, %v2363_v11, %v2364_v41  ;;  %v3777_v44 = vsel %vm2598_vm7, %v3775_v24, %v3776_v3  ;;  %v2733_v40 = vadd.f32 %v2609_v30, %v2456_v48  ;;  %v8027_v48 = vld [vmem:[#allocation2 + $0x60] sm:$0xff]  ;;  %v10246_v16 = vld [vmem:[#allocation2 + $0x90] sm:$0xff] }
 0x317   : > { %v10206_v35 = vadd.f32 %v2365_v8, %v2199_v6  ;;  %v2883_v49 = vmul.f32 %v15488_v43, %v10143_v46  ;;  %v2948_v2 = vsel %vm2353_vm6, %v2946_v26, %v2947_v54  ;;  %v3042_v31 = vadd.f32 %v2946_v26, %v10115_v45 }
 0x318   : > { %v3904_v11 = vadd.f32 %v3777_v44, %v3628_v37  ;;  %v3094_v24 = vmul.f32 %v15484_v17, %v10063_v58  ;;  %v3043_v3 = vadd.f32 %v2948_v2, %v2831_v50  ;;  %v3370_v25 = vmul.f32 %v8027_v48, %v15510_v9 }
 0x319   : > { %v2833_v28 = vadd.f32 %v9978_v1, %v2733_v40  ;;  %v2949_v47 = vrot.slane %v2883_v49, 1  ;;  %v2457_v42 = vadd.f32 %v2362_v10, %v2196_v61  ;;  %v3469_v53 = vmul.f32 %v15512_v12, %v10143_v46 }
 0x31a   : > { %v3192_v59 = vrot.slane %v3094_v24, 2  ;;  %v2617_v54 = vrot.slane %v9982_v36, 2  ;;  %v3958_v45 = vmul.f32 %v10213_v62, %v3903_v5  ;;  %v3200_v27 = vrot.slane %v9992_v21, 2  ;;  %v10262_v24 = vld [vmem:[#allocation2 + $0x80] sm:$0xff] }
 0x31b   : > { %v10227_v26 = vadd.f32 %v2949_v47, %v2833_v28  ;;  %v3783_v50 = vrot.slane %v10015_v14, 2  ;;  %v3959_v15 = vmul.f32 %v10213_v62, %v3904_v11  ;;  %v3682_v56 = vmul.f32 %v15489_v52, %v10143_v46 }
 0x31c   : > { %v3194_v1 = vsel %vm2598_vm7, %v3192_v59, %v3193_v51  ;;  %v3318_v7 = vadd.f32 %v3192_v59, %v3042_v31  ;;  %v2611_v36 = vsel %vm2598_vm7, %v2609_v30, %v2610_v57  ;;  %v2786_v4 = vmul.f32 %v15480_v23, %v10143_v46 }
 0x31d   : > { %v3319_v13 = vadd.f32 %v3194_v1, %v3043_v3  ;;  %v2200_v21 = vmul.f32 %v15496_v39, %v10141_v29  ;;  %v2734_v14 = vadd.f32 %v2611_v36, %v2457_v42  ;;  %v3534_v37 = vrot.slane %v3469_v53, 1 }
 0x31e   : > { %v3418_v34 = vadd.f32 %v3370_v25, %v3318_v7  ;;  %v2512_v51 = vmul.f32 %v15482_v0, %v10141_v29  ;;  %v3371_v60 = vmul.f32 %v15510_v9, %v10143_v46  ;;  %v2884_v57 = vmul.f32 %v15488_v43, %v10141_v29 }
 0x31f   : > { %v2461_v63 = vadd.f32 %v2364_v41, %v2200_v21  ;;  %v10252_v6 = vmul.f32 %v15484_v17, %v10141_v29  ;;  %v3780_v61 = vrot.slane %v3682_v56, 2  ;;  %v3470_v5 = vmul.f32 %v15512_v12, %v10141_v29 }
 0x320   : > { %v3630_v30 = vadd.f32 %v3534_v37, %v3418_v34  ;;  %v2615_v10 = vrot.slane %v2512_v51, 2  ;;  %v3419_v8 = vadd.f32 %v3371_v60, %v3319_v13  ;;  %v2950_v44 = vrot.slane %v2884_v57, 1 }
 0x321   : > { %v3198_v40 = vrot.slane %v10252_v6, 2  ;;  %v3683_v41 = vmul.f32 %v15489_v52, %v10141_v29  ;;  %v2790_v31 = vmul.f32 %v15480_v23, %v10246_v16  ;;  %v3535_v11 = vrot.slane %v3470_v5, 1 }
 0x322   : > { %v3906_v49 = vadd.f32 %v3780_v61, %v3630_v30  ;;  %v2618_v2 = vsel %vm2598_vm7, %v2615_v10, %v2617_v54  ;;  %v2951_v48 = vsel %vm2353_vm6, %v2949_v47, %v2950_v44  ;;  %v3047_v25 = vadd.f32 %v2950_v44, %v10175_v33  ;;  %v10277_v33 = vld [vmem:[#allocation2 + $0x88] sm:$0xff] }
 0x323   : > { %v2738_v3 = vadd.f32 %v2618_v2, %v2461_v63  ;;  %v3201_v28 = vsel %vm2598_vm7, %v3198_v40, %v3200_v27  ;;  %v3375_v42 = vmul.f32 %v15510_v9, %v10246_v16  ;;  %v3536_v59 = vsel %vm2353_vm6, %v3534_v37, %v3535_v11  ;;  %v10282_v27 = vld [vmem:[%s14807_s10] ss:$0 sm:$0xff] }
 0x324   : > { %v3632_v53 = vadd.f32 %v3535_v11, %v10196_v38  ;;  %v3781_v54 = vrot.slane %v3683_v41, 2  ;;  %v3323_v7 = vadd.f32 %v3201_v28, %v3047_v25  ;;  %v3631_v56 = vadd.f32 %v3536_v59, %v3419_v8 }
 0x325   : > { %v10273_v1 = vadd.f32 %v2790_v31, %v2738_v3  ;;  %v4077_v47 = vmul.f32 %v10262_v24, %v10262_v24  ;;  %v3960_v36 = vmul.f32 %v10213_v62, %v10187_v22  ;;  %v2834_v13 = vadd.f32 %v2786_v4, %v2734_v14 }
 0x326   : > { %v3782_v38 = vsel %vm2598_vm7, %v3780_v61, %v3781_v54  ;;  %v3784_v21 = vsel %vm2598_vm7, %v3781_v54, %v3783_v50  ;;  %v10288_v34 = vadd.f32 %v3375_v42, %v3323_v7  ;;  %v10293_v63 = vmul.f32 %v15487_v18, %v10277_v33 }
 0x327   : > { %v3907_v37 = vadd.f32 %v3782_v38, %v3631_v56  ;;  %v3908_v51 = vadd.f32 %v3784_v21, %v3632_v53  ;;  %v4181_v60 = vsel %vm1080_vm2, %v4077_v47, 0.0  ;;  %v2298_v57 = vmul.f32 %v15487_v18, %v10246_v16 }
 0x328   : > { %4182 = vadd.xlane.f32.xlu1 %v4181_v60  ;;  %v2511_v22 = vmul.f32 %v15482_v0, %v10143_v46  ;;  %v10300_v4 = vadd.f32 %v10282_v27, %v3958_v45  ;;  %v10303_v50 = vadd.f32 %v10282_v27, %v3959_v15  ;;  %v2788_v14 = vmul.f32 %v15480_v23, %v10262_v24 }
 0x329   : > { %v10309_v30 = vmul.f32 %v15488_v43, %v10277_v33  ;;  %v14941_v61 = vrot.slane %v10293_v63, 1  ;;  %v2367_v5 = vrot.slane %v2298_v57, 1  ;;  %v3046_v44 = vadd.f32 %v2951_v48, %v2834_v13 }
 0x32a   : > { %15523 = vst [vmem:[#allocation22_spill] sm:$0xff] %v10300_v4  ;;  %15524 = vst [vmem:[#allocation24_spill] sm:$0xff] %v10303_v50  ;;  %v2614_v8 = vrot.slane %v2511_v22, 2  ;;  %v10313_v41 = vadd.f32 %v10282_v27, %v3960_v36  ;;  %v2202_v45 = vmul.f32 %v15496_v39, %v10277_v33  ;;  %v3097_v15 = vmul.f32 %v15484_v17, %v10143_v46  ;;  %v2129_v22 = vld [vmem:[#allocation2 + $0x98] sm:$0xff] }
 0x32b   : > { %vm5435_vm3 = vcmask 1040384   ;;  %v2368_v2 = vsel %vm2353_vm6, %v14941_v61, %v2367_v5  ;;  %v5436_v3 = vrot.slane %v10300_v4, 7  ;;  %v2789_v28 = vmul.f32 %v15480_v23, %v10277_v33 }
 0x32c   : > { %15525 = vst [vmem:[#allocation25_spill] sm:$0xff] %v10313_v41  ;;  %v2616_v31 = vsel %vm2598_vm7, %v2614_v8, %v2615_v10  ;;  %v2736_v11 = vadd.f32 %v2614_v8, %v10191_v32  ;;  %v10325_v48 = vadd.f32 %v2368_v2, %v2202_v45  ;;  %v5437_v42 = vrot.slane %v10303_v50, 7  ;;  %v11336_v50 = vld [vmem:[#allocation2 + $0x1b0] sm:$0xff] }
 0x32d   : > { %v2737_v25 = vadd.f32 %v2616_v31, %v10206_v35  ;;  %v2952_v53 = vrot.slane %v10309_v30, 1  ;;  %v3197_v54 = vrot.slane %v3097_v15, 2  ;;  %v5439_v7 = vrot.slane %v10313_v41, 7 }
 0x32e   : > { %v2836_v59 = vadd.f32 %v2788_v14, %v2736_v11  ;;  %v3373_v32 = vmul.f32 %v15510_v9, %v10262_v24  ;;  %v10339_v56 = vmul.f32 %v15512_v12, %v10277_v33  ;;  %v3961_v35 = vmul.f32 %v10213_v62, %v3906_v49 }
 0x32f   : > { %v10335_v10 = vadd.f32 %v2789_v28, %v2737_v25  ;;  %v3962_v47 = vmul.f32 %v10213_v62, %v3907_v37  ;;  %v3199_v13 = vsel %vm2598_vm7, %v3197_v54, %v3198_v40  ;;  %v3321_v38 = vadd.f32 %v3197_v54, %v10227_v26 }
 0x330   : > { %v10343_v36 = vadd.f32 %v2952_v53, %v2836_v59  ;;  %v3322_v21 = vadd.f32 %v3199_v13, %v3046_v44  ;;  %v3374_v60 = vmul.f32 %v15510_v9, %v10277_v33  ;;  %v3685_v57 = vmul.f32 %v15489_v52, %v10277_v33 }
 0x331   : > { %v5438_v49 = vsel %vm5435_vm3, %v5436_v3, %v5437_v42  ;;  %v2516_v37 = vmul.f32 %v15482_v0, %v2129_v22  ;;  %v5440_v14 = vsel %vm5435_vm3, %v5437_v42, %v5439_v7  ;;  %v3421_v30 = vadd.f32 %v3373_v32, %v3321_v38 }
 0x332   : > { %v3422_v6 = vadd.f32 %v3374_v60, %v3322_v21  ;;  %v3537_v40 = vrot.slane %v10339_v56, 1  ;;  %v10358_v26 = vadd.f32 %v10282_v27, %v3961_v35  ;;  %v3963_v8 = vmul.f32 %v10213_v62, %v3908_v51 }
 0x333   : > { %v10362_v44 = vadd.f32 %v10282_v27, %v3962_v47  ;;  %v3102_v45 = vmul.f32 %v15484_v17, %v2129_v22  ;;  %v3785_v2 = vrot.slane %v3685_v57, 2  ;;  %v4080_v31 = vmul.f32 %v2129_v22, %v2129_v22 }
 0x334   : > { %15526 = vst [vmem:[#allocation28_spill] sm:$0xff] %v10358_v26  ;;  %v3633_v15 = vadd.f32 %v3537_v40, %v3421_v30  ;;  %v2203_v11 = vmul.f32 %v15496_v39, %v10246_v16  ;;  %v5548_v3 = vsel %vm1080_vm2, %v5438_v49, 0.0  ;;  %v2622_v25 = vrot.slane %v2516_v37, 2  ;;  %v10395_v37 = vld [vmem:[#allocation2 + $0xb8] sm:$0xff] }
 0x335   : > { %15527 = vst [vmem:[#allocation8_spill] sm:$0xff] %v10362_v44  ;;  %v10370_v28 = vmul.f32 %v15482_v0, %v10246_v16  ;;  %v2886_v51 = vmul.f32 %v15488_v43, %v10246_v16  ;;  %v3687_v59 = vmul.f32 %v15489_v52, %v2129_v22  ;;  %v4190_v54 = vsel %vm1080_vm2, %v4080_v31, 0.0 }
 0x336   : > { %v3909_v42 = vadd.f32 %v3785_v2, %v3633_v15  ;;  %v2464_v7 = vadd.f32 %v2367_v5, %v2203_v11  ;;  %v3205_v32 = vrot.slane %v3102_v45, 2  ;;  %4191 = vadd.xlane.f32.xlu0 %v4190_v54  ;;  %v10379_v47 = vmul.f32 %v15484_v17, %v10246_v16  ;;  %v10401_v15 = vld [vmem:[#allocation2 + $0xb0] sm:$0xff] }
 0x337   : > { %v14940_v56 = vrot.slane %v10370_v28, 2  ;;  %v2953_v35 = vrot.slane %v2886_v51, 1  ;;  %v5549_v13 = vsel %vm1080_vm2, %v5440_v14, 0.0  ;;  %v5441_v38 = vrot.slane %v10358_v26, 7 }
 0x338   : > { %v10384_v21 = vadd.f32 %v10282_v27, %v3963_v8  ;;  %v5442_v60 = vrot.slane %v10362_v44, 7  ;;  %v14939_v49 = vrot.slane %v10379_v47, 2  ;;  %v3472_v30 = vmul.f32 %v15512_v12, %v10246_v16 }
 0x339   : > { %v2623_v5 = vsel %vm2598_vm7, %v14940_v56, %v2622_v25  ;;  %v10391_v57 = vsel %vm2353_vm6, %v2952_v53, %v2953_v35  ;;  %v3050_v22 = vadd.f32 %v2953_v35, %v10273_v1  ;;  %v2201_v8 = vmul.f32 %v15496_v39, %v10262_v24 }
 0x33a   : > { %15528 = vst [vmem:[#allocation37_spill] sm:$0xff] %v10384_v21  ;;  %v2741_v14 = vadd.f32 %v2623_v5, %v2464_v7  ;;  %v3788_v45 = vrot.slane %v3687_v59, 2  ;;  %v3206_v53 = vsel %vm2598_vm7, %v14939_v49, %v3205_v32  ;;  %v3686_v1 = vmul.f32 %v15489_v52, %v10246_v16 }
 0x33b   : > { %v5550_v31 = vadd.f32 %v5549_v13, %v5548_v3  ;;  %v5443_v11 = vsel %vm5435_vm3, %v5441_v38, %v5442_v60  ;;  %v5444_v25 = vrot.slane %v10384_v21, 7  ;;  %v3326_v51 = vadd.f32 %v3206_v53, %v3050_v22 }
 0x33c   : > { %v3105_v54 = vmul.f32 %v15484_v17, %v10395_v37  ;;  %v3690_v24 = vmul.f32 %v15489_v52, %v10395_v37  ;;  %v3538_v59 = vrot.slane %v3472_v30, 1  ;;  %v3786_v7 = vrot.slane %v3686_v1, 2 }
 0x33d   : > { %v2793_v32 = vmul.f32 %v15480_v23, %v10401_v15  ;;  %v10418_v35 = vmul.f32 %v15484_v17, %v10401_v15  ;;  %v4067_v3 = vmul.f32 %v9972_v55, %v9972_v55  ;;  %v4066_v13 = vmul.f32 %v9974_v19, %v9974_v19 }
 0x33e   : > { %v3539_v38 = vsel %vm2353_vm6, %v3537_v40, %v3538_v59  ;;  %v3635_v5 = vadd.f32 %v3538_v59, %v10288_v34  ;;  %v3787_v22 = vsel %vm2598_vm7, %v3785_v2, %v3786_v7  ;;  %v3789_v30 = vsel %vm2598_vm7, %v3786_v7, %v3788_v45 }
 0x33f   : > { %v3378_v53 = vmul.f32 %v15510_v9, %v10401_v15  ;;  %v10432_v1 = vmul.f32 %v15512_v12, %v10401_v15  ;;  %v3634_v49 = vadd.f32 %v3539_v38, %v3422_v6  ;;  %v10436_v55 = vmul.f32 %v15489_v52, %v10401_v15 }
 0x340   : > { %v3911_v19 = vadd.f32 %v3789_v30, %v3635_v5  ;;  %v4151_v40 = vsel %vm1080_vm2, %v4067_v3, 0.0  ;;  %v4148_v34 = vsel %vm1080_vm2, %v4066_v13, 0.0  ;;  %v4071_v2 = vmul.f32 %v10051_v20, %v10051_v20 }
 0x341   : > { %v5551_v45 = vsel %vm1080_vm2, %v5443_v11, 0.0  ;;  %v10445_v59 = vmul.f32 %v15488_v43, %v10401_v15  ;;  %v3426_v7 = vadd.f32 %v3378_v53, %v3326_v51  ;;  %v3910_v6 = vadd.f32 %v3787_v22, %v3634_v49  ;;  %4152 = vadd.xlane.f32.xlu0 %v4151_v40  ;;  %4149 = vadd.xlane.f32.xlu1 %v4148_v34  ;;  %v10485_v40 = vld [vmem:[#allocation2 + $0xa8] sm:$0xff] }
 0x342   : > { %v3964_v38 = vmul.f32 %v10213_v62, %v3909_v42  ;;  %v3210_v5 = vrot.slane %v3105_v54, 2  ;;  %v3793_v30 = vrot.slane %v3690_v24, 2  ;;  %v4070_v3 = vmul.f32 %v10063_v58, %v10063_v58 }
 0x343   : > { %v2841_v13 = vadd.f32 %v2793_v32, %v2741_v14  ;;  %v3208_v20 = vrot.slane %v10418_v35, 2  ;;  %v3541_v11 = vrot.slane %v10432_v1, 1  ;;  %v3791_v56 = vrot.slane %v10436_v55, 2 }
 0x344   : > { %v4163_v61 = vsel %vm1080_vm2, %v4071_v2, 0.0  ;;  %v4160_v49 = vsel %vm1080_vm2, %v4070_v3, 0.0  ;;  %v4075_v51 = vmul.f32 %v10141_v29, %v10141_v29  ;;  %v4074_v42 = vmul.f32 %v10143_v46, %v10143_v46 }
 0x345   : > { %v5445_v54 = vsel %vm5435_vm3, %v5442_v60, %v5444_v25  ;;  %v15529_v58 = vrot.slane %v10293_v63, 1  ;;  %v2956_v24 = vrot.slane %v10445_v59, 1  ;;  %v3638_v32 = vadd.f32 %v3541_v11, %v3426_v7  ;;  %4164 = vadd.xlane.f32.xlu0 %v4163_v61  ;;  %4161 = vadd.xlane.f32.xlu1 %v4160_v49 }
 0x346   : > { %v10465_v22 = vadd.f32 %v5551_v45, %v5550_v31  ;;  %v10468_v53 = vadd.f32 %v10282_v27, %v3964_v38  ;;  %v3965_v29 = vmul.f32 %v10213_v62, %v3910_v6  ;;  %v4079_v46 = vmul.f32 %v10246_v16, %v10246_v16  ;;  %v2130_v16 = vld [vmem:[#allocation2 + $0xa0] sm:$0xff] }
 0x347   : > { %v2462_v14 = vadd.f32 %v15529_v58, %v2201_v8  ;;  %v3053_v63 = vadd.f32 %v2956_v24, %v2841_v13  ;;  %v3211_v60 = vsel %vm2598_vm7, %v3208_v20, %v3210_v5  ;;  %v3794_v61 = vsel %vm2598_vm7, %v3791_v56, %v3793_v30 }
 0x348   : > { %15530 = vst [vmem:[#allocation42_spill] sm:$0xff] %v10468_v53  ;;  %v4078_v8 = vmul.f32 %v10277_v33, %v10277_v33  ;;  %v4175_v31 = vsel %vm1080_vm2, %v4075_v51, 0.0  ;;  %v4172_v25 = vsel %vm1080_vm2, %v4074_v42, 0.0  ;;  %v2514_v34 = vmul.f32 %v15482_v0, %v10277_v33 }
 0x349   : > { %v3049_v2 = vadd.f32 %v10391_v57, %v10335_v10  ;;  %v3914_v45 = vadd.f32 %v3794_v61, %v3638_v32  ;;  %v3966_v7 = vmul.f32 %v10213_v62, %v3911_v19  ;;  %4176 = vadd.xlane.f32.xlu0 %v4175_v31  ;;  %4173 = vadd.xlane.f32.xlu1 %v4172_v25  ;;  %v4187_v5 = vsel %vm1080_vm2, %v4079_v46, 0.0 }
 0x34a   : > { %v3100_v6 = vmul.f32 %v15484_v17, %v10277_v33  ;;  %v10495_v38 = vadd.f32 %v10282_v27, %v3965_v29  ;;  %v2619_v30 = vrot.slane %v2514_v34, 2  ;;  %v2791_v3 = vmul.f32 %v15480_v23, %v2130_v16 }
 0x34b   : > { %v4184_v13 = vsel %vm1080_vm2, %v4078_v8, 0.0  ;;  %v4082_v10 = vmul.f32 %v10485_v40, %v10485_v40  ;;  %v2204_v57 = vmul.f32 %v15496_v39, %v2130_v16  ;;  %v15532_v49 = vrot.slane %v10370_v28, 2 }
 0x34c   : > { %15531 = vst [vmem:[#allocation36_spill] sm:$0xff] %v10495_v38  ;;  %v3202_v19 = vrot.slane %v3100_v6, 2  ;;  %v2739_v51 = vadd.f32 %v2619_v30, %v2462_v14  ;;  %v3376_v42 = vmul.f32 %v15510_v9, %v2130_v16  ;;  %v2299_v58 = vmul.f32 %v15487_v18, %v10485_v40 }
 0x34d   : > { %v2621_v33 = vsel %vm2598_vm7, %v2619_v30, %v15532_v49  ;;  %v5553_v32 = vsel %vm1080_vm2, %v5445_v54, 0.0  ;;  %4188 = vadd.xlane.f32.xlu0 %v4187_v5  ;;  %4185 = vadd.xlane.f32.xlu1 %v4184_v13  ;;  %v15533_v46 = vrot.slane %v10379_v47, 2  ;;  %v4081_v8 = vmul.f32 %v2130_v16, %v2130_v16 }
 0x34e   : > { %v2740_v29 = vadd.f32 %v2621_v33, %v10325_v48  ;;  %v2839_v28 = vadd.f32 %v2791_v3, %v2739_v51  ;;  %v3324_v31 = vadd.f32 %v3202_v19, %v10343_v36  ;;  %v2369_v25 = vrot.slane %v2299_v58, 1 }
 0x34f   : > { %v3204_v61 = vsel %vm2598_vm7, %v3202_v19, %v15533_v46  ;;  %v2792_v34 = vmul.f32 %v15480_v23, %v10485_v40  ;;  %v2887_v54 = vmul.f32 %v15488_v43, %v10485_v40  ;;  %v3377_v6 = vmul.f32 %v15510_v9, %v10485_v40  ;;  %v10528_v19 = vld [vmem:[#allocation2 + $0xc8] sm:$0xff] }
 0x350   : > { %v3325_v14 = vadd.f32 %v3204_v61, %v3049_v2  ;;  %v3473_v48 = vmul.f32 %v15512_v12, %v10485_v40  ;;  %v4196_v47 = vsel %vm1080_vm2, %v4082_v10, 0.0  ;;  %v3424_v16 = vadd.f32 %v3376_v42, %v3324_v31 }
 0x351   : > { %v2465_v5 = vadd.f32 %v2369_v25, %v2204_v57  ;;  %v3688_v36 = vmul.f32 %v15489_v52, %v10485_v40  ;;  %4197 = vadd.xlane.f32.xlu1 %v4196_v47  ;;  %v2300_v2 = vmul.f32 %v15487_v18, %v10401_v15  ;;  %v2840_v30 = vadd.f32 %v2792_v34, %v2740_v29 }
 0x352   : > { %v2955_v3 = vrot.slane %v2887_v54, 1  ;;  %v3425_v13 = vadd.f32 %v3377_v6, %v3325_v14  ;;  %v10531_v49 = vadd.f32 %v10282_v27, %v3966_v7  ;;  %v4193_v33 = vsel %vm1080_vm2, %v4081_v8, 0.0  ;;  %v10543_v8 = vld [vmem:[#allocation2 + $0xd0] sm:$0xff] }
 0x353   : > { %v3540_v10 = vrot.slane %v3473_v48, 1  ;;  %v3790_v51 = vrot.slane %v3688_v36, 2  ;;  %v5446_v57 = vrot.slane %v10468_v53, 7  ;;  %v3329_v42 = vadd.f32 %v3211_v60, %v3053_v63 }
 0x354   : > { %15534 = vst [vmem:[#allocation38_spill] sm:$0xff] %v10531_v49  ;;  %v2957_v58 = vsel %vm2353_vm6, %v2955_v3, %v2956_v24  ;;  %v3051_v46 = vadd.f32 %v2955_v3, %v2839_v28  ;;  %v4086_v7 = vmul.f32 %v10528_v19, %v10528_v19  ;;  %v5447_v14 = vrot.slane %v10495_v38, 7  ;;  %v2134_v28 = vld [vmem:[#allocation2 + $0xc0] sm:$0xff] }
 0x355   : > { %v3052_v29 = vadd.f32 %v2957_v58, %v2840_v30  ;;  %v3542_v61 = vsel %vm2353_vm6, %v3540_v10, %v3541_v11  ;;  %v3636_v31 = vadd.f32 %v3540_v10, %v3424_v16  ;;  %v2370_v34 = vrot.slane %v2300_v2, 1  ;;  %4194 = vadd.xlane.f32.xlu1 %v4193_v33 }
 0x356   : > { %v3637_v63 = vadd.f32 %v3542_v61, %v3425_v13  ;;  %v2517_v59 = vmul.f32 %v15482_v0, %v10485_v40  ;;  %v3969_v24 = vmul.f32 %v10213_v62, %v3914_v45  ;;  %v5449_v1 = vrot.slane %v10531_v49, 7 }
 0x357   : > { %v3792_v11 = vsel %vm2598_vm7, %v3790_v51, %v3791_v56  ;;  %v3912_v60 = vadd.f32 %v3790_v51, %v3636_v31  ;;  %v10555_v6 = vmul.f32 %v15482_v0, %v10401_v15  ;;  %v2794_v47 = vmul.f32 %v15480_v23, %v2134_v28 }
 0x358   : > { %v3913_v54 = vadd.f32 %v3792_v11, %v3637_v63  ;;  %v2624_v48 = vrot.slane %v2517_v59, 2  ;;  %v5554_v16 = vadd.f32 %v5553_v32, %v10465_v22  ;;  %v3381_v45 = vmul.f32 %v15510_v9, %v10543_v8  ;;  %v10589_v59 = vld [vmem:[#allocation2 + $0xd8] sm:$0xff] }
 0x359   : > { %v4208_v36 = vsel %vm1080_vm2, %v4086_v7, 0.0  ;;  %v5448_v55 = vsel %vm5435_vm3, %v5446_v57, %v5447_v14  ;;  %v2371_v56 = vsel %vm2353_vm6, %v2369_v25, %v2370_v34  ;;  %v3103_v30 = vmul.f32 %v15484_v17, %v10485_v40 }
 0x35a   : > { %4209 = vadd.xlane.f32.xlu1 %v4208_v36  ;;  %v2742_v2 = vadd.f32 %v2624_v48, %v2465_v5  ;;  %v3429_v3 = vadd.f32 %v3381_v45, %v3329_v42  ;;  %v10567_v13 = vadd.f32 %v10282_v27, %v3969_v24  ;;  %v2205_v22 = vmul.f32 %v15496_v39, %v10485_v40 }
 0x35b   : > { %v10572_v32 = vsel %vm5435_vm3, %v5447_v14, %v5449_v1  ;;  %v2206_v33 = vmul.f32 %v15496_v39, %v10401_v15  ;;  %v2625_v25 = vrot.slane %v10555_v6, 2  ;;  %v5555_v5 = vsel %vm1080_vm2, %v5448_v55, 0.0 }
 0x35c   : > { %15535 = vst [vmem:[#allocation41_spill] sm:$0xff] %v10567_v13  ;;  %v2842_v10 = vadd.f32 %v2794_v47, %v2742_v2  ;;  %v2466_v51 = vadd.f32 %v2371_v56, %v2205_v22  ;;  %v3207_v57 = vrot.slane %v3103_v30, 2  ;;  %v3379_v42 = vmul.f32 %v15510_v9, %v2134_v28 }
 0x35d   : > { %v5556_v58 = vadd.f32 %v5555_v5, %v5554_v16  ;;  %v3967_v61 = vmul.f32 %v10213_v62, %v3912_v60  ;;  %v2519_v40 = vmul.f32 %v15482_v0, %v10395_v37  ;;  %v4085_v31 = vmul.f32 %v2134_v28, %v2134_v28 }
 0x35e   : > { %v2467_v7 = vadd.f32 %v2370_v34, %v2206_v33  ;;  %v10584_v15 = vmul.f32 %v15488_v43, %v10543_v8  ;;  %v3209_v14 = vsel %vm2598_vm7, %v3207_v57, %v3208_v20  ;;  %v3327_v63 = vadd.f32 %v3207_v57, %v3051_v46 }
 0x35f   : > { %v2207_v24 = vmul.f32 %v15496_v39, %v2134_v28  ;;  %v2626_v1 = vsel %vm2598_vm7, %v2624_v48, %v2625_v25  ;;  %v3328_v11 = vadd.f32 %v3209_v14, %v3052_v29  ;;  %v3476_v37 = vmul.f32 %v15512_v12, %v10543_v8 }
 0x360   : > { %v2743_v34 = vadd.f32 %v2626_v1, %v2466_v51  ;;  %v3427_v60 = vadd.f32 %v3379_v42, %v3327_v63  ;;  %v3692_v6 = vmul.f32 %v15489_v52, %v10543_v8  ;;  %v4205_v35 = vsel %vm1080_vm2, %v4085_v31, 0.0 }
 0x361   : > { %v3968_v20 = vmul.f32 %v10213_v62, %v3913_v54  ;;  %v10600_v46 = vadd.f32 %v10282_v27, %v3967_v61  ;;  %v2302_v28 = vmul.f32 %v15487_v18, %v10543_v8  ;;  %v2627_v48 = vrot.slane %v2519_v40, 2  ;;  %4206 = vadd.xlane.f32.xlu1 %v4205_v35  ;;  %v10611_v54 = vld [vmem:[#allocation2 + $0xe8] sm:$0xff] }
 0x362   : > { %v2959_v29 = vrot.slane %v10584_v15, 1  ;;  %v3693_v47 = vmul.f32 %v15489_v52, %v10589_v59  ;;  %v2301_v16 = vmul.f32 %v15487_v18, %v10528_v19  ;;  %v2795_v45 = vmul.f32 %v15480_v23, %v10528_v19 }
 0x363   : > { %15536 = vst [vmem:[#allocation44_spill] sm:$0xff] %v10600_v46  ;;  %v3544_v36 = vrot.slane %v3476_v37, 1  ;;  %v2889_v55 = vmul.f32 %v15488_v43, %v10528_v19  ;;  %v3380_v56 = vmul.f32 %v15510_v9, %v10528_v19  ;;  %v3475_v2 = vmul.f32 %v15512_v12, %v10528_v19 }
 0x364   : > { %v3796_v30 = vrot.slane %v3692_v6, 2  ;;  %v2372_v22 = vrot.slane %v2301_v16, 1  ;;  %v2843_v33 = vadd.f32 %v2795_v45, %v2743_v34  ;;  %v3691_v5 = vmul.f32 %v15489_v52, %v10528_v19 }
 0x365   : > { %v2958_v51 = vrot.slane %v2889_v55, 1  ;;  %v3428_v57 = vadd.f32 %v3380_v56, %v3328_v11  ;;  %v3543_v42 = vrot.slane %v3475_v2, 1  ;;  %v4090_v61 = vmul.f32 %v10611_v54, %v10611_v54 }
 0x366   : > { %v10624_v40 = vadd.f32 %v10282_v27, %v3968_v20  ;;  %v2628_v31 = vsel %vm2598_vm7, %v2625_v25, %v2627_v48  ;;  %v2468_v14 = vadd.f32 %v2372_v22, %v2207_v24  ;;  %v3795_v63 = vrot.slane %v3691_v5, 2 }
 0x367   : > { %v3798_v1 = vrot.slane %v3693_v47, 2  ;;  %v2960_v37 = vsel %vm2353_vm6, %v2958_v51, %v2959_v29  ;;  %v3054_v34 = vadd.f32 %v2958_v51, %v2842_v10  ;;  %v3545_v6 = vsel %vm2353_vm6, %v3543_v42, %v3544_v36 }
 0x368   : > { %15537 = vst [vmem:[#allocation47_spill] sm:$0xff] %v10624_v40  ;;  %v3641_v11 = vadd.f32 %v3544_v36, %v3429_v3  ;;  %v3055_v35 = vadd.f32 %v2960_v37, %v2843_v33  ;;  %v3639_v16 = vadd.f32 %v3543_v42, %v3427_v60  ;;  %v3640_v45 = vadd.f32 %v3545_v6, %v3428_v57  ;;  %v10661_v6 = vld [vmem:[#allocation2 + $0xf0] sm:$0xff] }
 0x369   : > { %v2373_v20 = vrot.slane %v2302_v28, 1  ;;  %v3797_v56 = vsel %vm2598_vm7, %v3795_v63, %v3796_v30  ;;  %v4220_v25 = vsel %vm1080_vm2, %v4090_v61, 0.0  ;;  %v5557_v24 = vsel %vm1080_vm2, %v10572_v32, 0.0  ;;  %v2138_v32 = vld [vmem:[#allocation2 + $0xe0] sm:$0xff] }
 0x36a   : > { %v3915_v48 = vadd.f32 %v3795_v63, %v3639_v16  ;;  %v3916_v47 = vadd.f32 %v3797_v56, %v3640_v45  ;;  %4221 = vadd.xlane.f32.xlu1 %v4220_v25  ;;  %v2520_v10 = vmul.f32 %v15482_v0, %v10528_v19  ;;  %v10638_v3 = vadd.f32 %v5557_v24, %v5556_v58 }
 0x36b   : > { %v2209_v60 = vmul.f32 %v15496_v39, %v10543_v8  ;;  %v2744_v36 = vadd.f32 %v2628_v31, %v2467_v7  ;;  %v3799_v28 = vsel %vm2598_vm7, %v3796_v30, %v3798_v1  ;;  %v5451_v2 = vrot.slane %v10600_v46, 7 }
 0x36c   : > { %v14942_v33 = vrot.slane %v10624_v40, 7  ;;  %v3917_v5 = vadd.f32 %v3799_v28, %v3641_v11  ;;  %v2629_v51 = vrot.slane %v2520_v10, 2  ;;  %v2796_v57 = vmul.f32 %v15480_v23, %v10543_v8 }
 0x36d   : > { %v2374_v42 = vsel %vm2353_vm6, %v2372_v22, %v2373_v20  ;;  %v2797_v58 = vmul.f32 %v15480_v23, %v2138_v32  ;;  %v3106_v61 = vmul.f32 %v15484_v17, %v10528_v19  ;;  %v2208_v7 = vmul.f32 %v15496_v39, %v10528_v19 }
 0x36e   : > { %v2521_v30 = vmul.f32 %v15482_v0, %v10543_v8  ;;  %v2522_v31 = vmul.f32 %v15482_v0, %v10589_v59  ;;  %v2745_v63 = vadd.f32 %v2629_v51, %v2468_v14  ;;  %v10657_v1 = vadd.f32 %v2373_v20, %v2209_v60 }
 0x36f   : > { %v3970_v37 = vmul.f32 %v10213_v62, %v3915_v48  ;;  %v3971_v22 = vmul.f32 %v10213_v62, %v3916_v47  ;;  %v3107_v11 = vmul.f32 %v15484_v17, %v10543_v8  ;;  %v5453_v19 = vsel %vm5435_vm3, %v5451_v2, %v14942_v33 }
 0x370   : > { %v2844_v16 = vadd.f32 %v2796_v57, %v2744_v36  ;;  %v3972_v45 = vmul.f32 %v10213_v62, %v3917_v5  ;;  %v2469_v56 = vadd.f32 %v2374_v42, %v2208_v7  ;;  %v2845_v14 = vadd.f32 %v2797_v58, %v2745_v63 }
 0x371   : > { %v3108_v20 = vmul.f32 %v15484_v17, %v10589_v59  ;;  %v3212_v25 = vrot.slane %v3106_v61, 2  ;;  %v3213_v24 = vrot.slane %v3107_v11, 2  ;;  %v2630_v48 = vrot.slane %v2521_v30, 2 }
 0x372   : > { %v2632_v47 = vrot.slane %v2522_v31, 2  ;;  %v10673_v10 = vmul.f32 %v15488_v43, %v10661_v6  ;;  %v3382_v8 = vmul.f32 %v15510_v9, %v2138_v32  ;;  %v10677_v60 = vadd.f32 %v10282_v27, %v3970_v37 }
 0x373   : > { %v10680_v36 = vadd.f32 %v10282_v27, %v3971_v22  ;;  %v3214_v28 = vsel %vm2598_vm7, %v3212_v25, %v3213_v24  ;;  %v3330_v2 = vadd.f32 %v3212_v25, %v3054_v34  ;;  %v5559_v59 = vsel %vm1080_vm2, %v5453_v19, 0.0 }
 0x374   : > { %15538 = vst [vmem:[#allocation50_spill] sm:$0xff] %v10677_v60  ;;  %v3056_v5 = vadd.f32 %v2959_v29, %v2844_v16  ;;  %v3215_v57 = vrot.slane %v3108_v20, 2  ;;  %v3331_v42 = vadd.f32 %v3214_v28, %v3055_v35  ;;  %v10687_v58 = vadd.f32 %v10282_v27, %v3972_v45  ;;  %v10707_v45 = vld [vmem:[#allocation2 + $0x108] sm:$0xff] }
 0x375   : > { %15539 = vst [vmem:[#allocation53_spill] sm:$0xff] %v10680_v36  ;;  %v2210_v61 = vmul.f32 %v15496_v39, %v2138_v32  ;;  %v10692_v7 = vmul.f32 %v15487_v18, %v10661_v6  ;;  %v3430_v30 = vadd.f32 %v3382_v8, %v3330_v2  ;;  %v2631_v31 = vsel %vm2598_vm7, %v2629_v51, %v2630_v48 }
 0x376   : > { %15540 = vst [vmem:[#allocation56_spill] sm:$0xff] %v10687_v58  ;;  %v2633_v34 = vsel %vm2598_vm7, %v2630_v48, %v2632_v47  ;;  %v3478_v15 = vmul.f32 %v15512_v12, %v10661_v6  ;;  %v4089_v29 = vmul.f32 %v2138_v32, %v2138_v32  ;;  %v5456_v35 = vrot.slane %v10677_v60, 7 }
 0x377   : > { %v5457_v63 = vrot.slane %v10680_v36, 7  ;;  %v2746_v37 = vadd.f32 %v2631_v31, %v2469_v56  ;;  %v14949_v22 = vrot.slane %v10673_v10, 1  ;;  %v3216_v11 = vsel %vm2598_vm7, %v3213_v24, %v3215_v57  ;;  %v10715_v24 = vld [vmem:[#allocation2 + $0xf8] sm:$0xff] }
 0x378   : > { %v3695_v19 = vmul.f32 %v15489_v52, %v10661_v6  ;;  %v4217_v51 = vsel %vm1080_vm2, %v4089_v29, 0.0  ;;  %v2303_v16 = vmul.f32 %v15487_v18, %v10611_v54  ;;  %v3332_v32 = vadd.f32 %v3216_v11, %v3056_v5 }
 0x379   : > { %4218 = vadd.xlane.f32.xlu1 %v4217_v51  ;;  %v2798_v20 = vmul.f32 %v15480_v23, %v10611_v54  ;;  %v2891_v56 = vmul.f32 %v15488_v43, %v10611_v54  ;;  %v3383_v25 = vmul.f32 %v15510_v9, %v10611_v54  ;;  %v3547_v48 = vrot.slane %v3478_v15, 1 }
 0x37a   : > { %v2375_v47 = vrot.slane %v2303_v16, 1  ;;  %v3477_v8 = vmul.f32 %v15512_v12, %v10611_v54  ;;  %v3694_v28 = vmul.f32 %v15489_v52, %v10611_v54  ;;  %v4094_v31 = vmul.f32 %v10707_v45, %v10707_v45 }
 0x37b   : > { %v2846_v2 = vadd.f32 %v2798_v20, %v2746_v37  ;;  %v2961_v5 = vrot.slane %v2891_v56, 1  ;;  %v3431_v57 = vadd.f32 %v3383_v25, %v3331_v42  ;;  %v3384_v29 = vmul.f32 %v15510_v9, %v10661_v6 }
 0x37c   : > { %v3801_v11 = vrot.slane %v3695_v19, 2  ;;  %v2471_v51 = vadd.f32 %v2375_v47, %v2210_v61  ;;  %v3546_v33 = vrot.slane %v3477_v8, 1  ;;  %v3696_v15 = vmul.f32 %v15489_v52, %v10715_v24 }
 0x37d   : > { %v2963_v16 = vsel %vm2353_vm6, %v2961_v5, %v14949_v22  ;;  %v3057_v55 = vadd.f32 %v2961_v5, %v2845_v14  ;;  %v3800_v37 = vrot.slane %v3694_v28, 2  ;;  %v3432_v20 = vadd.f32 %v3384_v29, %v3332_v32 }
 0x37e   : > { %v3058_v42 = vadd.f32 %v2963_v16, %v2846_v2  ;;  %v3548_v56 = vsel %vm2353_vm6, %v3546_v33, %v3547_v48  ;;  %v3642_v25 = vadd.f32 %v3546_v33, %v3430_v30  ;;  %v5560_v60 = vadd.f32 %v5559_v59, %v10638_v3 }
 0x37f   : > { %v15541_v19 = vrot.slane %v10567_v13, 7  ;;  %v15542_v61 = vrot.slane %v10624_v40, 7  ;;  %v3643_v36 = vadd.f32 %v3548_v56, %v3431_v57  ;;  %v4232_v49 = vsel %vm1080_vm2, %v4094_v31, 0.0 }
 0x380   : > { %v2376_v22 = vrot.slane %v10692_v7, 1  ;;  %v2747_v14 = vadd.f32 %v2633_v34, %v10657_v1  ;;  %v3802_v32 = vsel %vm2598_vm7, %v3800_v37, %v3801_v11  ;;  %v3918_v28 = vadd.f32 %v3800_v37, %v3642_v25  ;;  %4233 = vadd.xlane.f32.xlu1 %v4232_v49  ;;  %v2142_v34 = vld [vmem:[#allocation2 + $0x100] sm:$0xff] }
 0x381   : > { %v5455_v8 = vsel %vm5435_vm3, %v15542_v61, %v15541_v19  ;;  %v5459_v33 = vrot.slane %v10687_v58, 7  ;;  %v3803_v3 = vrot.slane %v3696_v15, 2  ;;  %v3919_v59 = vadd.f32 %v3802_v32, %v3643_v36  ;;  %v10773_v32 = vld [vmem:[#allocation2 + $0x110] sm:$0xff] }
 0x382   : > { %v2523_v30 = vmul.f32 %v15482_v0, %v10611_v54  ;;  %v5458_v2 = vsel %vm5435_vm3, %v5456_v35, %v5457_v63  ;;  %v2212_v5 = vmul.f32 %v15496_v39, %v10661_v6  ;;  %v2799_v7 = vmul.f32 %v15480_v23, %v10661_v6 }
 0x383   : > { %v3644_v1 = vadd.f32 %v3547_v48, %v3432_v20  ;;  %v5561_v57 = vsel %vm1080_vm2, %v5455_v8, 0.0  ;;  %v2800_v31 = vmul.f32 %v15480_v23, %v2142_v34  ;;  %v2524_v16 = vmul.f32 %v15482_v0, %v10661_v6 }
 0x384   : > { %v2634_v49 = vrot.slane %v2523_v30, 2  ;;  %v5562_v29 = vadd.f32 %v5561_v57, %v5560_v60  ;;  %v2473_v36 = vadd.f32 %v2376_v22, %v2212_v5  ;;  %v2847_v15 = vadd.f32 %v2799_v7, %v2747_v14 }
 0x385   : > { %v5563_v35 = vsel %vm1080_vm2, %v5458_v2, 0.0  ;;  %v3804_v37 = vsel %vm2598_vm7, %v3801_v11, %v3803_v3  ;;  %v5460_v56 = vsel %vm5435_vm3, %v5457_v63, %v5459_v33  ;;  %v2377_v20 = vsel %vm2353_vm6, %v2375_v47, %v2376_v22 }
 0x386   : > { %v2748_v25 = vadd.f32 %v2634_v49, %v2471_v51  ;;  %v3920_v48 = vadd.f32 %v3804_v37, %v3644_v1  ;;  %v3973_v19 = vmul.f32 %v10213_v62, %v3918_v28  ;;  %v2525_v60 = vmul.f32 %v15482_v0, %v10715_v24 }
 0x387   : > { %v2211_v61 = vmul.f32 %v15496_v39, %v10611_v54  ;;  %v3109_v14 = vmul.f32 %v15484_v17, %v10611_v54  ;;  %v3110_v11 = vmul.f32 %v15484_v17, %v10661_v6  ;;  %v10766_v63 = vadd.f32 %v5563_v35, %v5562_v29 }
 0x388   : > { %v2848_v8 = vadd.f32 %v2800_v31, %v2748_v25  ;;  %v15543_v51 = vrot.slane %v10673_v10, 1  ;;  %v10771_v47 = vsel %vm1080_vm2, %v5460_v56, 0.0  ;;  %v2635_v28 = vrot.slane %v2524_v16, 2 }
 0x389   : > { %v2472_v33 = vadd.f32 %v2377_v20, %v2211_v61  ;;  %v3217_v3 = vrot.slane %v3109_v14, 2  ;;  %v3218_v30 = vrot.slane %v3110_v11, 2  ;;  %v3385_v2 = vmul.f32 %v15510_v9, %v2142_v34 }
 0x38a   : > { %v3059_v22 = vadd.f32 %v15543_v51, %v2847_v15  ;;  %v3975_v54 = vmul.f32 %v10213_v62, %v3920_v48  ;;  %v3974_v6 = vmul.f32 %v10213_v62, %v3919_v59  ;;  %v10779_v5 = vadd.f32 %v10282_v27, %v3973_v19 }
 0x38b   : > { %v2637_v10 = vrot.slane %v2525_v60, 2  ;;  %v2213_v7 = vmul.f32 %v15496_v39, %v2142_v34  ;;  %v10784_v1 = vmul.f32 %v15488_v43, %v10773_v32  ;;  %v3219_v57 = vsel %vm2598_vm7, %v3217_v3, %v3218_v30 }
 0x38c   : > { %15544 = vst [vmem:[#allocation59_spill] sm:$0xff] %v10779_v5  ;;  %v3333_v31 = vadd.f32 %v3217_v3, %v3057_v55  ;;  %v10789_v29 = vmul.f32 %v15487_v18, %v10773_v32  ;;  %v2636_v15 = vsel %vm2598_vm7, %v2634_v49, %v2635_v28  ;;  %v3111_v62 = vmul.f32 %v15484_v17, %v10715_v24  ;;  %v10825_v3 = vld [vmem:[#allocation2 + $0x128] sm:$0xff] }
 0x38d   : > { %v3334_v59 = vadd.f32 %v3219_v57, %v3058_v42  ;;  %v2749_v16 = vadd.f32 %v2636_v15, %v2472_v33  ;;  %v10796_v37 = vmul.f32 %v15512_v12, %v10773_v32  ;;  %v4093_v56 = vmul.f32 %v2142_v34, %v2142_v34 }
 0x38e   : > { %v3433_v35 = vadd.f32 %v3385_v2, %v3333_v31  ;;  %v10799_v25 = vadd.f32 %v10282_v27, %v3974_v6  ;;  %v5461_v55 = vrot.slane %v10779_v5, 7  ;;  %v2638_v48 = vsel %vm2598_vm7, %v2635_v28, %v2637_v10 }
 0x38f   : > { %v10805_v49 = vmul.f32 %v15487_v18, %v10707_v45  ;;  %v2965_v24 = vrot.slane %v10784_v1, 1  ;;  %v10810_v42 = vmul.f32 %v15489_v52, %v10773_v32  ;;  %v4229_v20 = vsel %vm1080_vm2, %v4093_v56, 0.0 }
 0x390   : > { %15545 = vst [vmem:[#allocation62_spill] sm:$0xff] %v10799_v25  ;;  %v2801_v34 = vmul.f32 %v15480_v23, %v10707_v45  ;;  %v3220_v19 = vrot.slane %v3111_v62, 2  ;;  %4230 = vadd.xlane.f32.xlu1 %v4229_v20  ;;  %v2893_v61 = vmul.f32 %v15488_v43, %v10707_v45  ;;  %v3386_v14 = vmul.f32 %v15510_v9, %v10707_v45 }
 0x391   : > { %v2378_v60 = vrot.slane %v10805_v49, 1  ;;  %v3550_v11 = vrot.slane %v10796_v37, 1  ;;  %v3479_v28 = vmul.f32 %v15512_v12, %v10707_v45  ;;  %v3697_v33 = vmul.f32 %v15489_v52, %v10707_v45  ;;  %v2145_v37 = vld [vmem:[#allocation2 + $0x118] sm:$0xff] }
 0x392   : > { %v2849_v51 = vadd.f32 %v2801_v34, %v2749_v16  ;;  %v2750_v2 = vadd.f32 %v2638_v48, %v2473_v36  ;;  %v2964_v10 = vrot.slane %v2893_v61, 1  ;;  %v3434_v1 = vadd.f32 %v3386_v14, %v3334_v59 }
 0x393   : > { %v2474_v6 = vadd.f32 %v2378_v60, %v2213_v7  ;;  %v14950_v57 = vrot.slane %v10799_v25, 7  ;;  %v3806_v31 = vrot.slane %v10810_v42, 2  ;;  %v3549_v15 = vrot.slane %v3479_v28, 1 }
 0x394   : > { %v3805_v62 = vrot.slane %v3697_v33, 2  ;;  %v3221_v16 = vsel %vm2598_vm7, %v3218_v30, %v3220_v19  ;;  %v2966_v56 = vsel %vm2353_vm6, %v2964_v10, %v2965_v24  ;;  %v3060_v49 = vadd.f32 %v2964_v10, %v2848_v8  ;;  %v2146_v10 = vld [vmem:[#allocation2 + $0x120] sm:$0xff] }
 0x395   : > { %v4098_v20 = vmul.f32 %v10825_v3, %v10825_v3  ;;  %v3335_v34 = vadd.f32 %v3221_v16, %v3059_v22  ;;  %v3061_v36 = vadd.f32 %v2966_v56, %v2849_v51  ;;  %v3551_v7 = vsel %vm2353_vm6, %v3549_v15, %v3550_v11 }
 0x396   : > { %v3645_v59 = vadd.f32 %v3549_v15, %v3433_v35  ;;  %v2802_v48 = vmul.f32 %v15480_v23, %v10773_v32  ;;  %v3387_v42 = vmul.f32 %v15510_v9, %v10773_v32  ;;  %v3646_v61 = vadd.f32 %v3551_v7, %v3434_v1 }
 0x397   : > { %v4244_v30 = vsel %vm1080_vm2, %v4098_v20, 0.0  ;;  %v3699_v19 = vmul.f32 %v15489_v52, %v2145_v37  ;;  %v3807_v8 = vsel %vm2598_vm7, %v3805_v62, %v3806_v31  ;;  %v2526_v22 = vmul.f32 %v15482_v0, %v10707_v45 }
 0x398   : > { %v3921_v14 = vadd.f32 %v3805_v62, %v3645_v59  ;;  %4245 = vadd.xlane.f32.xlu1 %v4244_v30  ;;  %v10844_v35 = vadd.f32 %v10282_v27, %v3975_v54  ;;  %v2379_v51 = vrot.slane %v10789_v29, 1  ;;  %v2850_v28 = vadd.f32 %v2802_v48, %v2750_v2 }
 0x399   : > { %v3922_v33 = vadd.f32 %v3807_v8, %v3646_v61  ;;  %v5463_v1 = vsel %vm5435_vm3, %v5461_v55, %v14950_v57  ;;  %v3435_v15 = vadd.f32 %v3387_v42, %v3335_v34  ;;  %v2639_v16 = vrot.slane %v2526_v22, 2 }
 0x39a   : > { %15546 = vst [vmem:[#allocation65_spill] sm:$0xff] %v10844_v35  ;;  %v2803_v62 = vmul.f32 %v15480_v23, %v2146_v10  ;;  %v5566_v56 = vadd.f32 %v10771_v47, %v10766_v63  ;;  %v2215_v27 = vmul.f32 %v15496_v39, %v10773_v32  ;;  %v3808_v54 = vrot.slane %v3699_v19, 2 }
 0x39b   : > { %v10857_v29 = vmul.f32 %v15482_v0, %v10773_v32  ;;  %v2751_v2 = vadd.f32 %v2639_v16, %v2474_v6  ;;  %v5567_v55 = vsel %vm1080_vm2, %v5463_v1, 0.0  ;;  %v3112_v7 = vmul.f32 %v15484_v17, %v10707_v45  ;;  %v10870_v6 = vld [vmem:[#allocation2 + $0x130] sm:$0xff] }
 0x39c   : > { %v10861_v34 = vadd.f32 %v2379_v51, %v2215_v27  ;;  %v3062_v59 = vadd.f32 %v2965_v24, %v2850_v28  ;;  %v3647_v63 = vadd.f32 %v3550_v11, %v3435_v15  ;;  %v2380_v47 = vsel %vm2353_vm6, %v2378_v60, %v2379_v51 }
 0x39d   : > { %v2851_v48 = vadd.f32 %v2803_v62, %v2751_v2  ;;  %v10866_v42 = vadd.f32 %v5567_v55, %v5566_v56  ;;  %v2214_v61 = vmul.f32 %v15496_v39, %v10707_v45  ;;  %v3113_v30 = vmul.f32 %v15484_v17, %v10773_v32 }
 0x39e   : > { %v3114_v19 = vmul.f32 %v15484_v17, %v2145_v37  ;;  %v3809_v8 = vsel %vm2598_vm7, %v3806_v31, %v3808_v54  ;;  %v2640_v24 = vrot.slane %v10857_v29, 2  ;;  %v3222_v11 = vrot.slane %v3112_v7, 2  ;;  %v10887_v31 = vld [vmem:[%s14806_s9] ss:$0 sm:$0xff]  ;;  %v10899_v7 = vld [vmem:[#allocation2 + $0x138] sm:$0xff] }
 0x39f   : > { %v3388_v60 = vmul.f32 %v15510_v9, %v2146_v10  ;;  %v2475_v22 = vadd.f32 %v2380_v47, %v2214_v61  ;;  %v2528_v51 = vmul.f32 %v15482_v0, %v2145_v37  ;;  %v3223_v28 = vrot.slane %v3113_v30, 2 }
 0x3a0   : > { %v3225_v1 = vrot.slane %v3114_v19, 2  ;;  %v3923_v45 = vadd.f32 %v3809_v8, %v3647_v63  ;;  %v2216_v15 = vmul.f32 %v15496_v39, %v2146_v10  ;;  %v10882_v32 = vmul.f32 %v15488_v43, %v10870_v6 }
 0x3a1   : > { %v3336_v62 = vadd.f32 %v3222_v11, %v3060_v49  ;;  %v3976_v56 = vmul.f32 %v10887_v31, %v3921_v14  ;;  %v3977_v27 = vmul.f32 %v10887_v31, %v3922_v33  ;;  %v10893_v37 = vmul.f32 %v15487_v18, %v10870_v6 }
 0x3a2   : > { %v3224_v54 = vsel %vm2598_vm7, %v3222_v11, %v3223_v28  ;;  %v2641_v29 = vsel %vm2598_vm7, %v2639_v16, %v2640_v24  ;;  %v3482_v49 = vmul.f32 %v15512_v12, %v10870_v6  ;;  %v2642_v63 = vrot.slane %v2528_v51, 2 }
 0x3a3   : > { %v3337_v2 = vadd.f32 %v3224_v54, %v3061_v36  ;;  %v3436_v55 = vadd.f32 %v3388_v60, %v3336_v62  ;;  %v2752_v47 = vadd.f32 %v2641_v29, %v2475_v22  ;;  %v3226_v14 = vsel %vm2598_vm7, %v3223_v28, %v3225_v1  ;;  %v10922_v29 = vld [vmem:[#allocation2 + $0x148] sm:$0xff] }
 0x3a4   : > { %v4097_v33 = vmul.f32 %v2146_v10, %v2146_v10  ;;  %v2968_v61 = vrot.slane %v10882_v32, 1  ;;  %v3338_v30 = vadd.f32 %v3226_v14, %v3062_v59  ;;  %v3390_v19 = vmul.f32 %v15510_v9, %v10870_v6 }
 0x3a5   : > { %v2307_v36 = vmul.f32 %v15487_v18, %v10825_v3  ;;  %v3701_v16 = vmul.f32 %v15489_v52, %v10870_v6  ;;  %v2804_v11 = vmul.f32 %v15480_v23, %v10825_v3  ;;  %v2895_v10 = vmul.f32 %v15488_v43, %v10825_v3 }
 0x3a6   : > { %v4241_v8 = vsel %vm1080_vm2, %v4097_v33, 0.0  ;;  %v3553_v60 = vrot.slane %v3482_v49, 1  ;;  %v3702_v59 = vmul.f32 %v15489_v52, %v10899_v7  ;;  %v3389_v51 = vmul.f32 %v15510_v9, %v10825_v3  ;;  %v10927_v49 = vld [vmem:[%s14807_s10] ss:$0 sm:$0xff] }
 0x3a7   : > { %4242 = vadd.xlane.f32.xlu1 %v4241_v8  ;;  %v2381_v22 = vrot.slane %v2307_v36, 1  ;;  %v2852_v28 = vadd.f32 %v2804_v11, %v2752_v47  ;;  %v2967_v1 = vrot.slane %v2895_v10, 1  ;;  %v3481_v62 = vmul.f32 %v15512_v12, %v10825_v3 }
 0x3a8   : > { %v3700_v54 = vmul.f32 %v15489_v52, %v10825_v3  ;;  %v10930_v14 = vadd.f32 %v10927_v49, %v3976_v56  ;;  %v3438_v33 = vadd.f32 %v3390_v19, %v3338_v30  ;;  %v3437_v47 = vadd.f32 %v3389_v51, %v3337_v2 }
 0x3a9   : > { %v2477_v36 = vadd.f32 %v2381_v22, %v2216_v15  ;;  %v3811_v8 = vrot.slane %v3701_v16, 2  ;;  %v2969_v11 = vsel %vm2353_vm6, %v2967_v1, %v2968_v61  ;;  %v3063_v10 = vadd.f32 %v2967_v1, %v2851_v48 }
 0x3aa   : > { %15547 = vst [vmem:[#allocation69_spill] sm:$0xff] %v10930_v14  ;;  %v3552_v57 = vrot.slane %v3481_v62, 1  ;;  %v10936_v20 = vadd.f32 %v10927_v49, %v3977_v27  ;;  %v3064_v58 = vadd.f32 %v2969_v11, %v2852_v28  ;;  %v3810_v5 = vrot.slane %v3700_v54, 2 }
 0x3ab   : > { %v4102_v40 = vmul.f32 %v10922_v29, %v10922_v29  ;;  %v2643_v56 = vsel %vm2598_vm7, %v2640_v24, %v2642_v63  ;;  %v3813_v30 = vrot.slane %v3702_v59, 2  ;;  %v3978_v19 = vmul.f32 %v10887_v31, %v3923_v45  ;;  %v2150_v63 = vld [vmem:[#allocation2 + $0x140] sm:$0xff] }
 0x3ac   : > { %15548 = vst [vmem:[#allocation10_spill] sm:$0xff] %v10936_v20  ;;  %v3554_v15 = vsel %vm2353_vm6, %v3552_v57, %v3553_v60  ;;  %v3648_v2 = vadd.f32 %v3552_v57, %v3436_v55  ;;  %v3650_v16 = vadd.f32 %v3553_v60, %v3438_v33  ;;  %v15549_v27 = vrot.slane %v10844_v35, 7 }
 0x3ad   : > { %v3649_v51 = vadd.f32 %v3554_v15, %v3437_v47  ;;  %v4256_v48 = vsel %vm1080_vm2, %v4102_v40, 0.0  ;;  %v15550_v28 = vrot.slane %v10799_v25, 7  ;;  %v3812_v62 = vsel %vm2598_vm7, %v3810_v5, %v3811_v8 }
 0x3ae   : > { %v3924_v54 = vadd.f32 %v3810_v5, %v3648_v2  ;;  %4257 = vadd.xlane.f32.xlu1 %v4256_v48  ;;  %v2529_v24 = vmul.f32 %v15482_v0, %v10825_v3  ;;  %v5466_v57 = vrot.slane %v10930_v14, 7  ;;  %v2382_v45 = vrot.slane %v10893_v37, 1 }
 0x3af   : > { %v5465_v1 = vsel %vm5435_vm3, %v15550_v28, %v15549_v27  ;;  %v2753_v55 = vadd.f32 %v2643_v56, %v10861_v34  ;;  %v3925_v40 = vadd.f32 %v3812_v62, %v3649_v51  ;;  %v14958_v60 = vrot.slane %v10936_v20, 7  ;;  %v10981_v28 = vld [vmem:[#allocation2 + $0x150] sm:$0xff] }
 0x3b0   : > { %v3814_v59 = vsel %vm2598_vm7, %v3811_v8, %v3813_v30  ;;  %v2644_v33 = vrot.slane %v2529_v24, 2  ;;  %v2806_v47 = vmul.f32 %v15480_v23, %v2150_v63  ;;  %v10959_v5 = vadd.f32 %v10927_v49, %v3978_v19 }
 0x3b1   : > { %v2805_v11 = vmul.f32 %v15480_v23, %v10870_v6  ;;  %v3926_v15 = vadd.f32 %v3814_v59, %v3650_v16  ;;  %v10965_v37 = vmul.f32 %v15482_v0, %v10870_v6  ;;  %v5569_v34 = vsel %vm1080_vm2, %v5465_v1, 0.0 }
 0x3b2   : > { %15551 = vst [vmem:[#allocation11_spill] sm:$0xff] %v10959_v5  ;;  %v2754_v56 = vadd.f32 %v2644_v33, %v2477_v36  ;;  %v5570_v2 = vadd.f32 %v5569_v34, %v10866_v42  ;;  %v2218_v8 = vmul.f32 %v15496_v39, %v10870_v6  ;;  %v2383_v19 = vsel %vm2353_vm6, %v2381_v22, %v2382_v45 }
 0x3b3   : > { %v2853_v30 = vadd.f32 %v2805_v11, %v2753_v55  ;;  %v5468_v51 = vsel %vm5435_vm3, %v5466_v57, %v14958_v60  ;;  %v2217_v16 = vmul.f32 %v15496_v39, %v10825_v3  ;;  %v3115_v27 = vmul.f32 %v15484_v17, %v10825_v3 }
 0x3b4   : > { %v2854_v48 = vadd.f32 %v2806_v47, %v2754_v56  ;;  %v3981_v42 = vmul.f32 %v10887_v31, %v3926_v15  ;;  %v14957_v1 = vrot.slane %v10965_v37, 2  ;;  %v3116_v22 = vmul.f32 %v15484_v17, %v10870_v6 }
 0x3b5   : > { %v2478_v62 = vadd.f32 %v2383_v19, %v2217_v16  ;;  %v3117_v24 = vmul.f32 %v15484_v17, %v10899_v7  ;;  %v3227_v57 = vrot.slane %v3115_v27, 2  ;;  %v3391_v55 = vmul.f32 %v15510_v9, %v2150_v63 }
 0x3b6   : > { %v5571_v3 = vsel %vm1080_vm2, %v5468_v51, 0.0  ;;  %v10990_v59 = vadd.f32 %v2382_v45, %v2218_v8  ;;  %v3065_v47 = vadd.f32 %v2968_v61, %v2853_v30  ;;  %v3228_v11 = vrot.slane %v3116_v22, 2 }
 0x3b7   : > { %v10994_v15 = vadd.f32 %v5571_v3, %v5570_v2  ;;  %v2219_v34 = vmul.f32 %v15496_v39, %v2150_v63  ;;  %v10999_v6 = vmul.f32 %v15488_v43, %v10981_v28  ;;  %v3339_v56 = vadd.f32 %v3227_v57, %v3063_v10 }
 0x3b8   : > { %v11002_v19 = vadd.f32 %v10927_v49, %v3981_v42  ;;  %v2646_v45 = vsel %vm2598_vm7, %v2644_v33, %v14957_v1  ;;  %v3229_v32 = vsel %vm2598_vm7, %v3227_v57, %v3228_v11  ;;  %v11010_v61 = vmul.f32 %v15512_v12, %v10981_v28 }
 0x3b9   : > { %v2755_v2 = vadd.f32 %v2646_v45, %v2478_v62  ;;  %v3230_v8 = vrot.slane %v3117_v24, 2  ;;  %v3340_v30 = vadd.f32 %v3229_v32, %v3064_v58  ;;  %v3439_v51 = vadd.f32 %v3391_v55, %v3339_v56 }
 0x3ba   : > { %15552 = vst [vmem:[#allocation35_spill] sm:$0xff] %v11002_v19  ;;  %v3979_v16 = vmul.f32 %v10887_v31, %v3924_v54  ;;  %v11015_v10 = vmul.f32 %v15487_v18, %v10981_v28  ;;  %v2531_v27 = vmul.f32 %v15482_v0, %v10899_v7  ;;  %v4101_v33 = vmul.f32 %v2150_v63, %v2150_v63  ;;  %v11027_v54 = vld [vmem:[#allocation2 + $0x168] sm:$0xff] }
 0x3bb   : > { %v3980_v42 = vmul.f32 %v10887_v31, %v3925_v40  ;;  %v14963_v22 = vrot.slane %v10999_v6, 1  ;;  %v11023_v62 = vmul.f32 %v15487_v18, %v10922_v29  ;;  %v2807_v58 = vmul.f32 %v15480_v23, %v10922_v29 }
 0x3bc   : > { %v3556_v24 = vrot.slane %v11010_v61, 1  ;;  %v11032_v57 = vmul.f32 %v15489_v52, %v10981_v28  ;;  %v4253_v7 = vsel %vm1080_vm2, %v4101_v33, 0.0  ;;  %v2897_v40 = vmul.f32 %v15488_v43, %v10922_v29 }
 0x3bd   : > { %v3231_v63 = vsel %vm2598_vm7, %v3228_v11, %v3230_v8  ;;  %4254 = vadd.xlane.f32.xlu1 %v4253_v7  ;;  %v2384_v55 = vrot.slane %v11023_v62, 1  ;;  %v2855_v3 = vadd.f32 %v2807_v58, %v2755_v2  ;;  %v3392_v56 = vmul.f32 %v15510_v9, %v10922_v29  ;;  %v11047_v7 = vld [vmem:[#allocation2 + $0x158] sm:$0xff] }
 0x3be   : > { %v2970_v45 = vrot.slane %v2897_v40, 1  ;;  %v3483_v32 = vmul.f32 %v15512_v12, %v10922_v29  ;;  %v3703_v61 = vmul.f32 %v15489_v52, %v10922_v29  ;;  %v4106_v33 = vmul.f32 %v11027_v54, %v11027_v54 }
 0x3bf   : > { %v2647_v1 = vrot.slane %v2531_v27, 2  ;;  %v3341_v60 = vadd.f32 %v3231_v63, %v3065_v47  ;;  %v2480_v11 = vadd.f32 %v2384_v55, %v2219_v34  ;;  %v3440_v8 = vadd.f32 %v3392_v56, %v3340_v30 }
 0x3c0   : > { %v3816_v2 = vrot.slane %v11032_v57, 2  ;;  %v2972_v62 = vsel %vm2353_vm6, %v2970_v45, %v14963_v22  ;;  %v3066_v58 = vadd.f32 %v2970_v45, %v2854_v48  ;;  %v3555_v40 = vrot.slane %v3483_v32, 1  ;;  %v11094_v22 = vld [vmem:[#allocation2 + $0x170] sm:$0xff] }
 0x3c1   : > { %v11054_v36 = vadd.f32 %v10927_v49, %v3979_v16  ;;  %v3067_v14 = vadd.f32 %v2972_v62, %v2855_v3  ;;  %v3815_v25 = vrot.slane %v3703_v61, 2  ;;  %v4268_v27 = vsel %vm1080_vm2, %v4106_v33, 0.0 }
 0x3c2   : > { %v11058_v47 = vadd.f32 %v10927_v49, %v3980_v42  ;;  %v3393_v34 = vmul.f32 %v15510_v9, %v10981_v28  ;;  %v3557_v30 = vsel %vm2353_vm6, %v3555_v40, %v3556_v24  ;;  %v3651_v57 = vadd.f32 %v3555_v40, %v3439_v51  ;;  %4269 = vadd.xlane.f32.xlu1 %v4268_v27 }
 0x3c3   : > { %15553 = vst [vmem:[#allocation74_spill] sm:$0xff] %v11054_v36  ;;  %v15555_v48 = vrot.slane %v10959_v5, 7  ;;  %v15556_v63 = vrot.slane %v10936_v20, 7  ;;  %v15557_v3 = vrot.slane %v10965_v37, 2  ;;  %v3705_v42 = vmul.f32 %v15489_v52, %v11047_v7 }
 0x3c4   : > { %15554 = vst [vmem:[#allocation39_spill] sm:$0xff] %v11058_v47  ;;  %v3652_v45 = vadd.f32 %v3557_v30, %v3440_v8  ;;  %v3441_v32 = vadd.f32 %v3393_v34, %v3341_v60  ;;  %v3817_v61 = vsel %vm2598_vm7, %v3815_v25, %v3816_v2  ;;  %v11074_v33 = vadd.f32 %v3815_v25, %v3651_v57 }
 0x3c5   : > { %v5470_v16 = vsel %vm5435_vm3, %v15556_v63, %v15555_v48  ;;  %v2648_v56 = vsel %vm2598_vm7, %v15557_v3, %v2647_v1  ;;  %v2532_v51 = vmul.f32 %v15482_v0, %v10922_v29  ;;  %v5474_v62 = vrot.slane %v11002_v19, 7  ;;  %v2154_v1 = vld [vmem:[#allocation2 + $0x160] sm:$0xff] }
 0x3c6   : > { %v5471_v40 = vrot.slane %v11054_v36, 7  ;;  %v2385_v37 = vrot.slane %v11015_v10, 1  ;;  %v11081_v27 = vadd.f32 %v3817_v61, %v3652_v45  ;;  %v5472_v48 = vrot.slane %v11058_v47, 7 }
 0x3c7   : > { %v2756_v60 = vadd.f32 %v2648_v56, %v10990_v59  ;;  %v2649_v8 = vrot.slane %v2532_v51, 2  ;;  %v2809_v25 = vmul.f32 %v15480_v23, %v2154_v1  ;;  %v5573_v34 = vsel %vm1080_vm2, %v5470_v16, 0.0 }
 0x3c8   : > { %v2221_v30 = vmul.f32 %v15496_v39, %v10981_v28  ;;  %v3818_v57 = vrot.slane %v3705_v42, 2  ;;  %v5574_v63 = vadd.f32 %v5573_v34, %v10994_v15  ;;  %v2808_v10 = vmul.f32 %v15480_v23, %v10981_v28 }
 0x3c9   : > { %v3653_v3 = vadd.f32 %v3556_v24, %v3441_v32  ;;  %v2757_v45 = vadd.f32 %v2649_v8, %v2480_v11  ;;  %v11098_v59 = vmul.f32 %v15482_v0, %v10981_v28  ;;  %v3118_v16 = vmul.f32 %v15484_v17, %v10922_v29 }
 0x3ca   : > { %v11092_v61 = vadd.f32 %v2385_v37, %v2221_v30  ;;  %v11104_v56 = vmul.f32 %v15484_v17, %v10981_v28  ;;  %v5473_v15 = vsel %vm5435_vm3, %v5471_v40, %v5472_v48  ;;  %v2856_v42 = vadd.f32 %v2808_v10, %v2756_v60 }
 0x3cb   : > { %v5475_v24 = vsel %vm5435_vm3, %v5472_v48, %v5474_v62  ;;  %v11108_v11 = vadd.f32 %v2809_v25, %v2757_v45  ;;  %v3819_v32 = vsel %vm2598_vm7, %v3816_v2, %v3818_v57  ;;  %v2386_v51 = vsel %vm2353_vm6, %v2384_v55, %v2385_v37  ;;  %v11138_v45 = vld [vmem:[#allocation2 + $0x180] sm:$0xff] }
 0x3cc   : > { %v3232_v34 = vrot.slane %v3118_v16, 2  ;;  %v14969_v30 = vrot.slane %v11104_v56, 2  ;;  %v3929_v19 = vadd.f32 %v3819_v32, %v3653_v3  ;;  %v2220_v47 = vmul.f32 %v15496_v39, %v10922_v29 }
 0x3cd   : > { %v11117_v28 = vmul.f32 %v15487_v18, %v11094_v22  ;;  %v3394_v40 = vmul.f32 %v15510_v9, %v2154_v1  ;;  %v11122_v62 = vmul.f32 %v15482_v0, %v11094_v22  ;;  %v14968_v2 = vrot.slane %v11098_v59, 2 }
 0x3ce   : > { %v3234_v55 = vsel %vm2598_vm7, %v3232_v34, %v14969_v30  ;;  %v3342_v37 = vadd.f32 %v3232_v34, %v3066_v58  ;;  %v5575_v48 = vsel %vm1080_vm2, %v5473_v15, 0.0  ;;  %v15558_v29 = vrot.slane %v10999_v6, 1 }
 0x3cf   : > { %v2481_v25 = vadd.f32 %v2386_v51, %v2220_v47  ;;  %v3343_v57 = vadd.f32 %v3234_v55, %v3067_v14  ;;  %v11133_v10 = vadd.f32 %v5575_v48, %v5574_v63  ;;  %v11136_v3 = vsel %vm1080_vm2, %v5475_v24, 0.0 }
 0x3d0   : > { %v11131_v60 = vadd.f32 %v15558_v29, %v2856_v42  ;;  %v11142_v16 = vmul.f32 %v15488_v43, %v11094_v22  ;;  %v11144_v58 = vadd.f32 %v3394_v40, %v3342_v37  ;;  %v3984_v15 = vmul.f32 %v10887_v31, %v3929_v19  ;;  %v11171_v37 = vld [vmem:[#allocation2 + $0x188] sm:$0xff] }
 0x3d1   : > { %v2222_v6 = vmul.f32 %v15496_v39, %v2154_v1  ;;  %v14978_v47 = vrot.slane %v11117_v28, 1  ;;  %v4105_v14 = vmul.f32 %v2154_v1, %v2154_v1  ;;  %v2651_v63 = vsel %vm2598_vm7, %v2649_v8, %v14968_v2 }
 0x3d2   : > { %v11155_v24 = vmul.f32 %v15484_v17, %v11094_v22  ;;  %v2311_v32 = vmul.f32 %v15487_v18, %v11027_v54  ;;  %v2758_v51 = vadd.f32 %v2651_v63, %v2481_v25  ;;  %v2812_v19 = vmul.f32 %v15480_v23, %v11138_v45 }
 0x3d3   : > { %v4265_v34 = vsel %vm1080_vm2, %v4105_v14, 0.0  ;;  %v2535_v1 = vmul.f32 %v15482_v0, %v11027_v54  ;;  %v11167_v40 = vmul.f32 %v15484_v17, %v11047_v7  ;;  %v3397_v55 = vmul.f32 %v15510_v9, %v11138_v45 }
 0x3d4   : > { %4266 = vadd.xlane.f32.xlu1 %v4265_v34  ;;  %v2387_v48 = vrot.slane %v2311_v32, 1  ;;  %v2223_v29 = vmul.f32 %v15496_v39, %v11027_v54  ;;  %v2810_v14 = vmul.f32 %v15480_v23, %v11027_v54  ;;  %v2899_v63 = vmul.f32 %v15488_v43, %v11027_v54 }
 0x3d5   : > { %v2654_v25 = vrot.slane %v2535_v1, 2  ;;  %v11182_v30 = vmul.f32 %v15512_v12, %v11094_v22  ;;  %v11189_v1 = vmul.f32 %v15489_v52, %v11094_v22  ;;  %v11193_v36 = vmul.f32 %v15488_v43, %v11171_v37 }
 0x3d6   : > { %v2389_v32 = vsel %vm2353_vm6, %v2387_v48, %v14978_v47  ;;  %v2483_v34 = vadd.f32 %v2387_v48, %v2222_v6  ;;  %v2858_v42 = vadd.f32 %v2810_v14, %v2758_v51  ;;  %v15559_v2 = vrot.slane %v11122_v62, 2 }
 0x3d7   : > { %v2484_v8 = vadd.f32 %v2389_v32, %v2223_v29  ;;  %v2973_v35 = vrot.slane %v2899_v63, 1  ;;  %v3121_v47 = vmul.f32 %v15484_v17, %v11027_v54  ;;  %v2813_v48 = vmul.f32 %v15480_v23, %v11171_v37 }
 0x3d8   : > { %v2656_v5 = vsel %vm2598_vm7, %v2654_v25, %v15559_v2  ;;  %v2760_v20 = vadd.f32 %v2654_v25, %v2483_v34  ;;  %v11205_v51 = vmul.f32 %v15484_v17, %v11171_v37  ;;  %v15560_v32 = vrot.slane %v11142_v16, 1 }
 0x3d9   : > { %v2761_v6 = vadd.f32 %v2656_v5, %v2484_v8  ;;  %v3069_v25 = vadd.f32 %v2973_v35, %v11108_v11  ;;  %v3395_v63 = vmul.f32 %v15510_v9, %v11027_v54  ;;  %v14989_v5 = vrot.slane %v11182_v30, 1 }
 0x3da   : > { %v2860_v14 = vadd.f32 %v2812_v19, %v2760_v20  ;;  %v2975_v2 = vsel %vm2353_vm6, %v2973_v35, %v15560_v32  ;;  %v3237_v29 = vrot.slane %v3121_v47, 2  ;;  %v15561_v13 = vrot.slane %v11193_v36, 1 }
 0x3db   : > { %v11214_v8 = vadd.f32 %v2813_v48, %v2761_v6  ;;  %v3070_v34 = vadd.f32 %v2975_v2, %v2858_v42  ;;  %v14985_v20 = vrot.slane %v11205_v51, 2  ;;  %v3443_v19 = vadd.f32 %v3395_v63, %v3343_v57 }
 0x3dc   : > { %v3072_v38 = vadd.f32 %v15561_v13, %v2860_v14  ;;  %v3485_v32 = vmul.f32 %v15512_v12, %v11027_v54  ;;  %v15562_v35 = vrot.slane %v11155_v24, 2  ;;  %v3345_v53 = vadd.f32 %v3237_v29, %v3069_v25 }
 0x3dd   : > { %v3398_v6 = vmul.f32 %v15510_v9, %v11171_v37  ;;  %v11228_v47 = vmul.f32 %v15512_v12, %v11171_v37  ;;  %v3706_v48 = vmul.f32 %v15489_v52, %v11027_v54  ;;  %v11237_v14 = vadd.f32 %v10927_v49, %v3984_v15 }
 0x3de   : > { %v3239_v11 = vsel %vm2598_vm7, %v3237_v29, %v15562_v35  ;;  %v11232_v13 = vadd.f32 %v14985_v20, %v3072_v38  ;;  %v3558_v57 = vrot.slane %v3485_v32, 1  ;;  %v3445_v29 = vadd.f32 %v3397_v55, %v3345_v53  ;;  %v11286_v20 = vld [vmem:[#allocation2 + $0x198] sm:$0xff] }
 0x3df   : > { %v3346_v42 = vadd.f32 %v3239_v11, %v3070_v34  ;;  %15563 = vst [vmem:[#allocation109_spill] sm:$0xff] %v11237_v14  ;;  %v14986_v2 = vrot.slane %v11228_v47, 1  ;;  %v11242_v25 = vmul.f32 %v15489_v52, %v11171_v37  ;;  %v3982_v63 = vmul.f32 %v10887_v31, %v11074_v33  ;;  %v2162_v34 = vld [vmem:[#allocation2 + $0x1a0] sm:$0xff]  ;;  %v11255_v11 = vld [vmem:[#allocation2 + $0x190] sm:$0xff] }
 0x3e0   : > { %v3560_v54 = vsel %vm2353_vm6, %v3558_v57, %v14989_v5  ;;  %v3654_v15 = vadd.f32 %v3558_v57, %v11144_v58  ;;  %v14988_v53 = vrot.slane %v11189_v1, 2  ;;  %v3820_v35 = vrot.slane %v3706_v48, 2  ;;  %v11265_v57 = vld [vmem:[#allocation2 + $0x178] sm:$0xff] }
 0x3e1   : > { %v11246_v38 = vadd.f32 %v3398_v6, %v3346_v42  ;;  %v3655_v55 = vadd.f32 %v3560_v54, %v3443_v19  ;;  %v3657_v32 = vadd.f32 %v14986_v2, %v3445_v29  ;;  %v11259_v33 = vadd.f32 %v11136_v3, %v11133_v10 }
 0x3e2   : > { %v3235_v6 = vrot.slane %v11167_v40, 2  ;;  %v14987_v42 = vrot.slane %v11242_v25, 2  ;;  %v4110_v58 = vmul.f32 %v11171_v37, %v11171_v37  ;;  %v11269_v19 = vmul.f32 %v15496_v39, %v11138_v45 }
 0x3e3   : > { %v11272_v48 = vmul.f32 %v15496_v39, %v2162_v34  ;;  %v3822_v10 = vsel %vm2598_vm7, %v3820_v35, %v14988_v53  ;;  %v11277_v3 = vadd.f32 %v3820_v35, %v3654_v15  ;;  %v11290_v45 = vmul.f32 %v15487_v18, %v11255_v11 }
 0x3e4   : > { %v11279_v40 = vadd.f32 %v3822_v10, %v3655_v55  ;;  %v11283_v29 = vadd.f32 %v14987_v42, %v3657_v32  ;;  %v4280_v54 = vsel %vm1080_vm2, %v4110_v58, 0.0  ;;  %v3983_v15 = vmul.f32 %v10887_v31, %v11081_v27 }
 0x3e5   : > { %v11296_v55 = vadd.f32 %v10927_v49, %v3982_v63  ;;  %4281 = vadd.xlane.f32.xlu1 %v4280_v54  ;;  %v2534_v32 = vmul.f32 %v15482_v0, %v11047_v7  ;;  %v15565_v35 = vrot.slane %v11104_v56, 2  ;;  %v2224_v10 = vmul.f32 %v15496_v39, %v11094_v22 }
 0x3e6   : > { %v15005_v42 = vrot.slane %v11290_v45, 1  ;;  %v2537_v2 = vmul.f32 %v15482_v0, %v11265_v57  ;;  %v2227_v63 = vmul.f32 %v15496_v39, %v11255_v11  ;;  %v11313_v7 = vmul.f32 %v15482_v0, %v11255_v11 }
 0x3e7   : > { %15564 = vst [vmem:[#allocation43_spill] sm:$0xff] %v11296_v55  ;;  %v3236_v58 = vsel %vm2598_vm7, %v15565_v35, %v3235_v6  ;;  %v2540_v56 = vmul.f32 %v15482_v0, %v11286_v20  ;;  %v11318_v6 = vmul.f32 %v15480_v23, %v2162_v34  ;;  %v3396_v54 = vmul.f32 %v15510_v9, %v11094_v22  ;;  %v11322_v35 = vld [vmem:[#allocation2 + $0x1a8] sm:$0xff] }
 0x3e8   : > { %v3344_v27 = vadd.f32 %v3236_v58, %v11131_v60  ;;  %v15566_v60 = vrot.slane %v11117_v28, 1  ;;  %v2652_v53 = vrot.slane %v2534_v32, 2  ;;  %v3400_v5 = vmul.f32 %v15510_v9, %v2162_v34 }
 0x3e9   : > { %v2488_v21 = vadd.f32 %v15005_v42, %v2227_v63  ;;  %v2657_v44 = vrot.slane %v2537_v2, 2  ;;  %v15004_v26 = vrot.slane %v11313_v7, 2  ;;  %v11331_v41 = vadd.f32 %v10927_v49, %v3983_v15 }
 0x3ea   : > { %v2485_v58 = vadd.f32 %v15566_v60, %v2224_v10  ;;  %v3708_v4 = vmul.f32 %v15489_v52, %v11265_v57  ;;  %v2662_v28 = vrot.slane %v2540_v56, 2  ;;  %v3444_v32 = vadd.f32 %v3396_v54, %v3344_v27 }
 0x3eb   : > { %15567 = vst [vmem:[#allocation46_spill] sm:$0xff] %v11331_v41  ;;  %v11340_v34 = vmul.f32 %v15512_v12, %v11322_v35  ;;  %v15568_v2 = vrot.slane %v11098_v59, 2  ;;  %v15569_v15 = vrot.slane %v11122_v62, 2  ;;  %v11350_v60 = vmul.f32 %v15487_v18, %v11171_v37 }
 0x3ec   : > { %v2663_v27 = vsel %vm2598_vm7, %v15004_v26, %v2662_v28  ;;  %v2814_v54 = vmul.f32 %v15480_v23, %v11255_v11  ;;  %v3448_v59 = vadd.f32 %v3400_v5, %v11232_v13  ;;  %v2817_v62 = vmul.f32 %v15480_v23, %v11336_v50 }
 0x3ed   : > { %v2653_v10 = vsel %vm2598_vm7, %v15568_v2, %v2652_v53  ;;  %v2658_v63 = vsel %vm2598_vm7, %v15569_v15, %v2657_v44  ;;  %v2765_v46 = vadd.f32 %v2663_v27, %v2488_v21  ;;  %v2902_v44 = vmul.f32 %v15488_v43, %v11255_v11 }
 0x3ee   : > { %v2762_v56 = vadd.f32 %v2658_v63, %v2485_v58  ;;  %v2759_v53 = vadd.f32 %v2653_v10, %v11092_v61  ;;  %v3125_v15 = vmul.f32 %v15484_v17, %v11255_v11  ;;  %v3126_v58 = vmul.f32 %v15484_v17, %v11286_v20 }
 0x3ef   : > { %v3823_v28 = vrot.slane %v3708_v4, 2  ;;  %v15006_v63 = vrot.slane %v11340_v34, 1  ;;  %v11368_v5 = vadd.f32 %v2817_v62, %v2765_v46  ;;  %v2977_v21 = vrot.slane %v2902_v44, 1 }
 0x3f0   : > { %v2862_v2 = vadd.f32 %v2814_v54, %v2762_v56  ;;  %v11372_v13 = vmul.f32 %v15489_v52, %v11322_v35  ;;  %v2811_v61 = vmul.f32 %v15480_v23, %v11094_v22  ;;  %v3243_v10 = vrot.slane %v3125_v15, 2 }
 0x3f1   : > { %v3245_v27 = vrot.slane %v3126_v58, 2  ;;  %v15570_v56 = vrot.slane %v11182_v30, 1  ;;  %v3123_v4 = vmul.f32 %v15484_v17, %v11265_v57  ;;  %v11382_v46 = vmul.f32 %v15512_v12, %v11255_v11 }
 0x3f2   : > { %v3074_v26 = vadd.f32 %v2977_v21, %v2862_v2  ;;  %v3660_v62 = vadd.f32 %v15006_v63, %v3448_v59  ;;  %v2859_v44 = vadd.f32 %v2811_v61, %v2759_v53  ;;  %v4112_v22 = vmul.f32 %v11286_v20, %v11286_v20 }
 0x3f3   : > { %v3656_v54 = vadd.f32 %v15570_v56, %v3444_v32  ;;  %v3246_v42 = vsel %vm2598_vm7, %v3243_v10, %v3245_v27  ;;  %v15014_v30 = vrot.slane %v11331_v41, 7  ;;  %v3402_v2 = vmul.f32 %v15510_v9, %v11336_v50 }
 0x3f4   : > { %v3350_v32 = vadd.f32 %v3246_v42, %v3074_v26  ;;  %v11394_v57 = vmul.f32 %v15489_v52, %v11255_v11  ;;  %v15571_v15 = vrot.slane %v11189_v1, 2  ;;  %v15012_v53 = vrot.slane %v11350_v60, 1 }
 0x3f5   : > { %v15007_v58 = vrot.slane %v11372_v13, 2  ;;  %v4286_v61 = vsel %vm1080_vm2, %v4112_v22, 0.0  ;;  %v3240_v26 = vrot.slane %v3123_v4, 2  ;;  %v3562_v56 = vrot.slane %v11382_v46, 1 }
 0x3f6   : > { %v3824_v59 = vsel %vm2598_vm7, %v15571_v15, %v3823_v28  ;;  %v11404_v42 = vadd.f32 %v3402_v2, %v3350_v32  ;;  %4287 = vadd.xlane.f32.xlu1 %v4286_v61  ;;  %v3985_v1 = vmul.f32 %v10887_v31, %v11277_v3  ;;  %v15572_v28 = vrot.slane %v11142_v16, 1 }
 0x3f7   : > { %v11402_v27 = vadd.f32 %v3824_v59, %v3656_v54  ;;  %v11409_v63 = vadd.f32 %v15007_v58, %v3660_v62  ;;  %v15573_v22 = vrot.slane %v11193_v36, 1  ;;  %v15010_v4 = vrot.slane %v11394_v57, 2 }
 0x3f8   : > { %v3071_v15 = vadd.f32 %v15572_v28, %v2859_v44  ;;  %v11421_v32 = vmul.f32 %v15482_v0, %v11171_v37  ;;  %v15574_v62 = vrot.slane %v11228_v47, 1  ;;  %v3986_v16 = vmul.f32 %v10887_v31, %v11279_v40 }
 0x3f9   : > { %v2978_v54 = vsel %vm2353_vm6, %v15573_v22, %v2977_v21  ;;  %v11433_v36 = vmul.f32 %v15489_v52, %v11286_v20  ;;  %v15575_v21 = vrot.slane %v11205_v51, 2  ;;  %v15577_v28 = vrot.slane %v11242_v25, 2  ;;  %v2165_v22 = vld [vmem:[#allocation2 + $0x1b8] sm:$0xff] }
 0x3fa   : > { %v3073_v2 = vadd.f32 %v2978_v54, %v11214_v8  ;;  %v3563_v3 = vsel %vm2353_vm6, %v15574_v62, %v3562_v56  ;;  %v15576_v8 = vrot.slane %v11155_v24, 2  ;;  %v4115_v20 = vmul.f32 %v11336_v50, %v11336_v50 }
 0x3fb   : > { %v3244_v44 = vsel %vm2598_vm7, %v15575_v21, %v3243_v10  ;;  %v3658_v59 = vadd.f32 %v3563_v3, %v11246_v38  ;;  %v3827_v40 = vsel %vm2598_vm7, %v15577_v28, %v15010_v4  ;;  %v11450_v51 = vadd.f32 %v10927_v49, %v3985_v1 }
 0x3fc   : > { %v3241_v61 = vsel %vm2598_vm7, %v15576_v8, %v3240_v26  ;;  %v3349_v47 = vadd.f32 %v3244_v44, %v3073_v2  ;;  %v11456_v24 = vmul.f32 %v15487_v18, %v11336_v50  ;;  %v3399_v26 = vmul.f32 %v15510_v9, %v11255_v11 }
 0x3fd   : > { %15578 = vst [vmem:[#allocation110_spill] sm:$0xff] %v11450_v51  ;;  %v3347_v10 = vadd.f32 %v3241_v61, %v3071_v15  ;;  %v11452_v38 = vadd.f32 %v3827_v40, %v3658_v59  ;;  %v15579_v25 = vrot.slane %v11290_v45, 1  ;;  %v15009_v2 = vrot.slane %v11421_v32, 2  ;;  %v11481_v59 = vld [vmem:[#allocation2 + $0x1d0] sm:$0xff] }
 0x3fe   : > { %v4295_v1 = vsel %vm1080_vm2, %v4115_v20, 0.0  ;;  %v2230_v15 = vmul.f32 %v15496_v39, %v11336_v50  ;;  %v15008_v62 = vrot.slane %v11456_v24, 1  ;;  %v11472_v3 = vmul.f32 %v15482_v0, %v11336_v50 }
 0x3ff   : > { %v2392_v54 = vsel %vm2353_vm6, %v15012_v53, %v15579_v25  ;;  %4296 = vadd.xlane.f32.xlu1 %v4295_v1  ;;  %v2543_v11 = vmul.f32 %v15482_v0, %v2165_v22  ;;  %v11476_v45 = vadd.f32 %v10927_v49, %v3986_v16  ;;  %v3828_v21 = vrot.slane %v11433_v36, 2 }
 0x400   : > { %v2226_v44 = vmul.f32 %v15496_v39, %v11171_v37  ;;  %v2904_v8 = vmul.f32 %v15488_v43, %v11336_v50  ;;  %v3447_v61 = vadd.f32 %v3399_v26, %v3347_v10  ;;  %v2491_v28 = vadd.f32 %v15008_v62, %v2230_v15 }
 0x401   : > { %15580 = vst [vmem:[#allocation6_spill] sm:$0xff] %v11476_v45  ;;  %v15011_v40 = vrot.slane %v11472_v3, 2  ;;  %v2667_v20 = vrot.slane %v2543_v11, 2  ;;  %v3128_v36 = vmul.f32 %v15484_v17, %v11336_v50  ;;  %v3129_v1 = vmul.f32 %v15484_v17, %v2165_v22 }
 0x402   : > { %v2487_v25 = vadd.f32 %v2392_v54, %v2226_v44  ;;  %v2980_v16 = vrot.slane %v2904_v8, 1  ;;  %v15581_v37 = vrot.slane %v11313_v7, 2  ;;  %v2820_v26 = vmul.f32 %v15480_v23, %v11481_v59 }
 0x403   : > { %v2668_v10 = vsel %vm2598_vm7, %v15011_v40, %v2667_v20  ;;  %v3490_v54 = vmul.f32 %v15512_v12, %v11336_v50  ;;  %v3248_v44 = vrot.slane %v3128_v36, 2  ;;  %v3250_v8 = vrot.slane %v3129_v1, 2 }
 0x404   : > { %v2661_v58 = vsel %vm2598_vm7, %v15009_v2, %v15581_v37  ;;  %v2768_v15 = vadd.f32 %v2668_v10, %v2491_v28  ;;  %v3077_v11 = vadd.f32 %v2980_v16, %v11368_v5  ;;  %v3713_v62 = vmul.f32 %v15489_v52, %v11336_v50 }
 0x405   : > { %v3565_v7 = vrot.slane %v3490_v54, 1  ;;  %v3714_v37 = vmul.f32 %v15489_v52, %v2165_v22  ;;  %v4116_v2 = vmul.f32 %v2165_v22, %v2165_v22  ;;  %v2764_v4 = vadd.f32 %v2661_v58, %v2487_v25 }
 0x406   : > { %v11507_v20 = vadd.f32 %v2820_v26, %v2768_v15  ;;  %v3251_v40 = vsel %vm2598_vm7, %v3248_v44, %v3250_v8  ;;  %v3405_v53 = vmul.f32 %v15510_v9, %v11481_v59  ;;  %v3831_v36 = vrot.slane %v3713_v62, 2 }
 0x407   : > { %v3353_v28 = vadd.f32 %v3251_v40, %v3077_v11  ;;  %v3662_v5 = vadd.f32 %v3565_v7, %v11404_v42  ;;  %v3833_v1 = vrot.slane %v3714_v37, 2  ;;  %v3659_v10 = vadd.f32 %v3562_v56, %v3447_v61 }
 0x408   : > { %v2816_v50 = vmul.f32 %v15480_v23, %v11322_v35  ;;  %v3401_v58 = vmul.f32 %v15510_v9, %v11322_v35  ;;  %v4298_v22 = vsel %vm1080_vm2, %v4116_v2, 0.0  ;;  %v11525_v42 = vmul.f32 %v15488_v43, %v11322_v35 }
 0x409   : > { %v11520_v25 = vadd.f32 %v3405_v53, %v3353_v28  ;;  %v3834_v26 = vsel %vm2598_vm7, %v3831_v36, %v3833_v1  ;;  %4299 = vadd.xlane.f32.xlu1 %v4298_v22  ;;  %v11529_v46 = vmul.f32 %v15484_v17, %v11322_v35  ;;  %v2315_v2 = vmul.f32 %v15487_v18, %v11322_v35 }
 0x40a   : > { %v2864_v56 = vadd.f32 %v2816_v50, %v2764_v4  ;;  %v3449_v62 = vadd.f32 %v3401_v58, %v3349_v47  ;;  %v11531_v61 = vadd.f32 %v3834_v26, %v3662_v5  ;;  %v15582_v53 = vrot.slane %v11296_v55, 7 }
 0x40b   : > { %v3988_v54 = vmul.f32 %v10887_v31, %v11283_v29  ;;  %v2979_v15 = vrot.slane %v11525_v42, 1  ;;  %v3247_v11 = vrot.slane %v11529_v46, 2  ;;  %v3987_v4 = vmul.f32 %v10887_v31, %v11402_v27 }
 0x40c   : > { %v5478_v40 = vsel %vm5435_vm3, %v15582_v53, %v15014_v30  ;;  %v15583_v47 = vrot.slane %v11350_v60, 1  ;;  %v5481_v37 = vrot.slane %v11450_v51, 7  ;;  %v15584_v28 = vrot.slane %v11394_v57, 2  ;;  %v11769_v30 = vld [vmem:[#allocation2 + $0x218] sm:$0xff] }
 0x40d   : > { %v15013_v1 = vrot.slane %v11476_v45, 7  ;;  %v2981_v50 = vsel %vm2353_vm6, %v2979_v15, %v2980_v16  ;;  %v15585_v58 = vrot.slane %v11340_v34, 1  ;;  %v2393_v60 = vrot.slane %v2315_v2, 1 }
 0x40e   : > { %v2486_v8 = vadd.f32 %v15583_v47, %v11269_v19  ;;  %v3829_v5 = vsel %vm2598_vm7, %v15584_v28, %v3828_v21  ;;  %v3991_v19 = vmul.f32 %v10887_v31, %v11409_v63  ;;  %v3076_v22 = vadd.f32 %v2981_v50, %v2864_v56  ;;  %v2169_v28 = vld [vmem:[#allocation2 + $0x1d8] sm:$0xff] }
 0x40f   : > { %v3935_v29 = vadd.f32 %v3829_v5, %v3659_v10  ;;  %v3566_v27 = vsel %vm2353_vm6, %v15585_v58, %v3565_v7  ;;  %v11563_v57 = vadd.f32 %v10927_v49, %v3988_v54  ;;  %v3249_v21 = vsel %vm2598_vm7, %v3247_v11, %v3248_v44 }
 0x410   : > { %v3661_v26 = vadd.f32 %v3566_v27, %v3449_v62  ;;  %v15587_v10 = vrot.slane %v11372_v13, 2  ;;  %v4119_v34 = vmul.f32 %v11481_v59, %v11481_v59  ;;  %v15588_v7 = vrot.slane %v11421_v32, 2 }
 0x411   : > { %15586 = vst [vmem:[#allocation14_spill] sm:$0xff] %v11563_v57  ;;  %v2541_v56 = vmul.f32 %v15482_v0, %v11322_v35  ;;  %v11577_v62 = vadd.f32 %v3249_v21, %v3076_v22  ;;  %v5579_v53 = vsel %vm1080_vm2, %v5478_v40, 0.0  ;;  %v5483_v13 = vsel %vm5435_vm3, %v5481_v37, %v15013_v1 }
 0x412   : > { %v3832_v16 = vsel %vm2598_vm7, %v15587_v10, %v3831_v36  ;;  %v2763_v63 = vadd.f32 %v15588_v7, %v2486_v8  ;;  %v3990_v44 = vmul.f32 %v10887_v31, %v3935_v29  ;;  %v4307_v36 = vsel %vm1080_vm2, %v4119_v34, 0.0  ;;  %v11602_v29 = vld [vmem:[#allocation2 + $0x1c0] sm:$0xff] }
 0x413   : > { %v11579_v2 = vadd.f32 %v3832_v16, %v3661_v26  ;;  %v11588_v32 = vadd.f32 %v5579_v53, %v11259_v33  ;;  %v11591_v54 = vadd.f32 %v10927_v49, %v3987_v4  ;;  %v3989_v47 = vmul.f32 %v10887_v31, %v11452_v38  ;;  %4308 = vadd.xlane.f32.xlu1 %v4307_v36 }
 0x414   : > { %v15591_v8 = vrot.slane %v11456_v24, 1  ;;  %v11599_v37 = vadd.f32 %v10927_v49, %v3991_v19  ;;  %v2229_v33 = vmul.f32 %v15496_v39, %v11322_v35  ;;  %v2906_v4 = vmul.f32 %v15488_v43, %v11481_v59 }
 0x415   : > { %15589 = vst [vmem:[#allocation45_spill] sm:$0xff] %v11588_v32  ;;  %15590 = vst [vmem:[#allocation15_spill] sm:$0xff] %v11591_v54  ;;  %v11609_v31 = vsel %vm1080_vm2, %v5483_v13, 0.0  ;;  %v2863_v38 = vadd.f32 %v11318_v6, %v2763_v63  ;;  %v2664_v24 = vrot.slane %v2541_v56, 2  ;;  %v3131_v50 = vmul.f32 %v15484_v17, %v11481_v59  ;;  %v11632_v63 = vld [vmem:[#allocation2 + $0x1c8] sm:$0xff] }
 0x416   : > { %v2395_v40 = vsel %vm2353_vm6, %v2393_v60, %v15591_v8  ;;  %15592 = vst [vmem:[#allocation112_spill] sm:$0xff] %v11599_v37  ;;  %15593 = vst [vmem:[#allocation49_spill] sm:$0xff] %v11609_v31  ;;  %v11615_v58 = vadd.f32 %v10927_v49, %v3990_v44  ;;  %v2983_v19 = vrot.slane %v2906_v4, 1  ;;  %v3132_v22 = vmul.f32 %v15484_v17, %v2169_v28 }
 0x417   : > { %v2490_v27 = vadd.f32 %v2395_v40, %v2229_v33  ;;  %v11619_v35 = vadd.f32 %v10927_v49, %v3989_v47  ;;  %v2818_v26 = vmul.f32 %v15480_v23, %v11602_v29  ;;  %v3253_v21 = vrot.slane %v3131_v50, 2  ;;  %15596 = vst [vmem:[#allocation57_spill] sm:$0xff] %v11632_v63 }
 0x418   : > { %15594 = vst [vmem:[#allocation51_spill] sm:$0xff] %v11615_v58  ;;  %v3492_v6 = vmul.f32 %v15512_v12, %v11481_v59  ;;  %v11627_v10 = vmul.f32 %v15510_v9, %v11602_v29  ;;  %v3080_v16 = vadd.f32 %v2983_v19, %v11507_v20  ;;  %v3255_v34 = vrot.slane %v3132_v22, 2 }
 0x419   : > { %15595 = vst [vmem:[#allocation55_spill] sm:$0xff] %v11619_v35  ;;  %v3716_v7 = vmul.f32 %v15489_v52, %v11481_v59  ;;  %v15597_v49 = vrot.slane %v11472_v3, 2  ;;  %v3717_v13 = vmul.f32 %v15489_v52, %v2169_v28  ;;  %v4120_v44 = vmul.f32 %v2169_v28, %v2169_v28 }
 0x41a   : > { %v3568_v53 = vrot.slane %v3492_v6, 1  ;;  %v2489_v36 = vadd.f32 %v2393_v60, %v11272_v48  ;;  %v3256_v8 = vsel %vm2598_vm7, %v3253_v21, %v3255_v34  ;;  %v2819_v3 = vmul.f32 %v15480_v23, %v11632_v63 }
 0x41b   : > { %v2666_v56 = vsel %vm2598_vm7, %v2664_v24, %v15597_v49  ;;  %v3836_v20 = vrot.slane %v3716_v7, 2  ;;  %v11640_v40 = vadd.f32 %v3256_v8, %v3080_v16  ;;  %v3838_v4 = vrot.slane %v3717_v13, 2 }
 0x41c   : > { %v2767_v47 = vadd.f32 %v2666_v56, %v2490_v27  ;;  %v3665_v33 = vadd.f32 %v3568_v53, %v11520_v25  ;;  %v4310_v50 = vsel %vm1080_vm2, %v4120_v44, 0.0  ;;  %v2318_v22 = vmul.f32 %v15487_v18, %v11481_v59 }
 0x41d   : > { %v11650_v48 = vmul.f32 %v15482_v0, %v11481_v59  ;;  %4311 = vadd.xlane.f32.xlu1 %v4310_v50  ;;  %v2905_v60 = vmul.f32 %v15488_v43, %v11632_v63  ;;  %v2546_v27 = vmul.f32 %v15482_v0, %v2169_v28  ;;  %v3839_v25 = vsel %vm2598_vm7, %v3836_v20, %v3838_v4  ;;  %v11669_v28 = vld [vmem:[%s14806_s9] ss:$0 sm:$0xff] }
 0x41e   : > { %v2317_v6 = vmul.f32 %v15487_v18, %v11632_v63  ;;  %v11660_v16 = vmul.f32 %v15484_v17, %v11632_v63  ;;  %v2766_v34 = vadd.f32 %v2664_v24, %v2489_v36  ;;  %v2867_v7 = vadd.f32 %v2819_v3, %v2767_v47 }
 0x41f   : > { %v3404_v49 = vmul.f32 %v15510_v9, %v11632_v63  ;;  %v11664_v56 = vadd.f32 %v3839_v25, %v3665_v33  ;;  %v3993_v13 = vmul.f32 %v11669_v28, %v11531_v61  ;;  %v2982_v44 = vrot.slane %v2905_v60, 1  ;;  %v11681_v33 = vld [vmem:[#allocation2 + $0x1f0] sm:$0xff] }
 0x420   : > { %v3252_v8 = vrot.slane %v11660_v16, 2  ;;  %v11676_v24 = vmul.f32 %v15512_v12, %v11632_v63  ;;  %v3075_v36 = vadd.f32 %v2979_v15, %v2863_v38  ;;  %v2397_v4 = vrot.slane %v2318_v22, 1 }
 0x421   : > { %v3452_v47 = vadd.f32 %v3404_v49, %v11577_v62  ;;  %v11685_v50 = vmul.f32 %v15489_v52, %v11632_v63  ;;  %v2670_v61 = vrot.slane %v11650_v48, 2  ;;  %v2672_v3 = vrot.slane %v2546_v27, 2 }
 0x422   : > { %v2396_v60 = vrot.slane %v2317_v6, 1  ;;  %v2984_v25 = vsel %vm2353_vm6, %v2982_v44, %v2983_v19  ;;  %v2866_v5 = vadd.f32 %v2818_v26, %v2766_v34  ;;  %v2233_v42 = vmul.f32 %v15496_v39, %v11481_v59  ;;  %v11703_v34 = vld [vmem:[#allocation2 + $0x1f8] sm:$0xff] }
 0x423   : > { %v3079_v15 = vadd.f32 %v2984_v25, %v2867_v7  ;;  %v3567_v62 = vrot.slane %v11676_v24, 1  ;;  %v2544_v38 = vmul.f32 %v15482_v0, %v11632_v63  ;;  %v3254_v22 = vsel %vm2598_vm7, %v3252_v8, %v3253_v21 }
 0x424   : > { %v3835_v48 = vrot.slane %v11685_v50, 2  ;;  %v4123_v27 = vmul.f32 %v11681_v33, %v11681_v33  ;;  %v2231_v19 = vmul.f32 %v15496_v39, %v11602_v29  ;;  %v2494_v26 = vadd.f32 %v2397_v4, %v2233_v42 }
 0x425   : > { %v3355_v59 = vadd.f32 %v3254_v22, %v3079_v15  ;;  %v3569_v6 = vsel %vm2353_vm6, %v3567_v62, %v3568_v53  ;;  %v2673_v7 = vsel %vm2598_vm7, %v2670_v61, %v2672_v3  ;;  %v2398_v49 = vsel %vm2353_vm6, %v2396_v60, %v2397_v4 }
 0x426   : > { %v3664_v24 = vadd.f32 %v3569_v6, %v3452_v47  ;;  %v4319_v21 = vsel %vm1080_vm2, %v4123_v27, 0.0  ;;  %v3351_v25 = vadd.f32 %v3247_v11, %v3075_v36  ;;  %v2232_v1 = vmul.f32 %v15496_v39, %v11632_v63  ;;  %v11727_v11 = vld [vmem:[#allocation2 + $0x1e0] sm:$0xff] }
 0x427   : > { %v3837_v29 = vsel %vm2598_vm7, %v3835_v48, %v3836_v20  ;;  %4320 = vadd.xlane.f32.xlu1 %v4319_v21  ;;  %v11717_v53 = vmul.f32 %v15487_v18, %v11681_v33  ;;  %v2669_v3 = vrot.slane %v2544_v38, 2  ;;  %v11723_v47 = vmul.f32 %v15482_v0, %v11681_v33  ;;  %15598 = vst [vmem:[#allocation52_spill] sm:$0xff] %v11727_v11  ;;  %v11737_v21 = vld [vmem:[%s14807_s10] ss:$0 sm:$0xff] }
 0x428   : > { %v11719_v4 = vadd.f32 %v3837_v29, %v3664_v24  ;;  %v2549_v46 = vmul.f32 %v15482_v0, %v11703_v34  ;;  %v2771_v36 = vadd.f32 %v2673_v7, %v2494_v26  ;;  %v2492_v42 = vadd.f32 %v2396_v60, %v2231_v19 }
 0x429   : > { %v2493_v20 = vadd.f32 %v2398_v49, %v2232_v1  ;;  %v15016_v15 = vrot.slane %v11717_v53, 1  ;;  %v3078_v22 = vadd.f32 %v2982_v44, %v2866_v5  ;;  %v2236_v38 = vmul.f32 %v15496_v39, %v11681_v33  ;;  %v11747_v44 = vld [vmem:[#allocation2 + $0x1e8] sm:$0xff] }
 0x42a   : > { %v15015_v27 = vrot.slane %v11723_v47, 2  ;;  %v2677_v6 = vrot.slane %v2549_v46, 2  ;;  %v11740_v26 = vadd.f32 %v11737_v21, %v3993_v13  ;;  %v3451_v1 = vadd.f32 %v11627_v10, %v3351_v25 }
 0x42b   : > { %v11745_v5 = vmul.f32 %v11669_v28, %v11579_v2  ;;  %v2821_v60 = vmul.f32 %v15480_v23, %v11727_v11  ;;  %v2823_v19 = vmul.f32 %v15480_v23, %v11681_v33  ;;  %v2671_v7 = vsel %vm2598_vm7, %v2669_v3, %v2670_v61  ;;  %v11758_v2 = vld [vmem:[#allocation2 + $0x210] sm:$0xff] }
 0x42c   : > { %15599 = vst [vmem:[#allocation61_spill] sm:$0xff] %v11740_v26  ;;  %v2497_v13 = vadd.f32 %v15016_v15, %v2236_v38  ;;  %v3406_v10 = vmul.f32 %v15510_v9, %v11727_v11  ;;  %v2769_v49 = vadd.f32 %v2669_v3, %v2492_v42  ;;  %v2770_v25 = vadd.f32 %v2671_v7, %v2493_v20 }
 0x42d   : > { %v2678_v29 = vsel %vm2598_vm7, %v15015_v27, %v2677_v6  ;;  %v2871_v46 = vadd.f32 %v2823_v19, %v2771_v36  ;;  %v3408_v24 = vmul.f32 %v15510_v9, %v11681_v33  ;;  %v2822_v61 = vmul.f32 %v15480_v23, %v11747_v44  ;;  %v11794_v19 = vld [vmem:[#allocation2 + $0x200] sm:$0xff] }
 0x42e   : > { %v3354_v38 = vadd.f32 %v3252_v8, %v3078_v22  ;;  %v3663_v3 = vadd.f32 %v3567_v62, %v3451_v1  ;;  %v11773_v42 = vmul.f32 %v15488_v43, %v11681_v33  ;;  %v11777_v20 = vmul.f32 %v15484_v17, %v11681_v33  ;;  %15600 = vst [vmem:[#allocation40_spill] sm:$0xff] %v11794_v19 }
 0x42f   : > { %v3135_v36 = vmul.f32 %v15484_v17, %v11703_v34  ;;  %v11782_v6 = vadd.f32 %v3408_v24, %v11640_v40  ;;  %v3407_v16 = vmul.f32 %v15510_v9, %v11747_v44  ;;  %v2774_v8 = vadd.f32 %v2678_v29, %v2497_v13 }
 0x430   : > { %v11788_v62 = vmul.f32 %v15488_v43, %v11758_v2  ;;  %v11790_v22 = vadd.f32 %v2821_v60, %v2769_v49  ;;  %v11792_v1 = vadd.f32 %v2822_v61, %v2770_v25  ;;  %v11798_v7 = vmul.f32 %v15484_v17, %v11758_v2  ;;  %v11814_v25 = vld [vmem:[#allocation2 + $0x230] sm:$0xff] }
 0x431   : > { %v3138_v40 = vmul.f32 %v15484_v17, %v11769_v30  ;;  %v11802_v24 = vadd.f32 %v3406_v10, %v3354_v38  ;;  %v11804_v13 = vadd.f32 %v3407_v16, %v3355_v59  ;;  %v2234_v29 = vmul.f32 %v15496_v39, %v11727_v11 }
 0x432   : > { %v2826_v60 = vmul.f32 %v15480_v23, %v11758_v2  ;;  %v11812_v49 = vadd.f32 %v3835_v48, %v3663_v3  ;;  %v2986_v61 = vrot.slane %v11773_v42, 1  ;;  %v15022_v27 = vrot.slane %v11777_v20, 2 }
 0x433   : > { %v3260_v10 = vrot.slane %v3135_v36, 2  ;;  %v2824_v59 = vmul.f32 %v15480_v23, %v11794_v19  ;;  %v2989_v16 = vrot.slane %v11788_v62, 1  ;;  %v4124_v15 = vmul.f32 %v11703_v34, %v11703_v34  ;;  %v11833_v62 = vld [vmem:[#allocation2 + $0x208] sm:$0xff] }
 0x434   : > { %v2874_v38 = vadd.f32 %v2826_v60, %v2774_v8  ;;  %v3083_v51 = vadd.f32 %v2986_v61, %v2871_v46  ;;  %v3265_v48 = vrot.slane %v3138_v40, 2  ;;  %v11826_v3 = vmul.f32 %v15510_v9, %v11794_v19 }
 0x435   : > { %v3411_v42 = vmul.f32 %v15510_v9, %v11758_v2  ;;  %v3414_v36 = vmul.f32 %v15510_v9, %v11814_v25  ;;  %v4322_v8 = vsel %vm1080_vm2, %v4124_v15, 0.0  ;;  %v2319_v46 = vmul.f32 %v15487_v18, %v11747_v44 }
 0x436   : > { %v3261_v40 = vsel %vm2598_vm7, %v15022_v27, %v3260_v10  ;;  %v11842_v60 = vmul.f32 %v15512_v12, %v11681_v33  ;;  %v11846_v50 = vmul.f32 %v15512_v12, %v11758_v2  ;;  %4323 = vadd.xlane.f32.xlu1 %v4322_v8  ;;  %v2547_v15 = vmul.f32 %v15482_v0, %v11747_v44 }
 0x437   : > { %v3086_v55 = vadd.f32 %v2989_v16, %v2874_v38  ;;  %v11852_v18 = vmul.f32 %v15512_v12, %v11814_v25  ;;  %v2399_v19 = vrot.slane %v2319_v46, 1  ;;  %v2907_v10 = vmul.f32 %v15488_v43, %v11747_v44 }
 0x438   : > { %v15601_v27 = vrot.slane %v11798_v7, 2  ;;  %v2235_v63 = vmul.f32 %v15496_v39, %v11747_v44  ;;  %v2674_v8 = vrot.slane %v2547_v15, 2  ;;  %v2909_v0 = vmul.f32 %v15488_v43, %v11833_v62  ;;  %v11873_v15 = vpop.xlane.xlu1 %4137 }
 0x439   : > { %v3359_v38 = vadd.f32 %v3261_v40, %v3083_v51  ;;  %v11865_v31 = vmul.f32 %v15489_v52, %v11681_v33  ;;  %v15602_v46 = vrot.slane %v11717_v53, 1  ;;  %v2495_v57 = vadd.f32 %v2399_v19, %v2234_v29 }
 0x43a   : > { %v3266_v11 = vsel %vm2598_vm7, %v15601_v27, %v3265_v48  ;;  %v2985_v48 = vrot.slane %v2907_v10, 1  ;;  %v3133_v39 = vmul.f32 %v15484_v17, %v11747_v44  ;;  %v15603_v33 = vrot.slane %v11723_v47, 2 }
 0x43b   : > { %v2401_v58 = vsel %vm2353_vm6, %v2399_v19, %v15602_v46  ;;  %v2772_v40 = vadd.f32 %v2674_v8, %v2495_v57  ;;  %v2825_v19 = vmul.f32 %v15480_v23, %v11833_v62  ;;  %v3362_v29 = vadd.f32 %v3266_v11, %v3086_v55 }
 0x43c   : > { %v2496_v27 = vadd.f32 %v2401_v58, %v2235_v63  ;;  %v2676_v53 = vsel %vm2598_vm7, %v2674_v8, %v15603_v33  ;;  %v2988_v58 = vrot.slane %v2909_v0, 1  ;;  %v3136_v63 = vmul.f32 %v15484_v17, %v11833_v62  ;;  %v11888_v8 = vpop.xlane.xlu0 %4140  ;;  %v11903_v0 = vpop.xlane.xlu1 %4134 }
 0x43d   : > { %v3459_v10 = vadd.f32 %v3411_v42, %v3359_v38  ;;  %v3720_v43 = vmul.f32 %v15489_v52, %v11703_v34  ;;  %v2872_v32 = vadd.f32 %v2824_v59, %v2772_v40  ;;  %v2987_v47 = vsel %vm2353_vm6, %v2985_v48, %v2986_v61 }
 0x43e   : > { %v2773_v46 = vadd.f32 %v2676_v53, %v2496_v27  ;;  %v3081_v33 = vadd.f32 %v2985_v48, %v11790_v22  ;;  %v3257_v57 = vrot.slane %v3133_v39, 2  ;;  %v11892_v23 = vmul.f32 %v15489_v52, %v11758_v2  ;;  %v11908_v39 = vld [vmem:[#allocation2 + $0x220] sm:$0xff]  ;;  %v11910_v53 = vld [vmem:[#allocation2 + $0x228] sm:$0xff] }
 0x43f   : > { %v3723_v17 = vmul.f32 %v15489_v52, %v11769_v30  ;;  %v3082_v55 = vadd.f32 %v2987_v47, %v11792_v1  ;;  %v3493_v34 = vmul.f32 %v15512_v12, %v11747_v44  ;;  %v15604_v11 = vrot.slane %v11842_v60, 1  ;;  %15605 = vst [vmem:[#allocation54_spill] sm:$0xff] %v11908_v39  ;;  %15606 = vst [vmem:[#allocation94_spill] sm:$0xff] %v11910_v53 }
 0x440   : > { %v2873_v51 = vadd.f32 %v2825_v19, %v2773_v46  ;;  %v2990_v22 = vsel %vm2353_vm6, %v2988_v58, %v2989_v16  ;;  %v3084_v59 = vadd.f32 %v2988_v58, %v2872_v32  ;;  %v3262_v42 = vrot.slane %v3136_v63, 2 }
 0x441   : > { %v3668_v61 = vadd.f32 %v15604_v11, %v11782_v6  ;;  %v3841_v38 = vrot.slane %v11865_v31, 2  ;;  %v3843_v27 = vrot.slane %v3720_v43, 2  ;;  %v3495_v1 = vmul.f32 %v15512_v12, %v11833_v62 }
 0x442   : > { %v3085_v48 = vadd.f32 %v2990_v22, %v2873_v51  ;;  %v3462_v40 = vadd.f32 %v3414_v36, %v3362_v29  ;;  %v15607_v6 = vrot.slane %v11846_v50, 1  ;;  %v15608_v32 = vrot.slane %v11777_v20, 2  ;;  %v11924_v29 = vld [vmem:[#allocation2 + $0x238] sm:$0xff] }
 0x443   : > { %v3357_v19 = vadd.f32 %v3257_v57, %v3081_v33  ;;  %v3410_v31 = vmul.f32 %v15510_v9, %v11833_v62  ;;  %v3570_v43 = vrot.slane %v3493_v34, 1  ;;  %v3718_v51 = vmul.f32 %v15489_v52, %v11747_v44  ;;  %v11930_v33 = vpop.xlane.xlu0 %4143 }
 0x444   : > { %v3671_v46 = vadd.f32 %v15607_v6, %v3459_v10  ;;  %v3259_v16 = vsel %vm2598_vm7, %v3257_v57, %v15608_v32  ;;  %v15609_v63 = vrot.slane %v11798_v7, 2  ;;  %v3360_v10 = vadd.f32 %v3262_v42, %v3084_v59  ;;  %v11940_v6 = vpop.xlane.xlu1 %4146 }
 0x445   : > { %v3358_v58 = vadd.f32 %v3259_v16, %v3082_v55  ;;  %v3412_v20 = vmul.f32 %v15510_v9, %v11908_v39  ;;  %v3497_v47 = vmul.f32 %v15512_v12, %v11910_v53  ;;  %v3573_v55 = vrot.slane %v3495_v1, 1 }
 0x446   : > { %v3264_v36 = vsel %vm2598_vm7, %v3262_v42, %v15609_v63  ;;  %v3721_v34 = vmul.f32 %v15489_v52, %v11833_v62  ;;  %v3413_v7 = vmul.f32 %v15510_v9, %v11910_v53  ;;  %v3846_v11 = vrot.slane %v11892_v23, 2 }
 0x447   : > { %v3361_v57 = vadd.f32 %v3264_v36, %v3085_v48  ;;  %v3848_v22 = vrot.slane %v3723_v17, 2  ;;  %v3457_v59 = vadd.f32 %v11826_v3, %v3357_v19  ;;  %v3724_v42 = vmul.f32 %v15489_v52, %v11910_v53 }
 0x448   : > { %v3458_v12 = vadd.f32 %v3410_v31, %v3358_v58  ;;  %v3576_v32 = vrot.slane %v3497_v47, 1  ;;  %v3725_v48 = vmul.f32 %v15489_v52, %v11814_v25  ;;  %v3726_v1 = vmul.f32 %v15489_v52, %v11924_v29 }
 0x449   : > { %v3844_v9 = vsel %vm2598_vm7, %v3841_v38, %v3843_v27  ;;  %v15610_v23 = vrot.slane %v11842_v60, 1  ;;  %v3840_v3 = vrot.slane %v3718_v51, 2  ;;  %v3460_v16 = vadd.f32 %v3412_v20, %v3360_v10  ;;  %v11957_v60 = vpop.xlane.xlu0 %4155 }
 0x44a   : > { %v15611_v19 = vrot.slane %v11846_v50, 1  ;;  %v3845_v31 = vrot.slane %v3721_v34, 2  ;;  %v3461_v36 = vadd.f32 %v3413_v7, %v3361_v57  ;;  %v15612_v47 = vrot.slane %v11852_v18, 1  ;;  %v11962_v34 = vpop.xlane.xlu1 %4158 }
 0x44b   : > { %v3572_v17 = vsel %vm2353_vm6, %v3570_v43, %v15610_v23  ;;  %v3850_v39 = vrot.slane %v3724_v42, 2  ;;  %v3851_v27 = vrot.slane %v3725_v48, 2  ;;  %v3853_v53 = vrot.slane %v3726_v1, 2 }
 0x44c   : > { %v3575_v63 = vsel %vm2353_vm6, %v3573_v55, %v15611_v19  ;;  %v3667_v58 = vadd.f32 %v3572_v17, %v11804_v13  ;;  %v3578_v52 = vsel %vm2353_vm6, %v3576_v32, %v15612_v47  ;;  %v3849_v51 = vsel %vm2598_vm7, %v3846_v11, %v3848_v22 }
 0x44d   : > { %v3666_v10 = vadd.f32 %v3570_v43, %v11802_v24  ;;  %v3669_v50 = vadd.f32 %v3573_v55, %v3457_v59  ;;  %v3670_v20 = vadd.f32 %v3575_v63, %v3458_v12  ;;  %v3944_v23 = vadd.f32 %v3844_v9, %v3668_v61 }
 0x44e   : > { %v3947_v19 = vadd.f32 %v3849_v51, %v3671_v46  ;;  %v3842_v13 = vsel %vm2598_vm7, %v3840_v3, %v3841_v38  ;;  %v3672_v57 = vadd.f32 %v3576_v32, %v3460_v16  ;;  %v3996_v7 = vmul.f32 %v11669_v28, %v11664_v56 }
 0x44f   : > { %v15613_v42 = vmov %v15612_v47  ;;  %v3943_v1 = vadd.f32 %v3842_v13, %v3667_v58  ;;  %v3673_v17 = vadd.f32 %v3578_v52, %v3461_v36  ;;  %v3994_v24 = vmul.f32 %v11669_v28, %v11812_v49  ;;  %v11978_v49 = vpop.xlane.xlu0 %4167 }
 0x450   : > { %v3674_v48 = vadd.f32 %v15613_v42, %v3462_v40  ;;  %v3847_v43 = vsel %vm2598_vm7, %v3845_v31, %v3846_v11  ;;  %v3852_v61 = vsel %vm2598_vm7, %v3850_v39, %v3851_v27  ;;  %v3854_v38 = vsel %vm2598_vm7, %v3851_v27, %v3853_v53 }
 0x451   : > { %v3995_v46 = vmul.f32 %v11669_v28, %v11719_v4  ;;  %v3942_v55 = vadd.f32 %v3840_v3, %v3666_v10  ;;  %v3946_v22 = vadd.f32 %v3847_v43, %v3670_v20  ;;  %v3945_v56 = vadd.f32 %v3845_v31, %v3669_v50 }
 0x452   : > { %v5494_v18 = vrot.slane %v11740_v26, 7  ;;  %v3999_v40 = vmul.f32 %v11669_v28, %v3944_v23  ;;  %v4002_v59 = vmul.f32 %v11669_v28, %v3947_v19  ;;  %v3948_v12 = vadd.f32 %v3850_v39, %v3672_v57 }
 0x453   : > { %v11982_v11 = vadd.f32 %v11737_v21, %v11745_v5  ;;  %v3998_v53 = vmul.f32 %v11669_v28, %v3943_v1  ;;  %v3949_v32 = vadd.f32 %v3852_v61, %v3673_v17  ;;  %v3950_v4 = vadd.f32 %v3854_v38, %v3674_v48  ;;  %v11997_v5 = vpop.xlane.xlu1 %4170  ;;  %v15624_v1 = vld [vmem:[#allocation45_spill] sm:$0xff] }
 0x454   : > { %v11986_v9 = vadd.f32 %v11737_v21, %v3996_v7  ;;  %v11989_v3 = vadd.f32 %v11737_v21, %v3994_v24  ;;  %v15617_v16 = vrot.slane %v11237_v14, 7  ;;  %v15618_v39 = vrot.slane %v11331_v41, 7  ;;  %v12025_v24 = vpop.xlane.xlu0 %4179 }
 0x455   : > { %15614 = vst [vmem:[#allocation4_spill] sm:$0xff] %v11982_v11  ;;  %v5484_v58 = vrot.slane %v11591_v54, 7  ;;  %v12000_v31 = vadd.f32 %v11737_v21, %v3995_v46  ;;  %v3997_v36 = vmul.f32 %v11669_v28, %v3942_v55  ;;  %v4000_v47 = vmul.f32 %v11669_v28, %v3945_v56  ;;  %v15629_v55 = vld [vmem:[#allocation14_spill] sm:$0xff] }
 0x456   : > { %15615 = vst [vmem:[#allocation66_spill] sm:$0xff] %v11986_v9  ;;  %15616 = vst [vmem:[#allocation64_spill] sm:$0xff] %v11989_v3  ;;  %v5480_v63 = vsel %vm5435_vm3, %v15618_v39, %v15617_v16  ;;  %v4001_v52 = vmul.f32 %v11669_v28, %v3946_v22  ;;  %v12006_v27 = vadd.f32 %v11737_v21, %v3999_v40  ;;  %v5487_v50 = vrot.slane %v11619_v35, 7  ;;  %v15631_v40 = vld [vmem:[#allocation51_spill] sm:$0xff] }
 0x457   : > { %15619 = vst [vmem:[#allocation3_spill] sm:$0xff] %v12000_v31  ;;  %v12009_v51 = vadd.f32 %v11737_v21, %v4002_v59  ;;  %v4003_v10 = vmul.f32 %v11669_v28, %v3948_v12  ;;  %v12014_v20 = vadd.f32 %v11737_v21, %v3998_v53  ;;  %v4004_v23 = vmul.f32 %v11669_v28, %v3949_v32  ;;  %v15633_v53 = vld [vmem:[#allocation49_spill] sm:$0xff] }
 0x458   : > { %15620 = vst [vmem:[#allocation71_spill] sm:$0xff] %v12006_v27  ;;  %v4005_v19 = vmul.f32 %v11669_v28, %v3950_v4  ;;  %v5581_v13 = vsel %vm1080_vm2, %v5480_v63, 0.0  ;;  %v15623_v57 = vrot.slane %v11476_v45, 7  ;;  %v5491_v42 = vrot.slane %v11599_v37, 7  ;;  %v12047_v4 = vpop.xlane.xlu1 %4182 }
 0x459   : > { %15621 = vst [vmem:[#allocation70_spill] sm:$0xff] %v12009_v51  ;;  %15622 = vst [vmem:[#allocation5_spill] sm:$0xff] %v12014_v20  ;;  %v5492_v48 = vrot.slane %v11982_v11, 7  ;;  %v5582_v17 = vadd.f32 %v5581_v13, %v15624_v1  ;;  %v12028_v43 = vadd.f32 %v11737_v21, %v3997_v36  ;;  %v12031_v61 = vadd.f32 %v11737_v21, %v4000_v47 }
 0x45a   : > { %v5485_v7 = vsel %vm5435_vm3, %v15623_v57, %v5484_v58  ;;  %v12034_v28 = vadd.f32 %v11737_v21, %v4001_v52  ;;  %v5496_v38 = vrot.slane %v11989_v3, 7  ;;  %v12038_v46 = vadd.f32 %v11737_v21, %v4003_v10 }
 0x45b   : > { %15625 = vst [vmem:[#allocation18_spill] sm:$0xff] %v12028_v43  ;;  %15626 = vst [vmem:[#allocation7_spill] sm:$0xff] %v12031_v61  ;;  %v15630_v22 = vrot.slane %v15629_v55, 7  ;;  %v15632_v59 = vrot.slane %v15631_v40, 7  ;;  %v5584_v32 = vadd.f32 %v15633_v53, %v5582_v17  ;;  %v12050_v16 = vadd.f32 %v11737_v21, %v4004_v23 }
 0x45c   : > { %15627 = vst [vmem:[#allocation113_spill] sm:$0xff] %v12034_v28  ;;  %15628 = vst [vmem:[#allocation80_spill] sm:$0xff] %v12038_v46  ;;  %v12053_v39 = vadd.f32 %v11737_v21, %v4005_v19  ;;  %v5585_v63 = vsel %vm1080_vm2, %v5485_v7, 0.0  ;;  %v4127_v58 = vmul.f32 %v11758_v2, %v11758_v2  ;;  %v5493_v36 = vsel %vm5435_vm3, %v5491_v42, %v5492_v48  ;;  %v12079_v53 = vpop.xlane.xlu1 %4149 }
 0x45d   : > { %v5488_v56 = vsel %vm5435_vm3, %v15630_v22, %v5487_v50  ;;  %v5490_v12 = vsel %vm5435_vm3, %v5487_v50, %v15632_v59  ;;  %15634 = vst [vmem:[#allocation9_spill] sm:$0xff] %v12050_v16  ;;  %v5495_v47 = vsel %vm5435_vm3, %v5492_v48, %v5494_v18  ;;  %v5586_v52 = vadd.f32 %v5585_v63, %v5584_v32  ;;  %v12069_v18 = vpop.xlane.xlu0 %4191 }
 0x45e   : > { %15635 = vst [vmem:[#allocation106_spill] sm:$0xff] %v12053_v39  ;;  %v4128_v10 = vmul.f32 %v11769_v30, %v11769_v30  ;;  %v5497_v50 = vrot.slane %v12000_v31, 7  ;;  %v5499_v23 = vrot.slane %v11986_v9, 7  ;;  %v5587_v21 = vsel %vm1080_vm2, %v5488_v56, 0.0 }
 0x45f   : > { %v4331_v19 = vsel %vm1080_vm2, %v4127_v58, 0.0  ;;  %v5501_v13 = vrot.slane %v12028_v43, 7  ;;  %v5502_v2 = vrot.slane %v12014_v20, 7  ;;  %v5504_v57 = vrot.slane %v12006_v27, 7  ;;  %v15641_v20 = vld [vmem:[#allocation52_spill] sm:$0xff] }
 0x460   : > { %v5588_v7 = vadd.f32 %v5587_v21, %v5586_v52  ;;  %4332 = vadd.xlane.f32.xlu1 %v4331_v19  ;;  %v5506_v30 = vrot.slane %v12031_v61, 7  ;;  %v5589_v42 = vsel %vm1080_vm2, %v5490_v12, 0.0  ;;  %v4334_v48 = vsel %vm1080_vm2, %v4128_v10, 0.0 }
 0x461   : > { %v4131_v1 = vmul.f32 %v11814_v25, %v11814_v25  ;;  %v15034_v22 = vrot.slane %v11888_v8, 1  ;;  %v15033_v56 = vrot.slane %v11888_v8, 2  ;;  %v15031_v59 = vrot.slane %v11873_v15, 1 }
 0x462   : > { %v5590_v17 = vadd.f32 %v5589_v42, %v5588_v7  ;;  %v5507_v32 = vrot.slane %v12034_v28, 7  ;;  %v5591_v63 = vsel %vm1080_vm2, %v5493_v36, 0.0  ;;  %v15032_v12 = vrot.slane %v11873_v15, 2 }
 0x463   : > { %v4568_v58 = vrot.slane %v11930_v33, 2  ;;  %v5498_v52 = vsel %vm5435_vm3, %v5496_v38, %v5497_v50  ;;  %v4495_v10 = vadd.f32 %v15034_v22, %v11888_v8  ;;  %v4493_v21 = vadd.f32 %v15031_v59, %v11903_v0 }
 0x464   : > { %v5592_v25 = vadd.f32 %v5591_v63, %v5590_v17  ;;  %4335 = vadd.xlane.f32.xlu1 %v4334_v48  ;;  %v5593_v19 = vsel %vm1080_vm2, %v5495_v47, 0.0  ;;  %v4343_v36 = vsel %vm1080_vm2, %v4131_v1, 0.0  ;;  %v4132_v7 = vmul.f32 %v11924_v29, %v11924_v29  ;;  %v4153_v63 = vpop.xlane.xlu0 %4152 }
 0x465   : > { %v4569_v33 = vsel %vm2598_vm7, %v15033_v56, %v4568_v58  ;;  %v5500_v38 = vsel %vm5435_vm3, %v5497_v50, %v5499_v23  ;;  %v4709_v48 = vadd.f32 %v15032_v12, %v4493_v21  ;;  %v5503_v0 = vsel %vm5435_vm3, %v5501_v13, %v5502_v2 }
 0x466   : > { %v5594_v42 = vadd.f32 %v5593_v19, %v5592_v25  ;;  %v4711_v17 = vadd.f32 %v4569_v33, %v4495_v10  ;;  %v5509_v47 = vrot.slane %v12009_v51, 7  ;;  %v5511_v1 = vrot.slane %v12038_v46, 7  ;;  %v4162_v25 = vpop.xlane.xlu1 %4161 }
 0x467   : > { %v5595_v29 = vsel %vm1080_vm2, %v5498_v52, 0.0  ;;  %v5505_v59 = vsel %vm5435_vm3, %v5502_v2, %v5504_v57  ;;  %v5508_v58 = vsel %vm5435_vm3, %v5506_v30, %v5507_v32  ;;  %v5512_v50 = vrot.slane %v12050_v16, 7 }
 0x468   : > { %v5596_v23 = vadd.f32 %v5595_v29, %v5594_v42  ;;  %4344 = vadd.xlane.f32.xlu1 %v4343_v36  ;;  %v5510_v10 = vsel %vm5435_vm3, %v5507_v32, %v5509_v47  ;;  %v5597_v21 = vsel %vm1080_vm2, %v5500_v38, 0.0  ;;  %v4346_v13 = vsel %vm1080_vm2, %v4132_v7, 0.0  ;;  %v4165_v12 = vpop.xlane.xlu0 %4164 }
 0x469   : > { %v4388_v19 = vrot.slane %v12079_v53, 1  ;;  %v5514_v33 = vrot.slane %v12053_v39, 7  ;;  %v5599_v2 = vsel %vm1080_vm2, %v5503_v0, 0.0  ;;  %v4573_v57 = vrot.slane %v11957_v60, 2 }
 0x46a   : > { %v5598_v52 = vadd.f32 %v5597_v21, %v5596_v23  ;;  %v4570_v36 = vrot.slane %v12079_v53, 2  ;;  %v4389_v42 = vrot.slane %v4153_v63, 1  ;;  %v4571_v29 = vrot.slane %v4153_v63, 2  ;;  %v12124_v46 = vpop.xlane.xlu1 %4173 }
 0x46b   : > { %v4496_v30 = vadd.f32 %v4388_v19, %v11940_v6  ;;  %v5513_v32 = vsel %vm5435_vm3, %v5511_v1, %v5512_v50  ;;  %v5601_v7 = vsel %vm1080_vm2, %v5505_v59, 0.0  ;;  %v4391_v47 = vrot.slane %v4162_v25, 1 }
 0x46c   : > { %v5600_v38 = vadd.f32 %v5599_v2, %v5598_v52  ;;  %4347 = vadd.xlane.f32.xlu1 %v4346_v13  ;;  %v5603_v23 = vsel %vm1080_vm2, %v5508_v58, 0.0  ;;  %v4498_v0 = vadd.f32 %v4389_v42, %v4153_v63  ;;  %v4575_v56 = vrot.slane %v4162_v25, 2 }
 0x46d   : > { %v4712_v21 = vadd.f32 %v4570_v36, %v4496_v30  ;;  %v4390_v6 = vsel %vm2353_vm6, %v4388_v19, %v4389_v42  ;;  %v4574_v22 = vsel %vm2598_vm7, %v4571_v29, %v4573_v57  ;;  %v4499_v39 = vadd.f32 %v4391_v47, %v11962_v34 }
 0x46e   : > { %v5602_v60 = vadd.f32 %v5601_v7, %v5600_v38  ;;  %v4578_v1 = vrot.slane %v11978_v49, 2  ;;  %v4714_v13 = vadd.f32 %v4574_v22, %v4498_v0  ;;  %v4392_v52 = vrot.slane %v4165_v12, 1 }
 0x46f   : > { %v4763_v59 = vadd.f32 %v4712_v21, %v4709_v48  ;;  %v5605_v58 = vsel %vm1080_vm2, %v5510_v10, 0.0  ;;  %v12128_v30 = vadd.f32 %v4575_v56, %v4499_v39  ;;  %v4576_v63 = vrot.slane %v4165_v12, 2 }
 0x470   : > { %v5604_v2 = vadd.f32 %v5603_v23, %v5602_v60  ;;  %v4497_v38 = vadd.f32 %v4390_v6, %v12079_v53  ;;  %v4765_v19 = vadd.f32 %v4714_v13, %v4711_v17  ;;  %v4393_v57 = vsel %vm2353_vm6, %v4391_v47, %v4392_v52 }
 0x471   : > { %v4501_v42 = vadd.f32 %v4392_v52, %v4165_v12  ;;  %v5515_v34 = vsel %vm5435_vm3, %v5512_v50, %v5514_v33  ;;  %v12134_v49 = vadd.f32 %v12128_v30, %v4712_v21  ;;  %v12137_v22 = vadd.f32 %v4763_v59, %v12128_v30  ;;  %v12145_v50 = vpop.xlane.xlu1 %4185 }
 0x472   : > { %v5606_v7 = vadd.f32 %v5605_v58, %v5604_v2  ;;  %v5607_v48 = vsel %vm1080_vm2, %v5513_v32, 0.0  ;;  %v4500_v39 = vadd.f32 %v4393_v57, %v4162_v25  ;;  %v4579_v10 = vsel %vm2598_vm7, %v4576_v63, %v4578_v1 }
 0x473   : > { %v4572_v53 = vsel %vm2598_vm7, %v4570_v36, %v4571_v29  ;;  %v4577_v17 = vsel %vm2598_vm7, %v4575_v56, %v4576_v63  ;;  %v12143_v12 = vadd.f32 %v4579_v10, %v4501_v42  ;;  %v5609_v33 = vsel %vm1080_vm2, %v5515_v34, 0.0 }
 0x474   : > { %v5608_v23 = vadd.f32 %v5607_v48, %v5606_v7  ;;  %v4713_v47 = vadd.f32 %v4572_v53, %v4497_v38  ;;  %v12148_v21 = vadd.f32 %v4577_v17, %v4500_v39  ;;  %v15636_v29 = vrot.slane %v11888_v8, 1  ;;  %v8032_v17 = vld [vmem:[#allocation2 + $0xb0] sm:$0xff] }
 0x475   : > { %v12151_v32 = vadd.f32 %v12143_v12, %v4714_v13  ;;  %v12154_v25 = vadd.f32 %v4765_v19, %v12143_v12  ;;  %v15637_v60 = vrot.slane %v11873_v15, 1  ;;  %v12164_v59 = vpop.xlane.xlu1 %4197  ;;  %v15638_v2 = vrot.slane %v11888_v8, 2 }
 0x476   : > { %v5610_v0 = vadd.f32 %v5609_v33, %v5608_v23  ;;  %v12157_v36 = vadd.f32 %v12148_v21, %v4713_v47  ;;  %v15639_v58 = vrot.slane %v11873_v15, 2  ;;  %v15042_v19 = vrot.slane %v12145_v50, 1 }
 0x477   : > { %v4387_v6 = vsel %vm2353_vm6, %v15637_v60, %v15636_v29  ;;  %v15040_v7 = vrot.slane %v12164_v59, 1  ;;  %v15041_v23 = vrot.slane %v12145_v50, 2  ;;  %v15039_v53 = vrot.slane %v12164_v59, 2 }
 0x478   : > { %v5611_v56 = vrot.slane %v5610_v0, 4  ;;  %v4494_v13 = vadd.f32 %v4387_v6, %v11873_v15  ;;  %v4567_v63 = vsel %vm2598_vm7, %v15639_v58, %v15638_v2  ;;  %v4505_v39 = vadd.f32 %v15042_v19, %v12047_v4  ;;  %v8034_v58 = vld [vmem:[#allocation2 + $0xd0] sm:$0xff] }
 0x479   : > { %v4195_v34 = vpop.xlane.xlu1 %4194  ;;  %v4083_v33 = vmul.f32 %v8032_v17, %v8032_v17  ;;  %v4583_v61 = vrot.slane %v12025_v24, 2  ;;  %v4122_v27 = vmul.f32 %v11747_v44, %v11747_v44  ;;  %v4588_v43 = vrot.slane %v12069_v18, 2 }
 0x47a   : > { %v5612_v1 = vadd.f32 %v5611_v56, %v5610_v0  ;;  %v4710_v42 = vadd.f32 %v4567_v63, %v4494_v13  ;;  %v4508_v8 = vadd.f32 %v15040_v7, %v4195_v34  ;;  %v12188_v4 = vadd.f32 %v15041_v23, %v4505_v39 }
 0x47b   : > { %v4087_v63 = vmul.f32 %v8034_v58, %v8034_v58  ;;  %v4121_v9 = vmul.f32 %v15641_v20, %v15641_v20  ;;  %v15642_v44 = vrot.slane %v12145_v50, 1  ;;  %v4316_v3 = vsel %vm1080_vm2, %v4122_v27, 0.0 }
 0x47c   : > { %v5613_v52 = vrot.slane %v5612_v1, 2  ;;  %v4764_v15 = vadd.f32 %v4713_v47, %v4710_v42  ;;  %v12192_v29 = vadd.f32 %v15039_v53, %v4508_v8  ;;  %v8033_v47 = vld [vmem:[#allocation2 + $0xb8] sm:$0xff] }
 0x47d   : > { %v4084_v60 = vmul.f32 %v8033_v47, %v8033_v47  ;;  %v8035_v42 = vld [vmem:[#allocation2 + $0xd8] sm:$0xff] }
 0x47e   : > { %v5614_v38 = vadd.f32 %v5613_v52, %v5612_v1  ;;  %v4812_v56 = vadd.f32 %v4764_v15, %v12148_v21  ;;  %v12196_v6 = vadd.f32 %v12192_v29, %v12188_v4  ;;  %v12198_v1 = vpop.xlane.xlu1 %4209  ;;  %v4199_v52 = vsel %vm1080_vm2, %v4083_v33, 0.0  ;;  %v8036_v15 = vld [vmem:[#allocation2 + $0xf0] sm:$0xff] }
 0x47f   : > { %v4202_v2 = vsel %vm1080_vm2, %v4084_v60, 0.0  ;;  %v4088_v34 = vmul.f32 %v8035_v42, %v8035_v42  ;;  %v4091_v17 = vmul.f32 %v8036_v15, %v8036_v15 }
 0x480   : > { %v5615_v57 = vrot.slane %v5614_v38, 1  ;;  %v4860_v13 = vmul.f32 0.11111111, %v4812_v56 }
 0x481   : > { %v4214_v39 = vsel %vm1080_vm2, %v4088_v34, 0.0  ;;  %v4223_v60 = vsel %vm1080_vm2, %v4091_v17, 0.0  ;;  %v8038_v34 = vld [vmem:[#allocation2 + $0x110] sm:$0xff] }
 0x482   : > { %v5616_v48 = vadd.f32 %v5615_v57, %v5614_v38  ;;  %v8060_v38 = vmov 0   ;;  %7731 = vrsqrt.f32 %v4860_v13  ;;  %v12202_v57 = vpop.xlane.xlu1 %4206  ;;  %vm4916_vm4 = vcmp.eq.f32.partialorder %v4860_v13, inf }
 0x483   : > { %7530 = vset.pattern.permute.xlu1 %v8060_v38  ;;  %7529 = vset.pattern.permute.xlu0 %v8060_v38  ;;  %vm4918_vm1 = vcmp.eq.f32.partialorder %v4860_v13, 0.0 }
 0x484   : > { %v12179_v10 = vmul.f32 0.00390625, %v5616_v48  ;;  %v4211_v48 = vsel %vm1080_vm2, %v4087_v63, 0.0 }
 0x486   : > { %v5620_v0 = vsel %vm1080_vm2, %v12179_v10, 0.0  ;;  %v12206_v8 = vpop.xlane.xlu1 %4221 }
 0x487   : > { %5621 = vadd.xlane.f32.xlu0 %v5620_v0  ;;  %v8037_v0 = vld [vmem:[#allocation2 + $0xf8] sm:$0xff] }
 0x488   : > { %v4092_v56 = vmul.f32 %v8037_v0, %v8037_v0 }
 0x48a   : > { %v4226_v63 = vsel %vm1080_vm2, %v4092_v56, 0.0  ;;  %v8041_v56 = vld [vmem:[#allocation2 + $0x138] sm:$0xff] }
 0x48b   : > { %4200 = vadd.xlane.f32.xlu0 %v4199_v52  ;;  %v4919_v52 = vand.u32 2147483648, %v4860_v13 }
 0x48c   : > { %v7732_v33 = vpop.eup %7731 }
 0x48d   : > { %v4915_v47 = vmul.f32 %v7732_v33, %v4860_v13 }
 0x48f   : > { %4203 = vadd.xlane.f32.xlu0 %v4202_v2  ;;  %v12209_v2 = vpop.xlane.xlu1 %4218  ;;  %v4917_v58 = vsel %vm4916_vm4, %v4860_v13, %v4915_v47 }
 0x490   : > { %v4920_v38 = vsel %vm4918_vm1, %v4919_v52, %v4917_v58  ;;  %v4100_v52 = vmul.f32 %v8041_v56, %v8041_v56 }
 0x491   : > { %v5244_v42 = vadd.f32 1e-08, %v4920_v38 }
 0x493   : > { %4212 = vadd.xlane.f32.xlu0 %v4211_v48  ;;  %v4095_v48 = vmul.f32 %v8038_v34, %v8038_v34  ;;  %7733 = vrcp.f32 %v5244_v42  ;;  %v12212_v33 = vpop.xlane.xlu1 %4233  ;;  %v4250_v42 = vsel %vm1080_vm2, %v4100_v52, 0.0 }
 0x495   : > { %v4235_v17 = vsel %vm1080_vm2, %v4095_v48, 0.0  ;;  %v8042_v48 = vld [vmem:[#allocation2 + $0x150] sm:$0xff] }
 0x497   : > { %4215 = vadd.xlane.f32.xlu0 %v4214_v39  ;;  %v8039_v39 = vld [vmem:[#allocation2 + $0x118] sm:$0xff]  ;;  %v12216_v13 = vpop.xlane.xlu1 %4230 }
 0x498   : > { %v4096_v15 = vmul.f32 %v8039_v39, %v8039_v39  ;;  %v4103_v39 = vmul.f32 %v8042_v48, %v8042_v48  ;;  %v8046_v48 = vld [vmem:[#allocation2 + $0x190] sm:$0xff] }
 0x49a   : > { %v4238_v0 = vsel %vm1080_vm2, %v4096_v15, 0.0  ;;  %v8043_v15 = vld [vmem:[#allocation2 + $0x158] sm:$0xff] }
 0x49b   : > { %4224 = vadd.xlane.f32.xlu0 %v4223_v60  ;;  %v8040_v60 = vld [vmem:[#allocation2 + $0x130] sm:$0xff]  ;;  %v12220_v34 = vpop.xlane.xlu1 %4245 }
 0x49c   : > { %v4099_v47 = vmul.f32 %v8040_v60, %v8040_v60 }
 0x49d   : > { %v7734_v58 = vpop.eup %7733 }
 0x49e   : > { %v5294_v38 = vmul.f32 0.33333334, %v7734_v58 }
 0x49f   : > { %4227 = vadd.xlane.f32.xlu0 %v4226_v63  ;;  %v4247_v63 = vsel %vm1080_vm2, %v4099_v47, 0.0  ;;  %v12223_v60 = vpop.xlane.xlu1 %4242  ;;  %v8044_v47 = vld [vmem:[#allocation2 + $0x170] sm:$0xff] }
 0x4a0   : > { %5713 = vperm.xlu1 %7530, %v5294_v38   ;;  %v4107_v58 = vmul.f32 %v8044_v47, %v8044_v47 }
 0x4a2   : > { %v4271_v53 = vsel %vm1080_vm2, %v4107_v58, 0.0 }
 0x4a3   : > { %4236 = vadd.xlane.f32.xlu0 %v4235_v17  ;;  %v4104_v17 = vmul.f32 %v8043_v15, %v8043_v15  ;;  %v12226_v38 = vpop.xlane.xlu1 %4257  ;;  %v4111_v15 = vmul.f32 %v8046_v48, %v8046_v48 }
 0x4a5   : > { %v4262_v56 = vsel %vm1080_vm2, %v4104_v17, 0.0  ;;  %v4283_v17 = vsel %vm1080_vm2, %v4111_v15, 0.0  ;;  %v4177_v15 = vpop.xlane.xlu0 %4176 }
 0x4a7   : > { %4239 = vadd.xlane.f32.xlu0 %v4238_v0  ;;  %v4259_v0 = vsel %vm1080_vm2, %v4103_v39, 0.0  ;;  %v12230_v39 = vpop.xlane.xlu1 %4254 }
 0x4a9   : > { %v4189_v28 = vpop.xlane.xlu0 %4188 }
 0x4ab   : > { %4248 = vadd.xlane.f32.xlu0 %v4247_v63  ;;  %v8045_v63 = vld [vmem:[#allocation2 + $0x178] sm:$0xff]  ;;  %v12234_v47 = vpop.xlane.xlu1 %4269 }
 0x4ac   : > { %v4108_v52 = vmul.f32 %v8045_v63, %v8045_v63  ;;  %v8048_v63 = vld [vmem:[#allocation2 + $0x1a8] sm:$0xff] }
 0x4ad   : > { %v4114_v23 = vmul.f32 %v8048_v63, %v8048_v63  ;;  %v8050_v63 = vld [vmem:[#allocation2 + $0x1c0] sm:$0xff] }
 0x4af   : > { %4251 = vadd.xlane.f32.xlu0 %v4250_v42  ;;  %v4274_v42 = vsel %vm1080_vm2, %v4108_v52, 0.0  ;;  %v4292_v52 = vsel %vm1080_vm2, %v4114_v23, 0.0  ;;  %v12238_v48 = vpop.xlane.xlu1 %4266  ;;  %v4395_v23 = vrot.slane %v4177_v15, 1 }
 0x4b1   : > { %v4504_v24 = vadd.f32 %v4395_v23, %v4177_v15 }
 0x4b3   : > { %4260 = vadd.xlane.f32.xlu0 %v4259_v0  ;;  %v8047_v0 = vld [vmem:[#allocation2 + $0x180] sm:$0xff]  ;;  %v12245_v16 = vpop.xlane.xlu1 %4281 }
 0x4b4   : > { %v4109_v7 = vmul.f32 %v8047_v0, %v8047_v0 }
 0x4b7   : > { %4263 = vadd.xlane.f32.xlu0 %v4262_v56  ;;  %v4277_v56 = vsel %vm1080_vm2, %v4109_v7, 0.0 }
 0x4bb   : > { %4272 = vadd.xlane.f32.xlu0 %v4271_v53  ;;  %v8049_v53 = vld [vmem:[#allocation2 + $0x1a0] sm:$0xff] }
 0x4bc   : > { %v4113_v58 = vmul.f32 %v8049_v53, %v8049_v53  ;;  %v4580_v53 = vrot.slane %v12124_v46, 2 }
 0x4be   : > { %v4289_v0 = vsel %vm1080_vm2, %v4113_v58, 0.0 }
 0x4bf   : > { %4275 = vadd.xlane.f32.xlu0 %v4274_v42  ;;  %v4394_v42 = vrot.slane %v12124_v46, 1 }
 0x4c1   : > { %v4502_v19 = vadd.f32 %v4394_v42, %v11997_v5 }
 0x4c3   : > { %4284 = vadd.xlane.f32.xlu0 %v4283_v17  ;;  %v15640_v17 = vld [vmem:[#allocation57_spill] sm:$0xff]  ;;  %v4718_v51 = vadd.f32 %v4580_v53, %v4502_v19  ;;  %v4586_v19 = vrot.slane %v4189_v28, 2 }
 0x4c4   : > { %v4118_v7 = vmul.f32 %v15640_v17, %v15640_v17  ;;  %v4581_v17 = vrot.slane %v4177_v15, 2 }
 0x4c5   : > { %v4772_v5 = vadd.f32 %v12188_v4, %v4718_v51 }
 0x4c6   : > { %v4584_v31 = vsel %vm2598_vm7, %v4581_v17, %v4583_v61  ;;  %v4582_v20 = vsel %vm2598_vm7, %v4580_v53, %v4581_v17  ;;  %v15077_v61 = vrot.slane %v12198_v1, 1  ;;  %v12291_v53 = vmul.f32 0.11111111, %v12154_v25 }
 0x4c7   : > { %4278 = vadd.xlane.f32.xlu0 %v4277_v56  ;;  %v4117_v56 = vmul.f32 %v8050_v63, %v8050_v63  ;;  %v4398_v63 = vrot.slane %v4189_v28, 1  ;;  %v12274_v15 = vadd.f32 %v4584_v31, %v4504_v24  ;;  %v4126_v31 = vmul.f32 %v11833_v62, %v11833_v62 }
 0x4c8   : > { %v4769_v25 = vadd.f32 %v4718_v51, %v12128_v30  ;;  %vm4923_vm0 = vcmp.eq.f32.partialorder %v12291_v53, inf  ;;  %vm4925_vm11 = vcmp.eq.f32.partialorder %v12291_v53, 0.0 }
 0x4c9   : > { %v4301_v58 = vsel %vm1080_vm2, %v4117_v56, 0.0  ;;  %v12259_v56 = vpop.xlane.xlu1 %4287  ;;  %v4399_v18 = vsel %vm2353_vm6, %v15642_v44, %v4398_v63  ;;  %v4771_v17 = vadd.f32 %v12274_v15, %v12143_v12  ;;  %v4816_v12 = vadd.f32 %v12151_v32, %v12274_v15 }
 0x4ca   : > { %v4328_v44 = vsel %vm1080_vm2, %v4126_v31, 0.0 }
 0x4cb   : > { %4293 = vadd.xlane.f32.xlu0 %v4292_v52  ;;  %v4304_v52 = vsel %vm1080_vm2, %v4118_v7, 0.0  ;;  %v12256_v7 = vmul.f32 0.11111111, %v12137_v22  ;;  %v4507_v22 = vadd.f32 %v4398_v63, %v4189_v28  ;;  %v4506_v28 = vadd.f32 %v4399_v18, %v12145_v50 }
 0x4cc   : > { %v4817_v18 = vadd.f32 %v4769_v25, %v12188_v4  ;;  %v15065_v25 = vrot.slane %v12212_v33, 2 }
 0x4cd   : > { %7735 = vrsqrt.f32 %v12256_v7  ;;  %v12281_v27 = vpop.xlane.xlu1 %4296  ;;  %vm4909_vm5 = vcmp.eq.f32.partialorder %v12256_v7, inf  ;;  %vm4911_vm8 = vcmp.eq.f32.partialorder %v12256_v7, 0.0 }
 0x4cf   : > { %4290 = vadd.xlane.f32.xlu0 %v4289_v0  ;;  %v4396_v0 = vsel %vm2353_vm6, %v4394_v42, %v4395_v23 }
 0x4d0   : > { %v4503_v42 = vadd.f32 %v4396_v0, %v12124_v46  ;;  %v4313_v46 = vsel %vm1080_vm2, %v4121_v9, 0.0  ;;  %v4814_v9 = vadd.f32 %v12134_v49, %v4718_v51  ;;  %v15643_v0 = vrot.slane %v12145_v50, 2 }
 0x4d1   : > { %v12322_v32 = vpop.xlane.xlu1 %4299 }
 0x4d2   : > { %v12278_v23 = vadd.f32 %v4582_v20, %v4503_v42  ;;  %v4587_v63 = vsel %vm2598_vm7, %v15643_v0, %v4586_v19  ;;  %v15074_v42 = vrot.slane %v12206_v8, 1 }
 0x4d3   : > { %4305 = vadd.xlane.f32.xlu0 %v4304_v52  ;;  %v4820_v52 = vadd.f32 %v4772_v5, %v12192_v29  ;;  %v4589_v5 = vsel %vm2598_vm7, %v4586_v19, %v4588_v43  ;;  %v12306_v24 = vadd.f32 %v4587_v63, %v4506_v28 }
 0x4d4   : > { %v12283_v43 = vadd.f32 %v4589_v5, %v4507_v22  ;;  %v4815_v49 = vadd.f32 %v12157_v36, %v12278_v23  ;;  %v4770_v51 = vadd.f32 %v12278_v23, %v12148_v21  ;;  %v4514_v30 = vadd.f32 %v15074_v42, %v12209_v2 }
 0x4d5   : > { %v15071_v36 = vrot.slane %v12212_v33, 1  ;;  %v12324_v22 = vmul.f32 0.11111111, %v4814_v9  ;;  %v15064_v5 = vrot.slane %v12220_v34, 1  ;;  %v15073_v2 = vrot.slane %v12206_v8, 2 }
 0x4d6   : > { %v4819_v50 = vadd.f32 %v4771_v17, %v12283_v43  ;;  %v12330_v21 = vmul.f32 0.11111111, %v4815_v49  ;;  %v12337_v9 = vmul.f32 0.11111111, %v4816_v12  ;;  %v15066_v49 = vrot.slane %v12220_v34, 2 }
 0x4d7   : > { %4302 = vadd.xlane.f32.xlu0 %v4301_v58  ;;  %v12270_v58 = vmul.f32 0.11111111, %v4820_v52  ;;  %v15644_v52 = vld [vmem:[#allocation40_spill] sm:$0xff]  ;;  %v7736_v28 = vpop.eup %7735  ;;  %v4517_v31 = vadd.f32 %v15071_v36, %v12216_v13  ;;  %v4520_v63 = vadd.f32 %v15064_v5, %v12223_v60  ;;  %v15063_v13 = vrot.slane %v12226_v38, 1 }
 0x4d8   : > { %v4125_v62 = vmul.f32 %v15644_v52, %v15644_v52  ;;  %v12339_v17 = vmul.f32 0.11111111, %v4819_v50  ;;  %v12345_v52 = vmul.f32 0.11111111, %v4817_v18  ;;  %v15646_v50 = vld [vmem:[#allocation54_spill] sm:$0xff]  ;;  %vm4930_vm12 = vcmp.eq.f32.partialorder %v12324_v22, inf }
 0x4d9   : > { %7737 = vrsqrt.f32 %v12270_v58  ;;  %vm4972_vm9 = vcmp.eq.f32.partialorder %v12270_v58, inf  ;;  %vm4974_vm10 = vcmp.eq.f32.partialorder %v12270_v58, 0.0  ;;  %vm4932_vm13 = vcmp.eq.f32.partialorder %v12324_v22, 0.0 }
 0x4da   : > { %v4325_v20 = vsel %vm1080_vm2, %v4125_v62, 0.0  ;;  %v4730_v62 = vadd.f32 %v15073_v2, %v4514_v30  ;;  %v4523_v30 = vadd.f32 %v15063_v13, %v12230_v39  ;;  %7739 = vrsqrt.f32 %v12339_v17 }
 0x4db   : > { %4317 = vadd.xlane.f32.xlu0 %v4316_v3  ;;  %v4511_v3 = vadd.f32 %v15077_v61, %v12202_v57  ;;  %v15076_v57 = vrot.slane %v12198_v1, 2  ;;  %7741 = vrsqrt.f32 %v12291_v53  ;;  %vm4937_vm14 = vcmp.eq.f32.partialorder %v12330_v21, inf }
 0x4dc   : > { %7743 = vrsqrt.f32 %v12324_v22  ;;  %vm4939_vm15 = vcmp.eq.f32.partialorder %v12330_v21, 0.0  ;;  %vm4944_vm4 = vcmp.eq.f32.partialorder %v12337_v9, inf  ;;  %vm4946_vm1 = vcmp.eq.f32.partialorder %v12337_v9, 0.0 }
 0x4dd   : > { %v4727_v19 = vadd.f32 %v15076_v57, %v4511_v3  ;;  %v4818_v3 = vadd.f32 %v4770_v51, %v12306_v24  ;;  %v4733_v51 = vadd.f32 %v15065_v25, %v4517_v31  ;;  %v15069_v31 = vrot.slane %v12226_v38, 2 }
 0x4df   : > { %4314 = vadd.xlane.f32.xlu0 %v4313_v46  ;;  %v15645_v46 = vld [vmem:[#allocation94_spill] sm:$0xff]  ;;  %v4823_v0 = vadd.f32 %v12196_v6, %v4727_v19  ;;  %v4129_v6 = vmul.f32 %v15646_v50, %v15646_v50  ;;  %v12356_v18 = vmul.f32 0.11111111, %v4818_v3  ;;  %v4781_v3 = vadd.f32 %v4730_v62, %v4727_v19 }
 0x4e0   : > { %v4130_v4 = vmul.f32 %v15645_v46, %v15645_v46  ;;  %v12364_v46 = vpop.xlane.xlu1 %4308  ;;  %v4784_v25 = vadd.f32 %v4733_v51, %v4730_v62 }
 0x4e1   : > { %v12368_v50 = vmul.f32 0.11111111, %v4823_v0  ;;  %v4337_v5 = vsel %vm1080_vm2, %v4129_v6, 0.0 }
 0x4e2   : > { %v4340_v12 = vsel %vm1080_vm2, %v4130_v4, 0.0  ;;  %v4778_v4 = vadd.f32 %v4727_v19, %v12192_v29  ;;  %v12382_v19 = vadd.f32 %v15069_v31, %v4523_v30  ;;  %v4947_v31 = vand.u32 2147483648, %v12337_v9 }
 0x4e3   : > { %4329 = vadd.xlane.f32.xlu0 %v4328_v44  ;;  %v4908_v44 = vmul.f32 %v7736_v28, %v12256_v7  ;;  %v7738_v60 = vpop.eup %7737  ;;  %v4736_v28 = vadd.f32 %v15066_v49, %v4520_v63  ;;  %v15067_v63 = vrot.slane %v12234_v47, 2  ;;  %v4829_v49 = vadd.f32 %v4781_v3, %v4733_v51 }
 0x4e4   : > { %v4826_v13 = vadd.f32 %v4778_v4, %v4730_v62  ;;  %v4971_v0 = vmul.f32 %v7738_v60, %v12270_v58  ;;  %7745 = vrsqrt.f32 %v12368_v50  ;;  %v4975_v4 = vand.u32 2147483648, %v12270_v58 }
 0x4e5   : > { %v4910_v29 = vsel %vm4909_vm5, %v12256_v7, %v4908_v44  ;;  %v12393_v44 = vpop.xlane.xlu1 %4311  ;;  %7747 = vrsqrt.f32 %v12330_v21  ;;  %vm4951_vm5 = vcmp.eq.f32.partialorder %v12345_v52, inf }
 0x4e6   : > { %v12397_v60 = vmul.f32 0.11111111, %v4826_v13  ;;  %7749 = vrsqrt.f32 %v12337_v9 }
 0x4e7   : > { %4326 = vadd.xlane.f32.xlu0 %v4325_v20  ;;  %v15068_v20 = vrot.slane %v12234_v47, 1  ;;  %7751 = vrsqrt.f32 %v12345_v52 }
 0x4e8   : > { %7753 = vrsqrt.f32 %v12397_v60 }
 0x4e9   : > { %v4526_v39 = vadd.f32 %v15068_v20, %v12238_v48  ;;  %v4787_v48 = vadd.f32 %v4736_v28, %v4733_v51  ;;  %v4832_v51 = vadd.f32 %v4784_v25, %v4736_v28  ;;  %7755 = vrsqrt.f32 %v12356_v18 }
 0x4eb   : > { %4341 = vadd.xlane.f32.xlu0 %v4340_v12  ;;  %v4912_v12 = vand.u32 2147483648, %v12256_v7  ;;  %v12390_v6 = vadd.f32 %v15067_v63, %v4526_v39  ;;  %v4973_v7 = vsel %vm4972_vm9, %v12270_v58, %v4971_v0  ;;  %v4835_v30 = vadd.f32 %v4787_v48, %v12382_v19 }
 0x4ec   : > { %v12406_v39 = vmul.f32 0.11111111, %v4829_v49  ;;  %v4976_v25 = vsel %vm4974_vm10, %v4975_v4, %v4973_v7  ;;  %v15070_v58 = vrot.slane %v12281_v27, 1  ;;  %v15072_v4 = vrot.slane %v12281_v27, 2 }
 0x4ed   : > { %v4913_v62 = vsel %vm4911_vm8, %v4912_v12, %v4910_v29  ;;  %v7740_v29 = vpop.eup %7739  ;;  %v12413_v0 = vmul.f32 0.11111111, %v4835_v30  ;;  %v12415_v12 = vpop.xlane.xlu1 %4320  ;;  %v5252_v49 = vadd.f32 1e-08, %v4976_v25  ;;  %v12430_v30 = vadd.f32 %v12283_v43, %v12274_v15 }
 0x4ee   : > { %v5243_v3 = vadd.f32 1e-08, %v4913_v62  ;;  %v4633_v62 = vrot.slane %v12322_v32, 2  ;;  %v7742_v7 = vpop.eup %7741  ;;  %vm4953_vm8 = vcmp.eq.f32.partialorder %v12345_v52, 0.0  ;;  %vm4958_vm9 = vcmp.eq.f32.partialorder %v12356_v18, inf }
 0x4ef   : > { %4338 = vadd.xlane.f32.xlu0 %v4337_v5  ;;  %v4790_v5 = vadd.f32 %v12382_v19, %v4736_v28  ;;  %v12411_v28 = vmul.f32 0.11111111, %v4832_v51  ;;  %v12425_v51 = vadd.f32 %v12306_v24, %v12278_v23  ;;  %v12440_v23 = vadd.f32 %v15070_v58, %v12281_v27 }
 0x4f0   : > { %7757 = vrcp.f32 %v5243_v3  ;;  %v15075_v3 = vrot.slane %v12364_v46, 1  ;;  %v12446_v15 = vsel %vm2598_vm7, %v15072_v4, %v4633_v62  ;;  %v4922_v32 = vmul.f32 %v7742_v7, %v12291_v53 }
 0x4f1   : > { %v4838_v13 = vadd.f32 %v4790_v5, %v12390_v6  ;;  %7759 = vrsqrt.f32 %v12406_v39  ;;  %v7744_v5 = vpop.eup %7743  ;;  %v12448_v20 = vpop.xlane.xlu1 %4323  ;;  %v4933_v7 = vand.u32 2147483648, %v12324_v22  ;;  %vm4960_vm10 = vcmp.eq.f32.partialorder %v12356_v18, 0.0 }
 0x4f2   : > { %7761 = vrsqrt.f32 %v12411_v28  ;;  %v4929_v58 = vmul.f32 %v7744_v5, %v12324_v22  ;;  %v12459_v62 = vadd.f32 %v15075_v3, %v12364_v46  ;;  %v4940_v5 = vand.u32 2147483648, %v12330_v21 }
 0x4f3   : > { %v12420_v48 = vmul.f32 0.11111111, %v4838_v13  ;;  %7763 = vrsqrt.f32 %v12413_v0  ;;  %v7746_v13 = vpop.eup %7745  ;;  %v4924_v3 = vsel %vm4923_vm0, %v12291_v53, %v4922_v32  ;;  %v4954_v32 = vand.u32 2147483648, %v12345_v52 }
 0x4f4   : > { %7765 = vrcp.f32 %v5252_v49  ;;  %v7748_v63 = vpop.eup %7747  ;;  %v4926_v49 = vand.u32 2147483648, %v12291_v53  ;;  %v4992_v53 = vmul.f32 %v7746_v13, %v12368_v50  ;;  %vm4965_vm0 = vcmp.eq.f32.partialorder %v12339_v17, inf }
 0x4f5   : > { %7767 = vrsqrt.f32 %v12420_v48  ;;  %v7750_v25 = vpop.eup %7749  ;;  %v4936_v2 = vmul.f32 %v7748_v63, %v12330_v21  ;;  %v4931_v63 = vsel %vm4930_vm12, %v12324_v22, %v4929_v58  ;;  %v12478_v11 = vpop.xlane.xlu1 %4332  ;;  %v4638_v22 = vrot.slane %v12393_v44, 2 }
 0x4f6   : > { %v7752_v36 = vpop.eup %7751  ;;  %v4943_v57 = vmul.f32 %v7750_v25, %v12337_v9  ;;  %v4964_v25 = vmul.f32 %v7740_v29, %v12339_v17  ;;  %v4927_v58 = vsel %vm4925_vm11, %v4926_v49, %v4924_v3  ;;  %v4934_v45 = vsel %vm4932_vm13, %v4933_v7, %v4931_v63 }
 0x4f7   : > { %v7754_v4 = vpop.eup %7753  ;;  %v4950_v26 = vmul.f32 %v7752_v36, %v12345_v52  ;;  %v4938_v36 = vsel %vm4937_vm14, %v12330_v21, %v4936_v2  ;;  %v5245_v7 = vadd.f32 1e-08, %v4927_v58  ;;  %v5246_v63 = vadd.f32 1e-08, %v4934_v45 }
 0x4f8   : > { %v7756_v42 = vpop.eup %7755  ;;  %v4945_v29 = vsel %vm4944_vm4, %v12337_v9, %v4943_v57  ;;  %v4941_v57 = vsel %vm4939_vm15, %v4940_v5, %v4938_v36  ;;  %v4966_v13 = vsel %vm4965_vm0, %v12339_v17, %v4964_v25  ;;  %vm4993_vm11 = vcmp.eq.f32.partialorder %v12368_v50, inf }
 0x4f9   : > { %v4957_v55 = vmul.f32 %v7756_v42, %v12356_v18  ;;  %v4952_v2 = vsel %vm4951_vm5, %v12345_v52, %v4950_v26  ;;  %v4961_v42 = vand.u32 2147483648, %v12356_v18  ;;  %v4948_v26 = vsel %vm4946_vm1, %v4947_v31, %v4945_v29 }
 0x4fa   : > { %v7758_v61 = vpop.eup %7757  ;;  %v4955_v44 = vsel %vm4953_vm8, %v4954_v32, %v4952_v2  ;;  %vm4967_vm12 = vcmp.eq.f32.partialorder %v12339_v17, 0.0  ;;  %v4994_v21 = vsel %vm4993_vm11, %v12368_v50, %v4992_v53  ;;  %v5247_v45 = vadd.f32 1e-08, %v4941_v57 }
 0x4fb   : > { %v7760_v37 = vpop.eup %7759  ;;  %v5292_v54 = vmul.f32 0.33333334, %v7758_v61  ;;  %v4968_v61 = vand.u32 2147483648, %v12339_v17  ;;  %v4959_v14 = vsel %vm4958_vm9, %v12356_v18, %v4957_v55  ;;  %v4996_v9 = vand.u32 2147483648, %v12368_v50 }
 0x4fc   : > { %v7762_v40 = vpop.eup %7761  ;;  %v5013_v31 = vmul.f32 %v7754_v4, %v12397_v60  ;;  %7769 = vrcp.f32 %v5245_v7  ;;  %v5248_v55 = vadd.f32 1e-08, %v4948_v26  ;;  %v4962_v25 = vsel %vm4960_vm10, %v4961_v42, %v4959_v14 }
 0x4fd   : > { %v7764_v35 = vpop.eup %7763  ;;  %v4969_v5 = vsel %vm4967_vm12, %v4968_v61, %v4966_v13  ;;  %vm4995_vm13 = vcmp.eq.f32.partialorder %v12368_v50, 0.0  ;;  %v15647_v52 = vrot.slane %v12364_v46, 2  ;;  %7771 = vrcp.f32 %v5246_v63 }
 0x4fe   : > { %v7766_v3 = vpop.eup %7765  ;;  %v5249_v32 = vadd.f32 1e-08, %v4955_v44  ;;  %v4997_v58 = vsel %vm4995_vm13, %v4996_v9, %v4994_v21  ;;  %v4431_v36 = vrot.slane %v12415_v12, 1  ;;  %v5251_v29 = vadd.f32 1e-08, %v4969_v5 }
 0x4ff   : > { %v7768_v49 = vpop.eup %7767  ;;  %v5310_v41 = vmul.f32 0.33333334, %v7766_v3  ;;  %v12527_v17 = vsel %vm2598_vm7, %v15647_v52, %v4638_v22  ;;  %vm5014_vm14 = vcmp.eq.f32.partialorder %v12397_v60, inf  ;;  %v4641_v18 = vrot.slane %v12415_v12, 2 }
 0x500   : > { %7773 = vrcp.f32 %v5247_v45  ;;  %v5250_v14 = vadd.f32 1e-08, %v4962_v25  ;;  %v5015_v50 = vsel %vm5014_vm14, %v12397_v60, %v5013_v31  ;;  %v4643_v4 = vrot.slane %v12448_v20, 2 }
 0x501   : > { %7775 = vrcp.f32 %v5248_v55  ;;  %v5255_v3 = vadd.f32 1e-08, %v4997_v58  ;;  %v5017_v2 = vand.u32 2147483648, %v12397_v60  ;;  %vm5016_vm15 = vcmp.eq.f32.partialorder %v12397_v60, 0.0 }
 0x502   : > { %7777 = vrcp.f32 %v5249_v32  ;;  %vm5035_vm4 = vcmp.eq.f32.partialorder %v12406_v39, inf  ;;  %v4540_v42 = vadd.f32 %v4431_v36, %v12415_v12  ;;  %vm5037_vm1 = vcmp.eq.f32.partialorder %v12406_v39, 0.0 }
 0x503   : > { %7779 = vrcp.f32 %v5251_v29  ;;  %v5018_v61 = vsel %vm5016_vm15, %v5017_v2, %v5015_v50  ;;  %v5038_v22 = vand.u32 2147483648, %v12406_v39  ;;  %v5076_v7 = vmul.f32 %v7764_v35, %v12413_v0 }
 0x504   : > { %7781 = vrcp.f32 %v5250_v14  ;;  %v4644_v60 = vsel %vm2598_vm7, %v4641_v18, %v4643_v4  ;;  %vm5056_vm5 = vcmp.eq.f32.partialorder %v12411_v28, inf  ;;  %v5258_v57 = vadd.f32 1e-08, %v5018_v61 }
 0x505   : > { %5708 = vperm.xlu0 %7529, %v5292_v54   ;;  %v12513_v54 = vpop.xlane.xlu1 %4335  ;;  %7783 = vrcp.f32 %v5255_v3  ;;  %vm5058_vm8 = vcmp.eq.f32.partialorder %v12411_v28, 0.0  ;;  %v5059_v35 = vand.u32 2147483648, %v12411_v28  ;;  %vm5077_vm9 = vcmp.eq.f32.partialorder %v12413_v0, inf }
 0x506   : > { %v12555_v26 = vpop.eup %7769  ;;  %vm5079_vm10 = vcmp.eq.f32.partialorder %v12413_v0, 0.0  ;;  %v5080_v44 = vand.u32 2147483648, %v12413_v0  ;;  %v4434_v45 = vrot.slane %v12478_v11, 1  ;;  %v4648_v5 = vrot.slane %v12513_v54, 2 }
 0x507   : > { %v12561_v21 = vpop.eup %7771  ;;  %v5078_v9 = vsel %vm5077_vm9, %v12413_v0, %v5076_v7  ;;  %vm5098_vm0 = vcmp.eq.f32.partialorder %v12420_v48, inf  ;;  %v15096_v32 = vrot.slane %v12478_v11, 2  ;;  %vm5100_vm11 = vcmp.eq.f32.partialorder %v12420_v48, 0.0 }
 0x508   : > { %v5081_v4 = vsel %vm5079_vm10, %v5080_v44, %v5078_v9  ;;  %v4543_v2 = vadd.f32 %v4434_v45, %v12478_v11  ;;  %7785 = vrcp.f32 %v5258_v57 }
 0x509   : > { %5753 = vperm.xlu0 %7529, %v5310_v41   ;;  %v5034_v41 = vmul.f32 %v7760_v37, %v12406_v39  ;;  %v12535_v53 = vpop.xlane.xlu1 %4344  ;;  %v5055_v37 = vmul.f32 %v7762_v40, %v12411_v28  ;;  %v5097_v40 = vmul.f32 %v7768_v49, %v12420_v48  ;;  %v4649_v61 = vsel %vm2598_vm7, %v15096_v32, %v4648_v5 }
 0x50a   : > { %v7774_v52 = vpop.eup %7773  ;;  %v15094_v58 = vrot.slane %v12535_v53, 2  ;;  %v4759_v9 = vadd.f32 %v4649_v61, %v4543_v2 }
 0x50b   : > { %v5036_v20 = vsel %vm5035_vm4, %v12406_v39, %v5034_v41  ;;  %v5057_v63 = vsel %vm5056_vm5, %v12411_v28, %v5055_v37  ;;  %v15095_v28 = vrot.slane %v12535_v53, 1  ;;  %v5099_v25 = vsel %vm5098_vm0, %v12420_v48, %v5097_v40  ;;  %v7776_v14 = vpop.eup %7775 }
 0x50c   : > { %v5039_v13 = vsel %vm5037_vm1, %v5038_v22, %v5036_v20  ;;  %v5060_v55 = vsel %vm5058_vm8, %v5059_v35, %v5057_v63  ;;  %v5101_v41 = vand.u32 2147483648, %v12420_v48  ;;  %v7778_v3 = vpop.eup %7777  ;;  %v4756_v63 = vadd.f32 %v4644_v60, %v4540_v42 }
 0x50d   : > { %v4348_v39 = vpop.xlane.xlu1 %4347  ;;  %v5261_v50 = vadd.f32 1e-08, %v5039_v13  ;;  %v5264_v20 = vadd.f32 1e-08, %v5060_v55  ;;  %v4546_v48 = vadd.f32 %v15095_v28, %v12535_v53  ;;  %v5267_v35 = vadd.f32 1e-08, %v5081_v4 }
 0x50e   : > { %v4653_v29 = vrot.slane %v4348_v39, 2  ;;  %v5102_v22 = vsel %vm5100_vm11, %v5101_v41, %v5099_v25  ;;  %v12600_v25 = vadd.f32 %v12390_v6, %v12382_v19  ;;  %v12604_v42 = vadd.f32 %v12527_v17, %v12459_v62 }
 0x50f   : > { %v5270_v55 = vadd.f32 1e-08, %v5102_v22  ;;  %7787 = vrcp.f32 %v5261_v50  ;;  %v12612_v19 = vadd.f32 %v12446_v15, %v12440_v23  ;;  %v4810_v17 = vadd.f32 %v4759_v9, %v4756_v63 }
 0x510   : > { %v4654_v39 = vsel %vm2598_vm7, %v15094_v58, %v4653_v29  ;;  %v15649_v29 = vrot.slane %v12164_v59, 2  ;;  %7789 = vrcp.f32 %v5264_v20  ;;  %v4807_v62 = vadd.f32 %v4756_v63, %v12604_v42 }
 0x511   : > { %v4762_v2 = vadd.f32 %v4654_v39, %v4546_v48  ;;  %7791 = vrcp.f32 %v5267_v35  ;;  %v5296_v15 = vmul.f32 0.33333334, %v12555_v26  ;;  %v12637_v26 = vmul.f32 0.33333334, %v7776_v14 }
 0x512   : > { %7793 = vrcp.f32 %v5270_v55 }
 0x513   : > { %v4858_v39 = vadd.f32 %v4810_v17, %v4762_v2 }
 0x514   : > { %v5622_v49 = vpop.xlane.xlu0 %5621 }
 0x515   : > { %v5623_v31 = vmul.f32 0.0625, %v5622_v49  ;;  %v15648_v49 = vrot.slane %v12164_v59, 1  ;;  %v12652_v14 = vmul.f32 0.11111111, %v4858_v39 }
 0x517   : > { %v12573_v54 = vsub.f32 %v12179_v10, %v5623_v31  ;;  %v7780_v10 = vpop.eup %7779 }
 0x518   : > { %v4201_v37 = vpop.xlane.xlu0 %4200  ;;  %v12589_v13 = vpop.eup %7781 }
 0x519   : > { %v4401_v7 = vrot.slane %v4201_v37, 1  ;;  %v4591_v40 = vrot.slane %v4201_v37, 2  ;;  %v5625_v0 = vmul.f32 %v12573_v54, %v12573_v54  ;;  %v7784_v44 = vpop.eup %7783 }
 0x51b   : > { %v4402_v5 = vsel %vm2353_vm6, %v15648_v49, %v4401_v7  ;;  %v5626_v31 = vsel %vm1080_vm2, %v5625_v0, 0.0  ;;  %v4592_v41 = vsel %vm2598_vm7, %v15649_v29, %v4591_v40  ;;  %v4510_v61 = vadd.f32 %v4401_v7, %v4201_v37 }
 0x51c   : > { %v4509_v60 = vadd.f32 %v4402_v5, %v12164_v59  ;;  %5627 = vadd.xlane.f32.xlu1 %v5626_v31  ;;  %v4204_v57 = vpop.xlane.xlu0 %4203  ;;  %v4804_v59 = vadd.f32 %v12604_v42, %v12612_v19  ;;  %v4855_v37 = vadd.f32 %v4807_v62, %v4759_v9  ;;  %v12630_v49 = vmul.f32 0.33333334, %v12561_v21 }
 0x51d   : > { %v4593_v4 = vrot.slane %v4204_v57, 2  ;;  %v12632_v5 = vmul.f32 0.33333334, %v7774_v52  ;;  %v15650_v31 = vrot.slane %v12198_v1, 1  ;;  %v12639_v9 = vmul.f32 0.33333334, %v7778_v3 }
 0x51e   : > { %v12614_v22 = vadd.f32 %v4592_v41, %v4509_v60  ;;  %v7786_v60 = vpop.eup %7785  ;;  %v12644_v41 = vmul.f32 0.33333334, %v7780_v10  ;;  %v12647_v21 = vmul.f32 0.11111111, %v4855_v37  ;;  %v15651_v52 = vrot.slane %v12198_v1, 2 }
 0x51f   : > { %v4594_v50 = vsel %vm2598_vm7, %v4591_v40, %v4593_v4  ;;  %v7788_v4 = vpop.eup %7787  ;;  %v12672_v39 = vmul.f32 0.33333334, %v7786_v60 }
 0x520   : > { %v4821_v20 = vadd.f32 %v12425_v51, %v12614_v22  ;;  %v12622_v0 = vadd.f32 %v4594_v50, %v4510_v61  ;;  %v4213_v23 = vpop.xlane.xlu0 %4212  ;;  %v4852_v51 = vadd.f32 %v4804_v59, %v4756_v63  ;;  %v4776_v2 = vadd.f32 %v12614_v22, %v12306_v24  ;;  %v7790_v10 = vpop.eup %7789 }
 0x521   : > { %v4404_v7 = vrot.slane %v4213_v23, 1  ;;  %v4596_v48 = vrot.slane %v4213_v23, 2  ;;  %v12665_v59 = vmul.f32 0.33333334, %v7784_v44 }
 0x522   : > { %v12625_v35 = vmul.f32 0.11111111, %v4821_v20  ;;  %v4822_v40 = vadd.f32 %v12430_v30, %v12622_v0  ;;  %v12659_v17 = vmul.f32 0.11111111, %v4852_v51  ;;  %v7792_v20 = vpop.eup %7791  ;;  %v4777_v37 = vadd.f32 %v12622_v0, %v12283_v43 }
 0x523   : > { %v4405_v55 = vsel %vm2353_vm6, %v15650_v31, %v4404_v7  ;;  %v4597_v63 = vsel %vm2598_vm7, %v15651_v52, %v4596_v48  ;;  %v4513_v61 = vadd.f32 %v4404_v7, %v4213_v23  ;;  %v12680_v31 = vmul.f32 0.33333334, %v7788_v4 }
 0x524   : > { %v12641_v57 = vmul.f32 0.11111111, %v4822_v40  ;;  %v4512_v29 = vadd.f32 %v4405_v55, %v12198_v1  ;;  %v4216_v30 = vpop.xlane.xlu0 %4215  ;;  %7795 = vrsqrt.f32 %v12625_v35  ;;  %v12663_v1 = vmul.f32 0.33333334, %v12589_v13  ;;  %v7794_v40 = vpop.eup %7793 }
 0x525   : > { %v4598_v3 = vrot.slane %v4216_v30, 2  ;;  %v4421_v13 = vrot.slane %v12245_v16, 1  ;;  %v15652_v55 = vrot.slane %v12206_v8, 1  ;;  %v12687_v30 = vmul.f32 0.33333334, %v7792_v20 }
 0x526   : > { %v12656_v62 = vadd.f32 %v4597_v63, %v4512_v29  ;;  %7797 = vrsqrt.f32 %v12641_v57  ;;  %v12685_v29 = vmul.f32 0.33333334, %v7790_v10  ;;  %v15653_v4 = vrot.slane %v12206_v8, 2 }
 0x527   : > { %v4599_v50 = vsel %vm2598_vm7, %v4596_v48, %v4598_v3  ;;  %7799 = vrsqrt.f32 %v12647_v21  ;;  %vm4979_vm12 = vcmp.eq.f32.partialorder %v12625_v35, inf  ;;  %vm4981_vm13 = vcmp.eq.f32.partialorder %v12625_v35, 0.0 }
 0x528   : > { %v4824_v24 = vadd.f32 %v4776_v2, %v12656_v62  ;;  %v12670_v23 = vadd.f32 %v4599_v50, %v4513_v61  ;;  %v4225_v7 = vpop.xlane.xlu0 %4224  ;;  %7801 = vrsqrt.f32 %v12652_v14  ;;  %v12694_v2 = vmul.f32 0.33333334, %v7794_v40 }
 0x529   : > { %v4407_v48 = vrot.slane %v4225_v7, 1  ;;  %v4601_v51 = vrot.slane %v4225_v7, 2  ;;  %7803 = vrsqrt.f32 %v12659_v17  ;;  %v4779_v20 = vadd.f32 %v12656_v62, %v12614_v22 }
 0x52a   : > { %v12676_v44 = vmul.f32 0.11111111, %v4824_v24  ;;  %v4825_v43 = vadd.f32 %v4777_v37, %v12670_v23  ;;  %vm4986_vm14 = vcmp.eq.f32.partialorder %v12641_v57, inf  ;;  %vm4988_vm15 = vcmp.eq.f32.partialorder %v12641_v57, 0.0 }
 0x52b   : > { %v4408_v60 = vsel %vm2353_vm6, %v15652_v55, %v4407_v48  ;;  %v4602_v61 = vsel %vm2598_vm7, %v15653_v4, %v4601_v51  ;;  %v4516_v37 = vadd.f32 %v4407_v48, %v4225_v7  ;;  %v4780_v55 = vadd.f32 %v12670_v23, %v12622_v0 }
 0x52c   : > { %v12690_v52 = vmul.f32 0.11111111, %v4825_v43  ;;  %v4515_v63 = vadd.f32 %v4408_v60, %v12206_v8  ;;  %v4228_v3 = vpop.xlane.xlu0 %4227  ;;  %7805 = vrsqrt.f32 %v12676_v44  ;;  %vm5000_vm4 = vcmp.eq.f32.partialorder %v12676_v44, inf }
 0x52d   : > { %v4603_v50 = vrot.slane %v4228_v3, 2  ;;  %5718 = vperm.xlu1 %7530, %v5296_v15   ;;  %v4982_v15 = vand.u32 2147483648, %v12625_v35  ;;  %vm5002_vm1 = vcmp.eq.f32.partialorder %v12676_v44, 0.0  ;;  %vm5196_vm5 = vcmp.eq.f32.partialorder %v12659_v17, inf }
 0x52e   : > { %v7796_v10 = vpop.eup %7795  ;;  %v12703_v24 = vadd.f32 %v4602_v61, %v4515_v63  ;;  %7807 = vrsqrt.f32 %v12690_v52  ;;  %v4989_v61 = vand.u32 2147483648, %v12641_v57  ;;  %vm5007_vm8 = vcmp.eq.f32.partialorder %v12690_v52, inf }
 0x52f   : > { %v4604_v40 = vsel %vm2598_vm7, %v4601_v51, %v4603_v50  ;;  %v4978_v8 = vmul.f32 %v7796_v10, %v12625_v35  ;;  %vm5009_vm9 = vcmp.eq.f32.partialorder %v12690_v52, 0.0 }
 0x530   : > { %v7798_v43 = vpop.eup %7797  ;;  %v4827_v60 = vadd.f32 %v4779_v20, %v12703_v24  ;;  %v12713_v22 = vadd.f32 %v4604_v40, %v4516_v37  ;;  %v4237_v7 = vpop.xlane.xlu0 %4236  ;;  %v15654_v20 = vrot.slane %v12212_v33, 1 }
 0x531   : > { %v4410_v48 = vrot.slane %v4237_v7, 1  ;;  %v4606_v63 = vrot.slane %v4237_v7, 2  ;;  %5723 = vperm.xlu1 %7530, %v12630_v49   ;;  %v4985_v51 = vmul.f32 %v7798_v43, %v12641_v57  ;;  %v4980_v3 = vsel %vm4979_vm12, %v12625_v35, %v4978_v8  ;;  %v12727_v10 = vpop.eup %7799 }
 0x532   : > { %v12721_v4 = vmul.f32 0.11111111, %v4827_v60  ;;  %v4828_v0 = vadd.f32 %v4780_v55, %v12713_v22  ;;  %v4983_v50 = vsel %vm4981_vm13, %v4982_v15, %v4980_v3  ;;  %v12737_v40 = vpop.eup %7801  ;;  %v15655_v3 = vrot.slane %v12212_v33, 2 }
 0x533   : > { %v4411_v49 = vsel %vm2353_vm6, %v15654_v20, %v4410_v48  ;;  %v4987_v37 = vsel %vm4986_vm14, %v12641_v57, %v4985_v51  ;;  %v5253_v55 = vadd.f32 1e-08, %v4983_v50  ;;  %v7804_v60 = vpop.eup %7803  ;;  %v4519_v28 = vadd.f32 %v4410_v48, %v4237_v7 }
 0x534   : > { %v12739_v8 = vmul.f32 0.11111111, %v4828_v0  ;;  %v4518_v35 = vadd.f32 %v4411_v49, %v12212_v33  ;;  %v4240_v15 = vpop.xlane.xlu0 %4239  ;;  %v4990_v43 = vsel %vm4988_vm15, %v4989_v61, %v4987_v37  ;;  %v4607_v51 = vsel %vm2598_vm7, %v15655_v3, %v4606_v63 }
 0x535   : > { %v4608_v20 = vrot.slane %v4240_v15, 2  ;;  %5728 = vperm.xlu1 %7530, %v12632_v5   ;;  %v5254_v58 = vadd.f32 1e-08, %v4990_v43  ;;  %7809 = vrsqrt.f32 %v12721_v4  ;;  %v4782_v49 = vadd.f32 %v12703_v24, %v12656_v62 }
 0x536   : > { %v7806_v0 = vpop.eup %7805  ;;  %v12751_v32 = vadd.f32 %v4607_v51, %v4518_v35  ;;  %7811 = vrcp.f32 %v5253_v55  ;;  %v5003_v61 = vand.u32 2147483648, %v12676_v44  ;;  %v4783_v50 = vadd.f32 %v12713_v22, %v12670_v23 }
 0x537   : > { %v4609_v57 = vsel %vm2598_vm7, %v4606_v63, %v4608_v20  ;;  %7813 = vrcp.f32 %v5254_v58  ;;  %v4999_v33 = vmul.f32 %v7806_v0, %v12676_v44  ;;  %v5195_v43 = vmul.f32 %v7804_v60, %v12659_v17 }
 0x538   : > { %v7808_v5 = vpop.eup %7807  ;;  %v4830_v37 = vadd.f32 %v4782_v49, %v12751_v32  ;;  %v12760_v62 = vadd.f32 %v4609_v57, %v4519_v28  ;;  %v4249_v7 = vpop.xlane.xlu0 %4248  ;;  %7815 = vrsqrt.f32 %v12739_v8  ;;  %v15656_v55 = vrot.slane %v12220_v34, 1 }
 0x539   : > { %v4413_v48 = vrot.slane %v4249_v7, 1  ;;  %v4611_v63 = vrot.slane %v4249_v7, 2  ;;  %5733 = vperm.xlu1 %7530, %v12637_v26   ;;  %v5001_v58 = vsel %vm5000_vm4, %v12676_v44, %v4999_v33  ;;  %v5006_v35 = vmul.f32 %v7808_v5, %v12690_v52 }
 0x53a   : > { %v12768_v15 = vmul.f32 0.11111111, %v4830_v37  ;;  %v4831_v23 = vadd.f32 %v4783_v50, %v12760_v62  ;;  %v5004_v28 = vsel %vm5002_vm1, %v5003_v61, %v5001_v58  ;;  %v5010_v51 = vand.u32 2147483648, %v12690_v52 }
 0x53b   : > { %v4414_v3 = vsel %vm2353_vm6, %v15656_v55, %v4413_v48  ;;  %v5256_v26 = vadd.f32 1e-08, %v5004_v28  ;;  %v5008_v57 = vsel %vm5007_vm8, %v12690_v52, %v5006_v35  ;;  %v15657_v44 = vrot.slane %v12220_v34, 2 }
 0x53c   : > { %v12779_v20 = vmul.f32 0.11111111, %v4831_v23  ;;  %v4521_v0 = vadd.f32 %v4414_v3, %v12220_v34  ;;  %v4252_v49 = vpop.xlane.xlu0 %4251  ;;  %v5011_v61 = vsel %vm5009_vm9, %v5010_v51, %v5008_v57  ;;  %v4785_v5 = vadd.f32 %v12751_v32, %v12703_v24 }
 0x53d   : > { %v4612_v60 = vsel %vm2598_vm7, %v15657_v44, %v4611_v63  ;;  %v4613_v33 = vrot.slane %v4252_v49, 2  ;;  %5738 = vperm.xlu1 %7530, %v12639_v9   ;;  %7817 = vrcp.f32 %v5256_v26  ;;  %v5257_v37 = vadd.f32 1e-08, %v5011_v61 }
 0x53e   : > { %v12790_v50 = vadd.f32 %v4612_v60, %v4521_v0  ;;  %7819 = vrsqrt.f32 %v12768_v15  ;;  %v5199_v34 = vand.u32 2147483648, %v12659_v17  ;;  %v5220_v35 = vand.u32 2147483648, %v12647_v21 }
 0x53f   : > { %v7810_v58 = vpop.eup %7809  ;;  %v4614_v52 = vsel %vm2598_vm7, %v4611_v63, %v4613_v33  ;;  %7821 = vrsqrt.f32 %v12779_v20  ;;  %v4522_v23 = vadd.f32 %v4413_v48, %v4249_v7  ;;  %vm5021_vm10 = vcmp.eq.f32.partialorder %v12721_v4, inf }
 0x540   : > { %v7812_v9 = vpop.eup %7811  ;;  %v4833_v28 = vadd.f32 %v4785_v5, %v12790_v50  ;;  %v4261_v55 = vpop.xlane.xlu0 %4260  ;;  %v12802_v24 = vsel %vm5196_vm5, %v12659_v17, %v5195_v43  ;;  %vm5028_vm0 = vcmp.eq.f32.partialorder %v12739_v8, inf  ;;  %v5031_v26 = vand.u32 2147483648, %v12739_v8 }
 0x541   : > { %v7814_v3 = vpop.eup %7813  ;;  %v4416_v63 = vrot.slane %v4261_v55, 1  ;;  %5743 = vperm.xlu1 %7530, %v12663_v1   ;;  %v5020_v7 = vmul.f32 %v7810_v58, %v12721_v4  ;;  %v12808_v51 = vadd.f32 %v4614_v52, %v4522_v23  ;;  %7823 = vrcp.f32 %v5257_v37 }
 0x542   : > { %v7816_v48 = vpop.eup %7815  ;;  %v5314_v0 = vmul.f32 0.33333334, %v7814_v3  ;;  %v5024_v49 = vand.u32 2147483648, %v12721_v4  ;;  %v12811_v57 = vmul.f32 0.11111111, %v4833_v28  ;;  %v15658_v43 = vrot.slane %v12226_v38, 1 }
 0x543   : > { %v4616_v1 = vrot.slane %v4261_v55, 2  ;;  %v5027_v60 = vmul.f32 %v7816_v48, %v12739_v8  ;;  %v4786_v33 = vadd.f32 %v12760_v62, %v12713_v22  ;;  %v5022_v37 = vsel %vm5021_vm10, %v12721_v4, %v5020_v7 }
 0x544   : > { %v4417_v44 = vsel %vm2353_vm6, %v15658_v43, %v4416_v63  ;;  %5763 = vperm.xlu0 %7529, %v5314_v0   ;;  %v4264_v5 = vpop.xlane.xlu0 %4263  ;;  %vm5023_vm11 = vcmp.eq.f32.partialorder %v12721_v4, 0.0  ;;  %vm5030_vm12 = vcmp.eq.f32.partialorder %v12739_v8, 0.0  ;;  %vm5042_vm13 = vcmp.eq.f32.partialorder %v12768_v15, inf }
 0x545   : > { %v4524_v61 = vadd.f32 %v4417_v44, %v12226_v38  ;;  %5748 = vperm.xlu1 %7530, %v12644_v41   ;;  %v5029_v58 = vsel %vm5028_vm0, %v12739_v8, %v5027_v60  ;;  %v5025_v52 = vsel %vm5023_vm11, %v5024_v49, %v5022_v37  ;;  %v4834_v22 = vadd.f32 %v4786_v33, %v12808_v51 }
 0x546   : > { %v5312_v23 = vmul.f32 0.33333334, %v7812_v9  ;;  %v5032_v28 = vsel %vm5030_vm12, %v5031_v26, %v5029_v58  ;;  %v5259_v3 = vadd.f32 1e-08, %v5025_v52  ;;  %v15659_v7 = vrot.slane %v12226_v38, 2 }
 0x547   : > { %v7818_v48 = vpop.eup %7817  ;;  %v4618_v41 = vrot.slane %v4264_v5, 2  ;;  %v5260_v0 = vadd.f32 1e-08, %v5032_v28  ;;  %7825 = vrsqrt.f32 %v12811_v57  ;;  %vm5044_vm14 = vcmp.eq.f32.partialorder %v12768_v15, 0.0 }
 0x548   : > { %v4617_v4 = vsel %vm2598_vm7, %v15659_v7, %v4616_v1  ;;  %v7820_v43 = vpop.eup %7819  ;;  %v4273_v8 = vpop.xlane.xlu0 %4272  ;;  %v5318_v49 = vmul.f32 0.33333334, %v7818_v48  ;;  %v5045_v9 = vand.u32 2147483648, %v12768_v15  ;;  %v4788_v60 = vadd.f32 %v12790_v50, %v12751_v32 }
 0x549   : > { %v12835_v44 = vadd.f32 %v4617_v4, %v4524_v61  ;;  %v7822_v26 = vpop.eup %7821  ;;  %v4419_v38 = vrot.slane %v4273_v8, 1  ;;  %5758 = vperm.xlu1 %7530, %v5312_v23   ;;  %7827 = vrcp.f32 %v5260_v0  ;;  %v5041_v33 = vmul.f32 %v7820_v43, %v12768_v15 }
 0x54a   : > { %v4789_v5 = vadd.f32 %v12808_v51, %v12760_v62  ;;  %v12844_v61 = vmul.f32 0.11111111, %v4834_v22  ;;  %v4525_v37 = vadd.f32 %v4416_v63, %v4261_v55  ;;  %5773 = vperm.xlu0 %7529, %v5318_v49   ;;  %7829 = vrcp.f32 %v5259_v3 }
 0x54b   : > { %v4619_v58 = vsel %vm2598_vm7, %v4616_v1, %v4618_v41  ;;  %v15660_v52 = vrot.slane %v12234_v47, 1  ;;  %vm5049_vm15 = vcmp.eq.f32.partialorder %v12779_v20, inf  ;;  %vm5051_vm4 = vcmp.eq.f32.partialorder %v12779_v20, 0.0  ;;  %v7824_v32 = vpop.eup %7823 }
 0x54c   : > { %v4836_v23 = vadd.f32 %v4788_v60, %v12835_v44  ;;  %v4276_v48 = vpop.xlane.xlu0 %4275  ;;  %v5043_v62 = vsel %vm5042_vm13, %v12768_v15, %v5041_v33  ;;  %v5048_v55 = vmul.f32 %v7822_v26, %v12779_v20  ;;  %v5052_v63 = vand.u32 2147483648, %v12779_v20 }
 0x54d   : > { %v4420_v28 = vsel %vm2353_vm6, %v15660_v52, %v4419_v38  ;;  %v4621_v1 = vrot.slane %v4273_v8, 2  ;;  %v4623_v22 = vrot.slane %v4276_v48, 2  ;;  %5768 = vperm.xlu1 %7530, %v12665_v59   ;;  %v5046_v3 = vsel %vm5044_vm14, %v5045_v9, %v5043_v62 }
 0x54e   : > { %vm5063_vm1 = vcmp.eq.f32.partialorder %v12811_v57, inf  ;;  %vm5198_vm5 = vcmp.eq.f32.partialorder %v12659_v17, 0.0  ;;  %v4741_v7 = vadd.f32 %v4619_v58, %v4525_v37  ;;  %v4527_v4 = vadd.f32 %v4420_v28, %v12234_v47  ;;  %5783 = vperm.xlu0 %7529, %v12672_v39  }
 0x54f   : > { %v5262_v41 = vadd.f32 1e-08, %v5046_v3  ;;  %v5050_v0 = vsel %vm5049_vm15, %v12779_v20, %v5048_v55  ;;  %v4791_v59 = vadd.f32 %v12835_v44, %v12790_v50  ;;  %v5320_v43 = vmul.f32 0.33333334, %v7824_v32 }
 0x550   : > { %v5053_v15 = vsel %vm5051_vm4, %v5052_v63, %v5050_v0  ;;  %7831 = vrsqrt.f32 %v12844_v61  ;;  %v12873_v49 = vmul.f32 0.11111111, %v4836_v23  ;;  %v4528_v9 = vadd.f32 %v4419_v38, %v4273_v8  ;;  %v4285_v39 = vpop.xlane.xlu0 %4284 }
 0x551   : > { %v4624_v26 = vsel %vm2598_vm7, %v4621_v1, %v4623_v22  ;;  %7833 = vrcp.f32 %v5262_v41  ;;  %v7826_v60 = vpop.eup %7825  ;;  %v15661_v33 = vrot.slane %v12234_v47, 2  ;;  %v4422_v58 = vrot.slane %v4285_v39, 1  ;;  %5778 = vperm.xlu1 %7530, %v5320_v43  }
 0x552   : > { %v4626_v50 = vrot.slane %v4285_v39, 2  ;;  %v5263_v52 = vadd.f32 1e-08, %v5053_v15  ;;  %v4792_v20 = vadd.f32 %v4741_v7, %v12808_v51  ;;  %v4837_v28 = vadd.f32 %v4789_v5, %v4741_v7 }
 0x553   : > { %v4622_v37 = vsel %vm2598_vm7, %v15661_v33, %v4621_v1  ;;  %v5062_v23 = vmul.f32 %v7826_v60, %v12811_v57  ;;  %v7828_v8 = vpop.eup %7827  ;;  %v4744_v38 = vadd.f32 %v4624_v26, %v4528_v9  ;;  %v4531_v48 = vadd.f32 %v4422_v58, %v4285_v39 }
 0x554   : > { %v4743_v32 = vadd.f32 %v4622_v37, %v4527_v4  ;;  %v15662_v62 = vrot.slane %v12259_v56, 2  ;;  %v4423_v47 = vsel %vm2353_vm6, %v4421_v13, %v4422_v58  ;;  %v7830_v63 = vpop.eup %7829  ;;  %v5326_v1 = vmul.f32 0.33333334, %v7828_v8  ;;  %v4279_v22 = vpop.xlane.xlu0 %4278 }
 0x555   : > { %7835 = vrcp.f32 %v5263_v52  ;;  %vm5065_vm8 = vcmp.eq.f32.partialorder %v12811_v57, 0.0  ;;  %v5066_v51 = vand.u32 2147483648, %v12811_v57  ;;  %v4530_v5 = vadd.f32 %v4423_v47, %v12245_v16 }
 0x556   : > { %v4629_v55 = vsel %vm2598_vm7, %v4626_v50, %v15662_v62  ;;  %v4529_v3 = vadd.f32 %v4421_v13, %v4279_v22  ;;  %v5324_v56 = vmul.f32 0.33333334, %v7830_v63  ;;  %v5064_v4 = vsel %vm5063_vm1, %v12811_v57, %v5062_v23  ;;  %5793 = vperm.xlu0 %7529, %v5326_v1  }
 0x557   : > { %v4747_v41 = vadd.f32 %v4629_v55, %v4531_v48  ;;  %v5067_v0 = vsel %vm5065_vm8, %v5066_v51, %v5064_v4  ;;  %7837 = vrsqrt.f32 %v12873_v49  ;;  %v12901_v43 = vsel %vm5198_vm5, %v5199_v34, %v12802_v24 }
 0x558   : > { %v12903_v15 = vmul.f32 0.11111111, %v4837_v28  ;;  %v4839_v13 = vadd.f32 %v4791_v59, %v4743_v32  ;;  %v4840_v9 = vadd.f32 %v4792_v20, %v4744_v38  ;;  %v15663_v26 = vrot.slane %v12245_v16, 2  ;;  %5788 = vperm.xlu1 %7530, %v5324_v56   ;;  %v4294_v37 = vpop.xlane.xlu0 %4293 }
 0x559   : > { %v4795_v57 = vadd.f32 %v4744_v38, %v4741_v7  ;;  %v5265_v58 = vadd.f32 1e-08, %v5067_v0  ;;  %vm5070_vm9 = vcmp.eq.f32.partialorder %v12844_v61, inf  ;;  %v4794_v34 = vadd.f32 %v4743_v32, %v12835_v44 }
 0x55a   : > { %v12907_v39 = vadd.f32 %v15663_v26, %v4529_v3  ;;  %v15664_v60 = vmov %v15663_v26  ;;  %v7832_v17 = vpop.eup %7831  ;;  %vm5072_vm10 = vcmp.eq.f32.partialorder %v12844_v61, 0.0  ;;  %v5073_v59 = vand.u32 2147483648, %v12844_v61 }
 0x55b   : > { %v4627_v33 = vsel %vm2598_vm7, %v15664_v60, %v4626_v50  ;;  %v7834_v52 = vpop.eup %7833  ;;  %v4798_v20 = vadd.f32 %v4747_v41, %v4744_v38  ;;  %v4843_v7 = vadd.f32 %v4795_v57, %v4747_v41  ;;  %v4424_v50 = vrot.slane %v4294_v37, 1 }
 0x55c   : > { %v12914_v24 = vadd.f32 %v4627_v33, %v4530_v5  ;;  %v4841_v16 = vadd.f32 %v12600_v25, %v12907_v39  ;;  %v12920_v28 = vmul.f32 0.11111111, %v4839_v13  ;;  %v12922_v23 = vmul.f32 0.11111111, %v4840_v9  ;;  %5798 = vperm.xlu1 %7530, %v12680_v31   ;;  %v4291_v47 = vpop.xlane.xlu0 %4290 }
 0x55d   : > { %v4801_v8 = vadd.f32 %v12612_v19, %v4747_v41  ;;  %v5330_v44 = vmul.f32 0.33333334, %v7834_v52  ;;  %v4630_v62 = vrot.slane %v4294_v37, 2  ;;  %v15665_v55 = vrot.slane %v12281_v27, 1 }
 0x55e   : > { %v12926_v48 = vmul.f32 0.11111111, %v4841_v16  ;;  %7839 = vrcp.f32 %v5265_v58  ;;  %v4842_v25 = vadd.f32 %v4794_v34, %v12914_v24  ;;  %v4532_v1 = vadd.f32 %v4424_v50, %v4291_v47 }
 0x55f   : > { %v4426_v38 = vsel %vm2353_vm6, %v4424_v50, %v15665_v55  ;;  %5803 = vperm.xlu0 %7529, %v5330_v44   ;;  %v5069_v22 = vmul.f32 %v7832_v17, %v12844_v61  ;;  %v7836_v51 = vpop.eup %7835  ;;  %v4846_v31 = vadd.f32 %v4798_v20, %v12612_v19  ;;  %v12934_v5 = vmul.f32 0.11111111, %v4843_v7 }
 0x560   : > { %v4533_v63 = vadd.f32 %v4426_v38, %v4294_v37  ;;  %v4797_v3 = vadd.f32 %v12914_v24, %v4743_v32  ;;  %vm5084_vm0 = vcmp.eq.f32.partialorder %v12873_v49, inf  ;;  %7841 = vrsqrt.f32 %v12926_v48  ;;  %v4306_v26 = vpop.xlane.xlu0 %4305 }
 0x561   : > { %v12939_v56 = vadd.f32 %v4630_v62, %v4532_v1  ;;  %v5332_v4 = vmul.f32 0.33333334, %v7836_v51  ;;  %v5071_v41 = vsel %vm5070_vm9, %v12844_v61, %v5069_v22  ;;  %v7838_v0 = vpop.eup %7837  ;;  %v4849_v13 = vadd.f32 %v4801_v8, %v12604_v42 }
 0x562   : > { %v15666_v19 = vrot.slane %v12281_v27, 2  ;;  %v5074_v32 = vsel %vm5072_vm10, %v5073_v59, %v5071_v41  ;;  %7843 = vrsqrt.f32 %v12903_v15  ;;  %v12951_v57 = vmul.f32 0.11111111, %v4842_v25 }
 0x563   : > { %v4796_v60 = vadd.f32 %v12907_v39, %v12390_v6  ;;  %5808 = vperm.xlu1 %7530, %v5332_v4   ;;  %vm5086_vm11 = vcmp.eq.f32.partialorder %v12873_v49, 0.0  ;;  %7845 = vrsqrt.f32 %v12934_v5  ;;  %5813 = vperm.xlu0 %7529, %v12685_v29   ;;  %v5266_v27 = vadd.f32 1e-08, %v5074_v32 }
 0x564   : > { %v4632_v9 = vsel %vm2598_vm7, %v4630_v62, %v15666_v19  ;;  %v4427_v42 = vrot.slane %v4306_v26, 1  ;;  %v5083_v61 = vmul.f32 %v7838_v0, %v12873_v49  ;;  %v12961_v37 = vmul.f32 0.11111111, %v4846_v31  ;;  %v4303_v29 = vpop.xlane.xlu0 %4302 }
 0x565   : > { %v12955_v33 = vadd.f32 %v4632_v9, %v4533_v63  ;;  %v4844_v58 = vadd.f32 %v4796_v60, %v12939_v56  ;;  %v5087_v17 = vand.u32 2147483648, %v12873_v49  ;;  %7847 = vrsqrt.f32 %v12920_v28 }
 0x566   : > { %v12966_v6 = vmul.f32 0.11111111, %v4849_v13  ;;  %7849 = vrcp.f32 %v5266_v27  ;;  %v15667_v34 = vrot.slane %v12364_v46, 1  ;;  %v5085_v52 = vsel %vm5084_vm0, %v12873_v49, %v5083_v61 }
 0x567   : > { %v4845_v20 = vadd.f32 %v4797_v3, %v12955_v33  ;;  %v4635_v7 = vrot.slane %v4306_v26, 2  ;;  %v4535_v16 = vadd.f32 %v4427_v42, %v4303_v29  ;;  %v5088_v50 = vsel %vm5086_vm11, %v5087_v17, %v5085_v52 }
 0x568   : > { %v4429_v59 = vsel %vm2353_vm6, %v4427_v42, %v15667_v34  ;;  %v7840_v8 = vpop.eup %7839  ;;  %v5268_v62 = vadd.f32 1e-08, %v5088_v50  ;;  %vm5091_vm12 = vcmp.eq.f32.partialorder %v12903_v15, inf  ;;  %7851 = vrsqrt.f32 %v12922_v23  ;;  %v4318_v63 = vpop.xlane.xlu0 %4317 }
 0x569   : > { %v4536_v44 = vadd.f32 %v4429_v59, %v4306_v26  ;;  %v12979_v55 = vmul.f32 0.11111111, %v4844_v58  ;;  %v5336_v38 = vmul.f32 0.33333334, %v7840_v8  ;;  %v12981_v47 = vadd.f32 %v4635_v7, %v4535_v16 }
 0x56a   : > { %vm5093_vm13 = vcmp.eq.f32.partialorder %v12903_v15, 0.0  ;;  %v4799_v25 = vadd.f32 %v12939_v56, %v12907_v39  ;;  %7853 = vrcp.f32 %v5268_v62  ;;  %v5094_v49 = vand.u32 2147483648, %v12903_v15  ;;  %v7842_v1 = vpop.eup %7841 }
 0x56b   : > { %vm5105_vm14 = vcmp.eq.f32.partialorder %v12920_v28, inf  ;;  %v4800_v22 = vadd.f32 %v12955_v33, %v12914_v24  ;;  %v12990_v51 = vmul.f32 0.11111111, %v4845_v20  ;;  %v15668_v31 = vrot.slane %v12364_v46, 2  ;;  %5818 = vperm.xlu1 %7530, %v5336_v38  }
 0x56c   : > { %vm5107_vm15 = vcmp.eq.f32.partialorder %v12920_v28, 0.0  ;;  %v7844_v39 = vpop.eup %7843  ;;  %v4847_v41 = vadd.f32 %v4799_v25, %v12981_v47  ;;  %v4430_v0 = vrot.slane %v4318_v63, 1  ;;  %7855 = vrsqrt.f32 %v12951_v57  ;;  %v4315_v19 = vpop.xlane.xlu0 %4314 }
 0x56d   : > { %v4637_v3 = vsel %vm2598_vm7, %v4635_v7, %v15668_v31  ;;  %7857 = vrsqrt.f32 %v12979_v55  ;;  %v5090_v24 = vmul.f32 %v7844_v39, %v12903_v15  ;;  %v5108_v13 = vand.u32 2147483648, %v12920_v28  ;;  %v7846_v46 = vpop.eup %7845 }
 0x56e   : > { %v12996_v4 = vadd.f32 %v4637_v3, %v4536_v44  ;;  %vm5112_vm4 = vcmp.eq.f32.partialorder %v12922_v23, inf  ;;  %vm5114_vm1 = vcmp.eq.f32.partialorder %v12922_v23, 0.0  ;;  %v5115_v9 = vand.u32 2147483648, %v12922_v23 }
 0x56f   : > { %v5129_v26 = vand.u32 2147483648, %v12951_v57  ;;  %v5118_v32 = vmul.f32 %v7842_v1, %v12926_v48  ;;  %v7848_v60 = vpop.eup %7847  ;;  %5828 = vperm.xlu1 %7530, %v12687_v30   ;;  %v4640_v27 = vrot.slane %v4318_v63, 2  ;;  %v5092_v42 = vsel %vm5091_vm12, %v12903_v15, %v5090_v24 }
 0x570   : > { %v4432_v61 = vsel %vm2353_vm6, %v4430_v0, %v4431_v36  ;;  %v4538_v58 = vadd.f32 %v4430_v0, %v4315_v19  ;;  %v7850_v17 = vpop.eup %7849  ;;  %v4803_v34 = vadd.f32 %v12996_v4, %v12955_v33  ;;  %v13017_v59 = vmul.f32 0.11111111, %v4847_v41  ;;  %v4330_v33 = vpop.xlane.xlu0 %4329 }
 0x571   : > { %v5095_v29 = vsel %vm5093_vm13, %v5094_v49, %v5092_v42  ;;  %v5104_v30 = vmul.f32 %v7848_v60, %v12920_v28  ;;  %v5338_v52 = vmul.f32 0.33333334, %v7850_v17  ;;  %vm5126_vm5 = vcmp.eq.f32.partialorder %v12951_v57, inf }
 0x572   : > { %v5269_v20 = vadd.f32 1e-08, %v5095_v29  ;;  %v13022_v7 = vadd.f32 %v4640_v27, %v4538_v58  ;;  %vm5119_vm8 = vcmp.eq.f32.partialorder %v12926_v48, inf  ;;  %v7852_v36 = vpop.eup %7851  ;;  %v4848_v16 = vadd.f32 %v4800_v22, %v12996_v4 }
 0x573   : > { %v4539_v50 = vadd.f32 %v4432_v61, %v4318_v63  ;;  %v5106_v15 = vsel %vm5105_vm14, %v12920_v28, %v5104_v30  ;;  %v5120_v8 = vsel %vm5119_vm8, %v12926_v48, %v5118_v32  ;;  %5823 = vperm.xlu0 %7529, %v5338_v52   ;;  %v4802_v44 = vadd.f32 %v12981_v47, %v12939_v56 }
 0x574   : > { %v4642_v62 = vsel %vm2598_vm7, %v4640_v27, %v4641_v18  ;;  %7859 = vrcp.f32 %v5269_v20  ;;  %vm5128_vm9 = vcmp.eq.f32.partialorder %v12951_v57, 0.0  ;;  %v5122_v38 = vand.u32 2147483648, %v12926_v48  ;;  %v7854_v25 = vpop.eup %7853  ;;  %v4327_v39 = vpop.xlane.xlu0 %4326 }
 0x575   : > { %v5109_v63 = vsel %vm5107_vm15, %v5108_v13, %v5106_v15  ;;  %v5111_v49 = vmul.f32 %v7852_v36, %v12922_v23  ;;  %v4433_v1 = vrot.slane %v4330_v33, 1  ;;  %vm5121_vm10 = vcmp.eq.f32.partialorder %v12926_v48, 0.0 }
 0x576   : > { %7861 = vrsqrt.f32 %v13017_v59  ;;  %v5342_v56 = vmul.f32 0.33333334, %v7854_v25  ;;  %v4850_v12 = vadd.f32 %v4802_v44, %v13022_v7  ;;  %v5123_v18 = vsel %vm5121_vm10, %v5122_v38, %v5120_v8  ;;  %v7856_v22 = vpop.eup %7855 }
 0x577   : > { %v13044_v31 = vadd.f32 %v4642_v62, %v4539_v50  ;;  %v5271_v3 = vadd.f32 1e-08, %v5109_v63  ;;  %v5113_v28 = vsel %vm5112_vm4, %v12922_v23, %v5111_v49  ;;  %v5132_v41 = vmul.f32 %v7846_v46, %v12934_v5  ;;  %v7858_v0 = vpop.eup %7857 }
 0x578   : > { %5833 = vperm.xlu0 %7529, %v5342_v56   ;;  %v4645_v48 = vrot.slane %v4330_v33, 2  ;;  %v5116_v24 = vsel %vm5114_vm1, %v5115_v9, %v5113_v28  ;;  %v4435_v13 = vsel %vm2353_vm6, %v4433_v1, %v4434_v45  ;;  %v4541_v19 = vadd.f32 %v4433_v1, %v4327_v39  ;;  %v4342_v9 = vpop.xlane.xlu0 %4341 }
 0x579   : > { %7863 = vrcp.f32 %v5271_v3  ;;  %v5272_v32 = vadd.f32 1e-08, %v5116_v24  ;;  %v5125_v60 = vmul.f32 %v7856_v22, %v12951_v57  ;;  %v5273_v27 = vadd.f32 1e-08, %v5123_v18 }
 0x57a   : > { %v13056_v42 = vmul.f32 0.11111111, %v4850_v12  ;;  %v4805_v46 = vadd.f32 %v13022_v7, %v12981_v47  ;;  %v4757_v61 = vadd.f32 %v4645_v48, %v4541_v19  ;;  %vm5133_vm0 = vcmp.eq.f32.partialorder %v12934_v5, inf }
 0x57b   : > { %v13061_v23 = vmul.f32 0.11111111, %v4848_v16  ;;  %7865 = vrcp.f32 %v5272_v32  ;;  %v5127_v45 = vsel %vm5126_vm5, %v12951_v57, %v5125_v60  ;;  %v5134_v58 = vsel %vm5133_vm0, %v12934_v5, %v5132_v41 }
 0x57c   : > { %5843 = vperm.xlu0 %7529, %v12694_v2   ;;  %v4542_v17 = vadd.f32 %v4435_v13, %v4330_v33  ;;  %v4853_v29 = vadd.f32 %v4805_v46, %v4757_v61  ;;  %vm5135_vm11 = vcmp.eq.f32.partialorder %v12934_v5, 0.0  ;;  %v5136_v47 = vand.u32 2147483648, %v12934_v5  ;;  %v4339_v44 = vpop.xlane.xlu0 %4338 }
 0x57d   : > { %v4851_v30 = vadd.f32 %v4803_v34, %v13044_v31  ;;  %v5130_v52 = vsel %vm5128_vm9, %v5129_v26, %v5127_v45  ;;  %7867 = vrcp.f32 %v5273_v27  ;;  %v4436_v20 = vrot.slane %v4342_v9, 1 }
 0x57e   : > { %v7860_v36 = vpop.eup %7859  ;;  %7869 = vrsqrt.f32 %v13056_v42  ;;  %v15669_v2 = vrot.slane %v12478_v11, 2  ;;  %v5274_v50 = vadd.f32 1e-08, %v5130_v52  ;;  %v5137_v33 = vsel %vm5135_vm11, %v5136_v47, %v5134_v58 }
 0x57f   : > { %v5344_v15 = vmul.f32 0.33333334, %v7860_v36  ;;  %v4650_v5 = vrot.slane %v4342_v9, 2  ;;  %v15670_v34 = vrot.slane %v12535_v53, 1  ;;  %v5275_v57 = vadd.f32 1e-08, %v5137_v33 }
 0x580   : > { %v4647_v16 = vsel %vm2598_vm7, %v4645_v48, %v15669_v2  ;;  %v7862_v26 = vpop.eup %7861  ;;  %v4806_v38 = vadd.f32 %v13044_v31, %v12996_v4  ;;  %v13084_v25 = vmul.f32 0.11111111, %v4853_v29  ;;  %v4544_v11 = vadd.f32 %v4436_v20, %v4339_v44 }
 0x581   : > { %v4438_v8 = vsel %vm2353_vm6, %v4436_v20, %v15670_v34  ;;  %v4758_v62 = vadd.f32 %v4647_v16, %v4542_v17  ;;  %5838 = vperm.xlu1 %7530, %v5344_v15   ;;  %v4808_v63 = vadd.f32 %v4757_v61, %v13022_v7  ;;  %7871 = vrcp.f32 %v5274_v50 }
 0x582   : > { %v4545_v49 = vadd.f32 %v4438_v8, %v4342_v9  ;;  %v5139_v1 = vmul.f32 %v7858_v0, %v12979_v55  ;;  %v4760_v56 = vadd.f32 %v4650_v5, %v4544_v11  ;;  %7873 = vrcp.f32 %v5275_v57 }
 0x583   : > { %vm5140_vm6 = vcmp.eq.f32.partialorder %v12979_v55, inf  ;;  %v5143_v12 = vand.u32 2147483648, %v12979_v55  ;;  %v7864_v18 = vpop.eup %7863  ;;  %v15671_v22 = vrot.slane %v12535_v53, 2  ;;  %7875 = vrsqrt.f32 %v12990_v51 }
 0x584   : > { %v5141_v3 = vsel %vm5140_vm6, %v12979_v55, %v5139_v1  ;;  %vm5142_vm12 = vcmp.eq.f32.partialorder %v12979_v55, 0.0  ;;  %v5348_v7 = vmul.f32 0.33333334, %v7864_v18  ;;  %7877 = vrsqrt.f32 %v13084_v25 }
 0x585   : > { %v4652_v4 = vsel %vm2598_vm7, %v4650_v5, %v15671_v22  ;;  %v4856_v28 = vadd.f32 %v4808_v63, %v4760_v56  ;;  %v5144_v39 = vsel %vm5142_vm12, %v5143_v12, %v5141_v3  ;;  %v7866_v41 = vpop.eup %7865  ;;  %v4854_v0 = vadd.f32 %v4806_v38, %v4758_v62 }
 0x586   : > { %v4761_v48 = vadd.f32 %v4652_v4, %v4545_v49  ;;  %v5276_v24 = vadd.f32 1e-08, %v5144_v39  ;;  %7879 = vrsqrt.f32 %v12961_v37  ;;  %v13098_v53 = vmul.f32 0.11111111, %v4851_v30  ;;  %5848 = vperm.xlu1 %7530, %v5348_v7  }
 0x587   : > { %v5350_v13 = vmul.f32 0.33333334, %v7866_v41  ;;  %7881 = vrsqrt.f32 %v13061_v23  ;;  %v13103_v55 = vmul.f32 %v12727_v10, %v12647_v21  ;;  %v7868_v19 = vpop.eup %7867  ;;  %v4809_v32 = vadd.f32 %v4758_v62, %v13044_v31 }
 0x588   : > { %vm5147_vm7 = vcmp.eq.f32.partialorder %v12990_v51, inf  ;;  %7883 = vrcp.f32 %v5276_v24  ;;  %v5160_v60 = vmul.f32 %v7862_v26, %v13017_v59  ;;  %v7870_v27 = vpop.eup %7869  ;;  %v5352_v46 = vmul.f32 0.33333334, %v7868_v19 }
 0x589   : > { %5853 = vperm.xlu0 %7529, %v5350_v13   ;;  %v13108_v61 = vmul.f32 0.11111111, %v4856_v28  ;;  %vm5149_vm13 = vcmp.eq.f32.partialorder %v12990_v51, 0.0  ;;  %vm5161_vm14 = vcmp.eq.f32.partialorder %v13017_v59, inf  ;;  %v13112_v9 = vmul.f32 0.11111111, %v4854_v0 }
 0x58a   : > { %v4857_v10 = vadd.f32 %v4809_v32, %v4761_v48  ;;  %v5162_v45 = vsel %vm5161_vm14, %v13017_v59, %v5160_v60  ;;  %7885 = vrsqrt.f32 %v12966_v6  ;;  %5858 = vperm.xlu1 %7530, %v5352_v46   ;;  %v5150_v31 = vand.u32 2147483648, %v12990_v51 }
 0x58b   : > { %vm5154_vm15 = vcmp.eq.f32.partialorder %v12961_v37, inf  ;;  %v5164_v58 = vand.u32 2147483648, %v13017_v59  ;;  %7887 = vrsqrt.f32 %v13098_v53  ;;  %v7872_v17 = vpop.eup %7871  ;;  %vm5156_vm4 = vcmp.eq.f32.partialorder %v12961_v37, 0.0 }
 0x58c   : > { %v5157_v29 = vand.u32 2147483648, %v12961_v37  ;;  %vm5168_vm1 = vcmp.eq.f32.partialorder %v13061_v23, inf  ;;  %vm5163_vm5 = vcmp.eq.f32.partialorder %v13017_v59, 0.0  ;;  %v7874_v47 = vpop.eup %7873  ;;  %v5354_v30 = vmul.f32 0.33333334, %v7872_v17 }
 0x58d   : > { %7889 = vrsqrt.f32 %v13108_v61  ;;  %v5165_v52 = vsel %vm5163_vm5, %v5164_v58, %v5162_v45  ;;  %v5181_v20 = vmul.f32 %v7870_v27, %v13056_v42  ;;  %v7876_v36 = vpop.eup %7875  ;;  %v13126_v2 = vmul.f32 0.11111111, %v4857_v10 }
 0x58e   : > { %v5356_v16 = vmul.f32 0.33333334, %v7874_v47  ;;  %vm5170_vm8 = vcmp.eq.f32.partialorder %v13061_v23, 0.0  ;;  %vm5182_vm9 = vcmp.eq.f32.partialorder %v13056_v42, inf  ;;  %v7878_v50 = vpop.eup %7877  ;;  %5863 = vperm.xlu0 %7529, %v5354_v30   ;;  %v5146_v33 = vmul.f32 %v7876_v36, %v12990_v51 }
 0x58f   : > { %v5171_v59 = vand.u32 2147483648, %v13061_v23  ;;  %v5183_v15 = vsel %vm5182_vm9, %v13056_v42, %v5181_v20  ;;  %v5185_v5 = vand.u32 2147483648, %v13056_v42  ;;  %v5279_v8 = vadd.f32 1e-08, %v5165_v52 }
 0x590   : > { %v7880_v34 = vpop.eup %7879  ;;  %5868 = vperm.xlu1 %7530, %v5356_v16   ;;  %vm5175_vm10 = vcmp.eq.f32.partialorder %v12966_v6, inf  ;;  %vm5184_vm0 = vcmp.eq.f32.partialorder %v13056_v42, 0.0  ;;  %7891 = vrsqrt.f32 %v13112_v9  ;;  %v5148_v57 = vsel %vm5147_vm7, %v12990_v51, %v5146_v33 }
 0x591   : > { %v7882_v44 = vpop.eup %7881  ;;  %v5153_v26 = vmul.f32 %v7880_v34, %v12961_v37  ;;  %vm5177_vm11 = vcmp.eq.f32.partialorder %v12966_v6, 0.0  ;;  %v5186_v62 = vsel %vm5184_vm0, %v5185_v5, %v5183_v15  ;;  %v5151_v11 = vsel %vm5149_vm13, %v5150_v31, %v5148_v57 }
 0x592   : > { %v7884_v38 = vpop.eup %7883  ;;  %v5167_v63 = vmul.f32 %v7882_v44, %v13061_v23  ;;  %v5178_v42 = vand.u32 2147483648, %v12966_v6  ;;  %vm5189_vm6 = vcmp.eq.f32.partialorder %v13098_v53, inf  ;;  %vm5217_vm12 = vcmp.eq.f32.partialorder %v12647_v21, inf }
 0x593   : > { %v5277_v49 = vadd.f32 1e-08, %v5151_v11  ;;  %v5358_v1 = vmul.f32 0.33333334, %v7884_v38  ;;  %v5155_v56 = vsel %vm5154_vm15, %v12961_v37, %v5153_v26  ;;  %v5202_v12 = vmul.f32 %v7878_v50, %v13084_v25 }
 0x594   : > { %v7886_v18 = vpop.eup %7885  ;;  %v5158_v51 = vsel %vm5156_vm4, %v5157_v29, %v5155_v56  ;;  %v5169_v22 = vsel %vm5168_vm1, %v13061_v23, %v5167_v63  ;;  %7893 = vrcp.f32 %v5279_v8  ;;  %v5282_v4 = vadd.f32 1e-08, %v5186_v62  ;;  %v13205_v56 = vpop.permute.xlu1 %5713 }
 0x595   : > { %v7888_v3 = vpop.eup %7887  ;;  %7895 = vrcp.f32 %v5277_v49  ;;  %5873 = vperm.xlu0 %7529, %v5358_v1   ;;  %v5278_v7 = vadd.f32 1e-08, %v5158_v51  ;;  %v5172_v28 = vsel %vm5170_vm8, %v5171_v59, %v5169_v22  ;;  %v5174_v39 = vmul.f32 %v7886_v18, %v12966_v6 }
 0x596   : > { %v5280_v41 = vadd.f32 1e-08, %v5172_v28  ;;  %v5188_v0 = vmul.f32 %v7888_v3, %v13098_v53  ;;  %vm5191_vm7 = vcmp.eq.f32.partialorder %v13098_v53, 0.0  ;;  %vm5203_vm13 = vcmp.eq.f32.partialorder %v13084_v25, inf }
 0x597   : > { %v7890_v37 = vpop.eup %7889  ;;  %7897 = vrcp.f32 %v5278_v7  ;;  %v5176_v48 = vsel %vm5175_vm10, %v12966_v6, %v5174_v39  ;;  %v5192_v24 = vand.u32 2147483648, %v13098_v53  ;;  %v5204_v23 = vsel %vm5203_vm13, %v13084_v25, %v5202_v12 }
 0x598   : > { %7899 = vrcp.f32 %v5280_v41  ;;  %v5179_v13 = vsel %vm5177_vm11, %v5178_v42, %v5176_v48  ;;  %v5190_v19 = vsel %vm5189_vm6, %v13098_v53, %v5188_v0  ;;  %v5206_v32 = vand.u32 2147483648, %v13084_v25 }
 0x599   : > { %v5281_v60 = vadd.f32 1e-08, %v5179_v13  ;;  %v5193_v27 = vsel %vm5191_vm7, %v5192_v24, %v5190_v19  ;;  %7901 = vrcp.f32 %v5282_v4  ;;  %vm5205_vm14 = vcmp.eq.f32.partialorder %v13084_v25, 0.0  ;;  %v6614_v24 = vld [vmem:[%s14812_s15] sm:$0xff] }
 0x59a   : > { %v7892_v46 = vpop.eup %7891  ;;  %v5283_v10 = vadd.f32 1e-08, %v5193_v27  ;;  %v5207_v45 = vsel %vm5205_vm14, %v5206_v32, %v5204_v23  ;;  %7903 = vrsqrt.f32 %v13126_v2  ;;  %v5223_v31 = vmul.f32 %v7890_v37, %v13108_v61  ;;  %v6615_v23 = vld [vmem:[%s14812_s15 + $0x8] sm:$0xff] }
 0x59b   : > { %7905 = vrcp.f32 %v5281_v60  ;;  %v5284_v6 = vadd.f32 1e-08, %v12901_v43  ;;  %v5209_v58 = vmul.f32 %v7892_v46, %v13112_v9  ;;  %v5218_v53 = vsel %vm5217_vm12, %v12647_v21, %v13103_v55 }
 0x59c   : > { %vm5210_vm15 = vcmp.eq.f32.partialorder %v13112_v9, inf  ;;  %vm5212_vm4 = vcmp.eq.f32.partialorder %v13112_v9, 0.0  ;;  %v5213_v25 = vand.u32 2147483648, %v13112_v9  ;;  %vm5224_vm1 = vcmp.eq.f32.partialorder %v13108_v61, inf }
 0x59d   : > { %7907 = vrcp.f32 %v5283_v10  ;;  %v5211_v17 = vsel %vm5210_vm15, %v13112_v9, %v5209_v58  ;;  %v5285_v29 = vadd.f32 1e-08, %v5207_v45  ;;  %v5225_v43 = vsel %vm5224_vm1, %v13108_v61, %v5223_v31 }
 0x59e   : > { %v7894_v47 = vpop.eup %7893  ;;  %v5214_v30 = vsel %vm5212_vm4, %v5213_v25, %v5211_v17  ;;  %vm5219_vm5 = vcmp.eq.f32.partialorder %v12647_v21, 0.0  ;;  %v5227_v55 = vand.u32 2147483648, %v13108_v61  ;;  %vm5226_vm8 = vcmp.eq.f32.partialorder %v13108_v61, 0.0 }
 0x59f   : > { %v7896_v52 = vpop.eup %7895  ;;  %v5286_v20 = vadd.f32 1e-08, %v5214_v30  ;;  %v5221_v36 = vsel %vm5219_vm5, %v5220_v35, %v5218_v53  ;;  %v5237_v16 = vmul.f32 %v12737_v40, %v12652_v14  ;;  %7909 = vrcp.f32 %v5284_v6 }
 0x5a0   : > { %v5360_v9 = vmul.f32 0.33333334, %v7896_v52  ;;  %v5228_v50 = vsel %vm5226_vm8, %v5227_v55, %v5225_v43  ;;  %7911 = vrcp.f32 %v5285_v29  ;;  %vm5238_vm9 = vcmp.eq.f32.partialorder %v12652_v14, inf  ;;  %v5618_v55 = vld [vmem:[%s14808_s11] sm:$0x1] }
 0x5a1   : > { %v7898_v33 = vpop.eup %7897  ;;  %v5364_v5 = vmul.f32 0.33333334, %v7894_v47  ;;  %v5287_v34 = vadd.f32 1e-08, %v5221_v36  ;;  %7913 = vrcp.f32 %v5286_v20  ;;  %v5288_v21 = vadd.f32 1e-08, %v5228_v50 }
 0x5a2   : > { %v7900_v59 = vpop.eup %7899  ;;  %5878 = vperm.xlu1 %7530, %v5360_v9   ;;  %v5362_v15 = vmul.f32 0.33333334, %v7898_v33  ;;  %v5239_v35 = vsel %vm5238_vm9, %v12652_v14, %v5237_v16  ;;  %v5241_v44 = vand.u32 2147483648, %v12652_v14  ;;  %vm5240_vm10 = vcmp.eq.f32.partialorder %v12652_v14, 0.0  ;;  %v5619_v20 = vld [vmem:[%s14809_s12] sm:$0x1] }
 0x5a3   : > { %v7902_v8 = vpop.eup %7901  ;;  %v5366_v40 = vmul.f32 0.33333334, %v7900_v59  ;;  %7915 = vrcp.f32 %v5287_v34  ;;  %vm5231_vm0 = vcmp.eq.f32.partialorder %v13126_v2, inf  ;;  %v5234_v62 = vand.u32 2147483648, %v13126_v2  ;;  %v13248_v34 = vld [vmem:[%s14810_s13] ss:$0 sm:$0xff] }
 0x5a4   : > { %v7904_v61 = vpop.eup %7903  ;;  %5883 = vperm.xlu0 %7529, %v5362_v15   ;;  %v5242_v38 = vsel %vm5240_vm10, %v5241_v44, %v5239_v35  ;;  %vm5233_vm11 = vcmp.eq.f32.partialorder %v13126_v2, 0.0  ;;  %7917 = vrcp.f32 %v5288_v21  ;;  %v5370_v49 = vmul.f32 0.33333334, %v7902_v8  ;;  %v13239_v15 = vld [vmem:[%s14811_s14] sm:$0x1]  ;;  %v15672_v8 = vld [vmem:[#allocation34_spill] sm:$0xff] }
 0x5a5   : > { %v7906_v57 = vpop.eup %7905  ;;  %v5230_v26 = vmul.f32 %v7904_v61, %v13126_v2  ;;  %v5290_v12 = vadd.f32 1e-08, %v5242_v38  ;;  %v7515_v13 = vpack.c.bf16 %v6615_v23, %v6614_v24  ;;  %v13252_v21 = vrot.slane %v13239_v15, %v15672_v8  ;;  %v15673_v35 = vld [vmem:[#allocation24_spill] sm:$0xff]  ;;  %v15675_v44 = vld [vmem:[#allocation22_spill] sm:$0xff] }
 0x5a6   : > { %5888 = vperm.xlu1 %7530, %v5364_v5   ;;  %v5368_v42 = vmul.f32 0.33333334, %v7906_v57  ;;  %v13241_v5 = vpop.permute.xlu0 %5708  ;;  %v13256_v61 = vmul.f32 %v13248_v34, %v15673_v35  ;;  %v13264_v57 = vmul.f32 %v13248_v34, %v15675_v44  ;;  %v15687_v23 = vld [vmem:[#allocation36_spill] sm:$0xff] }
 0x5a7   : > { %v7908_v11 = vpop.eup %7907  ;;  %v5232_v63 = vsel %vm5231_vm0, %v13126_v2, %v5230_v26  ;;  %7516 = vmatprep.subr.bf16.mxu1 %v7515_v13  ;;  %v13268_v26 = vmul.f32 %v13252_v21, %v15675_v44 }
 0x5a8   : > { %5893 = vperm.xlu0 %7529, %v5366_v40   ;;  %v5235_v1 = vsel %vm5233_vm11, %v5234_v62, %v5232_v63  ;;  %v5372_v51 = vmul.f32 0.33333334, %v7908_v11  ;;  %7518 = vmatpush3.bf16.msra.mxu1 %v7515_v13  ;;  %v13260_v40 = vmul.f32 %v13252_v21, %v15673_v35  ;;  %v15676_v62 = vld [vmem:[#allocation44_spill] sm:$0xff]  ;;  %v13324_v13 = vmul.f32 %v13248_v34, %v15687_v23 }
 0x5a9   : > { %v5289_v14 = vadd.f32 1e-08, %v5235_v1  ;;  %v7910_v18 = vpop.eup %7909  ;;  %v5628_v3 = vpop.xlane.xlu1 %5627  ;;  %v13272_v38 = vmul.f32 %v13248_v34, %v15676_v62  ;;  %v13276_v63 = vmul.f32 %v13252_v21, %v15676_v62 }
 0x5aa   : > { %5898 = vperm.xlu1 %7530, %v5368_v42   ;;  %v7912_v22 = vpop.eup %7911  ;;  %v5374_v2 = vmul.f32 0.33333334, %v7910_v18  ;;  %v5629_v28 = vmul.f32 0.0625, %v5628_v3  ;;  %15674 = vst [vmem:[#allocation85_spill] sm:$0xff] %v13260_v40  ;;  %v13278_v42 = vpop.permute.xlu0 %5753  ;;  %v15681_v3 = vld [vmem:[#allocation8_spill] sm:$0xff] }
 0x5ab   : > { %7919 = vrcp.f32 %v5289_v14  ;;  %v7914_v4 = vpop.eup %7913  ;;  %v5376_v7 = vmul.f32 0.33333334, %v7912_v22  ;;  %15677 = vst [vmem:[#allocation12_spill] sm:$0xff] %v13276_v63  ;;  %v15728_v63 = vld [vmem:[#allocation110_spill] sm:$0xff] }
 0x5ac   : > { %5903 = vperm.xlu0 %7529, %v5370_v49   ;;  %7921 = vrcp.f32 %v5290_v12  ;;  %v5378_v41 = vmul.f32 0.33333334, %v7914_v4  ;;  %v5630_v0 = vadd.f32 1e-06, %v5629_v28  ;;  %v15678_v49 = vld [vmem:[#allocation25_spill] sm:$0xff]  ;;  %v15679_v12 = vld [vmem:[#allocation28_spill] sm:$0xff] }
 0x5ad   : > { %v7916_v39 = vpop.eup %7915  ;;  %v13207_v48 = vpop.permute.xlu1 %5718  ;;  %v13282_v1 = vmul.f32 %v13248_v34, %v15678_v49  ;;  %v13286_v14 = vmul.f32 %v13252_v21, %v15678_v49  ;;  %v13290_v18 = vmul.f32 %v13248_v34, %v15679_v12  ;;  %v13296_v4 = vmul.f32 %v13252_v21, %v15679_v12  ;;  %v15683_v28 = vld [vmem:[#allocation37_spill] sm:$0xff] }
 0x5ae   : > { %5908 = vperm.xlu1 %7530, %v5372_v51   ;;  %v7918_v37 = vpop.eup %7917  ;;  %7923 = vrsqrt.f32 %v5630_v0  ;;  %v5380_v19 = vmul.f32 0.33333334, %v7916_v39  ;;  %vm5633_vm6 = vcmp.eq.f32.partialorder %v5630_v0, inf  ;;  %v5636_v25 = vand.u32 2147483648, %v5630_v0 }
 0x5af   : > { %v5382_v32 = vmul.f32 0.33333334, %v7918_v37  ;;  %vm5635_vm12 = vcmp.eq.f32.partialorder %v5630_v0, 0.0  ;;  %15680 = vst [vmem:[#allocation19_spill] sm:$0xff] %v13296_v4  ;;  %v13308_v39 = vmul.f32 %v13248_v34, %v15683_v28  ;;  %v15731_v4 = vld [vmem:[#allocation6_spill] sm:$0xff] }
 0x5b0   : > { %5913 = vperm.xlu0 %7529, %v5374_v2   ;;  %v13300_v2 = vmul.f32 %v13248_v34, %v15681_v3 }
 0x5b1   : > { %v13215_v27 = vpop.permute.xlu1 %5723 }
 0x5b2   : > { %5918 = vperm.xlu1 %7530, %v5376_v7   ;;  %v13304_v7 = vmul.f32 %v13252_v21, %v15681_v3  ;;  %v15746_v3 = vld [vmem:[#allocation4_spill] sm:$0xff] }
 0x5b4   : > { %5923 = vperm.xlu0 %7529, %v5378_v41   ;;  %15682 = vst [vmem:[#allocation77_spill] sm:$0xff] %v13304_v7  ;;  %v13312_v41 = vmul.f32 %v13252_v21, %v15683_v28  ;;  %v15722_v7 = vld [vmem:[#allocation46_spill] sm:$0xff] }
 0x5b5   : > { %v7920_v60 = vpop.eup %7919  ;;  %v13217_v45 = vpop.permute.xlu1 %5728 }
 0x5b6   : > { %5928 = vperm.xlu1 %7530, %v5380_v19   ;;  %v5384_v46 = vmul.f32 0.33333334, %v7920_v60  ;;  %v7922_v10 = vpop.eup %7921  ;;  %15684 = vst [vmem:[#allocation76_spill] sm:$0xff] %v13312_v41  ;;  %v13328_v19 = vmul.f32 %v13252_v21, %v15687_v23  ;;  %v15715_v41 = vld [vmem:[#allocation39_spill] sm:$0xff] }
 0x5b7   : > { %v5386_v31 = vmul.f32 0.33333334, %v7922_v10  ;;  %v15717_v23 = vld [vmem:[#allocation35_spill] sm:$0xff] }
 0x5b8   : > { %5933 = vperm.xlu0 %7529, %v5382_v32   ;;  %v7924_v6 = vpop.eup %7923  ;;  %15688 = vst [vmem:[#allocation13_spill] sm:$0xff] %v13328_v19  ;;  %v15689_v32 = vld [vmem:[#allocation41_spill] sm:$0xff] }
 0x5b9   : > { %v5632_v58 = vmul.f32 %v7924_v6, %v5630_v0  ;;  %v13219_v53 = vpop.permute.xlu1 %5733  ;;  %v13332_v60 = vmul.f32 %v13248_v34, %v15689_v32 }
 0x5ba   : > { %5938 = vperm.xlu1 %7530, %v5384_v46   ;;  %v13336_v46 = vmul.f32 %v13252_v21, %v15689_v32  ;;  %v15713_v32 = vld [vmem:[#allocation74_spill] sm:$0xff] }
 0x5bb   : > { %v5634_v17 = vsel %vm5633_vm6, %v5630_v0, %v5632_v58  ;;  %v15685_v0 = vld [vmem:[#allocation42_spill] sm:$0xff] }
 0x5bc   : > { %5943 = vperm.xlu0 %7529, %v5386_v31   ;;  %v5637_v29 = vsel %vm5635_vm12, %v5636_v25, %v5634_v17  ;;  %v13316_v37 = vmul.f32 %v13248_v34, %v15685_v0  ;;  %v13320_v24 = vmul.f32 %v13252_v21, %v15685_v0  ;;  %15690 = vst [vmem:[#allocation48_spill] sm:$0xff] %v13336_v46  ;;  %v15691_v31 = vld [vmem:[#allocation38_spill] sm:$0xff]  ;;  %v15693_v25 = vld [vmem:[#allocation47_spill] sm:$0xff] }
 0x5bd   : > { %7925 = vrcp.f32 %v5637_v29  ;;  %v13221_v43 = vpop.permute.xlu1 %5738  ;;  %v13342_v6 = vmul.f32 %v13248_v34, %v15691_v31  ;;  %v13346_v58 = vmul.f32 %v13252_v21, %v15691_v31  ;;  %v13350_v17 = vmul.f32 %v13248_v34, %v15693_v25  ;;  %v15711_v31 = vld [vmem:[#allocation11_spill] sm:$0xff] }
 0x5be   : > { %15686 = vst [vmem:[#allocation88_spill] sm:$0xff] %v13320_v24  ;;  %v13354_v29 = vmul.f32 %v13252_v21, %v15693_v25  ;;  %v15720_v0 = vld [vmem:[#allocation43_spill] sm:$0xff] }
 0x5bf   : > { %15692 = vst [vmem:[#allocation16_spill] sm:$0xff] %v13346_v58 }
 0x5c0   : > { %15694 = vst [vmem:[#allocation58_spill] sm:$0xff] %v13354_v29 }
 0x5c1   : > { %v13223_v47 = vpop.permute.xlu1 %5743 }
 0x5c3   : > { %v13338_v10 = vpop.permute.xlu0 %5763 }
 0x5c5   : > { %v13232_v16 = vpop.permute.xlu1 %5748 }
 0x5c7   : > { %v7926_v30 = vpop.eup %7925 }
 0x5c8   : > { %v5639_v52 = vmul.f32 %v7926_v30, %v12573_v54  ;;  %v15695_v30 = vld [vmem:[#allocation53_spill] sm:$0xff] }
 0x5c9   : > { %v13234_v59 = vpop.permute.xlu1 %5758  ;;  %v13402_v25 = vpop.permute.xlu0 %5773 }
 0x5ca   : > { %v5640_v36 = vmul.f32 %v5639_v52, %v5618_v55  ;;  %v13358_v55 = vmul.f32 %v13248_v34, %v15695_v30  ;;  %v13362_v52 = vmul.f32 %v13252_v21, %v15695_v30 }
 0x5cc   : > { %v5641_v9 = vadd.f32 %v5640_v36, %v5619_v20  ;;  %15696 = vst [vmem:[#allocation21_spill] sm:$0xff] %v13362_v52  ;;  %v15697_v20 = vld [vmem:[#allocation50_spill] sm:$0xff] }
 0x5cd   : > { %v13243_v54 = vpop.permute.xlu1 %5768  ;;  %v13366_v36 = vmul.f32 %v13248_v34, %v15697_v20 }
 0x5ce   : > { %v5642_v50 = vsub.f32 0.0, %v5641_v9  ;;  %v13370_v9 = vmul.f32 %v13252_v21, %v15697_v20  ;;  %v15703_v20 = vld [vmem:[#allocation65_spill] sm:$0xff] }
 0x5cf   : > { %v13396_v58 = vmul.f32 %v13252_v21, %v15703_v20 }
 0x5d0   : > { %v5643_v33 = vmul.f32 1.442695, %v5642_v50  ;;  %15698 = vst [vmem:[#allocation17_spill] sm:$0xff] %v13370_v9  ;;  %v15699_v50 = vld [vmem:[#allocation59_spill] sm:$0xff]  ;;  %v13392_v9 = vmul.f32 %v13248_v34, %v15703_v20  ;;  %v15709_v20 = vld [vmem:[#allocation10_spill] sm:$0xff] }
 0x5d1   : > { %v13292_v51 = vpop.permute.xlu1 %5778  ;;  %15704 = vst [vmem:[#allocation114_spill] sm:$0xff] %v13396_v58  ;;  %v13418_v58 = vmul.f32 %v13248_v34, %v15709_v20  ;;  %v13422_v24 = vmul.f32 %v13252_v21, %v15709_v20  ;;  %v13442_v20 = vmul.f32 %v13248_v34, %v15715_v41 }
 0x5d2   : > { %7927 = vpow2.f32 %v5643_v33  ;;  %v13374_v33 = vmul.f32 %v13248_v34, %v15699_v50 }
 0x5d3   : > { %15710 = vst [vmem:[#allocation82_spill] sm:$0xff] %v13422_v24  ;;  %v13446_v24 = vmul.f32 %v13252_v21, %v15715_v41  ;;  %v13466_v41 = vmul.f32 %v13248_v34, %v15722_v7 }
 0x5d5   : > { %15716 = vst [vmem:[#allocation97_spill] sm:$0xff] %v13446_v24  ;;  %15723 = vst [vmem:[#allocation26_spill] sm:$0xff] %v13466_v41  ;;  %v5650_v24 = vsub.f32 0.0, %v13239_v15  ;;  %v13485_v41 = vmul.f32 %v13248_v34, %v15728_v63  ;;  %v13489_v15 = vmul.f32 %v13252_v21, %v15728_v63  ;;  %v15737_v63 = vld [vmem:[#allocation55_spill] sm:$0xff] }
 0x5d7   : > { %v13384_v52 = vpop.permute.xlu1 %5788  ;;  %15729 = vst [vmem:[#allocation68_spill] sm:$0xff] %v13485_v41  ;;  %15730 = vst [vmem:[#allocation27_spill] sm:$0xff] %v13489_v15  ;;  %v13511_v15 = vmul.f32 %v13248_v34, %v15737_v63 }
 0x5d9   : > { %15738 = vst [vmem:[#allocation79_spill] sm:$0xff] %v13511_v15 }
 0x5db   : > { %v13469_v28 = vpop.permute.xlu1 %5798 }
 0x5dc   : > { %v7928_v11 = vpop.eup %7927 }
 0x5dd   : > { %v5645_v22 = vadd.f32 1.0, %v7928_v11  ;;  %v13378_v11 = vmul.f32 %v13252_v21, %v15699_v50  ;;  %v15705_v50 = vld [vmem:[#allocation62_spill] sm:$0xff] }
 0x5de   : > { %v13406_v46 = vmul.f32 %v13252_v21, %v15705_v50 }
 0x5df   : > { %7929 = vrcp.f32 %v5645_v22  ;;  %15700 = vst [vmem:[#allocation20_spill] sm:$0xff] %v13378_v11  ;;  %v15701_v22 = vld [vmem:[#allocation56_spill] sm:$0xff]  ;;  %v13400_v11 = vmul.f32 %v13248_v34, %v15705_v50  ;;  %v13426_v50 = vmul.f32 %v13248_v34, %v15711_v31 }
 0x5e0   : > { %v13382_v29 = vmul.f32 %v13248_v34, %v15701_v22  ;;  %v13388_v30 = vmul.f32 %v13252_v21, %v15701_v22  ;;  %15706 = vst [vmem:[#allocation63_spill] sm:$0xff] %v13406_v46  ;;  %v15707_v22 = vld [vmem:[#allocation69_spill] sm:$0xff]  ;;  %v13430_v46 = vmul.f32 %v13252_v21, %v15711_v31  ;;  %v13450_v31 = vmul.f32 %v13248_v34, %v15717_v23 }
 0x5e1   : > { %v13414_v19 = vmul.f32 %v13252_v21, %v15707_v22 }
 0x5e2   : > { %15702 = vst [vmem:[#allocation60_spill] sm:$0xff] %v13388_v30  ;;  %v13410_v30 = vmul.f32 %v13248_v34, %v15707_v22  ;;  %15712 = vst [vmem:[#allocation93_spill] sm:$0xff] %v13430_v46  ;;  %v13434_v22 = vmul.f32 %v13248_v34, %v15713_v32  ;;  %v13454_v46 = vmul.f32 %v13252_v21, %v15717_v23 }
 0x5e3   : > { %15708 = vst [vmem:[#allocation67_spill] sm:$0xff] %v13414_v19  ;;  %v13438_v19 = vmul.f32 %v13252_v21, %v15713_v32  ;;  %15718 = vst [vmem:[#allocation75_spill] sm:$0xff] %v13450_v31  ;;  %v13458_v32 = vmul.f32 %v13248_v34, %v15720_v0  ;;  %v13473_v23 = vmul.f32 %v13252_v21, %v15722_v7 }
 0x5e4   : > { %15719 = vst [vmem:[#allocation23_spill] sm:$0xff] %v13454_v46  ;;  %v15725_v46 = vld [vmem:[#allocation109_spill] sm:$0xff]  ;;  %v13497_v7 = vmul.f32 %v13252_v21, %v15731_v4 }
 0x5e5   : > { %15714 = vst [vmem:[#allocation84_spill] sm:$0xff] %v13438_v19  ;;  %v13462_v19 = vmul.f32 %v13252_v21, %v15720_v0  ;;  %15724 = vst [vmem:[#allocation72_spill] sm:$0xff] %v13473_v23  ;;  %v13477_v31 = vmul.f32 %v13248_v34, %v15725_v46  ;;  %v13481_v0 = vmul.f32 %v13252_v21, %v15725_v46 }
 0x5e6   : > { %v13493_v23 = vmul.f32 %v13248_v34, %v15731_v4  ;;  %15733 = vst [vmem:[#allocation30_spill] sm:$0xff] %v13497_v7  ;;  %v15740_v4 = vld [vmem:[#allocation14_spill] sm:$0xff] }
 0x5e7   : > { %15721 = vst [vmem:[#allocation95_spill] sm:$0xff] %v13462_v19  ;;  %15726 = vst [vmem:[#allocation91_spill] sm:$0xff] %v13477_v31  ;;  %v13499_v31 = vpop.permute.xlu0 %5783  ;;  %v13519_v7 = vmul.f32 %v13248_v34, %v15740_v4  ;;  %v13523_v40 = vmul.f32 %v13252_v21, %v15740_v4 }
 0x5e8   : > { %15727 = vst [vmem:[#allocation101_spill] sm:$0xff] %v13481_v0  ;;  %15732 = vst [vmem:[#allocation73_spill] sm:$0xff] %v13493_v23  ;;  %v15734_v0 = vld [vmem:[#allocation15_spill] sm:$0xff]  ;;  %v13515_v23 = vmul.f32 %v13252_v21, %v15737_v63  ;;  %v13539_v63 = vmul.f32 %v13252_v21, %v15746_v3 }
 0x5e9   : > { %v7930_v19 = vpop.eup %7929  ;;  %v13503_v46 = vmul.f32 %v13248_v34, %v15734_v0  ;;  %v13507_v41 = vmul.f32 %v13252_v21, %v15734_v0  ;;  %15741 = vst [vmem:[#allocation83_spill] sm:$0xff] %v13519_v7  ;;  %15742 = vst [vmem:[#allocation86_spill] sm:$0xff] %v13523_v40  ;;  %v15749_v7 = vld [vmem:[#allocation112_spill] sm:$0xff] }
 0x5ea   : > { %15739 = vst [vmem:[#allocation92_spill] sm:$0xff] %v13515_v23  ;;  %v5651_v15 = vadd.f32 %v7930_v19, %v5650_v24  ;;  %v13535_v23 = vmul.f32 %v13248_v34, %v15746_v3  ;;  %15748 = vst [vmem:[#allocation31_spill] sm:$0xff] %v13539_v63  ;;  %v13543_v40 = vmul.f32 %v13248_v34, %v15749_v7  ;;  %v15755_v19 = vld [vmem:[#allocation64_spill] sm:$0xff] }
 0x5eb   : > { %15735 = vst [vmem:[#allocation29_spill] sm:$0xff] %v13503_v46  ;;  %15736 = vst [vmem:[#allocation78_spill] sm:$0xff] %v13507_v41  ;;  %v15743_v46 = vld [vmem:[#allocation51_spill] sm:$0xff]  ;;  %v13547_v4 = vmul.f32 %v13252_v21, %v15749_v7  ;;  %v13559_v3 = vmul.f32 %v13248_v34, %v15755_v19  ;;  %v5794_v63 = vpop.permute.xlu0 %5793 }
 0x5ec   : > { %v13527_v0 = vmul.f32 %v13248_v34, %v15743_v46  ;;  %v13531_v41 = vmul.f32 %v13252_v21, %v15743_v46  ;;  %15747 = vst [vmem:[#allocation33_spill] sm:$0xff] %v13535_v23  ;;  %15750 = vst [vmem:[#allocation96_spill] sm:$0xff] %v13543_v40  ;;  %v5809_v46 = vpop.permute.xlu1 %5808  ;;  %v13563_v40 = vmul.f32 %v13252_v21, %v15755_v19  ;;  %v15758_v7 = vld [vmem:[#allocation3_spill] sm:$0xff]  ;;  %v15764_v23 = vld [vmem:[#allocation5_spill] sm:$0xff] }
 0x5ed   : > { %15751 = vst [vmem:[#allocation100_spill] sm:$0xff] %v13547_v4  ;;  %15756 = vst [vmem:[#allocation98_spill] sm:$0xff] %v13559_v3  ;;  %v13567_v4 = vmul.f32 %v13248_v34, %v15758_v7  ;;  %v13583_v19 = vmul.f32 %v13248_v34, %v15764_v23 }
 0x5ee   : > { %15744 = vst [vmem:[#allocation81_spill] sm:$0xff] %v13527_v0  ;;  %15745 = vst [vmem:[#allocation89_spill] sm:$0xff] %v13531_v41  ;;  %v15752_v0 = vld [vmem:[#allocation61_spill] sm:$0xff] }
 0x5ef   : > { %v13551_v41 = vmul.f32 %v13248_v34, %v15752_v0  ;;  %v13555_v24 = vmul.f32 %v13252_v21, %v15752_v0  ;;  %15757 = vst [vmem:[#allocation90_spill] sm:$0xff] %v13563_v40  ;;  %15759 = vst [vmem:[#allocation99_spill] sm:$0xff] %v13567_v4  ;;  %v15761_v0 = vld [vmem:[#allocation66_spill] sm:$0xff]  ;;  %v13587_v40 = vmul.f32 %v13252_v21, %v15764_v23 }
 0x5f0   : > { %v13579_v3 = vmul.f32 %v13252_v21, %v15761_v0  ;;  %15765 = vst [vmem:[#allocation104_spill] sm:$0xff] %v13583_v19  ;;  %v15767_v4 = vld [vmem:[#allocation18_spill] sm:$0xff] }
 0x5f1   : > { %15753 = vst [vmem:[#allocation87_spill] sm:$0xff] %v13551_v41  ;;  %15754 = vst [vmem:[#allocation32_spill] sm:$0xff] %v13555_v24  ;;  %v13571_v41 = vmul.f32 %v13252_v21, %v15758_v7  ;;  %v13575_v24 = vmul.f32 %v13248_v34, %v15761_v0  ;;  %v13591_v7 = vmul.f32 %v13248_v34, %v15767_v4 }
 0x5f2   : > { %15763 = vst [vmem:[#allocation102_spill] sm:$0xff] %v13579_v3  ;;  %15766 = vst [vmem:[#allocation105_spill] sm:$0xff] %v13587_v40  ;;  %v15770_v3 = vld [vmem:[#allocation71_spill] sm:$0xff] }
 0x5f3   : > { %15760 = vst [vmem:[#allocation103_spill] sm:$0xff] %v13571_v41  ;;  %15762 = vst [vmem:[#allocation107_spill] sm:$0xff] %v13575_v24  ;;  %v13594_v41 = vrot.slane %v5651_v15, %v15672_v8  ;;  %v13598_v24 = vmul.f32 %v13252_v21, %v15767_v4  ;;  %v13602_v0 = vmul.f32 %v13248_v34, %v15770_v3  ;;  %v15773_v40 = vld [vmem:[#allocation7_spill] sm:$0xff]  ;;  %v15776_v15 = vld [vmem:[#allocation113_spill] sm:$0xff] }
 0x5f4   : > { %15768 = vst [vmem:[#allocation108_spill] sm:$0xff] %v13591_v7  ;;  %v13606_v19 = vmul.f32 %v13252_v21, %v15770_v3  ;;  %v13610_v23 = vmul.f32 %v13248_v34, %v15773_v40  ;;  %v13614_v8 = vmul.f32 %v13252_v21, %v15773_v40  ;;  %v13618_v4 = vmul.f32 %v13248_v34, %v15776_v15 }
 0x5f5   : > { %15769 = vst [vmem:[#allocation111_spill] sm:$0xff] %v13598_v24  ;;  %15771 = vst [vmem:[#allocation45_spill] sm:$0xff] %v13602_v0  ;;  %v13622_v24 = vmul.f32 %v13252_v21, %v15776_v15  ;;  %v5948_v3 = vmul.f32 %v13207_v48, %v13282_v1  ;;  %v15779_v0 = vld [vmem:[#allocation70_spill] sm:$0xff] }
 0x5f6   : > { %15772 = vst [vmem:[#allocation49_spill] sm:$0xff] %v13606_v19  ;;  %15774 = vst [vmem:[#allocation57_spill] sm:$0xff] %v13610_v23  ;;  %v5804_v19 = vpop.permute.xlu0 %5803  ;;  %v13628_v7 = vmul.f32 %v13248_v34, %v15779_v0  ;;  %v13632_v40 = vmul.f32 %v13252_v21, %v15779_v0 }
 0x5f7   : > { %15775 = vst [vmem:[#allocation52_spill] sm:$0xff] %v13614_v8  ;;  %15777 = vst [vmem:[#allocation40_spill] sm:$0xff] %v13618_v4  ;;  %v15782_v8 = vld [vmem:[#allocation9_spill] sm:$0xff] }
 0x5f8   : > { %15778 = vst [vmem:[#allocation94_spill] sm:$0xff] %v13622_v24  ;;  %15780 = vst [vmem:[#allocation54_spill] sm:$0xff] %v13628_v7  ;;  %v13636_v23 = vmul.f32 %v13248_v34, %v15782_v8  ;;  %v13640_v15 = vmul.f32 %v13252_v21, %v15782_v8  ;;  %v15785_v24 = vld [vmem:[#allocation80_spill] sm:$0xff]  ;;  %v15788_v7 = vld [vmem:[#allocation106_spill] sm:$0xff]  ;;  %v5819_v8 = vpop.permute.xlu1 %5818 }
 0x5f9   : > { %15781 = vst [vmem:[#allocation34_spill] sm:$0xff] %v13632_v40  ;;  %v13644_v48 = vmul.f32 %v13248_v34, %v15785_v24  ;;  %v13648_v1 = vmul.f32 %v13252_v21, %v15785_v24  ;;  %v13652_v0 = vmul.f32 %v13248_v34, %v15788_v7  ;;  %v5947_v40 = vmul.f32 %v13205_v56, %v13256_v61 }
 0x5fa   : > { %15783 = vst [vmem:[#allocation24_spill] sm:$0xff] %v13636_v23  ;;  %15784 = vst [vmem:[#allocation22_spill] sm:$0xff] %v13640_v15  ;;  %v13657_v23 = vadd.f32 %v13594_v41, %v5948_v3  ;;  %v5949_v15 = vmul.f32 %v13215_v27, %v13290_v18  ;;  %v5955_v34 = vmul.f32 %v13278_v42, %v13272_v38 }
 0x5fb   : > { %15786 = vst [vmem:[#allocation44_spill] sm:$0xff] %v13644_v48  ;;  %15787 = vst [vmem:[#allocation25_spill] sm:$0xff] %v13648_v1  ;;  %v13663_v48 = vmul.f32 %v13252_v21, %v15788_v7  ;;  %v5946_v1 = vmul.f32 %v13241_v5, %v13264_v57  ;;  %v5950_v56 = vmul.f32 %v13217_v45, %v13300_v2  ;;  %v5814_v2 = vpop.permute.xlu0 %5813 }
 0x5fc   : > { %15789 = vst [vmem:[#allocation28_spill] sm:$0xff] %v13652_v0  ;;  %v5951_v61 = vmul.f32 %v13219_v53, %v13308_v39  ;;  %v13674_v3 = vadd.f32 %v13594_v41, %v5949_v15  ;;  %v5952_v27 = vmul.f32 %v13221_v43, %v13316_v37  ;;  %v5953_v21 = vmul.f32 %v13223_v47, %v13324_v13 }
 0x5fd   : > { %15790 = vst [vmem:[#allocation115_spill] sm:$0xff] %v13663_v48  ;;  %v5957_v5 = vmul.f32 %v13338_v10, %v13332_v60  ;;  %v13683_v57 = vadd.f32 %v13594_v41, %v5946_v1  ;;  %v5954_v45 = vmul.f32 %v13232_v16, %v13342_v6  ;;  %v5956_v53 = vmul.f32 %v13234_v59, %v13350_v17  ;;  %v5829_v10 = vpop.permute.xlu1 %5828 }
 0x5fe   : > { %v5959_v38 = vmul.f32 %v13402_v25, %v13358_v55  ;;  %v13692_v43 = vadd.f32 %v13594_v41, %v5947_v40  ;;  %v13695_v47 = vadd.f32 %v13594_v41, %v5955_v34  ;;  %v6152_v42 = vmin.f32 %v13657_v23, 0.0 }
 0x5ff   : > { %v5958_v18 = vmul.f32 %v13243_v54, %v13366_v36  ;;  %v13701_v16 = vadd.f32 %v13594_v41, %v5950_v56  ;;  %v5961_v59 = vmul.f32 %v13499_v31, %v13374_v33  ;;  %v13707_v39 = vmul.f32 %v13292_v51, %v13382_v29  ;;  %v5824_v48 = vpop.permute.xlu0 %5823 }
 0x600   : > { %v13710_v40 = vmul.f32 %v5794_v63, %v13392_v9  ;;  %v6344_v37 = vmul.f32 %v13657_v23, %v15678_v49  ;;  %v6153_v13 = vmin.f32 %v13674_v3, 0.0  ;;  %v13717_v54 = vmul.f32 %v13384_v52, %v13400_v11 }
 0x601   : > { %v13721_v60 = vmul.f32 %v13469_v28, %v13410_v30  ;;  %v6150_v51 = vmin.f32 %v13683_v57, 0.0  ;;  %v13725_v31 = vmul.f32 %v5804_v19, %v13418_v58  ;;  %v13728_v63 = vmul.f32 %v5809_v46, %v13426_v50  ;;  %v15791_v19 = vld [vmem:[#allocation8_spill] sm:$0xff] }
 0x602   : > { %v13731_v49 = vmul.f32 %v5814_v2, %v13434_v22  ;;  %v6202_v6 = vmul.f32 1.442695, %v6152_v42  ;;  %v6151_v25 = vmin.f32 %v13692_v43, 0.0  ;;  %v6159_v17 = vmin.f32 %v13695_v47, 0.0 }
 0x603   : > { %v6342_v28 = vmul.f32 %v13683_v57, %v15675_v44  ;;  %v6154_v29 = vmin.f32 %v13701_v16, 0.0  ;;  %v13739_v30 = vadd.f32 %v13594_v41, %v5951_v61  ;;  %v13742_v58 = vmul.f32 %v5819_v8, %v13442_v20  ;;  %v15794_v61 = vld [vmem:[#allocation19_spill] sm:$0xff] }
 0x604   : > { %v13745_v46 = vmul.f32 %v5829_v10, %v13458_v32  ;;  %v13748_v55 = vadd.f32 %v6344_v37, %v13286_v14  ;;  %v6343_v52 = vmul.f32 %v13692_v43, %v15673_v35  ;;  %v6204_v36 = vmul.f32 1.442695, %v6153_v13  ;;  %v15797_v37 = vld [vmem:[#allocation37_spill] sm:$0xff] }
 0x605   : > { %v13753_v44 = vadd.f32 %v13594_v41, %v5952_v27  ;;  %v6351_v9 = vmul.f32 %v13695_v47, %v15676_v62  ;;  %v6345_v20 = vmul.f32 %v13674_v3, %v15679_v12  ;;  %v6198_v50 = vmul.f32 1.442695, %v6150_v51  ;;  %v15793_v12 = vld [vmem:[#allocation85_spill] sm:$0xff] }
 0x606   : > { %v13760_v32 = vadd.f32 %v13594_v41, %v5953_v21  ;;  %7931 = vpow2.f32 %v6202_v6  ;;  %v6200_v33 = vmul.f32 1.442695, %v6151_v25  ;;  %v6216_v11 = vmul.f32 1.442695, %v6159_v17 }
 0x607   : > { %v13763_v22 = vadd.f32 %v6342_v28, %v13268_v26  ;;  %v6206_v35 = vmul.f32 1.442695, %v6154_v29  ;;  %v6346_v8 = vmul.f32 %v13701_v16, %v15791_v19  ;;  %v6155_v15 = vmin.f32 %v13739_v30, 0.0  ;;  %v15805_v19 = vld [vmem:[#allocation41_spill] sm:$0xff] }
 0x608   : > { %v13769_v62 = vadd.f32 %v13594_v41, %v5957_v5  ;;  %7933 = vpow2.f32 %v6204_v36  ;;  %v13772_v1 = vadd.f32 %v6343_v52, %v15793_v12  ;;  %v6156_v34 = vmin.f32 %v13753_v44, 0.0  ;;  %v15795_v5 = vld [vmem:[#allocation12_spill] sm:$0xff] }
 0x609   : > { %v13776_v56 = vadd.f32 %v13594_v41, %v5954_v45  ;;  %v13779_v27 = vadd.f32 %v6345_v20, %v15794_v61  ;;  %7935 = vpow2.f32 %v6198_v50  ;;  %v6157_v21 = vmin.f32 %v13760_v32, 0.0  ;;  %v15799_v45 = vld [vmem:[#allocation77_spill] sm:$0xff] }
 0x60a   : > { %15792 = vst [vmem:[#allocation8_spill] sm:$0xff] %v13769_v62  ;;  %v13783_v42 = vadd.f32 %v13594_v41, %v5956_v53  ;;  %v13786_v2 = vadd.f32 %v6351_v9, %v15795_v5  ;;  %7937 = vpow2.f32 %v6200_v33  ;;  %v6347_v13 = vmul.f32 %v13739_v30, %v15797_v37  ;;  %v15800_v53 = vld [vmem:[#allocation42_spill] sm:$0xff]  ;;  %v15802_v9 = vld [vmem:[#allocation36_spill] sm:$0xff] }
 0x60b   : > { %v13791_v10 = vadd.f32 %v13594_v41, %v5959_v38  ;;  %7939 = vpow2.f32 %v6206_v35  ;;  %v13794_v51 = vadd.f32 %v6346_v8, %v15799_v45  ;;  %v6208_v6 = vmul.f32 1.442695, %v6155_v15  ;;  %v15804_v33 = vld [vmem:[#allocation76_spill] sm:$0xff] }
 0x60c   : > { %15796 = vst [vmem:[#allocation85_spill] sm:$0xff] %v13786_v2  ;;  %v6161_v25 = vmin.f32 %v13769_v62, 0.0  ;;  %v6210_v17 = vmul.f32 1.442695, %v6156_v34  ;;  %v6348_v28 = vmul.f32 %v13753_v44, %v15800_v53  ;;  %v6158_v29 = vmin.f32 %v13776_v56, 0.0  ;;  %v15806_v34 = vld [vmem:[#allocation38_spill] sm:$0xff] }
 0x60d   : > { %15798 = vst [vmem:[#allocation19_spill] sm:$0xff] %v13791_v10  ;;  %v13801_v52 = vadd.f32 %v13594_v41, %v5958_v18  ;;  %v6212_v36 = vmul.f32 1.442695, %v6157_v21  ;;  %v6349_v38 = vmul.f32 %v13760_v32, %v15802_v9  ;;  %v6160_v20 = vmin.f32 %v13783_v42, 0.0 }
 0x60e   : > { %v13807_v50 = vadd.f32 %v13594_v41, %v5961_v59  ;;  %7941 = vpow2.f32 %v6216_v11  ;;  %v13810_v35 = vadd.f32 %v6347_v13, %v15804_v33  ;;  %v6353_v8 = vmul.f32 %v13769_v62, %v15805_v19  ;;  %v15808_v11 = vld [vmem:[#allocation88_spill] sm:$0xff]  ;;  %v15810_v19 = vld [vmem:[#allocation13_spill] sm:$0xff] }
 0x60f   : > { %15801 = vst [vmem:[#allocation37_spill] sm:$0xff] %v13801_v52  ;;  %v6163_v15 = vmin.f32 %v13791_v10, 0.0  ;;  %7943 = vpow2.f32 %v6208_v6  ;;  %v6220_v18 = vmul.f32 1.442695, %v6161_v25  ;;  %v6350_v21 = vmul.f32 %v13776_v56, %v15806_v34 }
 0x610   : > { %15803 = vst [vmem:[#allocation77_spill] sm:$0xff] %v13807_v50  ;;  %v13819_v37 = vadd.f32 %v13594_v41, %v13707_v39  ;;  %v13821_v59 = vpop.eup %7931  ;;  %7945 = vpow2.f32 %v6210_v17  ;;  %v13824_v13 = vadd.f32 %v6348_v28, %v15808_v11  ;;  %v6214_v53 = vmul.f32 1.442695, %v6158_v29  ;;  %v15812_v39 = vld [vmem:[#allocation48_spill] sm:$0xff]  ;;  %v15814_v17 = vld [vmem:[#allocation47_spill] sm:$0xff] }
 0x611   : > { %v6162_v9 = vmin.f32 %v13801_v52, 0.0  ;;  %7947 = vpow2.f32 %v6212_v36  ;;  %v13828_v6 = vadd.f32 %v6349_v38, %v15810_v19  ;;  %v6218_v25 = vmul.f32 1.442695, %v6160_v20  ;;  %v15816_v38 = vld [vmem:[#allocation16_spill] sm:$0xff] }
 0x612   : > { %15807 = vst [vmem:[#allocation42_spill] sm:$0xff] %v13819_v37  ;;  %15809 = vst [vmem:[#allocation36_spill] sm:$0xff] %v13824_v13  ;;  %v6165_v34 = vmin.f32 %v13807_v50, 0.0  ;;  %v13831_v7 = vpop.eup %7933  ;;  %v13834_v0 = vadd.f32 %v6353_v8, %v15812_v39  ;;  %v6352_v28 = vmul.f32 %v13783_v42, %v15814_v17  ;;  %v6224_v24 = vmul.f32 1.442695, %v6163_v15  ;;  %v15819_v15 = vld [vmem:[#allocation53_spill] sm:$0xff] }
 0x613   : > { %15811 = vst [vmem:[#allocation76_spill] sm:$0xff] %v13828_v6  ;;  %v13840_v29 = vadd.f32 %v13594_v41, %v13710_v40  ;;  %v13842_v36 = vpop.eup %7935  ;;  %7949 = vpow2.f32 %v6220_v18  ;;  %v13845_v20 = vadd.f32 %v6350_v21, %v15816_v38  ;;  %v6164_v4 = vmin.f32 %v13819_v37, 0.0  ;;  %v15821_v21 = vld [vmem:[#allocation50_spill] sm:$0xff]  ;;  %v5834_v38 = vpop.permute.xlu0 %5833 }
 0x614   : > { %15813 = vst [vmem:[#allocation41_spill] sm:$0xff] %v13834_v0  ;;  %v13850_v8 = vadd.f32 %v13594_v41, %v13717_v54  ;;  %v13852_v0 = vpop.eup %7937  ;;  %7951 = vpow2.f32 %v6214_v53  ;;  %v6355_v17 = vmul.f32 %v13791_v10, %v15819_v15  ;;  %v6222_v40 = vmul.f32 1.442695, %v6162_v9  ;;  %v15822_v54 = vld [vmem:[#allocation59_spill] sm:$0xff]  ;;  %v15823_v53 = vld [vmem:[#allocation58_spill] sm:$0xff]  ;;  %v15825_v9 = vld [vmem:[#allocation56_spill] sm:$0xff]  ;;  %v5839_v10 = vpop.permute.xlu1 %5838 }
 0x615   : > { %15815 = vst [vmem:[#allocation38_spill] sm:$0xff] %v13840_v29  ;;  %15817 = vst [vmem:[#allocation88_spill] sm:$0xff] %v13845_v20  ;;  %v13858_v2 = vadd.f32 %v13594_v41, %v13721_v60  ;;  %v13860_v18 = vpop.eup %7939  ;;  %7953 = vpow2.f32 %v6218_v25  ;;  %v6354_v39 = vmul.f32 %v13801_v52, %v15821_v21  ;;  %v6228_v20 = vmul.f32 1.442695, %v6165_v34  ;;  %v15826_v25 = vld [vmem:[#allocation65_spill] sm:$0xff] }
 0x616   : > { %15818 = vst [vmem:[#allocation13_spill] sm:$0xff] %v13850_v8  ;;  %v6357_v5 = vmul.f32 %v13807_v50, %v15822_v54  ;;  %v13867_v6 = vadd.f32 %v6352_v28, %v15823_v53  ;;  %7955 = vpow2.f32 %v6224_v24  ;;  %v6356_v15 = vmul.f32 %v13819_v37, %v15825_v9  ;;  %v15829_v28 = vld [vmem:[#allocation21_spill] sm:$0xff]  ;;  %v15839_v37 = vld [vmem:[#allocation62_spill] sm:$0xff] }
 0x617   : > { %15820 = vst [vmem:[#allocation47_spill] sm:$0xff] %v13858_v2  ;;  %v6167_v60 = vmin.f32 %v13840_v29, 0.0  ;;  %v6226_v13 = vmul.f32 1.442695, %v6164_v4  ;;  %v6359_v62 = vmul.f32 %v13840_v29, %v15826_v25  ;;  %v6166_v34 = vmin.f32 %v13850_v8, 0.0  ;;  %v15832_v25 = vld [vmem:[#allocation17_spill] sm:$0xff] }
 0x618   : > { %15824 = vst [vmem:[#allocation53_spill] sm:$0xff] %v13867_v6  ;;  %v13877_v21 = vadd.f32 %v13594_v41, %v13725_v31  ;;  %v13879_v54 = vpop.eup %7941  ;;  %v13882_v24 = vadd.f32 %v6355_v17, %v15829_v28  ;;  %7957 = vpow2.f32 %v6222_v40  ;;  %v6168_v9 = vmin.f32 %v13858_v2, 0.0  ;;  %v15834_v31 = vld [vmem:[#allocation20_spill] sm:$0xff] }
 0x619   : > { %15828 = vst [vmem:[#allocation59_spill] sm:$0xff] %v13879_v54  ;;  %v13887_v4 = vadd.f32 %v13594_v41, %v13728_v63  ;;  %v13889_v50 = vpop.eup %7943  ;;  %v13892_v29 = vadd.f32 %v6354_v39, %v15832_v25  ;;  %7959 = vpow2.f32 %v6228_v20  ;;  %v13895_v6 = vadd.f32 %v6357_v5, %v15834_v31  ;;  %v15840_v54 = vld [vmem:[#allocation69_spill] sm:$0xff]  ;;  %v5849_v20 = vpop.permute.xlu1 %5848  ;;  %v15842_v5 = vld [vmem:[#allocation114_spill] sm:$0xff] }
 0x61a   : > { %15827 = vst [vmem:[#allocation50_spill] sm:$0xff] %v13877_v21  ;;  %15830 = vst [vmem:[#allocation56_spill] sm:$0xff] %v13882_v24  ;;  %v13899_v17 = vadd.f32 %v13594_v41, %v13731_v49  ;;  %v13901_v40 = vpop.eup %7945  ;;  %v15837_v24 = vld [vmem:[#allocation60_spill] sm:$0xff]  ;;  %v6232_v63 = vmul.f32 1.442695, %v6167_v60  ;;  %v6358_v53 = vmul.f32 %v13850_v8, %v15839_v37  ;;  %v6360_v39 = vmul.f32 %v13858_v2, %v15840_v54  ;;  %v5844_v25 = vpop.permute.xlu0 %5843 }
 0x61b   : > { %15831 = vst [vmem:[#allocation65_spill] sm:$0xff] %v13887_v4  ;;  %15833 = vst [vmem:[#allocation116_spill] sm:$0xff] %v13892_v29  ;;  %v13904_v28 = vadd.f32 %v6356_v15, %v15837_v24  ;;  %v13910_v29 = vpop.eup %7947  ;;  %7961 = vpow2.f32 %v6226_v13  ;;  %v6230_v49 = vmul.f32 1.442695, %v6166_v34  ;;  %v6169_v31 = vmin.f32 %v13877_v21, 0.0  ;;  %v15847_v24 = vld [vmem:[#allocation10_spill] sm:$0xff] }
 0x61c   : > { %15835 = vst [vmem:[#allocation117_spill] sm:$0xff] %v13895_v6  ;;  %15836 = vst [vmem:[#allocation118_spill] sm:$0xff] %v13899_v17  ;;  %v13913_v6 = vadd.f32 %v6359_v62, %v15842_v5  ;;  %v6234_v15 = vmul.f32 1.442695, %v6168_v9  ;;  %v6170_v60 = vmin.f32 %v13887_v4, 0.0  ;;  %v13919_v37 = vadd.f32 %v13594_v41, %v13742_v58  ;;  %v15849_v9 = vld [vmem:[#allocation26_spill] sm:$0xff] }
 0x61d   : > { %15838 = vst [vmem:[#allocation119_spill] sm:$0xff] %v13904_v28  ;;  %15841 = vst [vmem:[#allocation62_spill] sm:$0xff] %v13910_v29  ;;  %v15845_v28 = vld [vmem:[#allocation75_spill] sm:$0xff]  ;;  %v13922_v2 = vpop.eup %7949  ;;  %v6361_v13 = vmul.f32 %v13877_v21, %v15847_v24  ;;  %v6171_v62 = vmin.f32 %v13899_v17, 0.0  ;;  %v13929_v34 = vadd.f32 %v13594_v41, %v13745_v46  ;;  %7963 = vpow2.f32 %v6232_v63  ;;  %v5859_v24 = vpop.permute.xlu1 %5858 }
 0x61e   : > { %15843 = vst [vmem:[#allocation69_spill] sm:$0xff] %v13913_v6  ;;  %15844 = vst [vmem:[#allocation120_spill] sm:$0xff] %v13919_v37  ;;  %v5969_v54 = vmul.f32 %v5824_v48, %v15845_v28  ;;  %v5971_v6 = vmul.f32 %v5834_v38, %v15849_v9  ;;  %v13932_v5 = vpop.eup %7951  ;;  %v15851_v58 = vld [vmem:[#allocation63_spill] sm:$0xff]  ;;  %v6236_v52 = vmul.f32 1.442695, %v6169_v31  ;;  %7965 = vpow2.f32 %v6230_v49  ;;  %v15865_v49 = vld [vmem:[#allocation73_spill] sm:$0xff] }
 0x61f   : > { %15846 = vst [vmem:[#allocation75_spill] sm:$0xff] %v13922_v2  ;;  %15848 = vst [vmem:[#allocation10_spill] sm:$0xff] %v13929_v34  ;;  %v13935_v8 = vadd.f32 %v6358_v53, %v15851_v58  ;;  %v15853_v48 = vld [vmem:[#allocation67_spill] sm:$0xff]  ;;  %v13943_v21 = vpop.eup %7953  ;;  %v5854_v53 = vpop.permute.xlu0 %5853  ;;  %7967 = vpow2.f32 %v6234_v15  ;;  %v15862_v58 = vld [vmem:[#allocation82_spill] sm:$0xff]  ;;  %vm6048_vm7 = vcmp.lt.f32.partialorder %v13683_v57, 0.0  ;;  %vm6050_vm13 = vcmp.lt.f32.partialorder %v13657_v23, 0.0 }
 0x620   : > { %15850 = vst [vmem:[#allocation26_spill] sm:$0xff] %v13932_v5  ;;  %v13938_v28 = vadd.f32 %v6360_v39, %v15853_v48  ;;  %v13941_v2 = vadd.f32 %v13594_v41, %v5969_v54  ;;  %15856 = vst [vmem:[#allocation124_spill] sm:$0xff] %v13943_v21  ;;  %v15857_v46 = vld [vmem:[#allocation11_spill] sm:$0xff]  ;;  %v13948_v38 = vadd.f32 %v13594_v41, %v5971_v6  ;;  %v6238_v39 = vmul.f32 1.442695, %v6170_v60 }
 0x621   : > { %15852 = vst [vmem:[#allocation121_spill] sm:$0xff] %v13935_v8  ;;  %v6362_v29 = vmul.f32 %v13887_v4, %v15857_v46  ;;  %v15859_v63 = vld [vmem:[#allocation91_spill] sm:$0xff]  ;;  %v13951_v8 = vpop.eup %7955  ;;  %v6172_v54 = vmin.f32 %v13919_v37, 0.0  ;;  %v13956_v31 = vadd.f32 %v6361_v13, %v15862_v58  ;;  %v6240_v21 = vmul.f32 1.442695, %v6171_v62  ;;  %v15866_v4 = vld [vmem:[#allocation29_spill] sm:$0xff] }
 0x622   : > { %15854 = vst [vmem:[#allocation122_spill] sm:$0xff] %v13938_v28  ;;  %15855 = vst [vmem:[#allocation123_spill] sm:$0xff] %v13941_v2  ;;  %v5972_v9 = vmul.f32 %v5839_v10, %v15859_v63  ;;  %v15861_v28 = vld [vmem:[#allocation68_spill] sm:$0xff]  ;;  %v6174_v46 = vmin.f32 %v13929_v34, 0.0  ;;  %v13959_v6 = vpop.eup %7957  ;;  %v6173_v10 = vmin.f32 %v13941_v2, 0.0  ;;  %v5974_v60 = vmul.f32 %v5849_v20, %v15865_v49  ;;  %v15870_v13 = vld [vmem:[#allocation74_spill] sm:$0xff] }
 0x623   : > { %15858 = vst [vmem:[#allocation11_spill] sm:$0xff] %v13948_v38  ;;  %15860 = vst [vmem:[#allocation91_spill] sm:$0xff] %v13951_v8  ;;  %v5973_v48 = vmul.f32 %v5844_v25, %v15861_v28  ;;  %v5975_v8 = vmul.f32 %v5854_v53, %v15866_v4  ;;  %v13967_v5 = vpop.eup %7959  ;;  %7969 = vpow2.f32 %v6236_v52  ;;  %v15868_v25 = vld [vmem:[#allocation93_spill] sm:$0xff]  ;;  %v6363_v62 = vmul.f32 %v13899_v17, %v15870_v13  ;;  %v15871_v58 = vld [vmem:[#allocation39_spill] sm:$0xff]  ;;  %v5864_v4 = vpop.permute.xlu0 %5863 }
 0x624   : > { %15863 = vst [vmem:[#allocation68_spill] sm:$0xff] %v13956_v31  ;;  %v13963_v63 = vadd.f32 %v13594_v41, %v5972_v9  ;;  %15867 = vst [vmem:[#allocation73_spill] sm:$0xff] %v13967_v5  ;;  %v13970_v15 = vadd.f32 %v6362_v29, %v15868_v25  ;;  %v6175_v28 = vmin.f32 %v13948_v38, 0.0  ;;  %7971 = vpow2.f32 %v6238_v39  ;;  %v5869_v53 = vpop.permute.xlu1 %5868  ;;  %v15874_v29 = vld [vmem:[#allocation43_spill] sm:$0xff]  ;;  %v15876_v17 = vld [vmem:[#allocation46_spill] sm:$0xff] }
 0x625   : > { %v6242_v31 = vmul.f32 1.442695, %v6172_v54  ;;  %v6364_v9 = vmul.f32 %v13919_v37, %v15871_v58  ;;  %v13978_v20 = vadd.f32 %v13594_v41, %v5973_v48  ;;  %v13980_v49 = vpop.eup %7961  ;;  %7973 = vpow2.f32 %v6240_v21  ;;  %v15875_v54 = vld [vmem:[#allocation35_spill] sm:$0xff] }
 0x626   : > { %15864 = vst [vmem:[#allocation125_spill] sm:$0xff] %v13963_v63  ;;  %15869 = vst [vmem:[#allocation29_spill] sm:$0xff] %v13970_v15  ;;  %v6246_v52 = vmul.f32 1.442695, %v6174_v46  ;;  %v6366_v15 = vmul.f32 %v13929_v34, %v15874_v29  ;;  %v13985_v13 = vadd.f32 %v13594_v41, %v5974_v60  ;;  %v6244_v39 = vmul.f32 1.442695, %v6173_v10 }
 0x627   : > { %15872 = vst [vmem:[#allocation74_spill] sm:$0xff] %v13978_v20  ;;  %15873 = vst [vmem:[#allocation39_spill] sm:$0xff] %v13980_v49  ;;  %v6365_v25 = vmul.f32 %v13941_v2, %v15875_v54  ;;  %v6176_v58 = vmin.f32 %v13963_v63, 0.0  ;;  %v13991_v48 = vadd.f32 %v13594_v41, %v5975_v8  ;;  %v6248_v37 = vmul.f32 1.442695, %v6175_v28  ;;  %v15877_v46 = vld [vmem:[#allocation79_spill] sm:$0xff]  ;;  %v13997_v34 = vpop.eup %7963 }
 0x628   : > { %v6367_v21 = vmul.f32 %v13948_v38, %v15876_v17  ;;  %v5977_v5 = vmul.f32 %v5864_v4, %v15877_v46  ;;  %v15878_v49 = vld [vmem:[#allocation83_spill] sm:$0xff]  ;;  %15879 = vst [vmem:[#allocation43_spill] sm:$0xff] %v13997_v34  ;;  %v15880_v60 = vld [vmem:[#allocation84_spill] sm:$0xff]  ;;  %7975 = vpow2.f32 %v6242_v31  ;;  %v15882_v54 = vld [vmem:[#allocation97_spill] sm:$0xff]  ;;  %v6177_v8 = vmin.f32 %v13978_v20, 0.0  ;;  %v14013_v46 = vpop.eup %7965 }
 0x629   : > { %v5976_v29 = vmul.f32 %v5859_v24, %v15878_v49  ;;  %v14000_v10 = vadd.f32 %v6363_v62, %v15880_v60  ;;  %v14003_v2 = vadd.f32 %v6364_v9, %v15882_v54  ;;  %7977 = vpow2.f32 %v6246_v52  ;;  %v15884_v28 = vld [vmem:[#allocation95_spill] sm:$0xff]  ;;  %v15886_v4 = vld [vmem:[#allocation109_spill] sm:$0xff]  ;;  %v14019_v54 = vpop.eup %7967 }
 0x62a   : > { %v14008_v17 = vadd.f32 %v6366_v15, %v15884_v28  ;;  %v6368_v24 = vmul.f32 %v13963_v63, %v15886_v4  ;;  %v6178_v49 = vmin.f32 %v13985_v13, 0.0  ;;  %7979 = vpow2.f32 %v6244_v39  ;;  %v15887_v31 = vld [vmem:[#allocation23_spill] sm:$0xff]  ;;  %15889 = vst [vmem:[#allocation109_spill] sm:$0xff] %v14019_v54  ;;  %v15890_v15 = vld [vmem:[#allocation72_spill] sm:$0xff]  ;;  %v5874_v39 = vpop.permute.xlu0 %5873  ;;  %v15894_v60 = vld [vmem:[#allocation81_spill] sm:$0xff] }
 0x62b   : > { %15881 = vst [vmem:[#allocation35_spill] sm:$0xff] %v14000_v10  ;;  %15883 = vst [vmem:[#allocation46_spill] sm:$0xff] %v14003_v2  ;;  %v14016_v62 = vadd.f32 %v6365_v25, %v15887_v31  ;;  %v6250_v9 = vmul.f32 1.442695, %v6176_v58  ;;  %v6179_v2 = vmin.f32 %v13991_v48, 0.0  ;;  %v5879_v10 = vpop.permute.xlu1 %5878  ;;  %vm6049_vm14 = vcmp.lt.f32.partialorder %v13692_v43, 0.0 }
 0x62c   : > { %15885 = vst [vmem:[#allocation79_spill] sm:$0xff] %v14008_v17  ;;  %7981 = vpow2.f32 %v6248_v37  ;;  %v14024_v52 = vadd.f32 %v6367_v21, %v15890_v15  ;;  %v14027_v4 = vadd.f32 %v13594_v41, %v5977_v5  ;;  %v14030_v25 = vadd.f32 %v13594_v41, %v5976_v29  ;;  %v15892_v17 = vld [vmem:[#allocation110_spill] sm:$0xff]  ;;  %v15895_v21 = vld [vmem:[#allocation101_spill] sm:$0xff]  ;;  %v15897_v15 = vld [vmem:[#allocation15_spill] sm:$0xff] }
 0x62d   : > { %15888 = vst [vmem:[#allocation83_spill] sm:$0xff] %v14016_v62  ;;  %v6252_v58 = vmul.f32 1.442695, %v6177_v8  ;;  %v6369_v28 = vmul.f32 %v13978_v20, %v15892_v17  ;;  %v15893_v62 = vld [vmem:[#allocation6_spill] sm:$0xff]  ;;  %v5978_v63 = vmul.f32 %v5869_v53, %v15894_v60  ;;  %v14037_v37 = vpop.eup %7969  ;;  %v6254_v5 = vmul.f32 1.442695, %v6178_v49 }
 0x62e   : > { %15891 = vst [vmem:[#allocation126_spill] sm:$0xff] %v14024_v52  ;;  %v6370_v31 = vmul.f32 %v13985_v13, %v15893_v62  ;;  %v14040_v52 = vadd.f32 %v6368_v24, %v15895_v21  ;;  %v6371_v29 = vmul.f32 %v13991_v48, %v15897_v15  ;;  %v15898_v38 = vld [vmem:[#allocation33_spill] sm:$0xff]  ;;  %v14045_v8 = vpop.eup %7971  ;;  %7983 = vpow2.f32 %v6250_v9  ;;  %v15899_v20 = vld [vmem:[#allocation96_spill] sm:$0xff]  ;;  %v15900_v49 = vld [vmem:[#allocation55_spill] sm:$0xff] }
 0x62f   : > { %v5980_v54 = vmul.f32 %v5879_v10, %v15898_v38  ;;  %v6256_v17 = vmul.f32 1.442695, %v6179_v2  ;;  %v5979_v34 = vmul.f32 %v5874_v39, %v15899_v20  ;;  %v6294_v53 = vmul.f32 %v13842_v36, %v13268_v26  ;;  %v14050_v60 = vpop.eup %7973  ;;  %v15901_v62 = vld [vmem:[#allocation14_spill] sm:$0xff]  ;;  %v15902_v26 = vld [vmem:[#allocation27_spill] sm:$0xff] }
 0x630   : > { %15896 = vst [vmem:[#allocation110_spill] sm:$0xff] %v14040_v52  ;;  %vm6051_vm15 = vcmp.lt.f32.partialorder %v13674_v3, 0.0  ;;  %vm6052_vm4 = vcmp.lt.f32.partialorder %v13701_v16, 0.0  ;;  %v6181_v24 = vmin.f32 %v14027_v4, 0.0  ;;  %v6373_v38 = vmul.f32 %v14027_v4, %v15900_v49  ;;  %v15904_v20 = vld [vmem:[#allocation30_spill] sm:$0xff]  ;;  %v15916_v16 = vld [vmem:[#allocation112_spill] sm:$0xff] }
 0x631   : > { %v6180_v10 = vmin.f32 %v14030_v25, 0.0  ;;  %v6372_v2 = vmul.f32 %v14030_v25, %v15901_v62  ;;  %vm6053_vm1 = vcmp.lt.f32.partialorder %v13739_v30, 0.0  ;;  %7985 = vpow2.f32 %v6252_v58  ;;  %v15906_v39 = vld [vmem:[#allocation78_spill] sm:$0xff] }
 0x632   : > { %v14062_v36 = vadd.f32 %v6369_v28, %v15902_v26  ;;  %v14065_v9 = vadd.f32 %v6370_v31, %v15904_v20  ;;  %v14068_v15 = vadd.f32 %v13594_v41, %v5978_v63  ;;  %7987 = vpow2.f32 %v6254_v5  ;;  %v14078_v58 = vpop.eup %7975  ;;  %v5884_v5 = vpop.permute.xlu0 %5883 }
 0x633   : > { %v14071_v49 = vadd.f32 %v6371_v29, %v15906_v39  ;;  %v14074_v52 = vadd.f32 %v13594_v41, %v5980_v54  ;;  %v6295_v62 = vmul.f32 %v13852_v0, %v15793_v12  ;;  %7989 = vpow2.f32 %v6256_v17  ;;  %v14088_v29 = vpop.eup %7977  ;;  %v15910_v12 = vld [vmem:[#allocation86_spill] sm:$0xff] }
 0x634   : > { %15903 = vst [vmem:[#allocation6_spill] sm:$0xff] %v14062_v36  ;;  %15905 = vst [vmem:[#allocation81_spill] sm:$0xff] %v14065_v9  ;;  %v14081_v28 = vadd.f32 %v13594_v41, %v5979_v34  ;;  %v6438_v63 = vsel %vm6048_vm7, %v6294_v53, %v13763_v22  ;;  %v6296_v31 = vmul.f32 %v13821_v59, %v13286_v14  ;;  %v6260_v54 = vmul.f32 1.442695, %v6181_v24  ;;  %v5889_v34 = vpop.permute.xlu1 %5888  ;;  %v14096_v36 = vpop.eup %7979  ;;  %v15912_v24 = vld [vmem:[#allocation51_spill] sm:$0xff] }
 0x635   : > { %15907 = vst [vmem:[#allocation101_spill] sm:$0xff] %v14071_v49  ;;  %v15908_v49 = vld [vmem:[#allocation92_spill] sm:$0xff]  ;;  %v6258_v0 = vmul.f32 1.442695, %v6180_v10  ;;  %v14094_v17 = vadd.f32 %v6372_v2, %v15910_v12  ;;  %v6182_v57 = vmin.f32 %v14068_v15, 0.0  ;;  %v6439_v14 = vsel %vm6049_vm14, %v6295_v62, %v13772_v1  ;;  %v15913_v1 = vld [vmem:[#allocation87_spill] sm:$0xff] }
 0x636   : > { %v14091_v9 = vadd.f32 %v6373_v38, %v15908_v49  ;;  %v6534_v22 = vrot.slane %v6438_v63, 7  ;;  %v6440_v59 = vsel %vm6050_vm13, %v6296_v31, %v13748_v55  ;;  %v14105_v53 = vpop.eup %7981  ;;  %v6374_v38 = vmul.f32 %v14068_v15, %v15912_v24  ;;  %v15914_v63 = vld [vmem:[#allocation4_spill] sm:$0xff] }
 0x637   : > { %15911 = vst [vmem:[#allocation33_spill] sm:$0xff] %v14094_v17  ;;  %v6184_v10 = vmin.f32 %v14074_v52, 0.0  ;;  %v6535_v2 = vrot.slane %v6439_v14, 7  ;;  %vm6054_vm5 = vcmp.lt.f32.partialorder %v13753_v44, 0.0  ;;  %vm6055_vm8 = vcmp.lt.f32.partialorder %v13760_v32, 0.0 }
 0x638   : > { %15909 = vst [vmem:[#allocation15_spill] sm:$0xff] %v14091_v9  ;;  %v6537_v9 = vrot.slane %v6440_v59, 7  ;;  %v6183_v43 = vmin.f32 %v14081_v28, 0.0  ;;  %v5981_v62 = vmul.f32 %v5884_v5, %v15913_v1  ;;  %v6297_v23 = vmul.f32 %v13831_v7, %v15794_v61  ;;  %v14124_v17 = vpop.eup %7983  ;;  %v5894_v5 = vpop.permute.xlu0 %5893 }
 0x639   : > { %v6298_v55 = vmul.f32 %v13860_v18, %v15799_v45  ;;  %v6376_v31 = vmul.f32 %v14074_v52, %v15914_v63  ;;  %v6536_v14 = vsel %vm5435_vm3, %v6534_v22, %v6535_v2  ;;  %v6299_v24 = vmul.f32 %v13889_v50, %v15804_v33  ;;  %v15915_v45 = vld [vmem:[#allocation98_spill] sm:$0xff]  ;;  %v5899_v22 = vpop.permute.xlu1 %5898 }
 0x63a   : > { %v6538_v59 = vsel %vm5435_vm3, %v6535_v2, %v6537_v9  ;;  %v6262_v49 = vmul.f32 1.442695, %v6182_v57  ;;  %7467 = vmatprep.mubr.msk.f32.mxu1 %vm1080_vm2, %v6536_v14  ;;  %v6441_v7 = vsel %vm6051_vm15, %v6297_v23, %v13779_v27  ;;  %v5982_v18 = vmul.f32 %v5889_v34, %v15915_v45  ;;  %v15926_v45 = vld [vmem:[#allocation61_spill] sm:$0xff] }
 0x63b   : > { %v6442_v61 = vsel %vm6052_vm4, %v6298_v55, %v13794_v51  ;;  %v6266_v9 = vmul.f32 1.442695, %v6184_v10  ;;  %7468 = vmatmul.mubr.msk.f32.vlgmr.msra.gmra.mrb[0].mxu1 %vm1080_vm2, %v6538_v59  ;;  %v6539_v50 = vrot.slane %v6441_v7, 7  ;;  %v6443_v57 = vsel %vm6053_vm1, %v6299_v24, %v13810_v35  ;;  %v14138_v2 = vpop.eup %7985  ;;  %v15917_v10 = vld [vmem:[#allocation99_spill] sm:$0xff]  ;;  %v15922_v59 = vld [vmem:[#allocation62_spill] sm:$0xff]  ;;  %v15923_v24 = vld [vmem:[#allocation8_spill] sm:$0xff] }
 0x63c   : > { %v6540_v33 = vrot.slane %v6442_v61, 7  ;;  %vm6056_vm9 = vcmp.lt.f32.partialorder %v13776_v56, 0.0  ;;  %7991 = vpow2.f32 %v6260_v54  ;;  %v6264_v3 = vmul.f32 1.442695, %v6183_v43  ;;  %v14146_v34 = vpop.eup %7987  ;;  %v15918_v43 = vld [vmem:[#allocation89_spill] sm:$0xff] }
 0x63d   : > { %v6375_v27 = vmul.f32 %v14081_v28, %v15916_v16  ;;  %v14144_v51 = vadd.f32 %v13594_v41, %v5981_v62  ;;  %vm6057_vm10 = vcmp.lt.f32.partialorder %v13695_v47, 0.0  ;;  %vm6058_vm0 = vcmp.lt.f32.partialorder %v13783_v42, 0.0  ;;  %v14152_v54 = vpop.eup %7989  ;;  %v15953_v47 = vld [vmem:[#allocation13_spill] sm:$0xff]  ;;  %v15954_v42 = vld [vmem:[#allocation90_spill] sm:$0xff] }
 0x63e   : > { %7993 = vpow2.f32 %v6258_v0  ;;  %v6541_v30 = vsel %vm5435_vm3, %v6539_v50, %v6540_v33  ;;  %v6542_v35 = vrot.slane %v6443_v57, 7  ;;  %v5983_v1 = vmul.f32 %v5894_v5, %v15917_v10  ;;  %v15920_v0 = vld [vmem:[#allocation31_spill] sm:$0xff]  ;;  %v15931_v10 = vld [vmem:[#allocation37_spill] sm:$0xff] }
 0x63f   : > { %7995 = vpow2.f32 %v6262_v49  ;;  %v14155_v23 = vadd.f32 %v6374_v38, %v15918_v43  ;;  %7470 = vmatprep.mubr.msk.f32.mxu1 %vm1080_vm2, %v6541_v30  ;;  %v14159_v62 = vadd.f32 %v13594_v41, %v5982_v18  ;;  %v6300_v55 = vmul.f32 %v13901_v40, %v15808_v11  ;;  %v15924_v38 = vld [vmem:[#allocation100_spill] sm:$0xff]  ;;  %v15981_v43 = vld [vmem:[#allocation63_spill] sm:$0xff] }
 0x640   : > { %7997 = vpow2.f32 %v6266_v9  ;;  %v14164_v63 = vadd.f32 %v6376_v31, %v15920_v0  ;;  %v6543_v14 = vsel %vm5435_vm3, %v6540_v33, %v6542_v35  ;;  %v6301_v49 = vmul.f32 %v15922_v59, %v15810_v19  ;;  %v15927_v31 = vld [vmem:[#allocation36_spill] sm:$0xff]  ;;  %v15929_v9 = vld [vmem:[#allocation107_spill] sm:$0xff]  ;;  %v5909_v33 = vpop.permute.xlu1 %5908  ;;  %v5904_v35 = vpop.permute.xlu0 %5903  ;;  %v15952_v0 = vld [vmem:[#allocation77_spill] sm:$0xff] }
 0x641   : > { %15919 = vst [vmem:[#allocation96_spill] sm:$0xff] %v14155_v23  ;;  %vm6059_vm11 = vcmp.lt.f32.partialorder %v15923_v24, 0.0  ;;  %7999 = vpow2.f32 %v6264_v3  ;;  %v14171_v7 = vadd.f32 %v6375_v27, %v15924_v38  ;;  %v6185_v61 = vmin.f32 %v14144_v51, 0.0  ;;  %7471 = vmatmul.mubr.msk.f32.gmra.mrb[2].mxu1 %vm1080_vm2, %v6543_v14  ;;  %v15928_v18 = vld [vmem:[#allocation76_spill] sm:$0xff]  ;;  %v15935_v59 = vld [vmem:[#allocation59_spill] sm:$0xff]  ;;  %v15948_v23 = vld [vmem:[#allocation53_spill] sm:$0xff] }
 0x642   : > { %15921 = vst [vmem:[#allocation55_spill] sm:$0xff] %v14164_v63  ;;  %v6377_v11 = vmul.f32 %v14144_v51, %v15926_v45  ;;  %v14178_v40 = vadd.f32 %v13594_v41, %v5983_v1  ;;  %v6444_v19 = vsel %vm6054_vm5, %v6300_v55, %v15927_v31  ;;  %v6445_v5 = vsel %vm6055_vm8, %v6301_v49, %v15928_v18  ;;  %v15930_v3 = vld [vmem:[#allocation64_spill] sm:$0xff]  ;;  %v15933_v55 = vld [vmem:[#allocation26_spill] sm:$0xff]  ;;  %v15938_v18 = vld [vmem:[#allocation19_spill] sm:$0xff] }
 0x643   : > { %15925 = vst [vmem:[#allocation14_spill] sm:$0xff] %v14171_v7  ;;  %v5984_v50 = vmul.f32 %v5899_v22, %v15929_v9  ;;  %v6186_v57 = vmin.f32 %v14159_v62, 0.0  ;;  %v6378_v16 = vmul.f32 %v14159_v62, %v15930_v3  ;;  %v6544_v27 = vrot.slane %v6444_v19, 7  ;;  %v15932_v1 = vld [vmem:[#allocation16_spill] sm:$0xff]  ;;  %v15936_v49 = vld [vmem:[#allocation58_spill] sm:$0xff]  ;;  %v15966_v24 = vld [vmem:[#allocation91_spill] sm:$0xff] }
 0x644   : > { %v6545_v30 = vrot.slane %v6445_v5, 7  ;;  %vm6060_vm6 = vcmp.lt.f32.partialorder %v15931_v10, 0.0  ;;  %v6302_v32 = vmul.f32 %v15933_v55, %v15932_v1  ;;  %v15934_v14 = vld [vmem:[#allocation12_spill] sm:$0xff]  ;;  %vm6061_vm12 = vcmp.lt.f32.partialorder %v15938_v18, 0.0  ;;  %v15942_v7 = vld [vmem:[#allocation42_spill] sm:$0xff]  ;;  %v5919_v38 = vpop.permute.xlu1 %5918  ;;  %v15978_v10 = vld [vmem:[#allocation119_spill] sm:$0xff] }
 0x645   : > { %v14192_v44 = vadd.f32 %v13594_v41, %v5984_v50  ;;  %v6303_v22 = vmul.f32 %v15935_v59, %v15934_v14  ;;  %v15937_v45 = vld [vmem:[#allocation124_spill] sm:$0xff]  ;;  %v6268_v9 = vmul.f32 1.442695, %v6185_v61  ;;  %vm6062_vm7 = vcmp.lt.f32.partialorder %v15942_v7, 0.0  ;;  %v15943_v55 = vld [vmem:[#allocation66_spill] sm:$0xff] }
 0x646   : > { %v6304_v31 = vmul.f32 %v15937_v45, %v15936_v49  ;;  %v15939_v19 = vld [vmem:[#allocation32_spill] sm:$0xff]  ;;  %v6546_v3 = vsel %vm5435_vm3, %v6544_v27, %v6545_v30  ;;  %v6187_v1 = vmin.f32 %v14178_v40, 0.0  ;;  %v6270_v56 = vmul.f32 1.442695, %v6186_v57 }
 0x647   : > { %v14202_v5 = vadd.f32 %v6377_v11, %v15939_v19  ;;  %v15941_v63 = vld [vmem:[#allocation104_spill] sm:$0xff]  ;;  %7473 = vmatprep.mubr.msk.f32.mxu1 %vm1080_vm2, %v6546_v3  ;;  %v6380_v14 = vmul.f32 %v14192_v44, %v15943_v55  ;;  %v15946_v11 = vld [vmem:[#allocation75_spill] sm:$0xff]  ;;  %vm6063_vm13 = vcmp.lt.f32.partialorder %v15952_v0, 0.0  ;;  %vm6064_vm14 = vcmp.lt.f32.partialorder %v15953_v47, 0.0  ;;  %v15989_v0 = vld [vmem:[#allocation114_spill] sm:$0xff] }
 0x648   : > { %v5986_v50 = vmul.f32 %v5909_v33, %v15941_v63  ;;  %v15944_v59 = vld [vmem:[#allocation88_spill] sm:$0xff]  ;;  %v15947_v63 = vld [vmem:[#allocation85_spill] sm:$0xff]  ;;  %v6448_v3 = vsel %vm6058_vm0, %v6304_v31, %v15948_v23  ;;  %8001 = vpow2.f32 %v6268_v9  ;;  %v14237_v23 = vadd.f32 %v6378_v16, %v15954_v42 }
 0x649   : > { %15940 = vst [vmem:[#allocation27_spill] sm:$0xff] %v14202_v5  ;;  %v6446_v61 = vsel %vm6056_vm9, %v6302_v32, %v15944_v59  ;;  %v15945_v49 = vld [vmem:[#allocation48_spill] sm:$0xff]  ;;  %v14216_v5 = vpop.eup %7991  ;;  %v6447_v33 = vsel %vm6057_vm10, %v6303_v22, %v15947_v63  ;;  %v15949_v32 = vld [vmem:[#allocation102_spill] sm:$0xff]  ;;  %v15956_v31 = vld [vmem:[#allocation5_spill] sm:$0xff]  ;;  %8003 = vpow2.f32 %v6270_v56  ;;  %v6310_v18 = vmul.f32 %v14013_v46, %v15981_v43  ;;  %v5929_v43 = vpop.permute.xlu1 %5928 }
 0x64a   : > { %v6305_v45 = vmul.f32 %v15946_v11, %v15945_v49  ;;  %v6547_v27 = vrot.slane %v6446_v61, 7  ;;  %v14225_v55 = vadd.f32 %v13594_v41, %v5986_v50  ;;  %v14227_v19 = vpop.eup %7993  ;;  %v14230_v59 = vadd.f32 %v6380_v14, %v15949_v32  ;;  %15955 = vst [vmem:[#allocation86_spill] sm:$0xff] %v14237_v23  ;;  %v5914_v50 = vpop.permute.xlu0 %5913  ;;  %v15958_v63 = vld [vmem:[#allocation3_spill] sm:$0xff]  ;;  %v15959_v9 = vld [vmem:[#allocation41_spill] sm:$0xff] }
 0x64b   : > { %v6549_v49 = vrot.slane %v6447_v33, 7  ;;  %v6550_v11 = vrot.slane %v6448_v3, 7  ;;  %v14232_v61 = vpop.eup %7995  ;;  %v14246_v33 = vmul.f32 %v14178_v40, %v15958_v63  ;;  %v15962_v32 = vld [vmem:[#allocation105_spill] sm:$0xff] }
 0x64c   : > { %15950 = vst [vmem:[#allocation30_spill] sm:$0xff] %v14230_v59  ;;  %15951 = vst [vmem:[#allocation78_spill] sm:$0xff] %v14232_v61  ;;  %v6548_v22 = vsel %vm5435_vm3, %v6545_v30, %v6547_v27  ;;  %v6382_v57 = vmul.f32 %v14225_v55, %v15956_v31  ;;  %v14242_v14 = vpop.eup %7997  ;;  %v6449_v16 = vsel %vm6059_vm11, %v6305_v45, %v15959_v9  ;;  %v15960_v59 = vld [vmem:[#allocation108_spill] sm:$0xff]  ;;  %v6272_v31 = vmul.f32 1.442695, %v6187_v1  ;;  %v15964_v42 = vld [vmem:[#allocation17_spill] sm:$0xff] }
 0x64d   : > { %15957 = vst [vmem:[#allocation51_spill] sm:$0xff] %v14242_v14  ;;  %7474 = vmatmul.mubr.msk.f32.gmra.mrb[4].mxu1 %vm1080_vm2, %v6548_v22  ;;  %v6551_v3 = vsel %vm5435_vm3, %v6549_v49, %v6550_v11  ;;  %v5985_v30 = vmul.f32 %v5904_v35, %v15960_v59  ;;  %v14254_v27 = vpop.eup %7999  ;;  %v6552_v63 = vrot.slane %v6449_v16, 7  ;;  %v6306_v22 = vmul.f32 %v13959_v6, %v15964_v42  ;;  %v15965_v14 = vld [vmem:[#allocation21_spill] sm:$0xff]  ;;  %v15967_v9 = vld [vmem:[#allocation60_spill] sm:$0xff]  ;;  %v15968_v35 = vld [vmem:[#allocation39_spill] sm:$0xff] }
 0x64e   : > { %15961 = vst [vmem:[#allocation87_spill] sm:$0xff] %v14254_v27  ;;  %7476 = vmatprep.mubr.msk.f32.mxu1 %vm1080_vm2, %v6551_v3  ;;  %v14258_v23 = vadd.f32 %v6382_v57, %v15962_v32  ;;  %v6307_v45 = vmul.f32 %v15966_v24, %v15965_v14  ;;  %v6308_v59 = vmul.f32 %v15968_v35, %v15967_v9  ;;  %v15969_v27 = vld [vmem:[#allocation45_spill] sm:$0xff]  ;;  %v15970_v3 = vld [vmem:[#allocation38_spill] sm:$0xff]  ;;  %v15971_v57 = vld [vmem:[#allocation47_spill] sm:$0xff]  ;;  %v6188_v16 = vmin.f32 %v14192_v44, 0.0 }
 0x64f   : > { %v14263_v49 = vadd.f32 %v13594_v41, %v5985_v30  ;;  %v5987_v1 = vmul.f32 %v5914_v50, %v15969_v27  ;;  %vm6065_vm15 = vcmp.lt.f32.partialorder %v15970_v3, 0.0  ;;  %vm6066_vm4 = vcmp.lt.f32.partialorder %v15971_v57, 0.0  ;;  %v15972_v42 = vld [vmem:[#allocation116_spill] sm:$0xff]  ;;  %v15973_v14 = vld [vmem:[#allocation50_spill] sm:$0xff] }
 0x650   : > { %15963 = vst [vmem:[#allocation4_spill] sm:$0xff] %v14258_v23  ;;  %v6553_v6 = vsel %vm5435_vm3, %v6550_v11, %v6552_v63  ;;  %v6450_v30 = vsel %vm6060_vm6, %v6306_v22, %v15972_v42  ;;  %vm6067_vm1 = vcmp.lt.f32.partialorder %v15973_v14, 0.0  ;;  %v6190_v24 = vmin.f32 %v14225_v55, 0.0  ;;  %v15974_v50 = vld [vmem:[#allocation18_spill] sm:$0xff]  ;;  %v15975_v9 = vld [vmem:[#allocation56_spill] sm:$0xff]  ;;  %v15977_v23 = vld [vmem:[#allocation73_spill] sm:$0xff] }
 0x651   : > { %7477 = vmatmul.mubr.msk.f32.gmra.mrb[6].mxu1 %vm1080_vm2, %v6553_v6  ;;  %v6381_v27 = vmul.f32 %v14263_v49, %v15974_v50  ;;  %v6451_v56 = vsel %vm6061_vm12, %v6307_v45, %v15975_v9  ;;  %v15976_v35 = vld [vmem:[#allocation20_spill] sm:$0xff]  ;;  %v6554_v63 = vrot.slane %v6450_v30, 7  ;;  %v6452_v22 = vsel %vm6062_vm7, %v6308_v59, %v15978_v10  ;;  %v15979_v6 = vld [vmem:[#allocation111_spill] sm:$0xff]  ;;  %v5924_v59 = vpop.permute.xlu0 %5923 }
 0x652   : > { %v6309_v11 = vmul.f32 %v15977_v23, %v15976_v35  ;;  %v6555_v32 = vrot.slane %v6451_v56, 7  ;;  %v14291_v42 = vadd.f32 %v13594_v41, %v5987_v1  ;;  %8005 = vpow2.f32 %v6272_v31  ;;  %v15982_v9 = vld [vmem:[#allocation71_spill] sm:$0xff]  ;;  %v15983_v1 = vld [vmem:[#allocation117_spill] sm:$0xff] }
 0x653   : > { %v14294_v61 = vadd.f32 %v6381_v27, %v15979_v6  ;;  %v6557_v50 = vrot.slane %v6452_v22, 7  ;;  %v6274_v45 = vmul.f32 1.442695, %v6188_v16  ;;  %v6189_v23 = vmin.f32 %v14263_v49, 0.0  ;;  %v15984_v35 = vld [vmem:[#allocation121_spill] sm:$0xff]  ;;  %v14310_v16 = vpop.eup %8001 }
 0x654   : > { %v6556_v30 = vsel %vm5435_vm3, %v6554_v63, %v6555_v32  ;;  %v6383_v7 = vmul.f32 %v14291_v42, %v15982_v9  ;;  %v6278_v56 = vmul.f32 1.442695, %v6190_v24  ;;  %v6453_v27 = vsel %vm6063_vm13, %v6309_v11, %v15983_v1  ;;  %15985 = vst [vmem:[#allocation112_spill] sm:$0xff] %v14310_v16  ;;  %v15986_v24 = vld [vmem:[#allocation49_spill] sm:$0xff]  ;;  %v15990_v11 = vld [vmem:[#allocation43_spill] sm:$0xff]  ;;  %v15991_v1 = vld [vmem:[#allocation40_spill] sm:$0xff] }
 0x655   : > { %15980 = vst [vmem:[#allocation98_spill] sm:$0xff] %v14294_v61  ;;  %7479 = vmatprep.mubr.msk.f32.mxu1 %vm1080_vm2, %v6556_v30  ;;  %v6558_v31 = vsel %vm5435_vm3, %v6555_v32, %v6557_v50  ;;  %v6454_v46 = vsel %vm6064_vm14, %v6310_v18, %v15984_v35  ;;  %v6191_v63 = vmin.f32 %v14291_v42, 0.0  ;;  %v6559_v22 = vrot.slane %v6453_v27, 7  ;;  %v15988_v50 = vld [vmem:[#allocation57_spill] sm:$0xff]  ;;  %v15992_v18 = vld [vmem:[#allocation67_spill] sm:$0xff] }
 0x656   : > { %7480 = vmatmul.mubr.msk.f32.gmra.mrb[8].mxu1 %vm1080_vm2, %v6558_v31  ;;  %v14315_v10 = vadd.f32 %v6383_v7, %v15986_v24  ;;  %v6560_v32 = vrot.slane %v6454_v46, 7  ;;  %v5988_v30 = vmul.f32 %v5919_v38, %v15988_v50  ;;  %v6311_v9 = vmul.f32 %v15990_v11, %v15989_v0  ;;  %v15993_v35 = vld [vmem:[#allocation109_spill] sm:$0xff]  ;;  %v15995_v31 = vld [vmem:[#allocation118_spill] sm:$0xff]  ;;  %v15998_v50 = vld [vmem:[#allocation120_spill] sm:$0xff] }
 0x657   : > { %v5989_v47 = vmul.f32 %v5924_v59, %v15991_v1  ;;  %v6312_v61 = vmul.f32 %v15993_v35, %v15992_v18  ;;  %v15994_v6 = vld [vmem:[#allocation65_spill] sm:$0xff]  ;;  %vm6069_vm8 = vcmp.lt.f32.partialorder %v15995_v31, 0.0  ;;  %v6276_v16 = vmul.f32 1.442695, %v6189_v23  ;;  %v15997_v46 = vld [vmem:[#allocation54_spill] sm:$0xff]  ;;  %v16002_v18 = vld [vmem:[#allocation68_spill] sm:$0xff] }
 0x658   : > { %15987 = vst [vmem:[#allocation99_spill] sm:$0xff] %v14315_v10  ;;  %vm6068_vm5 = vcmp.lt.f32.partialorder %v15994_v6, 0.0  ;;  %v6561_v7 = vsel %vm5435_vm3, %v6559_v22, %v6560_v32  ;;  %v15996_v10 = vld [vmem:[#allocation82_spill] sm:$0xff]  ;;  %v5990_v38 = vmul.f32 %v5929_v43, %v15997_v46  ;;  %vm6070_vm9 = vcmp.lt.f32.partialorder %v15998_v50, 0.0  ;;  %v15999_v0 = vld [vmem:[#allocation69_spill] sm:$0xff]  ;;  %v16001_v43 = vld [vmem:[#allocation123_spill] sm:$0xff] }
 0x659   : > { %v6313_v27 = vmul.f32 %v14037_v37, %v15996_v10  ;;  %7482 = vmatprep.mubr.msk.f32.mxu1 %vm1080_vm2, %v6561_v7  ;;  %v14332_v59 = vadd.f32 %v13594_v41, %v5988_v30  ;;  %v6455_v11 = vsel %vm6065_vm15, %v6311_v9, %v15999_v0  ;;  %v14338_v23 = vadd.f32 %v13594_v41, %v5989_v47  ;;  %v16000_v22 = vld [vmem:[#allocation122_spill] sm:$0xff]  ;;  %v14343_v10 = vpop.eup %8003  ;;  %v16004_v7 = vld [vmem:[#allocation7_spill] sm:$0xff]  ;;  %v16005_v0 = vld [vmem:[#allocation113_spill] sm:$0xff] }
 0x65a   : > { %v6456_v37 = vsel %vm6066_vm4, %v6312_v61, %v16000_v22  ;;  %vm6071_vm10 = vcmp.lt.f32.partialorder %v16001_v43, 0.0  ;;  %v6562_v1 = vrot.slane %v6455_v11, 7  ;;  %v14350_v3 = vadd.f32 %v13594_v41, %v5990_v38  ;;  %v16007_v22 = vld [vmem:[#allocation10_spill] sm:$0xff]  ;;  %v16008_v38 = vld [vmem:[#allocation103_spill] sm:$0xff] }
 0x65b   : > { %v6457_v30 = vsel %vm6067_vm1, %v6313_v27, %v16002_v18  ;;  %v6564_v35 = vrot.slane %v6456_v37, 7  ;;  %8007 = vpow2.f32 %v6274_v45  ;;  %v6280_v9 = vmul.f32 1.442695, %v6191_v63  ;;  %v16010_v63 = vld [vmem:[#allocation52_spill] sm:$0xff]  ;;  %v16012_v18 = vld [vmem:[#allocation94_spill] sm:$0xff]  ;;  %v16027_v31 = vld [vmem:[#allocation83_spill] sm:$0xff] }
 0x65c   : > { %16003 = vst [vmem:[#allocation62_spill] sm:$0xff] %v14350_v3  ;;  %v6192_v47 = vmin.f32 %v14332_v59, 0.0  ;;  %v6384_v61 = vmul.f32 %v14332_v59, %v16004_v7  ;;  %v6563_v57 = vsel %vm5435_vm3, %v6560_v32, %v6562_v1  ;;  %v6193_v46 = vmin.f32 %v14338_v23, 0.0  ;;  %v14359_v27 = vpop.eup %8005  ;;  %v5939_v1 = vpop.permute.xlu1 %5938 }
 0x65d   : > { %v6385_v11 = vmul.f32 %v14338_v23, %v16005_v0  ;;  %v6565_v14 = vrot.slane %v6457_v30, 7  ;;  %16006 = vst [vmem:[#allocation8_spill] sm:$0xff] %v14359_v27  ;;  %vm6072_vm0 = vcmp.lt.f32.partialorder %v16007_v22, 0.0  ;;  %v14364_v45 = vadd.f32 %v14246_v33, %v16008_v38  ;;  %7483 = vmatmul.mubr.msk.f32.gmra.mrb[10].mxu1 %vm1080_vm2, %v6563_v57  ;;  %v16014_v0 = vld [vmem:[#allocation70_spill] sm:$0xff]  ;;  %v16015_v33 = vld [vmem:[#allocation11_spill] sm:$0xff]  ;;  %v16017_v57 = vld [vmem:[#allocation93_spill] sm:$0xff]  ;;  %v5934_v27 = vpop.permute.xlu0 %5933 }
 0x65e   : > { %8009 = vpow2.f32 %v6278_v56  ;;  %v14367_v37 = vadd.f32 %v6384_v61, %v16010_v63  ;;  %v6194_v32 = vmin.f32 %v14350_v3, 0.0  ;;  %v6386_v24 = vmul.f32 %v14350_v3, %v16014_v0  ;;  %v16016_v56 = vld [vmem:[#allocation125_spill] sm:$0xff]  ;;  %v16023_v38 = vld [vmem:[#allocation35_spill] sm:$0xff] }
 0x65f   : > { %16009 = vst [vmem:[#allocation61_spill] sm:$0xff] %v14364_v45  ;;  %8011 = vpow2.f32 %v6276_v16  ;;  %v14372_v30 = vadd.f32 %v6385_v11, %v16012_v18  ;;  %v6566_v7 = vsel %vm5435_vm3, %v6564_v35, %v6565_v14  ;;  %vm6073_vm11 = vcmp.lt.f32.partialorder %v16015_v33, 0.0  ;;  %v16018_v16 = vld [vmem:[#allocation84_spill] sm:$0xff]  ;;  %v16019_v18 = vld [vmem:[#allocation34_spill] sm:$0xff]  ;;  %v16020_v63 = vld [vmem:[#allocation97_spill] sm:$0xff] }
 0x660   : > { %16011 = vst [vmem:[#allocation36_spill] sm:$0xff] %v14367_v37  ;;  %vm6074_vm6 = vcmp.lt.f32.partialorder %v16016_v56, 0.0  ;;  %8013 = vpow2.f32 %v6280_v9  ;;  %v6282_v61 = vmul.f32 1.442695, %v6192_v47  ;;  %7485 = vmatprep.mubr.msk.f32.mxu1 %vm1080_vm2, %v6566_v7  ;;  %v6314_v37 = vmul.f32 %v14045_v8, %v16017_v57  ;;  %v16021_v45 = vld [vmem:[#allocation24_spill] sm:$0xff]  ;;  %v16022_v47 = vld [vmem:[#allocation29_spill] sm:$0xff] }
 0x661   : > { %16013 = vst [vmem:[#allocation76_spill] sm:$0xff] %v14372_v30  ;;  %v6315_v11 = vmul.f32 %v14050_v60, %v16018_v16  ;;  %v6284_v30 = vmul.f32 1.442695, %v6193_v46  ;;  %v14385_v35 = vadd.f32 %v6386_v24, %v16019_v18  ;;  %v6316_v0 = vmul.f32 %v14078_v58, %v16020_v63  ;;  %v16024_v60 = vld [vmem:[#allocation23_spill] sm:$0xff]  ;;  %v16025_v57 = vld [vmem:[#allocation46_spill] sm:$0xff]  ;;  %v16038_v33 = vld [vmem:[#allocation28_spill] sm:$0xff] }
 0x662   : > { %v5992_v3 = vmul.f32 %v5939_v1, %v16021_v45  ;;  %v6286_v9 = vmul.f32 1.442695, %v6194_v32  ;;  %v6458_v7 = vsel %vm6068_vm5, %v6314_v37, %v16022_v47  ;;  %v6317_v46 = vmul.f32 %v14096_v36, %v16024_v60  ;;  %v16026_v32 = vld [vmem:[#allocation74_spill] sm:$0xff]  ;;  %v16029_v1 = vld [vmem:[#allocation95_spill] sm:$0xff] }
 0x663   : > { %v6459_v8 = vsel %vm6069_vm8, %v6315_v11, %v16023_v38  ;;  %v6567_v24 = vrot.slane %v6458_v7, 7  ;;  %v6460_v58 = vsel %vm6070_vm9, %v6316_v0, %v16025_v57  ;;  %vm6075_vm12 = vcmp.lt.f32.partialorder %v16026_v32, 0.0  ;;  %v16028_v38 = vld [vmem:[#allocation44_spill] sm:$0xff]  ;;  %v16030_v11 = vld [vmem:[#allocation9_spill] sm:$0xff]  ;;  %v16033_v60 = vld [vmem:[#allocation79_spill] sm:$0xff] }
 0x664   : > { %v6569_v63 = vrot.slane %v6459_v8, 7  ;;  %v14402_v45 = vadd.f32 %v13594_v41, %v5992_v3  ;;  %vm6076_vm7 = vcmp.lt.f32.partialorder %v13985_v13, 0.0  ;;  %vm6077_vm13 = vcmp.lt.f32.partialorder %v13991_v48, 0.0  ;;  %v16043_v13 = vld [vmem:[#allocation106_spill] sm:$0xff] }
 0x665   : > { %v6570_v6 = vrot.slane %v6460_v58, 7  ;;  %v6461_v36 = vsel %vm6071_vm10, %v6317_v46, %v16027_v31  ;;  %v5991_v37 = vmul.f32 %v5934_v27, %v16028_v38  ;;  %v6318_v50 = vmul.f32 %v14088_v29, %v16029_v1  ;;  %v14417_v47 = vpop.eup %8007  ;;  %v16031_v29 = vld [vmem:[#allocation72_spill] sm:$0xff]  ;;  %v5944_v31 = vpop.permute.xlu0 %5943 }
 0x666   : > { %8015 = vpow2.f32 %v6282_v61  ;;  %v6568_v3 = vsel %vm5435_vm3, %v6565_v14, %v6567_v24  ;;  %v6196_v16 = vmin.f32 %v14402_v45, 0.0  ;;  %v6388_v0 = vmul.f32 %v14402_v45, %v16030_v11  ;;  %v16032_v61 = vld [vmem:[#allocation22_spill] sm:$0xff] }
 0x667   : > { %vm6078_vm14 = vcmp.lt.f32.partialorder %v14030_v25, 0.0  ;;  %7486 = vmatmul.mubr.msk.f32.gmra.mrb[12].mxu1 %vm1080_vm2, %v6568_v3  ;;  %v6571_v43 = vsel %vm5435_vm3, %v6569_v63, %v6570_v6  ;;  %v6572_v27 = vrot.slane %v6461_v36, 7  ;;  %v14423_v7 = vadd.f32 %v13594_v41, %v5991_v37  ;;  %v16034_v63 = vld [vmem:[#allocation80_spill] sm:$0xff]  ;;  %v16035_v37 = vld [vmem:[#allocation126_spill] sm:$0xff]  ;;  %v16037_v3 = vld [vmem:[#allocation25_spill] sm:$0xff] }
 0x668   : > { %v6319_v14 = vmul.f32 %v14105_v53, %v16031_v29  ;;  %vm6079_vm15 = vcmp.lt.f32.partialorder %v14027_v4, 0.0  ;;  %8017 = vpow2.f32 %v6284_v30  ;;  %7488 = vmatprep.mubr.msk.f32.mxu1 %vm1080_vm2, %v6571_v43  ;;  %v14430_v8 = vadd.f32 %v6388_v0, %v16032_v61  ;;  %v14437_v57 = vpop.eup %8009 }
 0x669   : > { %v6462_v46 = vsel %vm6072_vm0, %v6318_v50, %v16033_v60  ;;  %v6320_v24 = vmul.f32 %v14124_v17, %v15895_v21  ;;  %8019 = vpow2.f32 %v6286_v9  ;;  %v6290_v58 = vmul.f32 1.442695, %v6196_v16  ;;  %v14442_v36 = vpop.eup %8011  ;;  %v16036_v21 = vld [vmem:[#allocation110_spill] sm:$0xff] }
 0x66a   : > { %v6195_v53 = vmin.f32 %v14423_v7, 0.0  ;;  %v6387_v30 = vmul.f32 %v14423_v7, %v16034_v63  ;;  %v6573_v38 = vsel %vm5435_vm3, %v6570_v6, %v6572_v27  ;;  %v6463_v22 = vsel %vm6073_vm11, %v6319_v14, %v16035_v37  ;;  %v14451_v9 = vpop.eup %8013 }
 0x66b   : > { %v6574_v1 = vrot.slane %v6462_v46, 7  ;;  %v6464_v17 = vsel %vm6074_vm6, %v6320_v24, %v16036_v21  ;;  %vm6080_vm4 = vcmp.lt.f32.partialorder %v14068_v15, 0.0  ;;  %7489 = vmatmul.mubr.msk.f32.gmra.mrb[14].mxu1 %vm1080_vm2, %v6573_v38  ;;  %v6575_v6 = vrot.slane %v6463_v22, 7  ;;  %v16046_v21 = vld [vmem:[#allocation115_spill] sm:$0xff]  ;;  %v16062_v15 = vld [vmem:[#allocation62_spill] sm:$0xff] }
 0x66c   : > { %v6288_v50 = vmul.f32 1.442695, %v6195_v53  ;;  %v14456_v16 = vadd.f32 %v6387_v30, %v16037_v3  ;;  %v6577_v11 = vrot.slane %v6464_v17, 7  ;;  %vm6082_vm1 = vcmp.lt.f32.partialorder %v14074_v52, 0.0  ;;  %v16044_v30 = vld [vmem:[#allocation33_spill] sm:$0xff] }
 0x66d   : > { %vm6081_vm5 = vcmp.lt.f32.partialorder %v14081_v28, 0.0  ;;  %vm6083_vm8 = vcmp.lt.f32.partialorder %v14144_v51, 0.0  ;;  %v5993_v56 = vmul.f32 %v5944_v31, %v16038_v33  ;;  %v6321_v0 = vmul.f32 %v14138_v2, %v15902_v26  ;;  %v16040_v2 = vld [vmem:[#allocation81_spill] sm:$0xff] }
 0x66e   : > { %v6322_v43 = vmul.f32 %v14146_v34, %v15904_v20  ;;  %v6323_v27 = vmul.f32 %v14152_v54, %v15906_v39  ;;  %vm6084_vm9 = vcmp.lt.f32.partialorder %v14159_v62, 0.0  ;;  %8021 = vpow2.f32 %v6290_v58  ;;  %v16039_v20 = vld [vmem:[#allocation6_spill] sm:$0xff]  ;;  %v16041_v54 = vld [vmem:[#allocation101_spill] sm:$0xff]  ;;  %v16042_v58 = vld [vmem:[#allocation92_spill] sm:$0xff] }
 0x66f   : > { %v6576_v29 = vsel %vm5435_vm3, %v6574_v1, %v6575_v6  ;;  %v6578_v14 = vsel %vm5435_vm3, %v6575_v6, %v6577_v11  ;;  %v6324_v60 = vmul.f32 %v14227_v19, %v15910_v12  ;;  %vm6085_vm10 = vcmp.lt.f32.partialorder %v14178_v40, 0.0  ;;  %v16047_v6 = vld [vmem:[#allocation89_spill] sm:$0xff]  ;;  %v16048_v11 = vld [vmem:[#allocation78_spill] sm:$0xff] }
 0x670   : > { %7491 = vmatprep.mubr.msk.f32.mxu1 %vm1080_vm2, %v6576_v29  ;;  %v14476_v26 = vadd.f32 %v13594_v41, %v5993_v56  ;;  %v6465_v39 = vsel %vm6075_vm12, %v6321_v0, %v16039_v20  ;;  %v6466_v34 = vsel %vm6076_vm7, %v6322_v43, %v16040_v2  ;;  %v6467_v46 = vsel %vm6077_vm13, %v6323_v27, %v16041_v54  ;;  %v8016_v53 = vpop.eup %8015  ;;  %v16049_v56 = vld [vmem:[#allocation100_spill] sm:$0xff]  ;;  %v16050_v0 = vld [vmem:[#allocation87_spill] sm:$0xff]  ;;  %v16055_v2 = vld [vmem:[#allocation90_spill] sm:$0xff] }
 0x671   : > { %7492 = vmatmul.mubr.msk.f32.gmra.mrb[16].mxu1 %vm1080_vm2, %v6578_v14  ;;  %v6579_v12 = vrot.slane %v6465_v39, 7  ;;  %v6580_v19 = vrot.slane %v6466_v34, 7  ;;  %v6582_v24 = vrot.slane %v6467_v46, 7  ;;  %v6325_v41 = vmul.f32 %v14216_v5, %v16042_v58  ;;  %v16045_v5 = vld [vmem:[#allocation15_spill] sm:$0xff]  ;;  %v16054_v20 = vld [vmem:[#allocation112_spill] sm:$0xff]  ;;  %v16064_v28 = vld [vmem:[#allocation61_spill] sm:$0xff] }
 0x672   : > { %vm6086_vm0 = vcmp.lt.f32.partialorder %v14192_v44, 0.0  ;;  %8023 = vpow2.f32 %v6288_v50  ;;  %v6197_v32 = vmin.f32 %v14476_v26, 0.0  ;;  %v6389_v63 = vmul.f32 %v14476_v26, %v16043_v13  ;;  %v8018_v1 = vpop.eup %8017  ;;  %v16051_v27 = vld [vmem:[#allocation31_spill] sm:$0xff]  ;;  %v16056_v46 = vld [vmem:[#allocation96_spill] sm:$0xff]  ;;  %v16068_v40 = vld [vmem:[#allocation105_spill] sm:$0xff] }
 0x673   : > { %v6468_v48 = vsel %vm6078_vm14, %v6324_v60, %v16044_v30  ;;  %vm6087_vm11 = vcmp.lt.f32.partialorder %v14263_v49, 0.0  ;;  %v6581_v31 = vsel %vm5435_vm3, %v6579_v12, %v6580_v19  ;;  %v6583_v38 = vsel %vm5435_vm3, %v6580_v19, %v6582_v24  ;;  %v8020_v4 = vpop.eup %8019  ;;  %v16052_v29 = vld [vmem:[#allocation51_spill] sm:$0xff]  ;;  %v16053_v60 = vld [vmem:[#allocation32_spill] sm:$0xff] }
 0x674   : > { %v6469_v37 = vsel %vm6079_vm15, %v6325_v41, %v16045_v5  ;;  %v6584_v22 = vrot.slane %v6468_v48, 7  ;;  %vm6088_vm6 = vcmp.lt.f32.partialorder %v14225_v55, 0.0  ;;  %vm6089_vm12 = vcmp.lt.f32.partialorder %v14291_v42, 0.0  ;;  %7494 = vmatprep.mubr.msk.f32.mxu1 %vm1080_vm2, %v6581_v31  ;;  %v16057_v19 = vld [vmem:[#allocation103_spill] sm:$0xff]  ;;  %v16058_v24 = vld [vmem:[#allocation8_spill] sm:$0xff] }
 0x675   : > { %vm6090_vm7 = vcmp.lt.f32.partialorder %v14332_v59, 0.0  ;;  %v6292_v25 = vmul.f32 1.442695, %v6197_v32  ;;  %v14507_v17 = vadd.f32 %v6389_v63, %v16046_v21  ;;  %v6585_v50 = vrot.slane %v6469_v37, 7  ;;  %7495 = vmatmul.mubr.msk.f32.gmra.mrb[18].mxu1 %vm1080_vm2, %v6583_v38  ;;  %v16059_v32 = vld [vmem:[#allocation14_spill] sm:$0xff]  ;;  %v16060_v63 = vld [vmem:[#allocation55_spill] sm:$0xff] }
 0x676   : > { %v6326_v33 = vmul.f32 %v16048_v11, %v16047_v6  ;;  %vm6091_vm13 = vcmp.lt.f32.partialorder %v14338_v23, 0.0  ;;  %v6327_v43 = vmul.f32 %v16050_v0, %v16049_v56  ;;  %v6328_v14 = vmul.f32 %v16052_v29, %v16051_v27  ;;  %v16061_v30 = vld [vmem:[#allocation27_spill] sm:$0xff]  ;;  %v16063_v37 = vld [vmem:[#allocation86_spill] sm:$0xff]  ;;  %v16073_v44 = vld [vmem:[#allocation4_spill] sm:$0xff] }
 0x677   : > { %v6329_v39 = vmul.f32 %v16054_v20, %v16053_v60  ;;  %v6330_v34 = vmul.f32 %v14343_v10, %v16055_v2  ;;  %8025 = vpow2.f32 %v6292_v25  ;;  %v6586_v54 = vsel %vm5435_vm3, %v6584_v22, %v6585_v50  ;;  %v16065_v6 = vld [vmem:[#allocation102_spill] sm:$0xff]  ;;  %v16066_v0 = vld [vmem:[#allocation111_spill] sm:$0xff]  ;;  %v16070_v60 = vld [vmem:[#allocation52_spill] sm:$0xff] }
 0x678   : > { %v6470_v12 = vsel %vm6080_vm4, %v6326_v33, %v16056_v46  ;;  %v6331_v58 = vmul.f32 %v16058_v24, %v16057_v19  ;;  %7497 = vmatprep.mubr.msk.f32.mxu1 %vm1080_vm2, %v6586_v54  ;;  %v6471_v13 = vsel %vm6081_vm5, %v6327_v43, %v16059_v32  ;;  %v6472_v10 = vsel %vm6082_vm1, %v6328_v14, %v16060_v63  ;;  %v8022_v25 = vpop.eup %8021  ;;  %v16067_v27 = vld [vmem:[#allocation30_spill] sm:$0xff]  ;;  %v16069_v14 = vld [vmem:[#allocation49_spill] sm:$0xff]  ;;  %v16074_v24 = vld [vmem:[#allocation99_spill] sm:$0xff] }
 0x679   : > { %v6587_v41 = vrot.slane %v6470_v12, 7  ;;  %v6473_v48 = vsel %vm6083_vm8, %v6329_v39, %v16061_v30  ;;  %vm6092_vm14 = vcmp.lt.f32.partialorder %v16062_v15, 0.0  ;;  %v6589_v31 = vrot.slane %v6471_v13, 7  ;;  %v16071_v54 = vld [vmem:[#allocation98_spill] sm:$0xff] }
 0x67a   : > { %v6590_v38 = vrot.slane %v6472_v10, 7  ;;  %v6592_v5 = vrot.slane %v6473_v48, 7  ;;  %v6474_v22 = vsel %vm6084_vm9, %v6330_v34, %v16063_v37  ;;  %vm6094_vm15 = vcmp.lt.f32.partialorder %v14402_v45, 0.0  ;;  %v16072_v46 = vld [vmem:[#allocation94_spill] sm:$0xff]  ;;  %v14615_v45 = vld [vmem:[%s14813_s16] ss:$0 sm:$0xff] }
 0x67b   : > { %vm6093_vm4 = vcmp.lt.f32.partialorder %v14423_v7, 0.0  ;;  %v6588_v52 = vsel %vm5435_vm3, %v6585_v50, %v6587_v41  ;;  %v6475_v51 = vsel %vm6085_vm10, %v6331_v58, %v16064_v28  ;;  %v6332_v11 = vmul.f32 %v14417_v47, %v16065_v6 }
 0x67c   : > { %7498 = vmatmul.mubr.msk.f32.gmra.mrb[20].mxu1 %vm1080_vm2, %v6588_v52  ;;  %v6591_v33 = vsel %vm5435_vm3, %v6589_v31, %v6590_v38  ;;  %v6594_v62 = vrot.slane %v6474_v22, 7  ;;  %v6595_v56 = vrot.slane %v6475_v51, 7  ;;  %v6333_v43 = vmul.f32 %v14442_v36, %v16066_v0  ;;  %v8024_v39 = vpop.eup %8023 }
 0x67d   : > { %7500 = vmatprep.mubr.msk.f32.mxu1 %vm1080_vm2, %v6591_v33  ;;  %v6476_v50 = vsel %vm6086_vm0, %v6332_v11, %v16067_v27  ;;  %v6334_v29 = vmul.f32 %v14437_v57, %v16068_v40  ;;  %v6335_v47 = vmul.f32 %v14451_v9, %v16069_v14  ;;  %v6336_v20 = vmul.f32 %v8016_v53, %v16070_v60  ;;  %v16075_v53 = vld [vmem:[#allocation36_spill] sm:$0xff] }
 0x67e   : > { %v6593_v2 = vsel %vm5435_vm3, %v6590_v38, %v6592_v5  ;;  %v6597_v34 = vrot.slane %v6476_v50, 7  ;;  %v6477_v36 = vsel %vm6087_vm11, %v6333_v43, %v16071_v54  ;;  %v6337_v12 = vmul.f32 %v8018_v1, %v16072_v46  ;;  %v16076_v1 = vld [vmem:[#allocation76_spill] sm:$0xff] }
 0x67f   : > { %v6478_v19 = vsel %vm6088_vm6, %v6334_v29, %v16073_v44  ;;  %v6599_v57 = vrot.slane %v6477_v36, 7  ;;  %v6479_v9 = vsel %vm6089_vm12, %v6335_v47, %v16074_v24  ;;  %v6480_v58 = vsel %vm6090_vm7, %v6336_v20, %v16075_v53 }
 0x680   : > { %7501 = vmatmul.mubr.msk.f32.gmra.mrb[22].mxu1 %vm1080_vm2, %v6593_v2  ;;  %v6596_v49 = vsel %vm5435_vm3, %v6594_v62, %v6595_v56  ;;  %v6600_v41 = vrot.slane %v6478_v19, 7  ;;  %v6602_v32 = vrot.slane %v6479_v9, 7  ;;  %v6481_v55 = vsel %vm6091_vm13, %v6337_v12, %v16076_v1 }
 0x681   : > { %7503 = vmatprep.mubr.msk.f32.mxu1 %vm1080_vm2, %v6596_v49  ;;  %v6604_v13 = vrot.slane %v6480_v58, 7  ;;  %v6605_v63 = vrot.slane %v6481_v55, 7  ;;  %v6338_v42 = vmul.f32 %v8020_v4, %v16019_v18  ;;  %v6339_v10 = vmul.f32 %v8024_v39, %v16037_v3  ;;  %v8026_v59 = vpop.eup %8025 }
 0x682   : > { %v6598_v30 = vsel %vm5435_vm3, %v6595_v56, %v6597_v34  ;;  %v6601_v48 = vsel %vm5435_vm3, %v6599_v57, %v6600_v41  ;;  %v6603_v31 = vsel %vm5435_vm3, %v6600_v41, %v6602_v32  ;;  %v6340_v38 = vmul.f32 %v8022_v25, %v16032_v61 }
 0x683   : > { %v6606_v23 = vsel %vm5435_vm3, %v6604_v13, %v6605_v63  ;;  %v6482_v5 = vsel %vm6092_vm14, %v6338_v42, %v14385_v35  ;;  %v6483_v18 = vsel %vm6093_vm4, %v6339_v10, %v14456_v16  ;;  %v6341_v3 = vmul.f32 %v8026_v59, %v16046_v21 }
 0x684   : > { %vm6095_vm1 = vcmp.lt.f32.partialorder %v14476_v26, 0.0  ;;  %7504 = vmatmul.mubr.msk.f32.gmra.mrb[24].mxu1 %vm1080_vm2, %v6598_v30  ;;  %v6607_v4 = vrot.slane %v6482_v5, 7  ;;  %v6484_v61 = vsel %vm6094_vm15, %v6340_v38, %v14430_v8  ;;  %v6609_v37 = vrot.slane %v6483_v18, 7 }
 0x685   : > { %7506 = vmatprep.mubr.msk.f32.mxu1 %vm1080_vm2, %v6601_v48  ;;  %v6610_v15 = vrot.slane %v6484_v61, 7  ;;  %v6485_v35 = vsel %vm6095_vm1, %v6341_v3, %v14507_v17  ;;  %v14620_v17 = vld [vmem:[%s14814_s17] ss:$0 sm:$0xff] }
 0x686   : > { %v6608_v7 = vsel %vm5435_vm3, %v6605_v63, %v6607_v4  ;;  %v6612_v16 = vrot.slane %v6485_v35, 7 }
 0x687   : > { %v6611_v21 = vsel %vm5435_vm3, %v6609_v37, %v6610_v15 }
 0x688   : > { %7507 = vmatmul.mubr.msk.f32.gmra.mrb[26].mxu1 %vm1080_vm2, %v6603_v31  ;;  %v6613_v26 = vsel %vm5435_vm3, %v6610_v15, %v6612_v16 }
 0x689   : > { %7509 = vmatprep.mubr.msk.f32.mxu1 %vm1080_vm2, %v6606_v23 }
 0x68c   : > { %7510 = vmatmul.mubr.msk.f32.gmra.mrb[28].mxu1 %vm1080_vm2, %v6608_v7 }
 0x68d   : > { %7512 = vmatprep.mubr.msk.f32.mxu1 %vm1080_vm2, %v6611_v21 }
 0x690   : > { %7513 = vmatmul.mubr.msk.f32.gmra.mrb[30].mxu1 %vm1080_vm2, %v6613_v26  ;;  %vm16077_vm2 = vcmask 64512  }
 0x691   : > { %vm16078_vm3 = vmmov %vm16077_vm2 }
 0x692   : > { %vm16079_vm5 = vmmov %vm16077_vm2 }
 0x693   : > { %vm16080_vm8 = vmmov %vm16077_vm2 }
 0x694   : > { %vm16081_vm9 = vmmov %vm16077_vm2 }
 0x695   : > { %vm16082_vm10 = vmmov %vm16077_vm2 }
 0x696   : > { %vm16083_vm0 = vmmov %vm16077_vm2 }
 0x697   : > { %vm16084_vm11 = vmmov %vm16083_vm0 }
 0x698   : > { %vm16085_vm6 = vmmov %vm16083_vm0 }
 0x699   : > { %vm16086_vm12 = vmmov %vm16083_vm0 }
 0x69a   : > { %vm16087_vm7 = vmmov %vm16083_vm0 }
 0x69b   : > { %vm16088_vm13 = vmmov %vm16083_vm0 }
 0x69c   : > { %vm16089_vm14 = vmmov %vm16083_vm0 }
 0x69d   : > { %vm16090_vm15 = vmmov %vm16083_vm0 }
 0x69e   : > { %vm16091_vm4 = vmmov %vm16083_vm0 }
 0x69f   : > { %vm16092_vm1 = vmmov %vm16083_vm0 }
 0x70e   : > { %v7469_v8 = vpop.f32.mrb[0].mxu1 }
 0x70f   : > { %v6913_v22 = vmul.f32 %v7469_v8, %v14615_v45  ;;  %v6746_v25 = vpop.f32.mrb[1].mxu1 }
 0x710   : > { %v6912_v52 = vmul.f32 %v14615_v45, %v6746_v25 }
 0x711   : > { %v6952_v28 = vadd.f32 %v14620_v17, %v6913_v22 }
 0x712   : > { %v6951_v51 = vadd.f32 %v14620_v17, %v6912_v52 }
 0x713   : > { %6984 = vst.msk [vmem:[%s14628_s24 + $0x8] sm:$0xff] %vm16077_vm2, %v6952_v28  ;;  %v7016_v6 = vsel %vm16078_vm3, %v6952_v28, 0.0  ;;  %vm16093_vm2 = vmmov %vm16083_vm0 }
 0x714   : > { %v7472_v11 = vpop.f32.mrb[2].mxu1  ;;  %6983 = vst.msk [vmem:[%s14628_s24] sm:$0xff] %vm16079_vm5, %v6951_v51  ;;  %v7015_v33 = vsel %vm16080_vm8, %v6951_v51, 0.0  ;;  %vm16094_vm3 = vmmov %vm16083_vm0 }
 0x715   : > { %v6915_v62 = vmul.f32 %v7472_v11, %v14615_v45  ;;  %v6756_v56 = vpop.f32.mrb[3].mxu1  ;;  %v7017_v0 = vadd.f32 %v7016_v6, %v7015_v33  ;;  %vm16095_vm5 = vmmov %vm16083_vm0 }
 0x716   : > { %v6914_v43 = vmul.f32 %v14615_v45, %v6756_v56  ;;  %vm16096_vm8 = vmmov %vm16083_vm0 }
 0x717   : > { %v6954_v27 = vadd.f32 %v14620_v17, %v6915_v62 }
 0x718   : > { %v6953_v50 = vadd.f32 %v14620_v17, %v6914_v43 }
 0x719   : > { %6986 = vst.msk [vmem:[%s14628_s24 + $0x18] sm:$0xff] %vm16081_vm9, %v6954_v27  ;;  %v7020_v14 = vsel %vm16084_vm11, %v6954_v27, 0.0  ;;  %vm16097_vm9 = vmmov %vm16083_vm0 }
 0x71a   : > { %6985 = vst.msk [vmem:[%s14628_s24 + $0x10] sm:$0xff] %vm16082_vm10, %v6953_v50  ;;  %v7018_v40 = vsel %vm16083_vm0, %v6953_v50, 0.0  ;;  %vm16098_vm10 = vmmov %vm16083_vm0 }
 0x71b   : > { %v7019_v29 = vadd.f32 %v7018_v40, %v7017_v0  ;;  %vm16099_vm11 = vmmov %vm16083_vm0 }
 0x71d   : > { %v7021_v60 = vadd.f32 %v7020_v14, %v7019_v29 }
 0x720   : > { %v7475_v47 = vpop.f32.mrb[4].mxu1 }
 0x721   : > { %v6917_v20 = vmul.f32 %v7475_v47, %v14615_v45  ;;  %v6766_v39 = vpop.f32.mrb[5].mxu1 }
 0x722   : > { %v6916_v2 = vmul.f32 %v14615_v45, %v6766_v39 }
 0x723   : > { %v6956_v34 = vadd.f32 %v14620_v17, %v6917_v20 }
 0x724   : > { %v6955_v54 = vadd.f32 %v14620_v17, %v6916_v2  ;;  %v7478_v36 = vpop.f32.mrb[6].mxu1 }
 0x725   : > { %6988 = vst.msk [vmem:[%s14628_s24 + $0x28] sm:$0xff] %vm16085_vm6, %v6956_v34  ;;  %v6919_v46 = vmul.f32 %v7478_v36, %v14615_v45  ;;  %v6776_v12 = vpop.f32.mrb[7].mxu1  ;;  %v7024_v9 = vsel %vm16088_vm13, %v6956_v34, 0.0  ;;  %vm16100_vm6 = vmmov %vm16083_vm0 }
 0x726   : > { %6987 = vst.msk [vmem:[%s14628_s24 + $0x20] sm:$0xff] %vm16086_vm12, %v6955_v54  ;;  %v7022_v44 = vsel %vm16087_vm7, %v6955_v54, 0.0  ;;  %v6918_v19 = vmul.f32 %v14615_v45, %v6776_v12  ;;  %vm16101_vm12 = vmmov %vm16083_vm0 }
 0x727   : > { %v7023_v57 = vadd.f32 %v7022_v44, %v7021_v60  ;;  %v6958_v24 = vadd.f32 %v14620_v17, %v6919_v46  ;;  %vm16102_vm7 = vmmov %vm16083_vm0 }
 0x728   : > { %v6957_v53 = vadd.f32 %v14620_v17, %v6918_v19  ;;  %vm16103_vm13 = vmmov %vm16083_vm0 }
 0x729   : > { %6990 = vst.msk [vmem:[%s14628_s24 + $0x38] sm:$0xff] %vm16089_vm14, %v6958_v24  ;;  %v7025_v58 = vadd.f32 %v7024_v9, %v7023_v57  ;;  %v7481_v49 = vpop.f32.mrb[8].mxu1  ;;  %v7028_v63 = vsel %vm16092_vm1, %v6958_v24, 0.0  ;;  %vm16104_vm14 = vmmov %vm16083_vm0 }
 0x72a   : > { %6989 = vst.msk [vmem:[%s14628_s24 + $0x30] sm:$0xff] %vm16090_vm15, %v6957_v53  ;;  %v7026_v41 = vsel %vm16091_vm4, %v6957_v53, 0.0  ;;  %v6921_v32 = vmul.f32 %v7481_v49, %v14615_v45  ;;  %v6786_v1 = vpop.f32.mrb[9].mxu1  ;;  %vm16105_vm15 = vmmov %vm16083_vm0 }
 0x72b   : > { %v7027_v55 = vadd.f32 %v7026_v41, %v7025_v58  ;;  %v6920_v13 = vmul.f32 %v14615_v45, %v6786_v1  ;;  %vm16106_vm4 = vmmov %vm16083_vm0 }
 0x72c   : > { %v6960_v42 = vadd.f32 %v14620_v17, %v6921_v32  ;;  %vm16107_vm1 = vmmov %vm16083_vm0 }
 0x72d   : > { %v6959_v10 = vadd.f32 %v14620_v17, %v6920_v13  ;;  %v7029_v59 = vadd.f32 %v7028_v63, %v7027_v55 }
 0x72e   : > { %6992 = vst.msk [vmem:[%s14628_s24 + $0x48] sm:$0xff] %vm16093_vm2, %v6960_v42  ;;  %v7032_v38 = vsel %vm16096_vm8, %v6960_v42, 0.0  ;;  %vm16108_vm2 = vmmov %vm16083_vm0 }
 0x72f   : > { %6991 = vst.msk [vmem:[%s14628_s24 + $0x40] sm:$0xff] %vm16094_vm3, %v6959_v10  ;;  %v7030_v30 = vsel %vm16095_vm5, %v6959_v10, 0.0  ;;  %vm16109_vm3 = vmmov %vm16083_vm0 }
 0x730   : > { %v7031_v48 = vadd.f32 %v7030_v30, %v7029_v59  ;;  %v7484_v31 = vpop.f32.mrb[10].mxu1  ;;  %vm16110_vm5 = vmmov %vm16083_vm0 }
 0x731   : > { %v6923_v23 = vmul.f32 %v7484_v31, %v14615_v45  ;;  %v6796_v5 = vpop.f32.mrb[11].mxu1  ;;  %vm16111_vm8 = vmmov %vm16083_vm0 }
 0x732   : > { %v6922_v18 = vmul.f32 %v14615_v45, %v6796_v5  ;;  %v7033_v3 = vadd.f32 %v7032_v38, %v7031_v48 }
 0x733   : > { %v6962_v4 = vadd.f32 %v14620_v17, %v6923_v23 }
 0x734   : > { %v6961_v61 = vadd.f32 %v14620_v17, %v6922_v18 }
 0x735   : > { %6994 = vst.msk [vmem:[%s14628_s24 + $0x58] sm:$0xff] %vm16097_vm9, %v6962_v4  ;;  %v7036_v35 = vsel %vm16099_vm11, %v6962_v4, 0.0  ;;  %vm16112_vm9 = vmmov %vm16083_vm0 }
 0x736   : > { %6993 = vst.msk [vmem:[%s14628_s24 + $0x50] sm:$0xff] %vm16098_vm10, %v6961_v61  ;;  %v7034_v37 = vsel %vm16083_vm0, %v6961_v61, 0.0  ;;  %vm16113_vm10 = vmmov %vm16083_vm0 }
 0x737   : > { %v7035_v15 = vadd.f32 %v7034_v37, %v7033_v3  ;;  %vm16114_vm11 = vmmov %vm16083_vm0 }
 0x739   : > { %v7037_v26 = vadd.f32 %v7036_v35, %v7035_v15 }
 0x73a   : > { %v7487_v7 = vpop.f32.mrb[12].mxu1 }
 0x73b   : > { %v6925_v16 = vmul.f32 %v7487_v7, %v14615_v45  ;;  %v6806_v21 = vpop.f32.mrb[13].mxu1 }
 0x73c   : > { %v6924_v8 = vmul.f32 %v14615_v45, %v6806_v21 }
 0x73d   : > { %v6964_v22 = vadd.f32 %v14620_v17, %v6925_v16 }
 0x73e   : > { %v6963_v25 = vadd.f32 %v14620_v17, %v6924_v8  ;;  %v7490_v52 = vpop.f32.mrb[14].mxu1 }
 0x73f   : > { %6996 = vst.msk [vmem:[%s14628_s24 + $0x68] sm:$0xff] %vm16100_vm6, %v6964_v22  ;;  %v6927_v28 = vmul.f32 %v7490_v52, %v14615_v45  ;;  %v6816_v51 = vpop.f32.mrb[15].mxu1  ;;  %v7040_v56 = vsel %vm16103_vm13, %v6964_v22, 0.0  ;;  %vm16115_vm6 = vmmov %vm16083_vm0 }
 0x740   : > { %6995 = vst.msk [vmem:[%s14628_s24 + $0x60] sm:$0xff] %vm16101_vm12, %v6963_v25  ;;  %v7038_v6 = vsel %vm16102_vm7, %v6963_v25, 0.0  ;;  %v6926_v11 = vmul.f32 %v14615_v45, %v6816_v51  ;;  %vm16116_vm12 = vmmov %vm16083_vm0 }
 0x741   : > { %v7039_v33 = vadd.f32 %v7038_v6, %v7037_v26  ;;  %v6966_v62 = vadd.f32 %v14620_v17, %v6927_v28  ;;  %vm16117_vm7 = vmmov %vm16083_vm0 }
 0x742   : > { %v6965_v0 = vadd.f32 %v14620_v17, %v6926_v11  ;;  %vm16118_vm13 = vmmov %vm16083_vm0 }
 0x743   : > { %6998 = vst.msk [vmem:[%s14628_s24 + $0x78] sm:$0xff] %vm16104_vm14, %v6966_v62  ;;  %v7041_v27 = vadd.f32 %v7040_v56, %v7039_v33  ;;  %v7044_v20 = vsel %vm16107_vm1, %v6966_v62, 0.0  ;;  %vm16119_vm14 = vmmov %vm16083_vm0 }
 0x744   : > { %v7493_v43 = vpop.f32.mrb[16].mxu1  ;;  %6997 = vst.msk [vmem:[%s14628_s24 + $0x70] sm:$0xff] %vm16105_vm15, %v6965_v0  ;;  %v7042_v29 = vsel %vm16106_vm4, %v6965_v0, 0.0  ;;  %vm16120_vm15 = vmmov %vm16083_vm0 }
 0x745   : > { %v6929_v50 = vmul.f32 %v7493_v43, %v14615_v45  ;;  %v6826_v40 = vpop.f32.mrb[17].mxu1  ;;  %v7043_v47 = vadd.f32 %v7042_v29, %v7041_v27  ;;  %vm16121_vm4 = vmmov %vm16083_vm0 }
 0x746   : > { %v6928_v14 = vmul.f32 %v14615_v45, %v6826_v40  ;;  %vm16122_vm1 = vmmov %vm16083_vm0 }
 0x747   : > { %v6968_v60 = vadd.f32 %v14620_v17, %v6929_v50  ;;  %v7045_v34 = vadd.f32 %v7044_v20, %v7043_v47 }
 0x748   : > { %v6967_v39 = vadd.f32 %v14620_v17, %v6928_v14  ;;  %v7496_v2 = vpop.f32.mrb[18].mxu1 }
 0x749   : > { %7000 = vst.msk [vmem:[%s14628_s24 + $0x88] sm:$0xff] %vm16108_vm2, %v6968_v60  ;;  %v6931_v54 = vmul.f32 %v7496_v2, %v14615_v45  ;;  %v6836_v36 = vpop.f32.mrb[19].mxu1  ;;  %v7048_v57 = vsel %vm16111_vm8, %v6968_v60, 0.0  ;;  %vm16123_vm2 = vmmov %vm16083_vm0 }
 0x74a   : > { %6999 = vst.msk [vmem:[%s14628_s24 + $0x80] sm:$0xff] %vm16109_vm3, %v6967_v39  ;;  %v7046_v46 = vsel %vm16110_vm5, %v6967_v39, 0.0  ;;  %v6930_v12 = vmul.f32 %v14615_v45, %v6836_v36  ;;  %vm16124_vm3 = vmmov %vm16083_vm0 }
 0x74b   : > { %v7047_v44 = vadd.f32 %v7046_v46, %v7045_v34  ;;  %v6970_v19 = vadd.f32 %v14620_v17, %v6931_v54  ;;  %vm16125_vm5 = vmmov %vm16083_vm0 }
 0x74c   : > { %v6969_v24 = vadd.f32 %v14620_v17, %v6930_v12  ;;  %vm16126_vm8 = vmmov %vm16083_vm0 }
 0x74d   : > { %7002 = vst.msk [vmem:[%s14628_s24 + $0x98] sm:$0xff] %vm16112_vm9, %v6970_v19  ;;  %v7049_v9 = vadd.f32 %v7048_v57, %v7047_v44  ;;  %v7052_v55 = vsel %vm16114_vm11, %v6970_v19, 0.0  ;;  %vm16127_vm9 = vmmov %vm16083_vm0 }
 0x74e   : > { %7001 = vst.msk [vmem:[%s14628_s24 + $0x90] sm:$0xff] %vm16113_vm10, %v6969_v24  ;;  %v7050_v58 = vsel %vm16083_vm0, %v6969_v24, 0.0  ;;  %vm16128_vm10 = vmmov %vm16083_vm0 }
 0x74f   : > { %v7499_v53 = vpop.f32.mrb[20].mxu1  ;;  %v7051_v32 = vadd.f32 %v7050_v58, %v7049_v9  ;;  %vm16129_vm11 = vmmov %vm16083_vm0 }
 0x750   : > { %v6933_v49 = vmul.f32 %v7499_v53, %v14615_v45  ;;  %v6846_v41 = vpop.f32.mrb[21].mxu1 }
 0x751   : > { %v6932_v1 = vmul.f32 %v14615_v45, %v6846_v41  ;;  %v7053_v42 = vadd.f32 %v7052_v55, %v7051_v32 }
 0x752   : > { %v6972_v13 = vadd.f32 %v14620_v17, %v6933_v49 }
 0x753   : > { %v6971_v63 = vadd.f32 %v14620_v17, %v6932_v1  ;;  %v7502_v10 = vpop.f32.mrb[22].mxu1 }
 0x754   : > { %7004 = vst.msk [vmem:[%s14628_s24 + $0xa8] sm:$0xff] %vm16115_vm6, %v6972_v13  ;;  %v6935_v59 = vmul.f32 %v7502_v10, %v14615_v45  ;;  %v6856_v30 = vpop.f32.mrb[23].mxu1  ;;  %v7056_v5 = vsel %vm16118_vm13, %v6972_v13, 0.0  ;;  %vm16130_vm6 = vmmov %vm16083_vm0 }
 0x755   : > { %7003 = vst.msk [vmem:[%s14628_s24 + $0xa0] sm:$0xff] %vm16116_vm12, %v6971_v63  ;;  %v7054_v48 = vsel %vm16117_vm7, %v6971_v63, 0.0  ;;  %v6934_v31 = vmul.f32 %v14615_v45, %v6856_v30  ;;  %vm16131_vm12 = vmmov %vm16083_vm0 }
 0x756   : > { %v7055_v38 = vadd.f32 %v7054_v48, %v7053_v42  ;;  %v6974_v23 = vadd.f32 %v14620_v17, %v6935_v59  ;;  %vm16132_vm7 = vmmov %vm16083_vm0 }
 0x757   : > { %v6973_v18 = vadd.f32 %v14620_v17, %v6934_v31  ;;  %v7505_v3 = vpop.f32.mrb[24].mxu1  ;;  %vm16133_vm13 = vmmov %vm16083_vm0 }
 0x758   : > { %7006 = vst.msk [vmem:[%s14628_s24 + $0xb8] sm:$0xff] %vm16119_vm14, %v6974_v23  ;;  %v7057_v4 = vadd.f32 %v7056_v5, %v7055_v38  ;;  %v6937_v61 = vmul.f32 %v7505_v3, %v14615_v45  ;;  %v6866_v37 = vpop.f32.mrb[25].mxu1  ;;  %v7060_v21 = vsel %vm16122_vm1, %v6974_v23, 0.0  ;;  %vm16134_vm14 = vmmov %vm16083_vm0 }
 0x759   : > { %7005 = vst.msk [vmem:[%s14628_s24 + $0xb0] sm:$0xff] %vm16120_vm15, %v6973_v18  ;;  %v7058_v15 = vsel %vm16121_vm4, %v6973_v18, 0.0  ;;  %v6936_v35 = vmul.f32 %v14615_v45, %v6866_v37  ;;  %vm16135_vm15 = vmmov %vm16083_vm0 }
 0x75a   : > { %v7059_v7 = vadd.f32 %v7058_v15, %v7057_v4  ;;  %v6976_v16 = vadd.f32 %v14620_v17, %v6937_v61  ;;  %vm16136_vm4 = vmmov %vm16083_vm0 }
 0x75b   : > { %v6975_v26 = vadd.f32 %v14620_v17, %v6936_v35  ;;  %v7508_v8 = vpop.f32.mrb[26].mxu1  ;;  %vm16137_vm1 = vmmov %vm16083_vm0 }
 0x75c   : > { %7008 = vst.msk [vmem:[%s14628_s24 + $0xc8] sm:$0xff] %vm16123_vm2, %v6976_v16  ;;  %v7061_v22 = vadd.f32 %v7060_v21, %v7059_v7  ;;  %v6939_v25 = vmul.f32 %v7508_v8, %v14615_v45  ;;  %v6876_v52 = vpop.f32.mrb[27].mxu1  ;;  %v7064_v33 = vsel %vm16126_vm8, %v6976_v16, 0.0  ;;  %vm16138_vm2 = vcmask 57344  }
 0x75d   : > { %7007 = vst.msk [vmem:[%s14628_s24 + $0xc0] sm:$0xff] %vm16124_vm3, %v6975_v26  ;;  %v7062_v28 = vsel %vm16125_vm5, %v6975_v26, 0.0  ;;  %v6938_v51 = vmul.f32 %v14615_v45, %v6876_v52 }
 0x75e   : > { %v7063_v6 = vadd.f32 %v7062_v28, %v7061_v22  ;;  %v6978_v11 = vadd.f32 %v14620_v17, %v6939_v25 }
 0x75f   : > { %v6977_v62 = vadd.f32 %v14620_v17, %v6938_v51  ;;  %v7511_v56 = vpop.f32.mrb[28].mxu1 }
 0x760   : > { %7010 = vst.msk [vmem:[%s14628_s24 + $0xd8] sm:$0xff] %vm16127_vm9, %v6978_v11  ;;  %v7065_v0 = vadd.f32 %v7064_v33, %v7063_v6  ;;  %v6941_v43 = vmul.f32 %v7511_v56, %v14615_v45  ;;  %v6886_v27 = vpop.f32.mrb[29].mxu1  ;;  %v7068_v47 = vsel %vm16129_vm11, %v6978_v11, 0.0 }
 0x761   : > { %7009 = vst.msk [vmem:[%s14628_s24 + $0xd0] sm:$0xff] %vm16128_vm10, %v6977_v62  ;;  %v7066_v50 = vsel %vm16083_vm0, %v6977_v62, 0.0  ;;  %v6940_v40 = vmul.f32 %v14615_v45, %v6886_v27 }
 0x762   : > { %v7067_v29 = vadd.f32 %v7066_v50, %v7065_v0  ;;  %v6980_v14 = vadd.f32 %v14620_v17, %v6941_v43 }
 0x763   : > { %v6979_v60 = vadd.f32 %v14620_v17, %v6940_v40  ;;  %v7514_v20 = vpop.f32.mrb[30].mxu1 }
 0x764   : > { %7012 = vst.msk [vmem:[%s14628_s24 + $0xe8] sm:$0xff] %vm16130_vm6, %v6980_v14  ;;  %v7069_v39 = vadd.f32 %v7068_v47, %v7067_v29  ;;  %v6943_v2 = vmul.f32 %v7514_v20, %v14615_v45  ;;  %v6896_v34 = vpop.f32.mrb[31].mxu1  ;;  %v7072_v44 = vsel %vm16133_vm13, %v6980_v14, 0.0 }
 0x765   : > { %7011 = vst.msk [vmem:[%s14628_s24 + $0xe0] sm:$0xff] %vm16131_vm12, %v6979_v60  ;;  %v7070_v54 = vsel %vm16132_vm7, %v6979_v60, 0.0  ;;  %v6942_v36 = vmul.f32 %v14615_v45, %v6896_v34 }
 0x766   : > { %v7071_v46 = vadd.f32 %v7070_v54, %v7069_v39  ;;  %v6982_v12 = vadd.f32 %v14620_v17, %v6943_v2 }
 0x767   : > { %v6981_v19 = vadd.f32 %v14620_v17, %v6942_v36 }
 0x768   : > { %7014 = vst.msk [vmem:[%s14628_s24 + $0xf8] sm:$0xff] %vm16134_vm14, %v6982_v12  ;;  %v7073_v57 = vadd.f32 %v7072_v44, %v7071_v46  ;;  %v7076_v53 = vsel %vm16137_vm1, %v6982_v12, 0.0 }
 0x769   : > { %7013 = vst.msk [vmem:[%s14628_s24 + $0xf0] sm:$0xff] %vm16135_vm15, %v6981_v19  ;;  %v7074_v24 = vsel %vm16136_vm4, %v6981_v19, 0.0 }
 0x76a   : > { %v7075_v9 = vadd.f32 %v7074_v24, %v7073_v57 }
 0x76c   : > { %v7077_v58 = vadd.f32 %v7076_v53, %v7075_v9 }
 0x76e   : > { %v7078_v45 = vrot.slane %v7077_v58, 4 }
 0x770   : > { %v7079_v49 = vadd.f32 %v7078_v45, %v7077_v58 }
 0x772   : > { %v7080_v41 = vrot.slane %v7079_v49, 2 }
 0x774   : > { %v7081_v32 = vadd.f32 %v7080_v41, %v7079_v49 }
 0x776   : > { %v7082_v1 = vrot.slane %v7081_v32, 1 }
 0x778   : > { %v7083_v17 = vadd.f32 %v7082_v1, %v7081_v32 }
 0x77a   : > { %7085 = vst.msk [vmem:[%s643_s3] sm:$0x1] %vm16138_vm2, %v7083_v17 }
 0x77b PF: > { %s31_s1 = sadd.s32 1, %s8057_s1  }
 0x77c   : > { %p28_p4 = scmp.ge.s32.totalorder %s31_s1, 4  }
 0x77e   :  { %30 = sbr.rel (!%p28_p4) target bundleno = 6 (0x6), region = 148 }

</bundles_post_ra>
